<compile_context>
chip_gen: v6e
topology: v6e:2x2x1
jax: 0.10.0
libtpu: 0.0.40
codegen_flags: <defaults>
</compile_context>

<pallas_src>
import jax
import jax.numpy as jnp
from jax.experimental import pallas as pl
from jax.experimental.pallas import tpu as pltpu


def _round_up(n, m):
    return ((n + m - 1) // m) * m


# ----------------------------------------------------------------------------
# Kernel: fused fwd+bwd LSTM recurrence over one block of K timesteps.
# ----------------------------------------------------------------------------
def _bilstm_kernel(gx_f_ref, gx_b_ref, whh_ref, out_f_ref, out_b_ref,
                   h_scr, c_scr):
    """Grid: (time_block,).

    gx_f_ref : (K, Bp, 4Hp) bf16  precomputed x@W_ih^T + b, forward direction,
                                  time block g (natural time order)
    gx_b_ref : (K, Bp, 4Hp) bf16  same for the backward direction, time block
                                  G-1-g (consumed in reverse inside the kernel)
    whh_ref  : (2Hp, 8Hp)   bf16  block-diagonal recurrent weights
                                  [[W_hh_f, 0], [0, W_hh_b]] (transposed)
    out_f_ref: (K, Bp, Hp)  bf16  forward hidden states, time block g
    out_b_ref: (K, Bp, Hp)  bf16  backward hidden states, time block G-1-g
    h_scr, c_scr: (Bp, 2Hp) f32   [fwd | bwd] recurrent state across blocks
    """
    @pl.when(pl.program_id(0) == 0)
    def _():
        h_scr[...] = jnp.zeros_like(h_scr)
        c_scr[...] = jnp.zeros_like(c_scr)

    K = gx_f_ref.shape[0]
    Hp = out_f_ref.shape[-1]

    def sigm(v):
        # sigmoid via the EUP tanh slot (no VPU divide / exp+select filler).
        return 0.5 * jnp.tanh(0.5 * v) + 0.5

    def cell(gates, c_prev):
        # Lane-aligned gate slices (Hp is a multiple of 128); PyTorch order
        # [i, f, g, o].
        i = sigm(gates[:, 0 * Hp:1 * Hp])
        f = sigm(gates[:, 1 * Hp:2 * Hp])
        g = jnp.tanh(gates[:, 2 * Hp:3 * Hp])
        o = sigm(gates[:, 3 * Hp:4 * Hp])
        c = f * c_prev + i * g
        return o * jnp.tanh(c), c

    def step(k, carry):
        h_cat, c_f, c_b = carry                      # f32
        # One block-diagonal matmul covers both directions:
        # (Bp, 2Hp) @ (2Hp, 8Hp) -> (Bp, 8Hp), f32 accumulation on the MXU.
        rec = jnp.dot(h_cat.astype(jnp.bfloat16), whh_ref[...],
                      preferred_element_type=jnp.float32)
        g_f = gx_f_ref[k].astype(jnp.float32) + rec[:, :4 * Hp]
        g_b = gx_b_ref[K - 1 - k].astype(jnp.float32) + rec[:, 4 * Hp:]
        h_f, c_f = cell(g_f, c_f)
        h_b, c_b = cell(g_b, c_b)
        out_f_ref[k] = h_f.astype(out_f_ref.dtype)
        out_b_ref[K - 1 - k] = h_b.astype(out_b_ref.dtype)   # folds the flip
        return jnp.concatenate([h_f, h_b], axis=-1), c_f, c_b

    h0 = h_scr[...]
    c0 = c_scr[...]
    h_cat, c_f, c_b = jax.lax.fori_loop(
        0, K, step, (h0, c0[:, :Hp], c0[:, Hp:]), unroll=True)
    h_scr[...] = h_cat
    c_scr[:, :Hp] = c_f
    c_scr[:, Hp:] = c_b


# ----------------------------------------------------------------------------
# Wrapper-side prep: hoisted input projection + packed weights (bf16).
# ----------------------------------------------------------------------------
def _prep_inputs(x, params, *, Hp, Bp, Tp):
    B, T, D = x.shape
    H = params["fwd"]["w_hh"].shape[1]
    pad_t, pad_b = Tp - T, Bp - B

    def pad_wih(w_ih):                       # (4H, D) -> (D, 4Hp), gate-padded
        w = w_ih.T.reshape(D, 4, H)
        return jnp.pad(w, ((0, 0), (0, 0), (0, Hp - H))).reshape(D, 4 * Hp)

    def pad_bias(b_ih, b_hh):                # -> (4Hp,)
        b = (b_ih + b_hh).reshape(4, H)
        return jnp.pad(b, ((0, 0), (0, Hp - H))).reshape(4 * Hp)

    def pad_whh(w_hh):                       # (4H, H) -> (Hp, 4Hp)
        w = w_hh.T.reshape(H, 4, H)
        return jnp.pad(w, ((0, Hp - H), (0, 0), (0, Hp - H))).reshape(Hp, 4 * Hp)

    # Block-diagonal recurrent weights: [h_f | h_b] @ blkdiag(W_f, W_b).
    whh = jnp.zeros((2 * Hp, 8 * Hp), jnp.float32)
    whh = whh.at[:Hp, :4 * Hp].set(pad_whh(params["fwd"]["w_hh"]))
    whh = whh.at[Hp:, 4 * Hp:].set(pad_whh(params["bwd"]["w_hh"]))
    whh = whh.astype(jnp.bfloat16)

    # Time-major x (tiny copy) so the gate einsum emits (Tp, Bp, 4Hp) directly
    # with no transpose pass over the large gx tensor.  Forward copy padded at
    # the END of time, backward copy at the START (reverse-order recurrence
    # then consumes padding last -> no masking, padded rows are discarded).
    x_tm = jnp.transpose(x, (1, 0, 2)).astype(jnp.bfloat16)         # (T, B, D)
    x_f = jnp.pad(x_tm, ((0, pad_t), (0, pad_b), (0, 0)))           # (Tp, Bp, D)
    x_b = x_f if pad_t == 0 else jnp.pad(x_tm, ((pad_t, 0), (0, pad_b), (0, 0)))

    def gates(xp, p):
        w = pad_wih(p["w_ih"]).astype(jnp.bfloat16)
        b = pad_bias(p["b_ih"], p["b_hh"])
        g = jnp.einsum("tbd,dg->tbg", xp, w,
                       preferred_element_type=jnp.float32) + b
        return g.astype(jnp.bfloat16)                               # (Tp, Bp, 4Hp)

    return gates(x_f, params["fwd"]), gates(x_b, params["bwd"]), whh


def bidirectional_lstm(x, params, *, block_k=16):
    """Equivalent of BidirectionalLSTM.forward:
    concat(fwd_LSTM(x), flip(bwd_LSTM(flip(x)))) along the feature dim.
    x: (B, T, D) float32.  Returns (B, T, 2H)."""
    B, T, D = x.shape
    H = params["fwd"]["w_hh"].shape[1]

    Hp = _round_up(H, 128)                   # lane-aligned hidden size
    Bp = _round_up(B, 8)                     # sublane-aligned batch
    K = min(block_k, T)                      # timesteps per grid step
    G = -(-T // K)                           # number of time blocks
    Tp = G * K
    pad_t = Tp - T

    gx_f, gx_b, whh = _prep_inputs(x, params, Hp=Hp, Bp=Bp, Tp=Tp)

    out_f, out_b = pl.pallas_call(
        _bilstm_kernel,
        out_shape=(jax.ShapeDtypeStruct((Tp, Bp, Hp), jnp.bfloat16),
                   jax.ShapeDtypeStruct((Tp, Bp, Hp), jnp.bfloat16)),
        grid_spec=pltpu.PrefetchScalarGridSpec(
            num_scalar_prefetch=0,
            grid=(G,),                                         # time blocks
            in_specs=[
                # forward gates: natural time order
                pl.BlockSpec((K, Bp, 4 * Hp), lambda g: (g, 0, 0)),
                # backward gates: reversed time-block order (flip folded here)
                pl.BlockSpec((K, Bp, 4 * Hp), lambda g: (G - 1 - g, 0, 0)),
                # block-diagonal recurrent weights, resident across the grid
                pl.BlockSpec((2 * Hp, 8 * Hp), lambda g: (0, 0)),
            ],
            out_specs=[
                pl.BlockSpec((K, Bp, Hp), lambda g: (g, 0, 0)),
                pl.BlockSpec((K, Bp, Hp), lambda g: (G - 1 - g, 0, 0)),
            ],
            scratch_shapes=[
                pltpu.VMEM((Bp, 2 * Hp), jnp.float32),   # [h_f | h_b]
                pltpu.VMEM((Bp, 2 * Hp), jnp.float32),   # [c_f | c_b]
            ],
        ),
        compiler_params=pltpu.CompilerParams(
            dimension_semantics=("arbitrary",),          # recurrent carry
            vmem_limit_bytes=48 * 1024 * 1024,           # fits v7x 64 MiB/TC
        ),
    )(gx_f, gx_b, whh)

    # Only remaining wrapper pass: slice + concat + batch-first transpose +
    # cast over the (small, bf16) kernel outputs; XLA fuses it into one copy.
    out_fwd = out_f[:T, :B, :H]                          # (T, B, H)
    out_bwd = out_b[pad_t:pad_t + T, :B, :H]             # (T, B, H), already un-flipped
    out = jnp.concatenate([out_fwd, out_bwd], axis=-1)
    return jnp.transpose(out, (1, 0, 2)).astype(x.dtype)


# ----------------------------------------------------------------------------
# Params + pure-JAX reference (for validation).
# ----------------------------------------------------------------------------
def init_params(key, input_dim, hidden_dim):
    """Deterministic init mimicking PyTorch LSTM: U(-1/sqrt(H), 1/sqrt(H))."""
    bound = 1.0 / (hidden_dim ** 0.5)
    ks = jax.random.split(key, 8)

    def u(k, shape):
        return jax.random.uniform(k, shape, jnp.float32, -bound, bound)

    return {
        "fwd": {
            "w_ih": u(ks[0], (4 * hidden_dim, input_dim)),
            "w_hh": u(ks[1], (4 * hidden_dim, hidden_dim)),
            "b_ih": u(ks[2], (4 * hidden_dim,)),
            "b_hh": u(ks[3], (4 * hidden_dim,)),
        },
        "bwd": {
            "w_ih": u(ks[4], (4 * hidden_dim, input_dim)),
            "w_hh": u(ks[5], (4 * hidden_dim, hidden_dim)),
            "b_ih": u(ks[6], (4 * hidden_dim,)),
            "b_hh": u(ks[7], (4 * hidden_dim,)),
        },
    }


def _lstm_reference(x, w_ih, w_hh, b_ih, b_hh, reverse=False):
    """Pure-JAX f32 reference (lax.scan)."""
    B, T, D = x.shape
    H = w_hh.shape[1]
    xs = jnp.transpose(x, (1, 0, 2))
    if reverse:
        xs = xs[::-1]

    def step(carry, x_t):
        h, c = carry
        g = x_t @ w_ih.T + h @ w_hh.T + b_ih + b_hh
        i = jax.nn.sigmoid(g[:, 0 * H:1 * H])
        f = jax.nn.sigmoid(g[:, 1 * H:2 * H])
        gg = jnp.tanh(g[:, 2 * H:3 * H])
        o = jax.nn.sigmoid(g[:, 3 * H:4 * H])
        c = f * c + i * gg
        h = o * jnp.tanh(c)
        return (h, c), h

    init = (jnp.zeros((B, H), jnp.float32), jnp.zeros((B, H), jnp.float32))
    _, hs = jax.lax.scan(step, init, xs)
    if reverse:
        hs = hs[::-1]
    return jnp.transpose(hs, (1, 0, 2))


if __name__ == "__main__":
    B, T, D, H = 2, 8, 16, 32
    key = jax.random.PRNGKey(0)
    kx, kp = jax.random.split(key)
    x = jax.random.normal(kx, (B, T, D), jnp.float32)
    params = init_params(kp, D, H)

    bilstm = jax.jit(bidirectional_lstm)
    out = jax.block_until_ready(bilstm(x, params))
    assert out.shape == (B, T, 2 * H), out.shape

    # Validate against an f32 reference.  Tolerance covers bf16 gx / recurrent
    # matmul operands / bf16 stored outputs (state & gate math are f32).
    ref_fwd = _lstm_reference(x, params["fwd"]["w_ih"], params["fwd"]["w_hh"],
                              params["fwd"]["b_ih"], params["fwd"]["b_hh"],
                              reverse=False)
    ref_bwd = _lstm_reference(x, params["bwd"]["w_ih"], params["bwd"]["w_hh"],
                              params["bwd"]["b_ih"], params["bwd"]["b_hh"],
                              reverse=True)
    ref = jnp.concatenate([ref_fwd, ref_bwd], axis=2)
    max_err = float(jnp.max(jnp.abs(out - ref)))
    assert jnp.allclose(out, ref, atol=5e-2, rtol=5e-2), f"max_err={max_err}"

    print("KERNEL_OK")
</pallas_src>

<mosaic_0001>
module attributes {stable_mosaic.version = 11 : i64} {
  func.func @_bilstm_kernel(%arg0: i32, %arg1: memref<8x8x512xbf16, #tpu.memory_space<vmem>>, %arg2: memref<8x8x512xbf16, #tpu.memory_space<vmem>>, %arg3: memref<256x1024xbf16, #tpu.memory_space<vmem>>, %arg4: memref<8x8x128xbf16, #tpu.memory_space<vmem>>, %arg5: memref<8x8x128xbf16, #tpu.memory_space<vmem>>, %arg6: memref<8x256xf32, #tpu.memory_space<vmem>>, %arg7: memref<8x256xf32, #tpu.memory_space<vmem>>) attributes {dimension_semantics = [#tpu.dimension_semantics<arbitrary>], iteration_bounds = array<i64: 1>, scalar_prefetch = 0 : i64, scratch_operands = 2 : i64, tpu.core_type = #tpu.core_type<tc>, window_params = [{transform_indices = @transform_0, window_bounds = array<i64: 8, 8, 512>}, {transform_indices = @transform_1, window_bounds = array<i64: 8, 8, 512>}, {pipeline_mode = #tpu.pipeline_mode<synchronous>, transform_indices = @transform_2, window_bounds = array<i64: 256, 1024>}, {transform_indices = @transform_3, window_bounds = array<i64: 8, 8, 128>}, {transform_indices = @transform_4, window_bounds = array<i64: 8, 8, 128>}]} {
    %c0_i32 = arith.constant 0 : i32
    %0 = arith.cmpi eq, %arg0, %c0_i32 : i32
    %1 = arith.extui %0 : i1 to i32
    %c0_i32_0 = arith.constant 0 : i32
    %2 = arith.cmpi ne, %1, %c0_i32_0 : i32
    scf.if %2 {
      %cst_257 = arith.constant 0.000000e+00 : f32
      %730 = vector.broadcast %cst_257 : f32 to vector<8x256xf32>
      %c0_258 = arith.constant 0 : index
      %c0_259 = arith.constant 0 : index
      %731 = vector.load %arg6[%c0_258, %c0_259] : memref<8x256xf32, #tpu.memory_space<vmem>>, vector<8x256xf32>
      tpu.vector_store %arg6[%c0_258, %c0_259], %730 {strides = array<i32>} : memref<8x256xf32, #tpu.memory_space<vmem>>, vector<8x256xf32>,
      %cst_260 = arith.constant 0.000000e+00 : f32
      %732 = vector.broadcast %cst_260 : f32 to vector<8x256xf32>
      %c0_261 = arith.constant 0 : index
      %c0_262 = arith.constant 0 : index
      %733 = vector.load %arg7[%c0_261, %c0_262] : memref<8x256xf32, #tpu.memory_space<vmem>>, vector<8x256xf32>
      tpu.vector_store %arg7[%c0_261, %c0_262], %732 {strides = array<i32>} : memref<8x256xf32, #tpu.memory_space<vmem>>, vector<8x256xf32>,
    } else {
    }
    %c0 = arith.constant 0 : index
    %c0_1 = arith.constant 0 : index
    %3 = vector.load %arg6[%c0, %c0_1] : memref<8x256xf32, #tpu.memory_space<vmem>>, vector<8x256xf32>
    %c0_2 = arith.constant 0 : index
    %c0_3 = arith.constant 0 : index
    %4 = vector.load %arg7[%c0_2, %c0_3] : memref<8x256xf32, #tpu.memory_space<vmem>>, vector<8x256xf32>
    %5 = vector.extract_strided_slice %4 {offsets = [0, 0], sizes = [8, 128], strides = [1, 1]} : vector<8x256xf32> to vector<8x128xf32>
    %6 = vector.extract_strided_slice %4 {offsets = [0, 128], sizes = [8, 128], strides = [1, 1]} : vector<8x256xf32> to vector<8x128xf32>
    %c0_i32_4 = arith.constant 0 : i32
    %7 = arith.truncf %3 : vector<8x256xf32> to vector<8x256xbf16>
    %c0_5 = arith.constant 0 : index
    %c0_6 = arith.constant 0 : index
    %8 = vector.load %arg3[%c0_5, %c0_6] : memref<256x1024xbf16, #tpu.memory_space<vmem>>, vector<256x1024xbf16>
    %cst = arith.constant dense<0.000000e+00> : vector<8x1024xf32>
    %9 = tpu.matmul %7, %8, %cst {dimension_numbers = #tpu.dot_dimension_numbers<[1], [0], [0], [1], [0, 0, 1, 1], [], []>} : vector<8x256xbf16>, vector<256x1024xbf16>, vector<8x1024xf32> -> vector<8x1024xf32>
    %10 = arith.index_cast %c0_i32_4 : i32 to index
    %c0_7 = arith.constant 0 : index
    %c0_8 = arith.constant 0 : index
    %11 = vector.load %arg1[%10, %c0_7, %c0_8] : memref<8x8x512xbf16, #tpu.memory_space<vmem>>, vector<1x8x512xbf16>
    %12 = vector.shape_cast %11 : vector<1x8x512xbf16> to vector<8x512xbf16>
    %13 = arith.extf %12 : vector<8x512xbf16> to vector<8x512xf32>
    %14 = vector.extract_strided_slice %9 {offsets = [0, 0], sizes = [8, 512], strides = [1, 1]} : vector<8x1024xf32> to vector<8x512xf32>
    %15 = arith.addf %13, %14 : vector<8x512xf32>
    %c7_i32 = arith.constant 7 : i32
    %16 = arith.subi %c7_i32, %c0_i32_4 : i32
    %17 = arith.index_cast %16 : i32 to index
    %c0_9 = arith.constant 0 : index
    %c0_10 = arith.constant 0 : index
    %18 = vector.load %arg2[%17, %c0_9, %c0_10] : memref<8x8x512xbf16, #tpu.memory_space<vmem>>, vector<1x8x512xbf16>
    %19 = vector.shape_cast %18 : vector<1x8x512xbf16> to vector<8x512xbf16>
    %20 = arith.extf %19 : vector<8x512xbf16> to vector<8x512xf32>
    %21 = vector.extract_strided_slice %9 {offsets = [0, 512], sizes = [8, 512], strides = [1, 1]} : vector<8x1024xf32> to vector<8x512xf32>
    %22 = arith.addf %20, %21 : vector<8x512xf32>
    %23 = vector.extract_strided_slice %15 {offsets = [0, 0], sizes = [8, 128], strides = [1, 1]} : vector<8x512xf32> to vector<8x128xf32>
    %cst_11 = arith.constant 5.000000e-01 : f32
    %24 = vector.broadcast %cst_11 : f32 to vector<8x128xf32>
    %25 = arith.mulf %24, %23 : vector<8x128xf32>
    %26 = math.tanh %25 : vector<8x128xf32>
    %cst_12 = arith.constant 5.000000e-01 : f32
    %27 = vector.broadcast %cst_12 : f32 to vector<8x128xf32>
    %28 = arith.mulf %27, %26 : vector<8x128xf32>
    %cst_13 = arith.constant 5.000000e-01 : f32
    %29 = vector.broadcast %cst_13 : f32 to vector<8x128xf32>
    %30 = arith.addf %28, %29 : vector<8x128xf32>
    %31 = vector.extract_strided_slice %15 {offsets = [0, 128], sizes = [8, 128], strides = [1, 1]} : vector<8x512xf32> to vector<8x128xf32>
    %cst_14 = arith.constant 5.000000e-01 : f32
    %32 = vector.broadcast %cst_14 : f32 to vector<8x128xf32>
    %33 = arith.mulf %32, %31 : vector<8x128xf32>
    %34 = math.tanh %33 : vector<8x128xf32>
    %cst_15 = arith.constant 5.000000e-01 : f32
    %35 = vector.broadcast %cst_15 : f32 to vector<8x128xf32>
    %36 = arith.mulf %35, %34 : vector<8x128xf32>
    %cst_16 = arith.constant 5.000000e-01 : f32
    %37 = vector.broadcast %cst_16 : f32 to vector<8x128xf32>
    %38 = arith.addf %36, %37 : vector<8x128xf32>
    %39 = vector.extract_strided_slice %15 {offsets = [0, 256], sizes = [8, 128], strides = [1, 1]} : vector<8x512xf32> to vector<8x128xf32>
    %40 = math.tanh %39 : vector<8x128xf32>
    %41 = vector.extract_strided_slice %15 {offsets = [0, 384], sizes = [8, 128], strides = [1, 1]} : vector<8x512xf32> to vector<8x128xf32>
    %cst_17 = arith.constant 5.000000e-01 : f32
    %42 = vector.broadcast %cst_17 : f32 to vector<8x128xf32>
    %43 = arith.mulf %42, %41 : vector<8x128xf32>
    %44 = math.tanh %43 : vector<8x128xf32>
    %cst_18 = arith.constant 5.000000e-01 : f32
    %45 = vector.broadcast %cst_18 : f32 to vector<8x128xf32>
    %46 = arith.mulf %45, %44 : vector<8x128xf32>
    %cst_19 = arith.constant 5.000000e-01 : f32
    %47 = vector.broadcast %cst_19 : f32 to vector<8x128xf32>
    %48 = arith.addf %46, %47 : vector<8x128xf32>
    %49 = arith.mulf %38, %5 : vector<8x128xf32>
    %50 = arith.mulf %30, %40 : vector<8x128xf32>
    %51 = arith.addf %49, %50 : vector<8x128xf32>
    %52 = math.tanh %51 : vector<8x128xf32>
    %53 = arith.mulf %48, %52 : vector<8x128xf32>
    %54 = vector.extract_strided_slice %22 {offsets = [0, 0], sizes = [8, 128], strides = [1, 1]} : vector<8x512xf32> to vector<8x128xf32>
    %cst_20 = arith.constant 5.000000e-01 : f32
    %55 = vector.broadcast %cst_20 : f32 to vector<8x128xf32>
    %56 = arith.mulf %55, %54 : vector<8x128xf32>
    %57 = math.tanh %56 : vector<8x128xf32>
    %cst_21 = arith.constant 5.000000e-01 : f32
    %58 = vector.broadcast %cst_21 : f32 to vector<8x128xf32>
    %59 = arith.mulf %58, %57 : vector<8x128xf32>
    %cst_22 = arith.constant 5.000000e-01 : f32
    %60 = vector.broadcast %cst_22 : f32 to vector<8x128xf32>
    %61 = arith.addf %59, %60 : vector<8x128xf32>
    %62 = vector.extract_strided_slice %22 {offsets = [0, 128], sizes = [8, 128], strides = [1, 1]} : vector<8x512xf32> to vector<8x128xf32>
    %cst_23 = arith.constant 5.000000e-01 : f32
    %63 = vector.broadcast %cst_23 : f32 to vector<8x128xf32>
    %64 = arith.mulf %63, %62 : vector<8x128xf32>
    %65 = math.tanh %64 : vector<8x128xf32>
    %cst_24 = arith.constant 5.000000e-01 : f32
    %66 = vector.broadcast %cst_24 : f32 to vector<8x128xf32>
    %67 = arith.mulf %66, %65 : vector<8x128xf32>
    %cst_25 = arith.constant 5.000000e-01 : f32
    %68 = vector.broadcast %cst_25 : f32 to vector<8x128xf32>
    %69 = arith.addf %67, %68 : vector<8x128xf32>
    %70 = vector.extract_strided_slice %22 {offsets = [0, 256], sizes = [8, 128], strides = [1, 1]} : vector<8x512xf32> to vector<8x128xf32>
    %71 = math.tanh %70 : vector<8x128xf32>
    %72 = vector.extract_strided_slice %22 {offsets = [0, 384], sizes = [8, 128], strides = [1, 1]} : vector<8x512xf32> to vector<8x128xf32>
    %cst_26 = arith.constant 5.000000e-01 : f32
    %73 = vector.broadcast %cst_26 : f32 to vector<8x128xf32>
    %74 = arith.mulf %73, %72 : vector<8x128xf32>
    %75 = math.tanh %74 : vector<8x128xf32>
    %cst_27 = arith.constant 5.000000e-01 : f32
    %76 = vector.broadcast %cst_27 : f32 to vector<8x128xf32>
    %77 = arith.mulf %76, %75 : vector<8x128xf32>
    %cst_28 = arith.constant 5.000000e-01 : f32
    %78 = vector.broadcast %cst_28 : f32 to vector<8x128xf32>
    %79 = arith.addf %77, %78 : vector<8x128xf32>
    %80 = arith.mulf %69, %6 : vector<8x128xf32>
    %81 = arith.mulf %61, %71 : vector<8x128xf32>
    %82 = arith.addf %80, %81 : vector<8x128xf32>
    %83 = math.tanh %82 : vector<8x128xf32>
    %84 = arith.mulf %79, %83 : vector<8x128xf32>
    %85 = arith.truncf %53 : vector<8x128xf32> to vector<8x128xbf16>
    %86 = arith.index_cast %c0_i32_4 : i32 to index
    %c0_29 = arith.constant 0 : index
    %c0_30 = arith.constant 0 : index
    %87 = vector.load %arg4[%86, %c0_29, %c0_30] : memref<8x8x128xbf16, #tpu.memory_space<vmem>>, vector<1x8x128xbf16>
    %88 = vector.shape_cast %87 : vector<1x8x128xbf16> to vector<8x128xbf16>
    %89 = vector.shape_cast %85 : vector<8x128xbf16> to vector<1x8x128xbf16>
    tpu.vector_store %arg4[%86, %c0_29, %c0_30], %89 {strides = array<i32>} : memref<8x8x128xbf16, #tpu.memory_space<vmem>>, vector<1x8x128xbf16>,
    %90 = arith.truncf %84 : vector<8x128xf32> to vector<8x128xbf16>
    %c7_i32_31 = arith.constant 7 : i32
    %91 = arith.subi %c7_i32_31, %c0_i32_4 : i32
    %92 = arith.index_cast %91 : i32 to index
    %c0_32 = arith.constant 0 : index
    %c0_33 = arith.constant 0 : index
    %93 = vector.load %arg5[%92, %c0_32, %c0_33] : memref<8x8x128xbf16, #tpu.memory_space<vmem>>, vector<1x8x128xbf16>
    %94 = vector.shape_cast %93 : vector<1x8x128xbf16> to vector<8x128xbf16>
    %95 = vector.shape_cast %90 : vector<8x128xbf16> to vector<1x8x128xbf16>
    tpu.vector_store %arg5[%92, %c0_32, %c0_33], %95 {strides = array<i32>} : memref<8x8x128xbf16, #tpu.memory_space<vmem>>, vector<1x8x128xbf16>,
    %96 = tpu.concatenate %53, %84 in 1 : vector<8x128xf32>, vector<8x128xf32> -> vector<8x256xf32>
    %c1_i32 = arith.constant 1 : i32
    %97 = arith.truncf %96 : vector<8x256xf32> to vector<8x256xbf16>
    %c0_34 = arith.constant 0 : index
    %c0_35 = arith.constant 0 : index
    %98 = vector.load %arg3[%c0_34, %c0_35] : memref<256x1024xbf16, #tpu.memory_space<vmem>>, vector<256x1024xbf16>
    %cst_36 = arith.constant dense<0.000000e+00> : vector<8x1024xf32>
    %99 = tpu.matmul %97, %98, %cst_36 {dimension_numbers = #tpu.dot_dimension_numbers<[1], [0], [0], [1], [0, 0, 1, 1], [], []>} : vector<8x256xbf16>, vector<256x1024xbf16>, vector<8x1024xf32> -> vector<8x1024xf32>
    %100 = arith.index_cast %c1_i32 : i32 to index
    %c0_37 = arith.constant 0 : index
    %c0_38 = arith.constant 0 : index
    %101 = vector.load %arg1[%100, %c0_37, %c0_38] : memref<8x8x512xbf16, #tpu.memory_space<vmem>>, vector<1x8x512xbf16>
    %102 = vector.shape_cast %101 : vector<1x8x512xbf16> to vector<8x512xbf16>
    %103 = arith.extf %102 : vector<8x512xbf16> to vector<8x512xf32>
    %104 = vector.extract_strided_slice %99 {offsets = [0, 0], sizes = [8, 512], strides = [1, 1]} : vector<8x1024xf32> to vector<8x512xf32>
    %105 = arith.addf %103, %104 : vector<8x512xf32>
    %c7_i32_39 = arith.constant 7 : i32
    %106 = arith.subi %c7_i32_39, %c1_i32 : i32
    %107 = arith.index_cast %106 : i32 to index
    %c0_40 = arith.constant 0 : index
    %c0_41 = arith.constant 0 : index
    %108 = vector.load %arg2[%107, %c0_40, %c0_41] : memref<8x8x512xbf16, #tpu.memory_space<vmem>>, vector<1x8x512xbf16>
    %109 = vector.shape_cast %108 : vector<1x8x512xbf16> to vector<8x512xbf16>
    %110 = arith.extf %109 : vector<8x512xbf16> to vector<8x512xf32>
    %111 = vector.extract_strided_slice %99 {offsets = [0, 512], sizes = [8, 512], strides = [1, 1]} : vector<8x1024xf32> to vector<8x512xf32>
    %112 = arith.addf %110, %111 : vector<8x512xf32>
    %113 = vector.extract_strided_slice %105 {offsets = [0, 0], sizes = [8, 128], strides = [1, 1]} : vector<8x512xf32> to vector<8x128xf32>
    %cst_42 = arith.constant 5.000000e-01 : f32
    %114 = vector.broadcast %cst_42 : f32 to vector<8x128xf32>
    %115 = arith.mulf %114, %113 : vector<8x128xf32>
    %116 = math.tanh %115 : vector<8x128xf32>
    %cst_43 = arith.constant 5.000000e-01 : f32
    %117 = vector.broadcast %cst_43 : f32 to vector<8x128xf32>
    %118 = arith.mulf %117, %116 : vector<8x128xf32>
    %cst_44 = arith.constant 5.000000e-01 : f32
    %119 = vector.broadcast %cst_44 : f32 to vector<8x128xf32>
    %120 = arith.addf %118, %119 : vector<8x128xf32>
    %121 = vector.extract_strided_slice %105 {offsets = [0, 128], sizes = [8, 128], strides = [1, 1]} : vector<8x512xf32> to vector<8x128xf32>
    %cst_45 = arith.constant 5.000000e-01 : f32
    %122 = vector.broadcast %cst_45 : f32 to vector<8x128xf32>
    %123 = arith.mulf %122, %121 : vector<8x128xf32>
    %124 = math.tanh %123 : vector<8x128xf32>
    %cst_46 = arith.constant 5.000000e-01 : f32
    %125 = vector.broadcast %cst_46 : f32 to vector<8x128xf32>
    %126 = arith.mulf %125, %124 : vector<8x128xf32>
    %cst_47 = arith.constant 5.000000e-01 : f32
    %127 = vector.broadcast %cst_47 : f32 to vector<8x128xf32>
    %128 = arith.addf %126, %127 : vector<8x128xf32>
    %129 = vector.extract_strided_slice %105 {offsets = [0, 256], sizes = [8, 128], strides = [1, 1]} : vector<8x512xf32> to vector<8x128xf32>
    %130 = math.tanh %129 : vector<8x128xf32>
    %131 = vector.extract_strided_slice %105 {offsets = [0, 384], sizes = [8, 128], strides = [1, 1]} : vector<8x512xf32> to vector<8x128xf32>
    %cst_48 = arith.constant 5.000000e-01 : f32
    %132 = vector.broadcast %cst_48 : f32 to vector<8x128xf32>
    %133 = arith.mulf %132, %131 : vector<8x128xf32>
    %134 = math.tanh %133 : vector<8x128xf32>
    %cst_49 = arith.constant 5.000000e-01 : f32
    %135 = vector.broadcast %cst_49 : f32 to vector<8x128xf32>
    %136 = arith.mulf %135, %134 : vector<8x128xf32>
    %cst_50 = arith.constant 5.000000e-01 : f32
    %137 = vector.broadcast %cst_50 : f32 to vector<8x128xf32>
    %138 = arith.addf %136, %137 : vector<8x128xf32>
    %139 = arith.mulf %128, %51 : vector<8x128xf32>
    %140 = arith.mulf %120, %130 : vector<8x128xf32>
    %141 = arith.addf %139, %140 : vector<8x128xf32>
    %142 = math.tanh %141 : vector<8x128xf32>
    %143 = arith.mulf %138, %142 : vector<8x128xf32>
    %144 = vector.extract_strided_slice %112 {offsets = [0, 0], sizes = [8, 128], strides = [1, 1]} : vector<8x512xf32> to vector<8x128xf32>
    %cst_51 = arith.constant 5.000000e-01 : f32
    %145 = vector.broadcast %cst_51 : f32 to vector<8x128xf32>
    %146 = arith.mulf %145, %144 : vector<8x128xf32>
    %147 = math.tanh %146 : vector<8x128xf32>
    %cst_52 = arith.constant 5.000000e-01 : f32
    %148 = vector.broadcast %cst_52 : f32 to vector<8x128xf32>
    %149 = arith.mulf %148, %147 : vector<8x128xf32>
    %cst_53 = arith.constant 5.000000e-01 : f32
    %150 = vector.broadcast %cst_53 : f32 to vector<8x128xf32>
    %151 = arith.addf %149, %150 : vector<8x128xf32>
    %152 = vector.extract_strided_slice %112 {offsets = [0, 128], sizes = [8, 128], strides = [1, 1]} : vector<8x512xf32> to vector<8x128xf32>
    %cst_54 = arith.constant 5.000000e-01 : f32
    %153 = vector.broadcast %cst_54 : f32 to vector<8x128xf32>
    %154 = arith.mulf %153, %152 : vector<8x128xf32>
    %155 = math.tanh %154 : vector<8x128xf32>
    %cst_55 = arith.constant 5.000000e-01 : f32
    %156 = vector.broadcast %cst_55 : f32 to vector<8x128xf32>
    %157 = arith.mulf %156, %155 : vector<8x128xf32>
    %cst_56 = arith.constant 5.000000e-01 : f32
    %158 = vector.broadcast %cst_56 : f32 to vector<8x128xf32>
    %159 = arith.addf %157, %158 : vector<8x128xf32>
    %160 = vector.extract_strided_slice %112 {offsets = [0, 256], sizes = [8, 128], strides = [1, 1]} : vector<8x512xf32> to vector<8x128xf32>
    %161 = math.tanh %160 : vector<8x128xf32>
    %162 = vector.extract_strided_slice %112 {offsets = [0, 384], sizes = [8, 128], strides = [1, 1]} : vector<8x512xf32> to vector<8x128xf32>
    %cst_57 = arith.constant 5.000000e-01 : f32
    %163 = vector.broadcast %cst_57 : f32 to vector<8x128xf32>
    %164 = arith.mulf %163, %162 : vector<8x128xf32>
    %165 = math.tanh %164 : vector<8x128xf32>
    %cst_58 = arith.constant 5.000000e-01 : f32
    %166 = vector.broadcast %cst_58 : f32 to vector<8x128xf32>
    %167 = arith.mulf %166, %165 : vector<8x128xf32>
    %cst_59 = arith.constant 5.000000e-01 : f32
    %168 = vector.broadcast %cst_59 : f32 to vector<8x128xf32>
    %169 = arith.addf %167, %168 : vector<8x128xf32>
    %170 = arith.mulf %159, %82 : vector<8x128xf32>
    %171 = arith.mulf %151, %161 : vector<8x128xf32>
    %172 = arith.addf %170, %171 : vector<8x128xf32>
    %173 = math.tanh %172 : vector<8x128xf32>
    %174 = arith.mulf %169, %173 : vector<8x128xf32>
    %175 = arith.truncf %143 : vector<8x128xf32> to vector<8x128xbf16>
    %176 = arith.index_cast %c1_i32 : i32 to index
    %c0_60 = arith.constant 0 : index
    %c0_61 = arith.constant 0 : index
    %177 = vector.load %arg4[%176, %c0_60, %c0_61] : memref<8x8x128xbf16, #tpu.memory_space<vmem>>, vector<1x8x128xbf16>
    %178 = vector.shape_cast %177 : vector<1x8x128xbf16> to vector<8x128xbf16>
    %179 = vector.shape_cast %175 : vector<8x128xbf16> to vector<1x8x128xbf16>
    tpu.vector_store %arg4[%176, %c0_60, %c0_61], %179 {strides = array<i32>} : memref<8x8x128xbf16, #tpu.memory_space<vmem>>, vector<1x8x128xbf16>,
    %180 = arith.truncf %174 : vector<8x128xf32> to vector<8x128xbf16>
    %c7_i32_62 = arith.constant 7 : i32
    %181 = arith.subi %c7_i32_62, %c1_i32 : i32
    %182 = arith.index_cast %181 : i32 to index
    %c0_63 = arith.constant 0 : index
    %c0_64 = arith.constant 0 : index
    %183 = vector.load %arg5[%182, %c0_63, %c0_64] : memref<8x8x128xbf16, #tpu.memory_space<vmem>>, vector<1x8x128xbf16>
    %184 = vector.shape_cast %183 : vector<1x8x128xbf16> to vector<8x128xbf16>
    %185 = vector.shape_cast %180 : vector<8x128xbf16> to vector<1x8x128xbf16>
    tpu.vector_store %arg5[%182, %c0_63, %c0_64], %185 {strides = array<i32>} : memref<8x8x128xbf16, #tpu.memory_space<vmem>>, vector<1x8x128xbf16>,
    %186 = tpu.concatenate %143, %174 in 1 : vector<8x128xf32>, vector<8x128xf32> -> vector<8x256xf32>
    %c2_i32 = arith.constant 2 : i32
    %187 = arith.truncf %186 : vector<8x256xf32> to vector<8x256xbf16>
    %c0_65 = arith.constant 0 : index
    %c0_66 = arith.constant 0 : index
    %188 = vector.load %arg3[%c0_65, %c0_66] : memref<256x1024xbf16, #tpu.memory_space<vmem>>, vector<256x1024xbf16>
    %cst_67 = arith.constant dense<0.000000e+00> : vector<8x1024xf32>
    %189 = tpu.matmul %187, %188, %cst_67 {dimension_numbers = #tpu.dot_dimension_numbers<[1], [0], [0], [1], [0, 0, 1, 1], [], []>} : vector<8x256xbf16>, vector<256x1024xbf16>, vector<8x1024xf32> -> vector<8x1024xf32>
    %190 = arith.index_cast %c2_i32 : i32 to index
    %c0_68 = arith.constant 0 : index
    %c0_69 = arith.constant 0 : index
    %191 = vector.load %arg1[%190, %c0_68, %c0_69] : memref<8x8x512xbf16, #tpu.memory_space<vmem>>, vector<1x8x512xbf16>
    %192 = vector.shape_cast %191 : vector<1x8x512xbf16> to vector<8x512xbf16>
    %193 = arith.extf %192 : vector<8x512xbf16> to vector<8x512xf32>
    %194 = vector.extract_strided_slice %189 {offsets = [0, 0], sizes = [8, 512], strides = [1, 1]} : vector<8x1024xf32> to vector<8x512xf32>
    %195 = arith.addf %193, %194 : vector<8x512xf32>
    %c7_i32_70 = arith.constant 7 : i32
    %196 = arith.subi %c7_i32_70, %c2_i32 : i32
    %197 = arith.index_cast %196 : i32 to index
    %c0_71 = arith.constant 0 : index
    %c0_72 = arith.constant 0 : index
    %198 = vector.load %arg2[%197, %c0_71, %c0_72] : memref<8x8x512xbf16, #tpu.memory_space<vmem>>, vector<1x8x512xbf16>
    %199 = vector.shape_cast %198 : vector<1x8x512xbf16> to vector<8x512xbf16>
    %200 = arith.extf %199 : vector<8x512xbf16> to vector<8x512xf32>
    %201 = vector.extract_strided_slice %189 {offsets = [0, 512], sizes = [8, 512], strides = [1, 1]} : vector<8x1024xf32> to vector<8x512xf32>
    %202 = arith.addf %200, %201 : vector<8x512xf32>
    %203 = vector.extract_strided_slice %195 {offsets = [0, 0], sizes = [8, 128], strides = [1, 1]} : vector<8x512xf32> to vector<8x128xf32>
    %cst_73 = arith.constant 5.000000e-01 : f32
    %204 = vector.broadcast %cst_73 : f32 to vector<8x128xf32>
    %205 = arith.mulf %204, %203 : vector<8x128xf32>
    %206 = math.tanh %205 : vector<8x128xf32>
    %cst_74 = arith.constant 5.000000e-01 : f32
    %207 = vector.broadcast %cst_74 : f32 to vector<8x128xf32>
    %208 = arith.mulf %207, %206 : vector<8x128xf32>
    %cst_75 = arith.constant 5.000000e-01 : f32
    %209 = vector.broadcast %cst_75 : f32 to vector<8x128xf32>
    %210 = arith.addf %208, %209 : vector<8x128xf32>
    %211 = vector.extract_strided_slice %195 {offsets = [0, 128], sizes = [8, 128], strides = [1, 1]} : vector<8x512xf32> to vector<8x128xf32>
    %cst_76 = arith.constant 5.000000e-01 : f32
    %212 = vector.broadcast %cst_76 : f32 to vector<8x128xf32>
    %213 = arith.mulf %212, %211 : vector<8x128xf32>
    %214 = math.tanh %213 : vector<8x128xf32>
    %cst_77 = arith.constant 5.000000e-01 : f32
    %215 = vector.broadcast %cst_77 : f32 to vector<8x128xf32>
    %216 = arith.mulf %215, %214 : vector<8x128xf32>
    %cst_78 = arith.constant 5.000000e-01 : f32
    %217 = vector.broadcast %cst_78 : f32 to vector<8x128xf32>
    %218 = arith.addf %216, %217 : vector<8x128xf32>
    %219 = vector.extract_strided_slice %195 {offsets = [0, 256], sizes = [8, 128], strides = [1, 1]} : vector<8x512xf32> to vector<8x128xf32>
    %220 = math.tanh %219 : vector<8x128xf32>
    %221 = vector.extract_strided_slice %195 {offsets = [0, 384], sizes = [8, 128], strides = [1, 1]} : vector<8x512xf32> to vector<8x128xf32>
    %cst_79 = arith.constant 5.000000e-01 : f32
    %222 = vector.broadcast %cst_79 : f32 to vector<8x128xf32>
    %223 = arith.mulf %222, %221 : vector<8x128xf32>
    %224 = math.tanh %223 : vector<8x128xf32>
    %cst_80 = arith.constant 5.000000e-01 : f32
    %225 = vector.broadcast %cst_80 : f32 to vector<8x128xf32>
    %226 = arith.mulf %225, %224 : vector<8x128xf32>
    %cst_81 = arith.constant 5.000000e-01 : f32
    %227 = vector.broadcast %cst_81 : f32 to vector<8x128xf32>
    %228 = arith.addf %226, %227 : vector<8x128xf32>
    %229 = arith.mulf %218, %141 : vector<8x128xf32>
    %230 = arith.mulf %210, %220 : vector<8x128xf32>
    %231 = arith.addf %229, %230 : vector<8x128xf32>
    %232 = math.tanh %231 : vector<8x128xf32>
    %233 = arith.mulf %228, %232 : vector<8x128xf32>
    %234 = vector.extract_strided_slice %202 {offsets = [0, 0], sizes = [8, 128], strides = [1, 1]} : vector<8x512xf32> to vector<8x128xf32>
    %cst_82 = arith.constant 5.000000e-01 : f32
    %235 = vector.broadcast %cst_82 : f32 to vector<8x128xf32>
    %236 = arith.mulf %235, %234 : vector<8x128xf32>
    %237 = math.tanh %236 : vector<8x128xf32>
    %cst_83 = arith.constant 5.000000e-01 : f32
    %238 = vector.broadcast %cst_83 : f32 to vector<8x128xf32>
    %239 = arith.mulf %238, %237 : vector<8x128xf32>
    %cst_84 = arith.constant 5.000000e-01 : f32
    %240 = vector.broadcast %cst_84 : f32 to vector<8x128xf32>
    %241 = arith.addf %239, %240 : vector<8x128xf32>
    %242 = vector.extract_strided_slice %202 {offsets = [0, 128], sizes = [8, 128], strides = [1, 1]} : vector<8x512xf32> to vector<8x128xf32>
    %cst_85 = arith.constant 5.000000e-01 : f32
    %243 = vector.broadcast %cst_85 : f32 to vector<8x128xf32>
    %244 = arith.mulf %243, %242 : vector<8x128xf32>
    %245 = math.tanh %244 : vector<8x128xf32>
    %cst_86 = arith.constant 5.000000e-01 : f32
    %246 = vector.broadcast %cst_86 : f32 to vector<8x128xf32>
    %247 = arith.mulf %246, %245 : vector<8x128xf32>
    %cst_87 = arith.constant 5.000000e-01 : f32
    %248 = vector.broadcast %cst_87 : f32 to vector<8x128xf32>
    %249 = arith.addf %247, %248 : vector<8x128xf32>
    %250 = vector.extract_strided_slice %202 {offsets = [0, 256], sizes = [8, 128], strides = [1, 1]} : vector<8x512xf32> to vector<8x128xf32>
    %251 = math.tanh %250 : vector<8x128xf32>
    %252 = vector.extract_strided_slice %202 {offsets = [0, 384], sizes = [8, 128], strides = [1, 1]} : vector<8x512xf32> to vector<8x128xf32>
    %cst_88 = arith.constant 5.000000e-01 : f32
    %253 = vector.broadcast %cst_88 : f32 to vector<8x128xf32>
    %254 = arith.mulf %253, %252 : vector<8x128xf32>
    %255 = math.tanh %254 : vector<8x128xf32>
    %cst_89 = arith.constant 5.000000e-01 : f32
    %256 = vector.broadcast %cst_89 : f32 to vector<8x128xf32>
    %257 = arith.mulf %256, %255 : vector<8x128xf32>
    %cst_90 = arith.constant 5.000000e-01 : f32
    %258 = vector.broadcast %cst_90 : f32 to vector<8x128xf32>
    %259 = arith.addf %257, %258 : vector<8x128xf32>
    %260 = arith.mulf %249, %172 : vector<8x128xf32>
    %261 = arith.mulf %241, %251 : vector<8x128xf32>
    %262 = arith.addf %260, %261 : vector<8x128xf32>
    %263 = math.tanh %262 : vector<8x128xf32>
    %264 = arith.mulf %259, %263 : vector<8x128xf32>
    %265 = arith.truncf %233 : vector<8x128xf32> to vector<8x128xbf16>
    %266 = arith.index_cast %c2_i32 : i32 to index
    %c0_91 = arith.constant 0 : index
    %c0_92 = arith.constant 0 : index
    %267 = vector.load %arg4[%266, %c0_91, %c0_92] : memref<8x8x128xbf16, #tpu.memory_space<vmem>>, vector<1x8x128xbf16>
    %268 = vector.shape_cast %267 : vector<1x8x128xbf16> to vector<8x128xbf16>
    %269 = vector.shape_cast %265 : vector<8x128xbf16> to vector<1x8x128xbf16>
    tpu.vector_store %arg4[%266, %c0_91, %c0_92], %269 {strides = array<i32>} : memref<8x8x128xbf16, #tpu.memory_space<vmem>>, vector<1x8x128xbf16>,
    %270 = arith.truncf %264 : vector<8x128xf32> to vector<8x128xbf16>
    %c7_i32_93 = arith.constant 7 : i32
    %271 = arith.subi %c7_i32_93, %c2_i32 : i32
    %272 = arith.index_cast %271 : i32 to index
    %c0_94 = arith.constant 0 : index
    %c0_95 = arith.constant 0 : index
    %273 = vector.load %arg5[%272, %c0_94, %c0_95] : memref<8x8x128xbf16, #tpu.memory_space<vmem>>, vector<1x8x128xbf16>
    %274 = vector.shape_cast %273 : vector<1x8x128xbf16> to vector<8x128xbf16>
    %275 = vector.shape_cast %270 : vector<8x128xbf16> to vector<1x8x128xbf16>
    tpu.vector_store %arg5[%272, %c0_94, %c0_95], %275 {strides = array<i32>} : memref<8x8x128xbf16, #tpu.memory_space<vmem>>, vector<1x8x128xbf16>,
    %276 = tpu.concatenate %233, %264 in 1 : vector<8x128xf32>, vector<8x128xf32> -> vector<8x256xf32>
    %c3_i32 = arith.constant 3 : i32
    %277 = arith.truncf %276 : vector<8x256xf32> to vector<8x256xbf16>
    %c0_96 = arith.constant 0 : index
    %c0_97 = arith.constant 0 : index
    %278 = vector.load %arg3[%c0_96, %c0_97] : memref<256x1024xbf16, #tpu.memory_space<vmem>>, vector<256x1024xbf16>
    %cst_98 = arith.constant dense<0.000000e+00> : vector<8x1024xf32>
    %279 = tpu.matmul %277, %278, %cst_98 {dimension_numbers = #tpu.dot_dimension_numbers<[1], [0], [0], [1], [0, 0, 1, 1], [], []>} : vector<8x256xbf16>, vector<256x1024xbf16>, vector<8x1024xf32> -> vector<8x1024xf32>
    %280 = arith.index_cast %c3_i32 : i32 to index
    %c0_99 = arith.constant 0 : index
    %c0_100 = arith.constant 0 : index
    %281 = vector.load %arg1[%280, %c0_99, %c0_100] : memref<8x8x512xbf16, #tpu.memory_space<vmem>>, vector<1x8x512xbf16>
    %282 = vector.shape_cast %281 : vector<1x8x512xbf16> to vector<8x512xbf16>
    %283 = arith.extf %282 : vector<8x512xbf16> to vector<8x512xf32>
    %284 = vector.extract_strided_slice %279 {offsets = [0, 0], sizes = [8, 512], strides = [1, 1]} : vector<8x1024xf32> to vector<8x512xf32>
    %285 = arith.addf %283, %284 : vector<8x512xf32>
    %c7_i32_101 = arith.constant 7 : i32
    %286 = arith.subi %c7_i32_101, %c3_i32 : i32
    %287 = arith.index_cast %286 : i32 to index
    %c0_102 = arith.constant 0 : index
    %c0_103 = arith.constant 0 : index
    %288 = vector.load %arg2[%287, %c0_102, %c0_103] : memref<8x8x512xbf16, #tpu.memory_space<vmem>>, vector<1x8x512xbf16>
    %289 = vector.shape_cast %288 : vector<1x8x512xbf16> to vector<8x512xbf16>
    %290 = arith.extf %289 : vector<8x512xbf16> to vector<8x512xf32>
    %291 = vector.extract_strided_slice %279 {offsets = [0, 512], sizes = [8, 512], strides = [1, 1]} : vector<8x1024xf32> to vector<8x512xf32>
    %292 = arith.addf %290, %291 : vector<8x512xf32>
    %293 = vector.extract_strided_slice %285 {offsets = [0, 0], sizes = [8, 128], strides = [1, 1]} : vector<8x512xf32> to vector<8x128xf32>
    %cst_104 = arith.constant 5.000000e-01 : f32
    %294 = vector.broadcast %cst_104 : f32 to vector<8x128xf32>
    %295 = arith.mulf %294, %293 : vector<8x128xf32>
    %296 = math.tanh %295 : vector<8x128xf32>
    %cst_105 = arith.constant 5.000000e-01 : f32
    %297 = vector.broadcast %cst_105 : f32 to vector<8x128xf32>
    %298 = arith.mulf %297, %296 : vector<8x128xf32>
    %cst_106 = arith.constant 5.000000e-01 : f32
    %299 = vector.broadcast %cst_106 : f32 to vector<8x128xf32>
    %300 = arith.addf %298, %299 : vector<8x128xf32>
    %301 = vector.extract_strided_slice %285 {offsets = [0, 128], sizes = [8, 128], strides = [1, 1]} : vector<8x512xf32> to vector<8x128xf32>
    %cst_107 = arith.constant 5.000000e-01 : f32
    %302 = vector.broadcast %cst_107 : f32 to vector<8x128xf32>
    %303 = arith.mulf %302, %301 : vector<8x128xf32>
    %304 = math.tanh %303 : vector<8x128xf32>
    %cst_108 = arith.constant 5.000000e-01 : f32
    %305 = vector.broadcast %cst_108 : f32 to vector<8x128xf32>
    %306 = arith.mulf %305, %304 : vector<8x128xf32>
    %cst_109 = arith.constant 5.000000e-01 : f32
    %307 = vector.broadcast %cst_109 : f32 to vector<8x128xf32>
    %308 = arith.addf %306, %307 : vector<8x128xf32>
    %309 = vector.extract_strided_slice %285 {offsets = [0, 256], sizes = [8, 128], strides = [1, 1]} : vector<8x512xf32> to vector<8x128xf32>
    %310 = math.tanh %309 : vector<8x128xf32>
    %311 = vector.extract_strided_slice %285 {offsets = [0, 384], sizes = [8, 128], strides = [1, 1]} : vector<8x512xf32> to vector<8x128xf32>
    %cst_110 = arith.constant 5.000000e-01 : f32
    %312 = vector.broadcast %cst_110 : f32 to vector<8x128xf32>
    %313 = arith.mulf %312, %311 : vector<8x128xf32>
    %314 = math.tanh %313 : vector<8x128xf32>
    %cst_111 = arith.constant 5.000000e-01 : f32
    %315 = vector.broadcast %cst_111 : f32 to vector<8x128xf32>
    %316 = arith.mulf %315, %314 : vector<8x128xf32>
    %cst_112 = arith.constant 5.000000e-01 : f32
    %317 = vector.broadcast %cst_112 : f32 to vector<8x128xf32>
    %318 = arith.addf %316, %317 : vector<8x128xf32>
    %319 = arith.mulf %308, %231 : vector<8x128xf32>
    %320 = arith.mulf %300, %310 : vector<8x128xf32>
    %321 = arith.addf %319, %320 : vector<8x128xf32>
    %322 = math.tanh %321 : vector<8x128xf32>
    %323 = arith.mulf %318, %322 : vector<8x128xf32>
    %324 = vector.extract_strided_slice %292 {offsets = [0, 0], sizes = [8, 128], strides = [1, 1]} : vector<8x512xf32> to vector<8x128xf32>
    %cst_113 = arith.constant 5.000000e-01 : f32
    %325 = vector.broadcast %cst_113 : f32 to vector<8x128xf32>
    %326 = arith.mulf %325, %324 : vector<8x128xf32>
    %327 = math.tanh %326 : vector<8x128xf32>
    %cst_114 = arith.constant 5.000000e-01 : f32
    %328 = vector.broadcast %cst_114 : f32 to vector<8x128xf32>
    %329 = arith.mulf %328, %327 : vector<8x128xf32>
    %cst_115 = arith.constant 5.000000e-01 : f32
    %330 = vector.broadcast %cst_115 : f32 to vector<8x128xf32>
    %331 = arith.addf %329, %330 : vector<8x128xf32>
    %332 = vector.extract_strided_slice %292 {offsets = [0, 128], sizes = [8, 128], strides = [1, 1]} : vector<8x512xf32> to vector<8x128xf32>
    %cst_116 = arith.constant 5.000000e-01 : f32
    %333 = vector.broadcast %cst_116 : f32 to vector<8x128xf32>
    %334 = arith.mulf %333, %332 : vector<8x128xf32>
    %335 = math.tanh %334 : vector<8x128xf32>
    %cst_117 = arith.constant 5.000000e-01 : f32
    %336 = vector.broadcast %cst_117 : f32 to vector<8x128xf32>
    %337 = arith.mulf %336, %335 : vector<8x128xf32>
    %cst_118 = arith.constant 5.000000e-01 : f32
    %338 = vector.broadcast %cst_118 : f32 to vector<8x128xf32>
    %339 = arith.addf %337, %338 : vector<8x128xf32>
    %340 = vector.extract_strided_slice %292 {offsets = [0, 256], sizes = [8, 128], strides = [1, 1]} : vector<8x512xf32> to vector<8x128xf32>
    %341 = math.tanh %340 : vector<8x128xf32>
    %342 = vector.extract_strided_slice %292 {offsets = [0, 384], sizes = [8, 128], strides = [1, 1]} : vector<8x512xf32> to vector<8x128xf32>
    %cst_119 = arith.constant 5.000000e-01 : f32
    %343 = vector.broadcast %cst_119 : f32 to vector<8x128xf32>
    %344 = arith.mulf %343, %342 : vector<8x128xf32>
    %345 = math.tanh %344 : vector<8x128xf32>
    %cst_120 = arith.constant 5.000000e-01 : f32
    %346 = vector.broadcast %cst_120 : f32 to vector<8x128xf32>
    %347 = arith.mulf %346, %345 : vector<8x128xf32>
    %cst_121 = arith.constant 5.000000e-01 : f32
    %348 = vector.broadcast %cst_121 : f32 to vector<8x128xf32>
    %349 = arith.addf %347, %348 : vector<8x128xf32>
    %350 = arith.mulf %339, %262 : vector<8x128xf32>
    %351 = arith.mulf %331, %341 : vector<8x128xf32>
    %352 = arith.addf %350, %351 : vector<8x128xf32>
    %353 = math.tanh %352 : vector<8x128xf32>
    %354 = arith.mulf %349, %353 : vector<8x128xf32>
    %355 = arith.truncf %323 : vector<8x128xf32> to vector<8x128xbf16>
    %356 = arith.index_cast %c3_i32 : i32 to index
    %c0_122 = arith.constant 0 : index
    %c0_123 = arith.constant 0 : index
    %357 = vector.load %arg4[%356, %c0_122, %c0_123] : memref<8x8x128xbf16, #tpu.memory_space<vmem>>, vector<1x8x128xbf16>
    %358 = vector.shape_cast %357 : vector<1x8x128xbf16> to vector<8x128xbf16>
    %359 = vector.shape_cast %355 : vector<8x128xbf16> to vector<1x8x128xbf16>
    tpu.vector_store %arg4[%356, %c0_122, %c0_123], %359 {strides = array<i32>} : memref<8x8x128xbf16, #tpu.memory_space<vmem>>, vector<1x8x128xbf16>,
    %360 = arith.truncf %354 : vector<8x128xf32> to vector<8x128xbf16>
    %c7_i32_124 = arith.constant 7 : i32
    %361 = arith.subi %c7_i32_124, %c3_i32 : i32
    %362 = arith.index_cast %361 : i32 to index
    %c0_125 = arith.constant 0 : index
    %c0_126 = arith.constant 0 : index
    %363 = vector.load %arg5[%362, %c0_125, %c0_126] : memref<8x8x128xbf16, #tpu.memory_space<vmem>>, vector<1x8x128xbf16>
    %364 = vector.shape_cast %363 : vector<1x8x128xbf16> to vector<8x128xbf16>
    %365 = vector.shape_cast %360 : vector<8x128xbf16> to vector<1x8x128xbf16>
    tpu.vector_store %arg5[%362, %c0_125, %c0_126], %365 {strides = array<i32>} : memref<8x8x128xbf16, #tpu.memory_space<vmem>>, vector<1x8x128xbf16>,
    %366 = tpu.concatenate %323, %354 in 1 : vector<8x128xf32>, vector<8x128xf32> -> vector<8x256xf32>
    %c4_i32 = arith.constant 4 : i32
    %367 = arith.truncf %366 : vector<8x256xf32> to vector<8x256xbf16>
    %c0_127 = arith.constant 0 : index
    %c0_128 = arith.constant 0 : index
    %368 = vector.load %arg3[%c0_127, %c0_128] : memref<256x1024xbf16, #tpu.memory_space<vmem>>, vector<256x1024xbf16>
    %cst_129 = arith.constant dense<0.000000e+00> : vector<8x1024xf32>
    %369 = tpu.matmul %367, %368, %cst_129 {dimension_numbers = #tpu.dot_dimension_numbers<[1], [0], [0], [1], [0, 0, 1, 1], [], []>} : vector<8x256xbf16>, vector<256x1024xbf16>, vector<8x1024xf32> -> vector<8x1024xf32>
    %370 = arith.index_cast %c4_i32 : i32 to index
    %c0_130 = arith.constant 0 : index
    %c0_131 = arith.constant 0 : index
    %371 = vector.load %arg1[%370, %c0_130, %c0_131] : memref<8x8x512xbf16, #tpu.memory_space<vmem>>, vector<1x8x512xbf16>
    %372 = vector.shape_cast %371 : vector<1x8x512xbf16> to vector<8x512xbf16>
    %373 = arith.extf %372 : vector<8x512xbf16> to vector<8x512xf32>
    %374 = vector.extract_strided_slice %369 {offsets = [0, 0], sizes = [8, 512], strides = [1, 1]} : vector<8x1024xf32> to vector<8x512xf32>
    %375 = arith.addf %373, %374 : vector<8x512xf32>
    %c7_i32_132 = arith.constant 7 : i32
    %376 = arith.subi %c7_i32_132, %c4_i32 : i32
    %377 = arith.index_cast %376 : i32 to index
    %c0_133 = arith.constant 0 : index
    %c0_134 = arith.constant 0 : index
    %378 = vector.load %arg2[%377, %c0_133, %c0_134] : memref<8x8x512xbf16, #tpu.memory_space<vmem>>, vector<1x8x512xbf16>
    %379 = vector.shape_cast %378 : vector<1x8x512xbf16> to vector<8x512xbf16>
    %380 = arith.extf %379 : vector<8x512xbf16> to vector<8x512xf32>
    %381 = vector.extract_strided_slice %369 {offsets = [0, 512], sizes = [8, 512], strides = [1, 1]} : vector<8x1024xf32> to vector<8x512xf32>
    %382 = arith.addf %380, %381 : vector<8x512xf32>
    %383 = vector.extract_strided_slice %375 {offsets = [0, 0], sizes = [8, 128], strides = [1, 1]} : vector<8x512xf32> to vector<8x128xf32>
    %cst_135 = arith.constant 5.000000e-01 : f32
    %384 = vector.broadcast %cst_135 : f32 to vector<8x128xf32>
    %385 = arith.mulf %384, %383 : vector<8x128xf32>
    %386 = math.tanh %385 : vector<8x128xf32>
    %cst_136 = arith.constant 5.000000e-01 : f32
    %387 = vector.broadcast %cst_136 : f32 to vector<8x128xf32>
    %388 = arith.mulf %387, %386 : vector<8x128xf32>
    %cst_137 = arith.constant 5.000000e-01 : f32
    %389 = vector.broadcast %cst_137 : f32 to vector<8x128xf32>
    %390 = arith.addf %388, %389 : vector<8x128xf32>
    %391 = vector.extract_strided_slice %375 {offsets = [0, 128], sizes = [8, 128], strides = [1, 1]} : vector<8x512xf32> to vector<8x128xf32>
    %cst_138 = arith.constant 5.000000e-01 : f32
    %392 = vector.broadcast %cst_138 : f32 to vector<8x128xf32>
    %393 = arith.mulf %392, %391 : vector<8x128xf32>
    %394 = math.tanh %393 : vector<8x128xf32>
    %cst_139 = arith.constant 5.000000e-01 : f32
    %395 = vector.broadcast %cst_139 : f32 to vector<8x128xf32>
    %396 = arith.mulf %395, %394 : vector<8x128xf32>
    %cst_140 = arith.constant 5.000000e-01 : f32
    %397 = vector.broadcast %cst_140 : f32 to vector<8x128xf32>
    %398 = arith.addf %396, %397 : vector<8x128xf32>
    %399 = vector.extract_strided_slice %375 {offsets = [0, 256], sizes = [8, 128], strides = [1, 1]} : vector<8x512xf32> to vector<8x128xf32>
    %400 = math.tanh %399 : vector<8x128xf32>
    %401 = vector.extract_strided_slice %375 {offsets = [0, 384], sizes = [8, 128], strides = [1, 1]} : vector<8x512xf32> to vector<8x128xf32>
    %cst_141 = arith.constant 5.000000e-01 : f32
    %402 = vector.broadcast %cst_141 : f32 to vector<8x128xf32>
    %403 = arith.mulf %402, %401 : vector<8x128xf32>
    %404 = math.tanh %403 : vector<8x128xf32>
    %cst_142 = arith.constant 5.000000e-01 : f32
    %405 = vector.broadcast %cst_142 : f32 to vector<8x128xf32>
    %406 = arith.mulf %405, %404 : vector<8x128xf32>
    %cst_143 = arith.constant 5.000000e-01 : f32
    %407 = vector.broadcast %cst_143 : f32 to vector<8x128xf32>
    %408 = arith.addf %406, %407 : vector<8x128xf32>
    %409 = arith.mulf %398, %321 : vector<8x128xf32>
    %410 = arith.mulf %390, %400 : vector<8x128xf32>
    %411 = arith.addf %409, %410 : vector<8x128xf32>
    %412 = math.tanh %411 : vector<8x128xf32>
    %413 = arith.mulf %408, %412 : vector<8x128xf32>
    %414 = vector.extract_strided_slice %382 {offsets = [0, 0], sizes = [8, 128], strides = [1, 1]} : vector<8x512xf32> to vector<8x128xf32>
    %cst_144 = arith.constant 5.000000e-01 : f32
    %415 = vector.broadcast %cst_144 : f32 to vector<8x128xf32>
    %416 = arith.mulf %415, %414 : vector<8x128xf32>
    %417 = math.tanh %416 : vector<8x128xf32>
    %cst_145 = arith.constant 5.000000e-01 : f32
    %418 = vector.broadcast %cst_145 : f32 to vector<8x128xf32>
    %419 = arith.mulf %418, %417 : vector<8x128xf32>
    %cst_146 = arith.constant 5.000000e-01 : f32
    %420 = vector.broadcast %cst_146 : f32 to vector<8x128xf32>
    %421 = arith.addf %419, %420 : vector<8x128xf32>
    %422 = vector.extract_strided_slice %382 {offsets = [0, 128], sizes = [8, 128], strides = [1, 1]} : vector<8x512xf32> to vector<8x128xf32>
    %cst_147 = arith.constant 5.000000e-01 : f32
    %423 = vector.broadcast %cst_147 : f32 to vector<8x128xf32>
    %424 = arith.mulf %423, %422 : vector<8x128xf32>
    %425 = math.tanh %424 : vector<8x128xf32>
    %cst_148 = arith.constant 5.000000e-01 : f32
    %426 = vector.broadcast %cst_148 : f32 to vector<8x128xf32>
    %427 = arith.mulf %426, %425 : vector<8x128xf32>
    %cst_149 = arith.constant 5.000000e-01 : f32
    %428 = vector.broadcast %cst_149 : f32 to vector<8x128xf32>
    %429 = arith.addf %427, %428 : vector<8x128xf32>
    %430 = vector.extract_strided_slice %382 {offsets = [0, 256], sizes = [8, 128], strides = [1, 1]} : vector<8x512xf32> to vector<8x128xf32>
    %431 = math.tanh %430 : vector<8x128xf32>
    %432 = vector.extract_strided_slice %382 {offsets = [0, 384], sizes = [8, 128], strides = [1, 1]} : vector<8x512xf32> to vector<8x128xf32>
    %cst_150 = arith.constant 5.000000e-01 : f32
    %433 = vector.broadcast %cst_150 : f32 to vector<8x128xf32>
    %434 = arith.mulf %433, %432 : vector<8x128xf32>
    %435 = math.tanh %434 : vector<8x128xf32>
    %cst_151 = arith.constant 5.000000e-01 : f32
    %436 = vector.broadcast %cst_151 : f32 to vector<8x128xf32>
    %437 = arith.mulf %436, %435 : vector<8x128xf32>
    %cst_152 = arith.constant 5.000000e-01 : f32
    %438 = vector.broadcast %cst_152 : f32 to vector<8x128xf32>
    %439 = arith.addf %437, %438 : vector<8x128xf32>
    %440 = arith.mulf %429, %352 : vector<8x128xf32>
    %441 = arith.mulf %421, %431 : vector<8x128xf32>
    %442 = arith.addf %440, %441 : vector<8x128xf32>
    %443 = math.tanh %442 : vector<8x128xf32>
    %444 = arith.mulf %439, %443 : vector<8x128xf32>
    %445 = arith.truncf %413 : vector<8x128xf32> to vector<8x128xbf16>
    %446 = arith.index_cast %c4_i32 : i32 to index
    %c0_153 = arith.constant 0 : index
    %c0_154 = arith.constant 0 : index
    %447 = vector.load %arg4[%446, %c0_153, %c0_154] : memref<8x8x128xbf16, #tpu.memory_space<vmem>>, vector<1x8x128xbf16>
    %448 = vector.shape_cast %447 : vector<1x8x128xbf16> to vector<8x128xbf16>
    %449 = vector.shape_cast %445 : vector<8x128xbf16> to vector<1x8x128xbf16>
    tpu.vector_store %arg4[%446, %c0_153, %c0_154], %449 {strides = array<i32>} : memref<8x8x128xbf16, #tpu.memory_space<vmem>>, vector<1x8x128xbf16>,
    %450 = arith.truncf %444 : vector<8x128xf32> to vector<8x128xbf16>
    %c7_i32_155 = arith.constant 7 : i32
    %451 = arith.subi %c7_i32_155, %c4_i32 : i32
    %452 = arith.index_cast %451 : i32 to index
    %c0_156 = arith.constant 0 : index
    %c0_157 = arith.constant 0 : index
    %453 = vector.load %arg5[%452, %c0_156, %c0_157] : memref<8x8x128xbf16, #tpu.memory_space<vmem>>, vector<1x8x128xbf16>
    %454 = vector.shape_cast %453 : vector<1x8x128xbf16> to vector<8x128xbf16>
    %455 = vector.shape_cast %450 : vector<8x128xbf16> to vector<1x8x128xbf16>
    tpu.vector_store %arg5[%452, %c0_156, %c0_157], %455 {strides = array<i32>} : memref<8x8x128xbf16, #tpu.memory_space<vmem>>, vector<1x8x128xbf16>,
    %456 = tpu.concatenate %413, %444 in 1 : vector<8x128xf32>, vector<8x128xf32> -> vector<8x256xf32>
    %c5_i32 = arith.constant 5 : i32
    %457 = arith.truncf %456 : vector<8x256xf32> to vector<8x256xbf16>
    %c0_158 = arith.constant 0 : index
    %c0_159 = arith.constant 0 : index
    %458 = vector.load %arg3[%c0_158, %c0_159] : memref<256x1024xbf16, #tpu.memory_space<vmem>>, vector<256x1024xbf16>
    %cst_160 = arith.constant dense<0.000000e+00> : vector<8x1024xf32>
    %459 = tpu.matmul %457, %458, %cst_160 {dimension_numbers = #tpu.dot_dimension_numbers<[1], [0], [0], [1], [0, 0, 1, 1], [], []>} : vector<8x256xbf16>, vector<256x1024xbf16>, vector<8x1024xf32> -> vector<8x1024xf32>
    %460 = arith.index_cast %c5_i32 : i32 to index
    %c0_161 = arith.constant 0 : index
    %c0_162 = arith.constant 0 : index
    %461 = vector.load %arg1[%460, %c0_161, %c0_162] : memref<8x8x512xbf16, #tpu.memory_space<vmem>>, vector<1x8x512xbf16>
    %462 = vector.shape_cast %461 : vector<1x8x512xbf16> to vector<8x512xbf16>
    %463 = arith.extf %462 : vector<8x512xbf16> to vector<8x512xf32>
    %464 = vector.extract_strided_slice %459 {offsets = [0, 0], sizes = [8, 512], strides = [1, 1]} : vector<8x1024xf32> to vector<8x512xf32>
    %465 = arith.addf %463, %464 : vector<8x512xf32>
    %c7_i32_163 = arith.constant 7 : i32
    %466 = arith.subi %c7_i32_163, %c5_i32 : i32
    %467 = arith.index_cast %466 : i32 to index
    %c0_164 = arith.constant 0 : index
    %c0_165 = arith.constant 0 : index
    %468 = vector.load %arg2[%467, %c0_164, %c0_165] : memref<8x8x512xbf16, #tpu.memory_space<vmem>>, vector<1x8x512xbf16>
    %469 = vector.shape_cast %468 : vector<1x8x512xbf16> to vector<8x512xbf16>
    %470 = arith.extf %469 : vector<8x512xbf16> to vector<8x512xf32>
    %471 = vector.extract_strided_slice %459 {offsets = [0, 512], sizes = [8, 512], strides = [1, 1]} : vector<8x1024xf32> to vector<8x512xf32>
    %472 = arith.addf %470, %471 : vector<8x512xf32>
    %473 = vector.extract_strided_slice %465 {offsets = [0, 0], sizes = [8, 128], strides = [1, 1]} : vector<8x512xf32> to vector<8x128xf32>
    %cst_166 = arith.constant 5.000000e-01 : f32
    %474 = vector.broadcast %cst_166 : f32 to vector<8x128xf32>
    %475 = arith.mulf %474, %473 : vector<8x128xf32>
    %476 = math.tanh %475 : vector<8x128xf32>
    %cst_167 = arith.constant 5.000000e-01 : f32
    %477 = vector.broadcast %cst_167 : f32 to vector<8x128xf32>
    %478 = arith.mulf %477, %476 : vector<8x128xf32>
    %cst_168 = arith.constant 5.000000e-01 : f32
    %479 = vector.broadcast %cst_168 : f32 to vector<8x128xf32>
    %480 = arith.addf %478, %479 : vector<8x128xf32>
    %481 = vector.extract_strided_slice %465 {offsets = [0, 128], sizes = [8, 128], strides = [1, 1]} : vector<8x512xf32> to vector<8x128xf32>
    %cst_169 = arith.constant 5.000000e-01 : f32
    %482 = vector.broadcast %cst_169 : f32 to vector<8x128xf32>
    %483 = arith.mulf %482, %481 : vector<8x128xf32>
    %484 = math.tanh %483 : vector<8x128xf32>
    %cst_170 = arith.constant 5.000000e-01 : f32
    %485 = vector.broadcast %cst_170 : f32 to vector<8x128xf32>
    %486 = arith.mulf %485, %484 : vector<8x128xf32>
    %cst_171 = arith.constant 5.000000e-01 : f32
    %487 = vector.broadcast %cst_171 : f32 to vector<8x128xf32>
    %488 = arith.addf %486, %487 : vector<8x128xf32>
    %489 = vector.extract_strided_slice %465 {offsets = [0, 256], sizes = [8, 128], strides = [1, 1]} : vector<8x512xf32> to vector<8x128xf32>
    %490 = math.tanh %489 : vector<8x128xf32>
    %491 = vector.extract_strided_slice %465 {offsets = [0, 384], sizes = [8, 128], strides = [1, 1]} : vector<8x512xf32> to vector<8x128xf32>
    %cst_172 = arith.constant 5.000000e-01 : f32
    %492 = vector.broadcast %cst_172 : f32 to vector<8x128xf32>
    %493 = arith.mulf %492, %491 : vector<8x128xf32>
    %494 = math.tanh %493 : vector<8x128xf32>
    %cst_173 = arith.constant 5.000000e-01 : f32
    %495 = vector.broadcast %cst_173 : f32 to vector<8x128xf32>
    %496 = arith.mulf %495, %494 : vector<8x128xf32>
    %cst_174 = arith.constant 5.000000e-01 : f32
    %497 = vector.broadcast %cst_174 : f32 to vector<8x128xf32>
    %498 = arith.addf %496, %497 : vector<8x128xf32>
    %499 = arith.mulf %488, %411 : vector<8x128xf32>
    %500 = arith.mulf %480, %490 : vector<8x128xf32>
    %501 = arith.addf %499, %500 : vector<8x128xf32>
    %502 = math.tanh %501 : vector<8x128xf32>
    %503 = arith.mulf %498, %502 : vector<8x128xf32>
    %504 = vector.extract_strided_slice %472 {offsets = [0, 0], sizes = [8, 128], strides = [1, 1]} : vector<8x512xf32> to vector<8x128xf32>
    %cst_175 = arith.constant 5.000000e-01 : f32
    %505 = vector.broadcast %cst_175 : f32 to vector<8x128xf32>
    %506 = arith.mulf %505, %504 : vector<8x128xf32>
    %507 = math.tanh %506 : vector<8x128xf32>
    %cst_176 = arith.constant 5.000000e-01 : f32
    %508 = vector.broadcast %cst_176 : f32 to vector<8x128xf32>
    %509 = arith.mulf %508, %507 : vector<8x128xf32>
    %cst_177 = arith.constant 5.000000e-01 : f32
    %510 = vector.broadcast %cst_177 : f32 to vector<8x128xf32>
    %511 = arith.addf %509, %510 : vector<8x128xf32>
    %512 = vector.extract_strided_slice %472 {offsets = [0, 128], sizes = [8, 128], strides = [1, 1]} : vector<8x512xf32> to vector<8x128xf32>
    %cst_178 = arith.constant 5.000000e-01 : f32
    %513 = vector.broadcast %cst_178 : f32 to vector<8x128xf32>
    %514 = arith.mulf %513, %512 : vector<8x128xf32>
    %515 = math.tanh %514 : vector<8x128xf32>
    %cst_179 = arith.constant 5.000000e-01 : f32
    %516 = vector.broadcast %cst_179 : f32 to vector<8x128xf32>
    %517 = arith.mulf %516, %515 : vector<8x128xf32>
    %cst_180 = arith.constant 5.000000e-01 : f32
    %518 = vector.broadcast %cst_180 : f32 to vector<8x128xf32>
    %519 = arith.addf %517, %518 : vector<8x128xf32>
    %520 = vector.extract_strided_slice %472 {offsets = [0, 256], sizes = [8, 128], strides = [1, 1]} : vector<8x512xf32> to vector<8x128xf32>
    %521 = math.tanh %520 : vector<8x128xf32>
    %522 = vector.extract_strided_slice %472 {offsets = [0, 384], sizes = [8, 128], strides = [1, 1]} : vector<8x512xf32> to vector<8x128xf32>
    %cst_181 = arith.constant 5.000000e-01 : f32
    %523 = vector.broadcast %cst_181 : f32 to vector<8x128xf32>
    %524 = arith.mulf %523, %522 : vector<8x128xf32>
    %525 = math.tanh %524 : vector<8x128xf32>
    %cst_182 = arith.constant 5.000000e-01 : f32
    %526 = vector.broadcast %cst_182 : f32 to vector<8x128xf32>
    %527 = arith.mulf %526, %525 : vector<8x128xf32>
    %cst_183 = arith.constant 5.000000e-01 : f32
    %528 = vector.broadcast %cst_183 : f32 to vector<8x128xf32>
    %529 = arith.addf %527, %528 : vector<8x128xf32>
    %530 = arith.mulf %519, %442 : vector<8x128xf32>
    %531 = arith.mulf %511, %521 : vector<8x128xf32>
    %532 = arith.addf %530, %531 : vector<8x128xf32>
    %533 = math.tanh %532 : vector<8x128xf32>
    %534 = arith.mulf %529, %533 : vector<8x128xf32>
    %535 = arith.truncf %503 : vector<8x128xf32> to vector<8x128xbf16>
    %536 = arith.index_cast %c5_i32 : i32 to index
    %c0_184 = arith.constant 0 : index
    %c0_185 = arith.constant 0 : index
    %537 = vector.load %arg4[%536, %c0_184, %c0_185] : memref<8x8x128xbf16, #tpu.memory_space<vmem>>, vector<1x8x128xbf16>
    %538 = vector.shape_cast %537 : vector<1x8x128xbf16> to vector<8x128xbf16>
    %539 = vector.shape_cast %535 : vector<8x128xbf16> to vector<1x8x128xbf16>
    tpu.vector_store %arg4[%536, %c0_184, %c0_185], %539 {strides = array<i32>} : memref<8x8x128xbf16, #tpu.memory_space<vmem>>, vector<1x8x128xbf16>,
    %540 = arith.truncf %534 : vector<8x128xf32> to vector<8x128xbf16>
    %c7_i32_186 = arith.constant 7 : i32
    %541 = arith.subi %c7_i32_186, %c5_i32 : i32
    %542 = arith.index_cast %541 : i32 to index
    %c0_187 = arith.constant 0 : index
    %c0_188 = arith.constant 0 : index
    %543 = vector.load %arg5[%542, %c0_187, %c0_188] : memref<8x8x128xbf16, #tpu.memory_space<vmem>>, vector<1x8x128xbf16>
    %544 = vector.shape_cast %543 : vector<1x8x128xbf16> to vector<8x128xbf16>
    %545 = vector.shape_cast %540 : vector<8x128xbf16> to vector<1x8x128xbf16>
    tpu.vector_store %arg5[%542, %c0_187, %c0_188], %545 {strides = array<i32>} : memref<8x8x128xbf16, #tpu.memory_space<vmem>>, vector<1x8x128xbf16>,
    %546 = tpu.concatenate %503, %534 in 1 : vector<8x128xf32>, vector<8x128xf32> -> vector<8x256xf32>
    %c6_i32 = arith.constant 6 : i32
    %547 = arith.truncf %546 : vector<8x256xf32> to vector<8x256xbf16>
    %c0_189 = arith.constant 0 : index
    %c0_190 = arith.constant 0 : index
    %548 = vector.load %arg3[%c0_189, %c0_190] : memref<256x1024xbf16, #tpu.memory_space<vmem>>, vector<256x1024xbf16>
    %cst_191 = arith.constant dense<0.000000e+00> : vector<8x1024xf32>
    %549 = tpu.matmul %547, %548, %cst_191 {dimension_numbers = #tpu.dot_dimension_numbers<[1], [0], [0], [1], [0, 0, 1, 1], [], []>} : vector<8x256xbf16>, vector<256x1024xbf16>, vector<8x1024xf32> -> vector<8x1024xf32>
    %550 = arith.index_cast %c6_i32 : i32 to index
    %c0_192 = arith.constant 0 : index
    %c0_193 = arith.constant 0 : index
    %551 = vector.load %arg1[%550, %c0_192, %c0_193] : memref<8x8x512xbf16, #tpu.memory_space<vmem>>, vector<1x8x512xbf16>
    %552 = vector.shape_cast %551 : vector<1x8x512xbf16> to vector<8x512xbf16>
    %553 = arith.extf %552 : vector<8x512xbf16> to vector<8x512xf32>
    %554 = vector.extract_strided_slice %549 {offsets = [0, 0], sizes = [8, 512], strides = [1, 1]} : vector<8x1024xf32> to vector<8x512xf32>
    %555 = arith.addf %553, %554 : vector<8x512xf32>
    %c7_i32_194 = arith.constant 7 : i32
    %556 = arith.subi %c7_i32_194, %c6_i32 : i32
    %557 = arith.index_cast %556 : i32 to index
    %c0_195 = arith.constant 0 : index
    %c0_196 = arith.constant 0 : index
    %558 = vector.load %arg2[%557, %c0_195, %c0_196] : memref<8x8x512xbf16, #tpu.memory_space<vmem>>, vector<1x8x512xbf16>
    %559 = vector.shape_cast %558 : vector<1x8x512xbf16> to vector<8x512xbf16>
    %560 = arith.extf %559 : vector<8x512xbf16> to vector<8x512xf32>
    %561 = vector.extract_strided_slice %549 {offsets = [0, 512], sizes = [8, 512], strides = [1, 1]} : vector<8x1024xf32> to vector<8x512xf32>
    %562 = arith.addf %560, %561 : vector<8x512xf32>
    %563 = vector.extract_strided_slice %555 {offsets = [0, 0], sizes = [8, 128], strides = [1, 1]} : vector<8x512xf32> to vector<8x128xf32>
    %cst_197 = arith.constant 5.000000e-01 : f32
    %564 = vector.broadcast %cst_197 : f32 to vector<8x128xf32>
    %565 = arith.mulf %564, %563 : vector<8x128xf32>
    %566 = math.tanh %565 : vector<8x128xf32>
    %cst_198 = arith.constant 5.000000e-01 : f32
    %567 = vector.broadcast %cst_198 : f32 to vector<8x128xf32>
    %568 = arith.mulf %567, %566 : vector<8x128xf32>
    %cst_199 = arith.constant 5.000000e-01 : f32
    %569 = vector.broadcast %cst_199 : f32 to vector<8x128xf32>
    %570 = arith.addf %568, %569 : vector<8x128xf32>
    %571 = vector.extract_strided_slice %555 {offsets = [0, 128], sizes = [8, 128], strides = [1, 1]} : vector<8x512xf32> to vector<8x128xf32>
    %cst_200 = arith.constant 5.000000e-01 : f32
    %572 = vector.broadcast %cst_200 : f32 to vector<8x128xf32>
    %573 = arith.mulf %572, %571 : vector<8x128xf32>
    %574 = math.tanh %573 : vector<8x128xf32>
    %cst_201 = arith.constant 5.000000e-01 : f32
    %575 = vector.broadcast %cst_201 : f32 to vector<8x128xf32>
    %576 = arith.mulf %575, %574 : vector<8x128xf32>
    %cst_202 = arith.constant 5.000000e-01 : f32
    %577 = vector.broadcast %cst_202 : f32 to vector<8x128xf32>
    %578 = arith.addf %576, %577 : vector<8x128xf32>
    %579 = vector.extract_strided_slice %555 {offsets = [0, 256], sizes = [8, 128], strides = [1, 1]} : vector<8x512xf32> to vector<8x128xf32>
    %580 = math.tanh %579 : vector<8x128xf32>
    %581 = vector.extract_strided_slice %555 {offsets = [0, 384], sizes = [8, 128], strides = [1, 1]} : vector<8x512xf32> to vector<8x128xf32>
    %cst_203 = arith.constant 5.000000e-01 : f32
    %582 = vector.broadcast %cst_203 : f32 to vector<8x128xf32>
    %583 = arith.mulf %582, %581 : vector<8x128xf32>
    %584 = math.tanh %583 : vector<8x128xf32>
    %cst_204 = arith.constant 5.000000e-01 : f32
    %585 = vector.broadcast %cst_204 : f32 to vector<8x128xf32>
    %586 = arith.mulf %585, %584 : vector<8x128xf32>
    %cst_205 = arith.constant 5.000000e-01 : f32
    %587 = vector.broadcast %cst_205 : f32 to vector<8x128xf32>
    %588 = arith.addf %586, %587 : vector<8x128xf32>
    %589 = arith.mulf %578, %501 : vector<8x128xf32>
    %590 = arith.mulf %570, %580 : vector<8x128xf32>
    %591 = arith.addf %589, %590 : vector<8x128xf32>
    %592 = math.tanh %591 : vector<8x128xf32>
    %593 = arith.mulf %588, %592 : vector<8x128xf32>
    %594 = vector.extract_strided_slice %562 {offsets = [0, 0], sizes = [8, 128], strides = [1, 1]} : vector<8x512xf32> to vector<8x128xf32>
    %cst_206 = arith.constant 5.000000e-01 : f32
    %595 = vector.broadcast %cst_206 : f32 to vector<8x128xf32>
    %596 = arith.mulf %595, %594 : vector<8x128xf32>
    %597 = math.tanh %596 : vector<8x128xf32>
    %cst_207 = arith.constant 5.000000e-01 : f32
    %598 = vector.broadcast %cst_207 : f32 to vector<8x128xf32>
    %599 = arith.mulf %598, %597 : vector<8x128xf32>
    %cst_208 = arith.constant 5.000000e-01 : f32
    %600 = vector.broadcast %cst_208 : f32 to vector<8x128xf32>
    %601 = arith.addf %599, %600 : vector<8x128xf32>
    %602 = vector.extract_strided_slice %562 {offsets = [0, 128], sizes = [8, 128], strides = [1, 1]} : vector<8x512xf32> to vector<8x128xf32>
    %cst_209 = arith.constant 5.000000e-01 : f32
    %603 = vector.broadcast %cst_209 : f32 to vector<8x128xf32>
    %604 = arith.mulf %603, %602 : vector<8x128xf32>
    %605 = math.tanh %604 : vector<8x128xf32>
    %cst_210 = arith.constant 5.000000e-01 : f32
    %606 = vector.broadcast %cst_210 : f32 to vector<8x128xf32>
    %607 = arith.mulf %606, %605 : vector<8x128xf32>
    %cst_211 = arith.constant 5.000000e-01 : f32
    %608 = vector.broadcast %cst_211 : f32 to vector<8x128xf32>
    %609 = arith.addf %607, %608 : vector<8x128xf32>
    %610 = vector.extract_strided_slice %562 {offsets = [0, 256], sizes = [8, 128], strides = [1, 1]} : vector<8x512xf32> to vector<8x128xf32>
    %611 = math.tanh %610 : vector<8x128xf32>
    %612 = vector.extract_strided_slice %562 {offsets = [0, 384], sizes = [8, 128], strides = [1, 1]} : vector<8x512xf32> to vector<8x128xf32>
    %cst_212 = arith.constant 5.000000e-01 : f32
    %613 = vector.broadcast %cst_212 : f32 to vector<8x128xf32>
    %614 = arith.mulf %613, %612 : vector<8x128xf32>
    %615 = math.tanh %614 : vector<8x128xf32>
    %cst_213 = arith.constant 5.000000e-01 : f32
    %616 = vector.broadcast %cst_213 : f32 to vector<8x128xf32>
    %617 = arith.mulf %616, %615 : vector<8x128xf32>
    %cst_214 = arith.constant 5.000000e-01 : f32
    %618 = vector.broadcast %cst_214 : f32 to vector<8x128xf32>
    %619 = arith.addf %617, %618 : vector<8x128xf32>
    %620 = arith.mulf %609, %532 : vector<8x128xf32>
    %621 = arith.mulf %601, %611 : vector<8x128xf32>
    %622 = arith.addf %620, %621 : vector<8x128xf32>
    %623 = math.tanh %622 : vector<8x128xf32>
    %624 = arith.mulf %619, %623 : vector<8x128xf32>
    %625 = arith.truncf %593 : vector<8x128xf32> to vector<8x128xbf16>
    %626 = arith.index_cast %c6_i32 : i32 to index
    %c0_215 = arith.constant 0 : index
    %c0_216 = arith.constant 0 : index
    %627 = vector.load %arg4[%626, %c0_215, %c0_216] : memref<8x8x128xbf16, #tpu.memory_space<vmem>>, vector<1x8x128xbf16>
    %628 = vector.shape_cast %627 : vector<1x8x128xbf16> to vector<8x128xbf16>
    %629 = vector.shape_cast %625 : vector<8x128xbf16> to vector<1x8x128xbf16>
    tpu.vector_store %arg4[%626, %c0_215, %c0_216], %629 {strides = array<i32>} : memref<8x8x128xbf16, #tpu.memory_space<vmem>>, vector<1x8x128xbf16>,
    %630 = arith.truncf %624 : vector<8x128xf32> to vector<8x128xbf16>
    %c7_i32_217 = arith.constant 7 : i32
    %631 = arith.subi %c7_i32_217, %c6_i32 : i32
    %632 = arith.index_cast %631 : i32 to index
    %c0_218 = arith.constant 0 : index
    %c0_219 = arith.constant 0 : index
    %633 = vector.load %arg5[%632, %c0_218, %c0_219] : memref<8x8x128xbf16, #tpu.memory_space<vmem>>, vector<1x8x128xbf16>
    %634 = vector.shape_cast %633 : vector<1x8x128xbf16> to vector<8x128xbf16>
    %635 = vector.shape_cast %630 : vector<8x128xbf16> to vector<1x8x128xbf16>
    tpu.vector_store %arg5[%632, %c0_218, %c0_219], %635 {strides = array<i32>} : memref<8x8x128xbf16, #tpu.memory_space<vmem>>, vector<1x8x128xbf16>,
    %636 = tpu.concatenate %593, %624 in 1 : vector<8x128xf32>, vector<8x128xf32> -> vector<8x256xf32>
    %c7_i32_220 = arith.constant 7 : i32
    %637 = arith.truncf %636 : vector<8x256xf32> to vector<8x256xbf16>
    %c0_221 = arith.constant 0 : index
    %c0_222 = arith.constant 0 : index
    %638 = vector.load %arg3[%c0_221, %c0_222] : memref<256x1024xbf16, #tpu.memory_space<vmem>>, vector<256x1024xbf16>
    %cst_223 = arith.constant dense<0.000000e+00> : vector<8x1024xf32>
    %639 = tpu.matmul %637, %638, %cst_223 {dimension_numbers = #tpu.dot_dimension_numbers<[1], [0], [0], [1], [0, 0, 1, 1], [], []>} : vector<8x256xbf16>, vector<256x1024xbf16>, vector<8x1024xf32> -> vector<8x1024xf32>
    %640 = arith.index_cast %c7_i32_220 : i32 to index
    %c0_224 = arith.constant 0 : index
    %c0_225 = arith.constant 0 : index
    %641 = vector.load %arg1[%640, %c0_224, %c0_225] : memref<8x8x512xbf16, #tpu.memory_space<vmem>>, vector<1x8x512xbf16>
    %642 = vector.shape_cast %641 : vector<1x8x512xbf16> to vector<8x512xbf16>
    %643 = arith.extf %642 : vector<8x512xbf16> to vector<8x512xf32>
    %644 = vector.extract_strided_slice %639 {offsets = [0, 0], sizes = [8, 512], strides = [1, 1]} : vector<8x1024xf32> to vector<8x512xf32>
    %645 = arith.addf %643, %644 : vector<8x512xf32>
    %c7_i32_226 = arith.constant 7 : i32
    %646 = arith.subi %c7_i32_226, %c7_i32_220 : i32
    %647 = arith.index_cast %646 : i32 to index
    %c0_227 = arith.constant 0 : index
    %c0_228 = arith.constant 0 : index
    %648 = vector.load %arg2[%647, %c0_227, %c0_228] : memref<8x8x512xbf16, #tpu.memory_space<vmem>>, vector<1x8x512xbf16>
    %649 = vector.shape_cast %648 : vector<1x8x512xbf16> to vector<8x512xbf16>
    %650 = arith.extf %649 : vector<8x512xbf16> to vector<8x512xf32>
    %651 = vector.extract_strided_slice %639 {offsets = [0, 512], sizes = [8, 512], strides = [1, 1]} : vector<8x1024xf32> to vector<8x512xf32>
    %652 = arith.addf %650, %651 : vector<8x512xf32>
    %653 = vector.extract_strided_slice %645 {offsets = [0, 0], sizes = [8, 128], strides = [1, 1]} : vector<8x512xf32> to vector<8x128xf32>
    %cst_229 = arith.constant 5.000000e-01 : f32
    %654 = vector.broadcast %cst_229 : f32 to vector<8x128xf32>
    %655 = arith.mulf %654, %653 : vector<8x128xf32>
    %656 = math.tanh %655 : vector<8x128xf32>
    %cst_230 = arith.constant 5.000000e-01 : f32
    %657 = vector.broadcast %cst_230 : f32 to vector<8x128xf32>
    %658 = arith.mulf %657, %656 : vector<8x128xf32>
    %cst_231 = arith.constant 5.000000e-01 : f32
    %659 = vector.broadcast %cst_231 : f32 to vector<8x128xf32>
    %660 = arith.addf %658, %659 : vector<8x128xf32>
    %661 = vector.extract_strided_slice %645 {offsets = [0, 128], sizes = [8, 128], strides = [1, 1]} : vector<8x512xf32> to vector<8x128xf32>
    %cst_232 = arith.constant 5.000000e-01 : f32
    %662 = vector.broadcast %cst_232 : f32 to vector<8x128xf32>
    %663 = arith.mulf %662, %661 : vector<8x128xf32>
    %664 = math.tanh %663 : vector<8x128xf32>
    %cst_233 = arith.constant 5.000000e-01 : f32
    %665 = vector.broadcast %cst_233 : f32 to vector<8x128xf32>
    %666 = arith.mulf %665, %664 : vector<8x128xf32>
    %cst_234 = arith.constant 5.000000e-01 : f32
    %667 = vector.broadcast %cst_234 : f32 to vector<8x128xf32>
    %668 = arith.addf %666, %667 : vector<8x128xf32>
    %669 = vector.extract_strided_slice %645 {offsets = [0, 256], sizes = [8, 128], strides = [1, 1]} : vector<8x512xf32> to vector<8x128xf32>
    %670 = math.tanh %669 : vector<8x128xf32>
    %671 = vector.extract_strided_slice %645 {offsets = [0, 384], sizes = [8, 128], strides = [1, 1]} : vector<8x512xf32> to vector<8x128xf32>
    %cst_235 = arith.constant 5.000000e-01 : f32
    %672 = vector.broadcast %cst_235 : f32 to vector<8x128xf32>
    %673 = arith.mulf %672, %671 : vector<8x128xf32>
    %674 = math.tanh %673 : vector<8x128xf32>
    %cst_236 = arith.constant 5.000000e-01 : f32
    %675 = vector.broadcast %cst_236 : f32 to vector<8x128xf32>
    %676 = arith.mulf %675, %674 : vector<8x128xf32>
    %cst_237 = arith.constant 5.000000e-01 : f32
    %677 = vector.broadcast %cst_237 : f32 to vector<8x128xf32>
    %678 = arith.addf %676, %677 : vector<8x128xf32>
    %679 = arith.mulf %668, %591 : vector<8x128xf32>
    %680 = arith.mulf %660, %670 : vector<8x128xf32>
    %681 = arith.addf %679, %680 : vector<8x128xf32>
    %682 = math.tanh %681 : vector<8x128xf32>
    %683 = arith.mulf %678, %682 : vector<8x128xf32>
    %684 = vector.extract_strided_slice %652 {offsets = [0, 0], sizes = [8, 128], strides = [1, 1]} : vector<8x512xf32> to vector<8x128xf32>
    %cst_238 = arith.constant 5.000000e-01 : f32
    %685 = vector.broadcast %cst_238 : f32 to vector<8x128xf32>
    %686 = arith.mulf %685, %684 : vector<8x128xf32>
    %687 = math.tanh %686 : vector<8x128xf32>
    %cst_239 = arith.constant 5.000000e-01 : f32
    %688 = vector.broadcast %cst_239 : f32 to vector<8x128xf32>
    %689 = arith.mulf %688, %687 : vector<8x128xf32>
    %cst_240 = arith.constant 5.000000e-01 : f32
    %690 = vector.broadcast %cst_240 : f32 to vector<8x128xf32>
    %691 = arith.addf %689, %690 : vector<8x128xf32>
    %692 = vector.extract_strided_slice %652 {offsets = [0, 128], sizes = [8, 128], strides = [1, 1]} : vector<8x512xf32> to vector<8x128xf32>
    %cst_241 = arith.constant 5.000000e-01 : f32
    %693 = vector.broadcast %cst_241 : f32 to vector<8x128xf32>
    %694 = arith.mulf %693, %692 : vector<8x128xf32>
    %695 = math.tanh %694 : vector<8x128xf32>
    %cst_242 = arith.constant 5.000000e-01 : f32
    %696 = vector.broadcast %cst_242 : f32 to vector<8x128xf32>
    %697 = arith.mulf %696, %695 : vector<8x128xf32>
    %cst_243 = arith.constant 5.000000e-01 : f32
    %698 = vector.broadcast %cst_243 : f32 to vector<8x128xf32>
    %699 = arith.addf %697, %698 : vector<8x128xf32>
    %700 = vector.extract_strided_slice %652 {offsets = [0, 256], sizes = [8, 128], strides = [1, 1]} : vector<8x512xf32> to vector<8x128xf32>
    %701 = math.tanh %700 : vector<8x128xf32>
    %702 = vector.extract_strided_slice %652 {offsets = [0, 384], sizes = [8, 128], strides = [1, 1]} : vector<8x512xf32> to vector<8x128xf32>
    %cst_244 = arith.constant 5.000000e-01 : f32
    %703 = vector.broadcast %cst_244 : f32 to vector<8x128xf32>
    %704 = arith.mulf %703, %702 : vector<8x128xf32>
    %705 = math.tanh %704 : vector<8x128xf32>
    %cst_245 = arith.constant 5.000000e-01 : f32
    %706 = vector.broadcast %cst_245 : f32 to vector<8x128xf32>
    %707 = arith.mulf %706, %705 : vector<8x128xf32>
    %cst_246 = arith.constant 5.000000e-01 : f32
    %708 = vector.broadcast %cst_246 : f32 to vector<8x128xf32>
    %709 = arith.addf %707, %708 : vector<8x128xf32>
    %710 = arith.mulf %699, %622 : vector<8x128xf32>
    %711 = arith.mulf %691, %701 : vector<8x128xf32>
    %712 = arith.addf %710, %711 : vector<8x128xf32>
    %713 = math.tanh %712 : vector<8x128xf32>
    %714 = arith.mulf %709, %713 : vector<8x128xf32>
    %715 = arith.truncf %683 : vector<8x128xf32> to vector<8x128xbf16>
    %716 = arith.index_cast %c7_i32_220 : i32 to index
    %c0_247 = arith.constant 0 : index
    %c0_248 = arith.constant 0 : index
    %717 = vector.load %arg4[%716, %c0_247, %c0_248] : memref<8x8x128xbf16, #tpu.memory_space<vmem>>, vector<1x8x128xbf16>
    %718 = vector.shape_cast %717 : vector<1x8x128xbf16> to vector<8x128xbf16>
    %719 = vector.shape_cast %715 : vector<8x128xbf16> to vector<1x8x128xbf16>
    tpu.vector_store %arg4[%716, %c0_247, %c0_248], %719 {strides = array<i32>} : memref<8x8x128xbf16, #tpu.memory_space<vmem>>, vector<1x8x128xbf16>,
    %720 = arith.truncf %714 : vector<8x128xf32> to vector<8x128xbf16>
    %c7_i32_249 = arith.constant 7 : i32
    %721 = arith.subi %c7_i32_249, %c7_i32_220 : i32
    %722 = arith.index_cast %721 : i32 to index
    %c0_250 = arith.constant 0 : index
    %c0_251 = arith.constant 0 : index
    %723 = vector.load %arg5[%722, %c0_250, %c0_251] : memref<8x8x128xbf16, #tpu.memory_space<vmem>>, vector<1x8x128xbf16>
    %724 = vector.shape_cast %723 : vector<1x8x128xbf16> to vector<8x128xbf16>
    %725 = vector.shape_cast %720 : vector<8x128xbf16> to vector<1x8x128xbf16>
    tpu.vector_store %arg5[%722, %c0_250, %c0_251], %725 {strides = array<i32>} : memref<8x8x128xbf16, #tpu.memory_space<vmem>>, vector<1x8x128xbf16>,
    %726 = tpu.concatenate %683, %714 in 1 : vector<8x128xf32>, vector<8x128xf32> -> vector<8x256xf32>
    %c8_i32 = arith.constant 8 : i32
    %c0_252 = arith.constant 0 : index
    %c0_253 = arith.constant 0 : index
    %727 = vector.load %arg6[%c0_252, %c0_253] : memref<8x256xf32, #tpu.memory_space<vmem>>, vector<8x256xf32>
    tpu.vector_store %arg6[%c0_252, %c0_253], %726 {strides = array<i32>} : memref<8x256xf32, #tpu.memory_space<vmem>>, vector<8x256xf32>,
    %c0_254 = arith.constant 0 : index
    %c0_255 = arith.constant 0 : index
    %728 = vector.load %arg7[%c0_254, %c0_255] : memref<8x256xf32, #tpu.memory_space<vmem>>, vector<8x128xf32>
    tpu.vector_store %arg7[%c0_254, %c0_255], %681 {strides = array<i32>} : memref<8x256xf32, #tpu.memory_space<vmem>>, vector<8x128xf32>,
    %c0_256 = arith.constant 0 : index
    %c128 = arith.constant 128 : index
    %729 = vector.load %arg7[%c0_256, %c128] : memref<8x256xf32, #tpu.memory_space<vmem>>, vector<8x128xf32>
    tpu.vector_store %arg7[%c0_256, %c128], %712 {strides = array<i32>} : memref<8x256xf32, #tpu.memory_space<vmem>>, vector<8x128xf32>,
    return
  }
  func.func @transform_0(%arg0: i32) -> (i32, i32, i32) {
    %c0_i32 = arith.constant 0 : i32
    %c0_i32_0 = arith.constant 0 : i32
    %c0_i32_1 = arith.constant 0 : i32
    return %arg0, %c0_i32, %c0_i32_0 : i32, i32, i32
  }
  func.func @transform_1(%arg0: i32) -> (i32, i32, i32) {
    %c0_i32 = arith.constant 0 : i32
    %0 = arith.subi %c0_i32, %arg0 : i32
    %c0_i32_0 = arith.constant 0 : i32
    %c0_i32_1 = arith.constant 0 : i32
    %c0_i32_2 = arith.constant 0 : i32
    return %0, %c0_i32_0, %c0_i32_1 : i32, i32, i32
  }
  func.func @transform_2(%arg0: i32) -> (i32, i32) {
    %c0_i32 = arith.constant 0 : i32
    %c0_i32_0 = arith.constant 0 : i32
    %c0_i32_1 = arith.constant 0 : i32
    return %c0_i32, %c0_i32_0 : i32, i32
  }
  func.func @transform_3(%arg0: i32) -> (i32, i32, i32) {
    %c0_i32 = arith.constant 0 : i32
    %c0_i32_0 = arith.constant 0 : i32
    %c0_i32_1 = arith.constant 0 : i32
    return %arg0, %c0_i32, %c0_i32_0 : i32, i32, i32
  }
  func.func @transform_4(%arg0: i32) -> (i32, i32, i32) {
    %c0_i32 = arith.constant 0 : i32
    %0 = arith.subi %c0_i32, %arg0 : i32
    %c0_i32_0 = arith.constant 0 : i32
    %c0_i32_1 = arith.constant 0 : i32
    %c0_i32_2 = arith.constant 0 : i32
    return %0, %c0_i32_0, %c0_i32_1 : i32, i32, i32
  }
}

</mosaic_0001>

<bundles_post_ra>
// kernel: bidirectional_lstm.1
= control target key start
LH: loop header
LB: loop body
LE: loop exit
PB: predicated region body
PF: predicated region fallthrough
CT: control target
= control target key end

     0   :  { %v13172_v3 = vmov 0.0|0.0   ;;  %s13167_s2 = inlined_call_operand.vmem [shape: bf16[256,1024], index: 2, kind: input, shape index: {}]   ;;  %s13168_s0 = inlined_call_operand.vmem [shape: bf16[8,8,512], index: 0, kind: input, shape index: {}]   ;;  %s13169_s3 = inlined_call_operand.vmem [shape: bf16[8,8,128], index: 3, kind: output, shape index: {0}]   ;;  %s13170_s1 = inlined_call_operand.vmem [shape: bf16[8,8,512], index: 1, kind: input, shape index: {}]   ;;  %s13171_s4 = inlined_call_operand.vmem [shape: bf16[8,8,128], index: 4, kind: output, shape index: {1}]  }
   0x1   :  { %v125_v0 = vld [vmem:[%s13167_s2 + $0x1c0] sm:$0xff]  ;;  %v126_v2 = vld [vmem:[%s13167_s2 + $0x1c8] sm:$0xff]  ;;  %869 = vmatprep.mubr.bf16.mxu0 %v13172_v3  ;;  %910 = vmatprep.mubr.bf16.mxu1 %v13172_v3 }
   0x2   :  { %v129_v1 = vld [vmem:[%s13167_s2 + $0x1e0] sm:$0xff]  ;;  %v130_v6 = vld [vmem:[%s13167_s2 + $0x1e8] sm:$0xff] }
   0x3   :  { %v9337_v4 = vcombine.high %v125_v0, %v129_v1  ;;  %v9339_v5 = vcombine.low %v125_v0, %v129_v1  ;;  %v117_v7 = vld [vmem:[%s13167_s2 + $0x180] sm:$0xff]  ;;  %v9350_v9 = vcombine.high %v126_v2, %v130_v6  ;;  %v9352_v10 = vcombine.low %v126_v2, %v130_v6  ;;  %v118_v12 = vld [vmem:[%s13167_s2 + $0x188] sm:$0xff] }
   0x4   :  { %v121_v8 = vld [vmem:[%s13167_s2 + $0x1a0] sm:$0xff]  ;;  %v122_v13 = vld [vmem:[%s13167_s2 + $0x1a8] sm:$0xff] }
   0x5   :  { %v9354_v11 = vcombine.high %v117_v7, %v121_v8  ;;  %v109_v14 = vld [vmem:[%s13167_s2 + $0x140] sm:$0xff]  ;;  %837 = vmatprep.subr.bf16.mxu0 %v9337_v4  ;;  %v9366_v15 = vcombine.high %v118_v12, %v122_v13  ;;  %v110_v17 = vld [vmem:[%s13167_s2 + $0x148] sm:$0xff]  ;;  %878 = vmatprep.subr.bf16.mxu1 %v9350_v9  ;;  %v9379_v19 = vcombine.low %v117_v7, %v121_v8 }
   0x6   :  { %v113_v16 = vld [vmem:[%s13167_s2 + $0x160] sm:$0xff]  ;;  %v114_v18 = vld [vmem:[%s13167_s2 + $0x168] sm:$0xff]  ;;  %838 = vmatpush1.bf16.msra.mxu0 %v9339_v5  ;;  %879 = vmatpush1.bf16.msra.mxu1 %v9352_v10  ;;  %v9383_v20 = vcombine.low %v118_v12, %v122_v13 }
   0x7   :  { %839 = vmatprep.subr.bf16.mxu0 %v9354_v11  ;;  %v9385_v21 = vcombine.high %v109_v14, %v113_v16  ;;  %880 = vmatprep.subr.bf16.mxu1 %v9366_v15  ;;  %v9388_v22 = vcombine.high %v110_v17, %v114_v18  ;;  %v101_v23 = vld [vmem:[%s13167_s2 + $0x100] sm:$0xff]  ;;  %v102_v25 = vld [vmem:[%s13167_s2 + $0x108] sm:$0xff]  ;;  %v9403_v27 = vcombine.low %v109_v14, %v113_v16 }
   0x8   :  { %v105_v24 = vld [vmem:[%s13167_s2 + $0x120] sm:$0xff]  ;;  %v106_v26 = vld [vmem:[%s13167_s2 + $0x128] sm:$0xff]  ;;  %v9407_v28 = vcombine.low %v110_v17, %v114_v18 }
   0x9   :  { %v9409_v29 = vcombine.high %v101_v23, %v105_v24  ;;  %v9412_v30 = vcombine.high %v102_v25, %v106_v26  ;;  %v93_v31 = vld [vmem:[%s13167_s2 + $0xc0] sm:$0xff]  ;;  %v94_v33 = vld [vmem:[%s13167_s2 + $0xc8] sm:$0xff]  ;;  %v9427_v35 = vcombine.low %v101_v23, %v105_v24  ;;  %v9431_v36 = vcombine.low %v102_v25, %v106_v26 }
   0xa   :  { %840 = vmatpush1.bf16.msra.mxu0 %v9379_v19  ;;  %881 = vmatpush1.bf16.msra.mxu1 %v9383_v20  ;;  %v97_v32 = vld [vmem:[%s13167_s2 + $0xe0] sm:$0xff]  ;;  %v98_v34 = vld [vmem:[%s13167_s2 + $0xe8] sm:$0xff] }
   0xb   :  { %841 = vmatprep.subr.bf16.mxu0 %v9385_v21  ;;  %882 = vmatprep.subr.bf16.mxu1 %v9388_v22  ;;  %v9433_v37 = vcombine.high %v93_v31, %v97_v32  ;;  %v9436_v38 = vcombine.high %v94_v33, %v98_v34  ;;  %v85_v39 = vld [vmem:[%s13167_s2 + $0x80] sm:$0xff]  ;;  %v86_v41 = vld [vmem:[%s13167_s2 + $0x88] sm:$0xff]  ;;  %v9451_v43 = vcombine.low %v93_v31, %v97_v32 }
   0xc   :  { %v89_v40 = vld [vmem:[%s13167_s2 + $0xa0] sm:$0xff]  ;;  %v90_v42 = vld [vmem:[%s13167_s2 + $0xa8] sm:$0xff]  ;;  %v9455_v44 = vcombine.low %v94_v33, %v98_v34 }
   0xd   :  { %v9457_v45 = vcombine.high %v85_v39, %v89_v40  ;;  %v9460_v46 = vcombine.high %v86_v41, %v90_v42  ;;  %v77_v47 = vld [vmem:[%s13167_s2 + $0x40] sm:$0xff]  ;;  %v78_v49 = vld [vmem:[%s13167_s2 + $0x48] sm:$0xff]  ;;  %v9475_v51 = vcombine.low %v85_v39, %v89_v40  ;;  %v9479_v52 = vcombine.low %v86_v41, %v90_v42 }
   0xe   :  { %842 = vmatpush1.bf16.msra.mxu0 %v9403_v27  ;;  %883 = vmatpush1.bf16.msra.mxu1 %v9407_v28  ;;  %v81_v48 = vld [vmem:[%s13167_s2 + $0x60] sm:$0xff]  ;;  %v82_v50 = vld [vmem:[%s13167_s2 + $0x68] sm:$0xff] }
   0xf   :  { %843 = vmatprep.subr.bf16.mxu0 %v9409_v29  ;;  %884 = vmatprep.subr.bf16.mxu1 %v9412_v30  ;;  %v9481_v53 = vcombine.high %v77_v47, %v81_v48  ;;  %v9484_v54 = vcombine.high %v78_v49, %v82_v50  ;;  %v69_v55 = vld [vmem:[%s13167_s2] sm:$0xff]  ;;  %v70_v57 = vld [vmem:[%s13167_s2 + $0x8] sm:$0xff]  ;;  %v9499_v59 = vcombine.low %v77_v47, %v81_v48 }
  0x10   :  { %v73_v56 = vld [vmem:[%s13167_s2 + $0x20] sm:$0xff]  ;;  %v74_v58 = vld [vmem:[%s13167_s2 + $0x28] sm:$0xff]  ;;  %v9503_v60 = vcombine.low %v78_v49, %v82_v50 }
  0x11   :  { %v9505_v61 = vcombine.high %v69_v55, %v73_v56  ;;  %v9508_v62 = vcombine.high %v70_v57, %v74_v58  ;;  %v189_v63 = vld [vmem:[%s13167_s2 + $0x3c0] sm:$0xff]  ;;  %v190_v1 = vld [vmem:[%s13167_s2 + $0x3c8] sm:$0xff]  ;;  %v9523_v6 = vcombine.low %v69_v55, %v73_v56  ;;  %v9527_v7 = vcombine.low %v70_v57, %v74_v58 }
  0x12   :  { %844 = vmatpush1.bf16.msra.mxu0 %v9427_v35  ;;  %885 = vmatpush1.bf16.msra.mxu1 %v9431_v36  ;;  %v193_v0 = vld [vmem:[%s13167_s2 + $0x3e0] sm:$0xff]  ;;  %v194_v2 = vld [vmem:[%s13167_s2 + $0x3e8] sm:$0xff] }
  0x13   :  { %845 = vmatprep.subr.bf16.mxu0 %v9433_v37  ;;  %886 = vmatprep.subr.bf16.mxu1 %v9436_v38  ;;  %v9529_v8 = vcombine.high %v189_v63, %v193_v0  ;;  %v9532_v12 = vcombine.high %v190_v1, %v194_v2  ;;  %v181_v13 = vld [vmem:[%s13167_s2 + $0x380] sm:$0xff]  ;;  %v182_v16 = vld [vmem:[%s13167_s2 + $0x388] sm:$0xff]  ;;  %v9547_v18 = vcombine.low %v189_v63, %v193_v0 }
  0x14   :  { %v185_v14 = vld [vmem:[%s13167_s2 + $0x3a0] sm:$0xff]  ;;  %v186_v17 = vld [vmem:[%s13167_s2 + $0x3a8] sm:$0xff]  ;;  %v9551_v23 = vcombine.low %v190_v1, %v194_v2 }
  0x15   :  { %v9553_v24 = vcombine.high %v181_v13, %v185_v14  ;;  %v9556_v25 = vcombine.high %v182_v16, %v186_v17  ;;  %v173_v26 = vld [vmem:[%s13167_s2 + $0x340] sm:$0xff]  ;;  %v174_v32 = vld [vmem:[%s13167_s2 + $0x348] sm:$0xff]  ;;  %v9571_v34 = vcombine.low %v181_v13, %v185_v14  ;;  %v9575_v39 = vcombine.low %v182_v16, %v186_v17 }
  0x16   :  { %846 = vmatpush1.bf16.msra.mxu0 %v9451_v43  ;;  %887 = vmatpush1.bf16.msra.mxu1 %v9455_v44  ;;  %v177_v31 = vld [vmem:[%s13167_s2 + $0x360] sm:$0xff]  ;;  %v178_v33 = vld [vmem:[%s13167_s2 + $0x368] sm:$0xff] }
  0x17   :  { %847 = vmatprep.subr.bf16.mxu0 %v9457_v45  ;;  %888 = vmatprep.subr.bf16.mxu1 %v9460_v46  ;;  %v9577_v40 = vcombine.high %v173_v26, %v177_v31  ;;  %v9580_v41 = vcombine.high %v174_v32, %v178_v33  ;;  %v165_v42 = vld [vmem:[%s13167_s2 + $0x300] sm:$0xff]  ;;  %v166_v48 = vld [vmem:[%s13167_s2 + $0x308] sm:$0xff]  ;;  %v9595_v50 = vcombine.low %v173_v26, %v177_v31 }
  0x18   :  { %v169_v47 = vld [vmem:[%s13167_s2 + $0x320] sm:$0xff]  ;;  %v170_v49 = vld [vmem:[%s13167_s2 + $0x328] sm:$0xff]  ;;  %v9599_v55 = vcombine.low %v174_v32, %v178_v33 }
  0x19   :  { %v9601_v56 = vcombine.high %v165_v42, %v169_v47  ;;  %v9604_v57 = vcombine.high %v166_v48, %v170_v49  ;;  %v157_v58 = vld [vmem:[%s13167_s2 + $0x2c0] sm:$0xff]  ;;  %v158_v0 = vld [vmem:[%s13167_s2 + $0x2c8] sm:$0xff]  ;;  %v9619_v2 = vcombine.low %v165_v42, %v169_v47  ;;  %v9623_v13 = vcombine.low %v166_v48, %v170_v49 }
  0x1a   :  { %848 = vmatpush1.bf16.msra.mxu0 %v9475_v51  ;;  %889 = vmatpush1.bf16.msra.mxu1 %v9479_v52  ;;  %v161_v63 = vld [vmem:[%s13167_s2 + $0x2e0] sm:$0xff]  ;;  %v162_v1 = vld [vmem:[%s13167_s2 + $0x2e8] sm:$0xff] }
  0x1b   :  { %849 = vmatprep.subr.bf16.mxu0 %v9481_v53  ;;  %890 = vmatprep.subr.bf16.mxu1 %v9484_v54  ;;  %13471 = vst [vmem:[#allocation4_spill] sm:$0xff] %v9619_v2  ;;  %13472 = vst [vmem:[#allocation5_spill] sm:$0xff] %v9623_v13  ;;  %v9625_v14 = vcombine.high %v157_v58, %v161_v63  ;;  %v9628_v16 = vcombine.high %v158_v0, %v162_v1  ;;  %v149_v17 = vld [vmem:[%s13167_s2 + $0x280] sm:$0xff]  ;;  %v150_v31 = vld [vmem:[%s13167_s2 + $0x288] sm:$0xff] }
  0x1c   :  { %v153_v26 = vld [vmem:[%s13167_s2 + $0x2a0] sm:$0xff]  ;;  %v154_v32 = vld [vmem:[%s13167_s2 + $0x2a8] sm:$0xff]  ;;  %v9643_v33 = vcombine.low %v157_v58, %v161_v63  ;;  %v9647_v42 = vcombine.low %v158_v0, %v162_v1 }
  0x1d   :  { %13473 = vst [vmem:[#allocation6_spill] sm:$0xff] %v9625_v14  ;;  %13474 = vst [vmem:[#allocation7_spill] sm:$0xff] %v9628_v16  ;;  %v9649_v47 = vcombine.high %v149_v17, %v153_v26  ;;  %v9652_v48 = vcombine.high %v150_v31, %v154_v32  ;;  %v141_v49 = vld [vmem:[%s13167_s2 + $0x240] sm:$0xff]  ;;  %v142_v63 = vld [vmem:[%s13167_s2 + $0x248] sm:$0xff]  ;;  %v9667_v1 = vcombine.low %v149_v17, %v153_v26 }
  0x1e   :  { %850 = vmatpush1.bf16.msra.mxu0 %v9499_v59  ;;  %891 = vmatpush1.bf16.msra.mxu1 %v9503_v60  ;;  %13475 = vst [vmem:[#allocation8_spill] sm:$0xff] %v9643_v33  ;;  %13476 = vst [vmem:[#allocation9_spill] sm:$0xff] %v9647_v42  ;;  %v145_v58 = vld [vmem:[%s13167_s2 + $0x260] sm:$0xff]  ;;  %v146_v0 = vld [vmem:[%s13167_s2 + $0x268] sm:$0xff]  ;;  %v9671_v3 = vcombine.low %v150_v31, %v154_v32 }
  0x1f   :  { %851 = vmatprep.subr.bf16.mxu0 %v9505_v61  ;;  %892 = vmatprep.subr.bf16.mxu1 %v9508_v62  ;;  %13477 = vst [vmem:[#allocation10_spill] sm:$0xff] %v9649_v47  ;;  %13478 = vst [vmem:[#allocation11_spill] sm:$0xff] %v9652_v48  ;;  %v137_v17 = vld [vmem:[%s13167_s2 + $0x220] sm:$0xff]  ;;  %v134_v26 = vld [vmem:[%s13167_s2 + $0x208] sm:$0xff]  ;;  %v9691_v32 = vcombine.low %v141_v49, %v145_v58 }
  0x20   :  { %13479 = vst [vmem:[#allocation12_spill] sm:$0xff] %v9667_v1  ;;  %13480 = vst [vmem:[#allocation13_spill] sm:$0xff] %v9671_v3  ;;  %v138_v31 = vld [vmem:[%s13167_s2 + $0x228] sm:$0xff] }
  0x21   :  { %13483 = vst [vmem:[#allocation16_spill] sm:$0xff] %v9691_v32 }
  0x22   :  { %852 = vmatpush1.bf16.msra.mxu0 %v9523_v6  ;;  %893 = vmatpush1.bf16.msra.mxu1 %v9527_v7 }
  0x23   :  { %853 = vmatprep.subr.bf16.mxu0 %v9529_v8  ;;  %894 = vmatprep.subr.bf16.mxu1 %v9532_v12 }
  0x26   :  { %854 = vmatpush2.bf16.msra.mxu0 %v9547_v18  ;;  %895 = vmatpush2.bf16.msra.mxu1 %v9551_v23 }
  0x27   :  { %855 = vmatprep.subr.bf16.mxu0 %v9553_v24  ;;  %896 = vmatprep.subr.bf16.mxu1 %v9556_v25 }
  0x2a   :  { %856 = vmatpush2.bf16.msra.mxu0 %v9571_v34  ;;  %897 = vmatpush2.bf16.msra.mxu1 %v9575_v39 }
  0x2b   :  { %857 = vmatprep.subr.bf16.mxu0 %v9577_v40  ;;  %898 = vmatprep.subr.bf16.mxu1 %v9580_v41 }
  0x2e   :  { %858 = vmatpush2.bf16.msra.mxu0 %v9595_v50  ;;  %899 = vmatpush2.bf16.msra.mxu1 %v9599_v55 }
  0x2f   :  { %859 = vmatprep.subr.bf16.mxu0 %v9601_v56  ;;  %900 = vmatprep.subr.bf16.mxu1 %v9604_v57 }
  0x32   :  { %860 = vmatpush2.bf16.msra.mxu0 %v9619_v2  ;;  %901 = vmatpush2.bf16.msra.mxu1 %v9623_v13  ;;  %v133_v13 = vld [vmem:[%s13167_s2 + $0x200] sm:$0xff]  ;;  %v95_v2 = vld [vmem:[%s13167_s2 + $0xd0] sm:$0xff] }
  0x33   :  { %861 = vmatprep.subr.bf16.mxu0 %v9625_v14  ;;  %902 = vmatprep.subr.bf16.mxu1 %v9628_v16  ;;  %v9673_v16 = vcombine.high %v141_v49, %v145_v58  ;;  %v9676_v14 = vcombine.high %v142_v63, %v146_v0  ;;  %v131_v49 = vld [vmem:[%s13167_s2 + $0x1f0] sm:$0xff]  ;;  %v128_v58 = vld [vmem:[%s13167_s2 + $0x1d8] sm:$0xff] }
  0x35   :  { %13481 = vst [vmem:[#allocation14_spill] sm:$0xff] %v9673_v16  ;;  %13482 = vst [vmem:[#allocation15_spill] sm:$0xff] %v9676_v14 }
  0x36   :  { %862 = vmatpush2.bf16.msra.mxu0 %v9643_v33  ;;  %903 = vmatpush2.bf16.msra.mxu1 %v9647_v42  ;;  %v9700_v42 = vcombine.high %v134_v26, %v138_v31  ;;  %v127_v33 = vld [vmem:[%s13167_s2 + $0x1d0] sm:$0xff] }
  0x37   :  { %863 = vmatprep.subr.bf16.mxu0 %v9649_v47  ;;  %904 = vmatprep.subr.bf16.mxu1 %v9652_v48  ;;  %v9695_v48 = vcombine.low %v142_v63, %v146_v0  ;;  %v9697_v47 = vcombine.high %v133_v13, %v137_v17  ;;  %v132_v63 = vld [vmem:[%s13167_s2 + $0x1f8] sm:$0xff]  ;;  %v9715_v0 = vcombine.low %v133_v13, %v137_v17  ;;  %v123_v13 = vld [vmem:[%s13167_s2 + $0x1b0] sm:$0xff] }
  0x38   :  { %13486 = vst [vmem:[#allocation19_spill] sm:$0xff] %v9700_v42  ;;  %v120_v17 = vld [vmem:[%s13167_s2 + $0x198] sm:$0xff] }
  0x39   :  { %13484 = vst [vmem:[#allocation17_spill] sm:$0xff] %v9695_v48  ;;  %13485 = vst [vmem:[#allocation18_spill] sm:$0xff] %v9697_v47 }
  0x3a   :  { %864 = vmatpush2.bf16.msra.mxu0 %v9667_v1  ;;  %905 = vmatpush2.bf16.msra.mxu1 %v9671_v3  ;;  %13487 = vst [vmem:[#allocation20_spill] sm:$0xff] %v9715_v0  ;;  %v9724_v3 = vcombine.high %v128_v58, %v132_v63  ;;  %v119_v1 = vld [vmem:[%s13167_s2 + $0x190] sm:$0xff] }
  0x3b   :  { %865 = vmatprep.subr.bf16.mxu0 %v9673_v16  ;;  %906 = vmatprep.subr.bf16.mxu1 %v9676_v14  ;;  %v9719_v14 = vcombine.low %v134_v26, %v138_v31  ;;  %v9721_v16 = vcombine.high %v127_v33, %v131_v49  ;;  %v124_v26 = vld [vmem:[%s13167_s2 + $0x1b8] sm:$0xff]  ;;  %v9739_v31 = vcombine.low %v127_v33, %v131_v49  ;;  %v115_v33 = vld [vmem:[%s13167_s2 + $0x170] sm:$0xff]  ;;  %v13495_v49 = vmov 0.0|0.0  }
  0x3c   :  { %13490 = vst [vmem:[#allocation23_spill] sm:$0xff] %v9724_v3 }
  0x3d   :  { %13488 = vst [vmem:[#allocation21_spill] sm:$0xff] %v9719_v14  ;;  %13489 = vst [vmem:[#allocation22_spill] sm:$0xff] %v9721_v16 }
  0x3e   :  { %866 = vmatpush2.bf16.msra.mxu0 %v9691_v32  ;;  %907 = vmatpush2.bf16.msra.mxu1 %v9695_v48  ;;  %13491 = vst [vmem:[#allocation24_spill] sm:$0xff] %v9739_v31  ;;  %v9748_v48 = vcombine.high %v120_v17, %v124_v26  ;;  %v111_v32 = vld [vmem:[%s13167_s2 + $0x150] sm:$0xff] }
  0x3f   :  { %867 = vmatprep.subr.bf16.mxu0 %v9697_v47  ;;  %908 = vmatprep.subr.bf16.mxu1 %v9700_v42  ;;  %v9743_v42 = vcombine.low %v128_v58, %v132_v63  ;;  %v9745_v47 = vcombine.high %v119_v1, %v123_v13  ;;  %v112_v58 = vld [vmem:[%s13167_s2 + $0x158] sm:$0xff] }
  0x40   :  { %13494 = vst [vmem:[#allocation27_spill] sm:$0xff] %v9748_v48  ;;  %v116_v63 = vld [vmem:[%s13167_s2 + $0x178] sm:$0xff] }
  0x41   :  { %13492 = vst [vmem:[#allocation25_spill] sm:$0xff] %v9743_v42  ;;  %13493 = vst [vmem:[#allocation26_spill] sm:$0xff] %v9745_v47 }
  0x42   :  { %868 = vmatpush2.bf16.msra.mxu0 %v9715_v0  ;;  %909 = vmatpush2.bf16.msra.mxu1 %v9719_v14  ;;  %v9771_v14 = vcombine.high %v111_v32, %v115_v33  ;;  %v9774_v0 = vcombine.high %v112_v58, %v116_v63 }
  0x43   :  { %919 = vmatprep.subr.bf16.mxu0 %v9721_v16  ;;  %960 = vmatprep.subr.bf16.mxu1 %v9724_v3  ;;  %v9765_v3 = vcombine.low %v119_v1, %v123_v13  ;;  %v9769_v16 = vcombine.low %v120_v17, %v124_v26  ;;  %v107_v1 = vld [vmem:[%s13167_s2 + $0x130] sm:$0xff]  ;;  %v104_v13 = vld [vmem:[%s13167_s2 + $0x118] sm:$0xff]  ;;  %v9791_v26 = vcombine.low %v111_v32, %v115_v33 }
  0x44   :  { %13498 = vst [vmem:[#allocation30_spill] sm:$0xff] %v9771_v14  ;;  %13499 = vst [vmem:[#allocation31_spill] sm:$0xff] %v9774_v0  ;;  %v108_v17 = vld [vmem:[%s13167_s2 + $0x138] sm:$0xff]  ;;  %v99_v32 = vld [vmem:[%s13167_s2 + $0xf0] sm:$0xff] }
  0x45   :  { %870 = vmatmul.mubr.bf16.vlgmr.msra.gmra.mxu0 %v13495_v49  ;;  %911 = vmatmul.mubr.bf16.vlgmr.msra.gmra.mxu1 %v13495_v49  ;;  %13496 = vst [vmem:[#allocation28_spill] sm:$0xff] %v9765_v3  ;;  %13497 = vst [vmem:[#allocation29_spill] sm:$0xff] %v9769_v16  ;;  %v96_v33 = vld [vmem:[%s13167_s2 + $0xd8] sm:$0xff] }
  0x46   :  { %920 = vmatpush1.bf16.msra.mxu0 %v9739_v31  ;;  %961 = vmatpush1.bf16.msra.mxu1 %v9743_v42  ;;  %v103_v31 = vld [vmem:[%s13167_s2 + $0x110] sm:$0xff]  ;;  %13500 = vst [vmem:[#allocation32_spill] sm:$0xff] %v9791_v26  ;;  %v9800_v42 = vcombine.high %v104_v13, %v108_v17 }
  0x47   :  { %921 = vmatprep.subr.bf16.mxu0 %v9745_v47  ;;  %962 = vmatprep.subr.bf16.mxu1 %v9748_v48  ;;  %v9795_v48 = vcombine.low %v112_v58, %v116_v63  ;;  %v9797_v47 = vcombine.high %v103_v31, %v107_v1  ;;  %v100_v58 = vld [vmem:[%s13167_s2 + $0xf8] sm:$0xff]  ;;  %v9815_v63 = vcombine.low %v103_v31, %v107_v1  ;;  %v91_v31 = vld [vmem:[%s13167_s2 + $0xb0] sm:$0xff] }
  0x48   :  { %951 = vmatprep.mubr.bf16.mxu0 %v13495_v49  ;;  %992 = vmatprep.mubr.bf16.mxu1 %v13495_v49  ;;  %13503 = vst [vmem:[#allocation35_spill] sm:$0xff] %v9800_v42  ;;  %v88_v1 = vld [vmem:[%s13167_s2 + $0x98] sm:$0xff] }
  0x49   :  { %13501 = vst [vmem:[#allocation33_spill] sm:$0xff] %v9795_v48  ;;  %13502 = vst [vmem:[#allocation34_spill] sm:$0xff] %v9797_v47 }
  0x4a   :  { %922 = vmatpush1.bf16.msra.mxu0 %v9765_v3  ;;  %963 = vmatpush1.bf16.msra.mxu1 %v9769_v16  ;;  %13504 = vst [vmem:[#allocation36_spill] sm:$0xff] %v9815_v63  ;;  %v9824_v16 = vcombine.high %v96_v33, %v100_v58  ;;  %v87_v3 = vld [vmem:[%s13167_s2 + $0x90] sm:$0xff] }
  0x4b   :  { %923 = vmatprep.subr.bf16.mxu0 %v9771_v14  ;;  %964 = vmatprep.subr.bf16.mxu1 %v9774_v0  ;;  %v9819_v0 = vcombine.low %v104_v13, %v108_v17  ;;  %v9821_v14 = vcombine.high %v95_v2, %v99_v32  ;;  %v92_v13 = vld [vmem:[%s13167_s2 + $0xb8] sm:$0xff]  ;;  %v9839_v17 = vcombine.low %v95_v2, %v99_v32  ;;  %v83_v2 = vld [vmem:[%s13167_s2 + $0x70] sm:$0xff] }
  0x4c   :  { %13507 = vst [vmem:[#allocation39_spill] sm:$0xff] %v9824_v16  ;;  %v80_v32 = vld [vmem:[%s13167_s2 + $0x58] sm:$0xff] }
  0x4d   :  { %13505 = vst [vmem:[#allocation37_spill] sm:$0xff] %v9819_v0  ;;  %13506 = vst [vmem:[#allocation38_spill] sm:$0xff] %v9821_v14 }
  0x4e   :  { %924 = vmatpush1.bf16.msra.mxu0 %v9791_v26  ;;  %965 = vmatpush1.bf16.msra.mxu1 %v9795_v48  ;;  %13508 = vst [vmem:[#allocation40_spill] sm:$0xff] %v9839_v17  ;;  %v9848_v48 = vcombine.high %v88_v1, %v92_v13  ;;  %v79_v26 = vld [vmem:[%s13167_s2 + $0x50] sm:$0xff] }
  0x4f   :  { %925 = vmatprep.subr.bf16.mxu0 %v9797_v47  ;;  %966 = vmatprep.subr.bf16.mxu1 %v9800_v42  ;;  %v9843_v42 = vcombine.low %v96_v33, %v100_v58  ;;  %v9845_v47 = vcombine.high %v87_v3, %v91_v31  ;;  %v84_v33 = vld [vmem:[%s13167_s2 + $0x78] sm:$0xff]  ;;  %v9863_v58 = vcombine.low %v87_v3, %v91_v31  ;;  %v75_v3 = vld [vmem:[%s13167_s2 + $0x30] sm:$0xff] }
  0x50   :  { %13511 = vst [vmem:[#allocation43_spill] sm:$0xff] %v9848_v48  ;;  %v72_v31 = vld [vmem:[%s13167_s2 + $0x18] sm:$0xff] }
  0x51   :  { %13509 = vst [vmem:[#allocation41_spill] sm:$0xff] %v9843_v42  ;;  %13510 = vst [vmem:[#allocation42_spill] sm:$0xff] %v9845_v47 }
  0x52   :  { %926 = vmatpush1.bf16.msra.mxu0 %v9815_v63  ;;  %967 = vmatpush1.bf16.msra.mxu1 %v9819_v0  ;;  %13512 = vst [vmem:[#allocation44_spill] sm:$0xff] %v9863_v58  ;;  %v9872_v0 = vcombine.high %v80_v32, %v84_v33  ;;  %v71_v63 = vld [vmem:[%s13167_s2 + $0x10] sm:$0xff] }
  0x53   :  { %927 = vmatprep.subr.bf16.mxu0 %v9821_v14  ;;  %968 = vmatprep.subr.bf16.mxu1 %v9824_v16  ;;  %v9867_v16 = vcombine.low %v88_v1, %v92_v13  ;;  %v9869_v14 = vcombine.high %v79_v26, %v83_v2  ;;  %v76_v1 = vld [vmem:[%s13167_s2 + $0x38] sm:$0xff]  ;;  %v9887_v13 = vcombine.low %v79_v26, %v83_v2  ;;  %v195_v26 = vld [vmem:[%s13167_s2 + $0x3f0] sm:$0xff] }
  0x54   :  { %13515 = vst [vmem:[#allocation47_spill] sm:$0xff] %v9872_v0  ;;  %v192_v2 = vld [vmem:[%s13167_s2 + $0x3d8] sm:$0xff] }
  0x55   :  { %13513 = vst [vmem:[#allocation45_spill] sm:$0xff] %v9867_v16  ;;  %13514 = vst [vmem:[#allocation46_spill] sm:$0xff] %v9869_v14 }
  0x56   :  { %928 = vmatpush1.bf16.msra.mxu0 %v9839_v17  ;;  %969 = vmatpush1.bf16.msra.mxu1 %v9843_v42  ;;  %13516 = vst [vmem:[#allocation48_spill] sm:$0xff] %v9887_v13  ;;  %v9896_v42 = vcombine.high %v72_v31, %v76_v1  ;;  %v191_v17 = vld [vmem:[%s13167_s2 + $0x3d0] sm:$0xff] }
  0x57   :  { %929 = vmatprep.subr.bf16.mxu0 %v9845_v47  ;;  %970 = vmatprep.subr.bf16.mxu1 %v9848_v48  ;;  %v9891_v48 = vcombine.low %v80_v32, %v84_v33  ;;  %v9893_v47 = vcombine.high %v71_v63, %v75_v3  ;;  %v196_v32 = vld [vmem:[%s13167_s2 + $0x3f8] sm:$0xff]  ;;  %v9911_v33 = vcombine.low %v71_v63, %v75_v3  ;;  %v187_v63 = vld [vmem:[%s13167_s2 + $0x3b0] sm:$0xff] }
  0x58   :  { %13519 = vst [vmem:[#allocation51_spill] sm:$0xff] %v9896_v42  ;;  %v184_v3 = vld [vmem:[%s13167_s2 + $0x398] sm:$0xff] }
  0x59   :  { %13517 = vst [vmem:[#allocation49_spill] sm:$0xff] %v9891_v48  ;;  %13518 = vst [vmem:[#allocation50_spill] sm:$0xff] %v9893_v47 }
  0x5a   :  { %930 = vmatpush1.bf16.msra.mxu0 %v9863_v58  ;;  %971 = vmatpush1.bf16.msra.mxu1 %v9867_v16  ;;  %13520 = vst [vmem:[#allocation52_spill] sm:$0xff] %v9911_v33  ;;  %v9920_v16 = vcombine.high %v192_v2, %v196_v32  ;;  %v183_v58 = vld [vmem:[%s13167_s2 + $0x390] sm:$0xff] }
  0x5b   :  { %931 = vmatprep.subr.bf16.mxu0 %v9869_v14  ;;  %972 = vmatprep.subr.bf16.mxu1 %v9872_v0  ;;  %v9915_v0 = vcombine.low %v72_v31, %v76_v1  ;;  %v9917_v14 = vcombine.high %v191_v17, %v195_v26  ;;  %v188_v31 = vld [vmem:[%s13167_s2 + $0x3b8] sm:$0xff]  ;;  %v9935_v1 = vcombine.low %v191_v17, %v195_v26  ;;  %v179_v17 = vld [vmem:[%s13167_s2 + $0x370] sm:$0xff] }
  0x5c   :  { %13523 = vst [vmem:[#allocation55_spill] sm:$0xff] %v9920_v16  ;;  %v176_v26 = vld [vmem:[%s13167_s2 + $0x358] sm:$0xff] }
  0x5d   :  { %13521 = vst [vmem:[#allocation53_spill] sm:$0xff] %v9915_v0  ;;  %13522 = vst [vmem:[#allocation54_spill] sm:$0xff] %v9917_v14 }
  0x5e   :  { %932 = vmatpush1.bf16.msra.mxu0 %v9887_v13  ;;  %973 = vmatpush1.bf16.msra.mxu1 %v9891_v48  ;;  %13524 = vst [vmem:[#allocation56_spill] sm:$0xff] %v9935_v1  ;;  %v9944_v48 = vcombine.high %v184_v3, %v188_v31  ;;  %v175_v13 = vld [vmem:[%s13167_s2 + $0x350] sm:$0xff] }
  0x5f   :  { %933 = vmatprep.subr.bf16.mxu0 %v9893_v47  ;;  %974 = vmatprep.subr.bf16.mxu1 %v9896_v42  ;;  %v9939_v42 = vcombine.low %v192_v2, %v196_v32  ;;  %v9941_v47 = vcombine.high %v183_v58, %v187_v63  ;;  %v180_v2 = vld [vmem:[%s13167_s2 + $0x378] sm:$0xff]  ;;  %v9959_v32 = vcombine.low %v183_v58, %v187_v63  ;;  %v171_v58 = vld [vmem:[%s13167_s2 + $0x330] sm:$0xff] }
  0x60   :  { %13527 = vst [vmem:[#allocation59_spill] sm:$0xff] %v9944_v48  ;;  %v168_v63 = vld [vmem:[%s13167_s2 + $0x318] sm:$0xff] }
  0x61   :  { %13525 = vst [vmem:[#allocation57_spill] sm:$0xff] %v9939_v42  ;;  %13526 = vst [vmem:[#allocation58_spill] sm:$0xff] %v9941_v47 }
  0x62   :  { %934 = vmatpush1.bf16.msra.mxu0 %v9911_v33  ;;  %975 = vmatpush1.bf16.msra.mxu1 %v9915_v0  ;;  %13528 = vst [vmem:[#allocation60_spill] sm:$0xff] %v9959_v32  ;;  %v9968_v0 = vcombine.high %v176_v26, %v180_v2  ;;  %v167_v33 = vld [vmem:[%s13167_s2 + $0x310] sm:$0xff] }
  0x63   :  { %935 = vmatprep.subr.bf16.mxu0 %v9917_v14  ;;  %976 = vmatprep.subr.bf16.mxu1 %v9920_v16  ;;  %v9963_v16 = vcombine.low %v184_v3, %v188_v31  ;;  %v9965_v14 = vcombine.high %v175_v13, %v179_v17  ;;  %v172_v3 = vld [vmem:[%s13167_s2 + $0x338] sm:$0xff]  ;;  %v9983_v31 = vcombine.low %v175_v13, %v179_v17  ;;  %v163_v13 = vld [vmem:[%s13167_s2 + $0x2f0] sm:$0xff] }
  0x64   :  { %13531 = vst [vmem:[#allocation63_spill] sm:$0xff] %v9968_v0  ;;  %v160_v17 = vld [vmem:[%s13167_s2 + $0x2d8] sm:$0xff] }
  0x65   :  { %13529 = vst [vmem:[#allocation61_spill] sm:$0xff] %v9963_v16  ;;  %13530 = vst [vmem:[#allocation62_spill] sm:$0xff] %v9965_v14 }
  0x66   :  { %936 = vmatpush2.bf16.msra.mxu0 %v9935_v1  ;;  %977 = vmatpush2.bf16.msra.mxu1 %v9939_v42  ;;  %13532 = vst [vmem:[#allocation64_spill] sm:$0xff] %v9983_v31  ;;  %v9992_v42 = vcombine.high %v168_v63, %v172_v3  ;;  %v159_v1 = vld [vmem:[%s13167_s2 + $0x2d0] sm:$0xff] }
  0x67   :  { %937 = vmatprep.subr.bf16.mxu0 %v9941_v47  ;;  %978 = vmatprep.subr.bf16.mxu1 %v9944_v48  ;;  %v9987_v48 = vcombine.low %v176_v26, %v180_v2  ;;  %v9989_v47 = vcombine.high %v167_v33, %v171_v58  ;;  %v164_v26 = vld [vmem:[%s13167_s2 + $0x2f8] sm:$0xff]  ;;  %v10007_v2 = vcombine.low %v167_v33, %v171_v58  ;;  %v155_v33 = vld [vmem:[%s13167_s2 + $0x2b0] sm:$0xff] }
  0x68   :  { %13535 = vst [vmem:[#allocation67_spill] sm:$0xff] %v9992_v42  ;;  %v152_v58 = vld [vmem:[%s13167_s2 + $0x298] sm:$0xff] }
  0x69   :  { %13533 = vst [vmem:[#allocation65_spill] sm:$0xff] %v9987_v48  ;;  %13534 = vst [vmem:[#allocation66_spill] sm:$0xff] %v9989_v47 }
  0x6a   :  { %938 = vmatpush2.bf16.msra.mxu0 %v9959_v32  ;;  %979 = vmatpush2.bf16.msra.mxu1 %v9963_v16  ;;  %13536 = vst [vmem:[#allocation68_spill] sm:$0xff] %v10007_v2  ;;  %v10016_v16 = vcombine.high %v160_v17, %v164_v26  ;;  %v151_v32 = vld [vmem:[%s13167_s2 + $0x290] sm:$0xff] }
  0x6b   :  { %939 = vmatprep.subr.bf16.mxu0 %v9965_v14  ;;  %980 = vmatprep.subr.bf16.mxu1 %v9968_v0  ;;  %v10011_v0 = vcombine.low %v168_v63, %v172_v3  ;;  %v10013_v14 = vcombine.high %v159_v1, %v163_v13  ;;  %v156_v63 = vld [vmem:[%s13167_s2 + $0x2b8] sm:$0xff]  ;;  %v10031_v3 = vcombine.low %v159_v1, %v163_v13  ;;  %v147_v1 = vld [vmem:[%s13167_s2 + $0x270] sm:$0xff] }
  0x6c   :  { %13539 = vst [vmem:[#allocation71_spill] sm:$0xff] %v10016_v16  ;;  %v144_v13 = vld [vmem:[%s13167_s2 + $0x258] sm:$0xff] }
  0x6d   :  { %13537 = vst [vmem:[#allocation69_spill] sm:$0xff] %v10011_v0  ;;  %13538 = vst [vmem:[#allocation70_spill] sm:$0xff] %v10013_v14 }
  0x6e   :  { %940 = vmatpush2.bf16.msra.mxu0 %v9983_v31  ;;  %981 = vmatpush2.bf16.msra.mxu1 %v9987_v48  ;;  %13540 = vst [vmem:[#allocation72_spill] sm:$0xff] %v10031_v3  ;;  %v10040_v48 = vcombine.high %v152_v58, %v156_v63  ;;  %v143_v31 = vld [vmem:[%s13167_s2 + $0x250] sm:$0xff] }
  0x6f   :  { %941 = vmatprep.subr.bf16.mxu0 %v9989_v47  ;;  %982 = vmatprep.subr.bf16.mxu1 %v9992_v42  ;;  %v10035_v42 = vcombine.low %v160_v17, %v164_v26  ;;  %v10037_v47 = vcombine.high %v151_v32, %v155_v33  ;;  %v148_v17 = vld [vmem:[%s13167_s2 + $0x278] sm:$0xff]  ;;  %v10055_v26 = vcombine.low %v151_v32, %v155_v33  ;;  %v139_v32 = vld [vmem:[%s13167_s2 + $0x230] sm:$0xff] }
  0x70   :  { %13543 = vst [vmem:[#allocation75_spill] sm:$0xff] %v10040_v48  ;;  %v136_v33 = vld [vmem:[%s13167_s2 + $0x218] sm:$0xff] }
  0x71   :  { %13541 = vst [vmem:[#allocation73_spill] sm:$0xff] %v10035_v42  ;;  %13542 = vst [vmem:[#allocation74_spill] sm:$0xff] %v10037_v47 }
  0x72   :  { %942 = vmatpush2.bf16.msra.mxu0 %v10007_v2  ;;  %983 = vmatpush2.bf16.msra.mxu1 %v10011_v0  ;;  %v10064_v0 = vcombine.high %v144_v13, %v148_v17  ;;  %v135_v2 = vld [vmem:[%s13167_s2 + $0x210] sm:$0xff] }
  0x73   :  { %943 = vmatprep.subr.bf16.mxu0 %v10013_v14  ;;  %984 = vmatprep.subr.bf16.mxu1 %v10016_v16  ;;  %v10059_v16 = vcombine.low %v152_v58, %v156_v63  ;;  %v10061_v14 = vcombine.high %v143_v31, %v147_v1  ;;  %v140_v58 = vld [vmem:[%s13167_s2 + $0x238] sm:$0xff]  ;;  %v10079_v63 = vcombine.low %v143_v31, %v147_v1 }
  0x74   :  { %v10095_v31 = vcombine.low %v136_v33, %v140_v58 }
  0x76   :  { %944 = vmatpush2.bf16.msra.mxu0 %v10031_v3  ;;  %985 = vmatpush2.bf16.msra.mxu1 %v10035_v42  ;;  %v10088_v42 = vcombine.high %v136_v33, %v140_v58  ;;  %v10091_v3 = vcombine.low %v135_v2, %v139_v32 }
  0x77   :  { %945 = vmatprep.subr.bf16.mxu0 %v10037_v47  ;;  %986 = vmatprep.subr.bf16.mxu1 %v10040_v48  ;;  %v10083_v48 = vcombine.low %v144_v13, %v148_v17  ;;  %v10085_v47 = vcombine.high %v135_v2, %v139_v32 }
  0x7a   :  { %946 = vmatpush2.bf16.msra.mxu0 %v10055_v26  ;;  %987 = vmatpush2.bf16.msra.mxu1 %v10059_v16 }
  0x7b   :  { %947 = vmatprep.subr.bf16.mxu0 %v10061_v14  ;;  %988 = vmatprep.subr.bf16.mxu1 %v10064_v0 }
  0x7e   :  { %948 = vmatpush2.bf16.msra.mxu0 %v10079_v63  ;;  %989 = vmatpush2.bf16.msra.mxu1 %v10083_v48 }
  0x7f   :  { %949 = vmatprep.subr.bf16.mxu0 %v10085_v47  ;;  %990 = vmatprep.subr.bf16.mxu1 %v10088_v42 }
  0x82   :  { %950 = vmatpush2.bf16.msra.mxu0 %v10091_v3  ;;  %991 = vmatpush2.bf16.msra.mxu1 %v10095_v31 }
  0x83   :  { %1831 = vmatprep.subr.bf16.mxu0 %v9337_v4  ;;  %1872 = vmatprep.subr.bf16.mxu1 %v9350_v9  ;;  %v13544_v4 = vld [vmem:[#allocation4_spill] sm:$0xff]  ;;  %v13546_v9 = vld [vmem:[#allocation6_spill] sm:$0xff] }
  0x85   :  { %952 = vmatmul.mubr.bf16.vlgmr.msra.gmra.mxu0 %v13495_v49  ;;  %993 = vmatmul.mubr.bf16.vlgmr.msra.gmra.mxu1 %v13495_v49 }
  0x86   :  { %1832 = vmatpush1.bf16.msra.mxu0 %v9339_v5  ;;  %1873 = vmatpush1.bf16.msra.mxu1 %v9352_v10  ;;  %v13545_v5 = vld [vmem:[#allocation5_spill] sm:$0xff]  ;;  %v13547_v10 = vld [vmem:[#allocation7_spill] sm:$0xff] }
  0x87   :  { %1833 = vmatprep.subr.bf16.mxu0 %v9354_v11  ;;  %1874 = vmatprep.subr.bf16.mxu1 %v9366_v15  ;;  %v13548_v11 = vld [vmem:[#allocation8_spill] sm:$0xff]  ;;  %v13549_v15 = vld [vmem:[#allocation9_spill] sm:$0xff] }
  0x8a   :  { %1834 = vmatpush1.bf16.msra.mxu0 %v9379_v19  ;;  %1875 = vmatpush1.bf16.msra.mxu1 %v9383_v20  ;;  %v13550_v19 = vld [vmem:[#allocation10_spill] sm:$0xff]  ;;  %v13551_v20 = vld [vmem:[#allocation11_spill] sm:$0xff] }
  0x8b   :  { %1835 = vmatprep.subr.bf16.mxu0 %v9385_v21  ;;  %1876 = vmatprep.subr.bf16.mxu1 %v9388_v22  ;;  %v13552_v21 = vld [vmem:[#allocation12_spill] sm:$0xff]  ;;  %v13553_v22 = vld [vmem:[#allocation13_spill] sm:$0xff] }
  0x8e   :  { %1836 = vmatpush1.bf16.msra.mxu0 %v9403_v27  ;;  %1877 = vmatpush1.bf16.msra.mxu1 %v9407_v28  ;;  %v13554_v27 = vld [vmem:[#allocation14_spill] sm:$0xff]  ;;  %v13555_v28 = vld [vmem:[#allocation15_spill] sm:$0xff] }
  0x8f   :  { %1837 = vmatprep.subr.bf16.mxu0 %v9409_v29  ;;  %1878 = vmatprep.subr.bf16.mxu1 %v9412_v30  ;;  %v13556_v29 = vld [vmem:[#allocation16_spill] sm:$0xff]  ;;  %v13557_v30 = vld [vmem:[#allocation17_spill] sm:$0xff] }
  0x92   :  { %1838 = vmatpush1.bf16.msra.mxu0 %v9427_v35  ;;  %1879 = vmatpush1.bf16.msra.mxu1 %v9431_v36  ;;  %v13558_v35 = vld [vmem:[#allocation18_spill] sm:$0xff]  ;;  %v13559_v36 = vld [vmem:[#allocation19_spill] sm:$0xff] }
  0x93   :  { %1839 = vmatprep.subr.bf16.mxu0 %v9433_v37  ;;  %1880 = vmatprep.subr.bf16.mxu1 %v9436_v38  ;;  %v13560_v37 = vld [vmem:[#allocation20_spill] sm:$0xff]  ;;  %v13561_v38 = vld [vmem:[#allocation21_spill] sm:$0xff] }
  0x96   :  { %1840 = vmatpush1.bf16.msra.mxu0 %v9451_v43  ;;  %1881 = vmatpush1.bf16.msra.mxu1 %v9455_v44  ;;  %v13562_v43 = vld [vmem:[#allocation22_spill] sm:$0xff]  ;;  %v13563_v44 = vld [vmem:[#allocation23_spill] sm:$0xff] }
  0x97   :  { %1841 = vmatprep.subr.bf16.mxu0 %v9457_v45  ;;  %1882 = vmatprep.subr.bf16.mxu1 %v9460_v46  ;;  %v1001_v45 = vld [vmem:[%s13168_s0] sm:$0xff]  ;;  %v1002_v46 = vld [vmem:[%s13168_s0 + $0x8] sm:$0xff] }
  0x9a   :  { %1842 = vmatpush1.bf16.msra.mxu0 %v9475_v51  ;;  %1883 = vmatpush1.bf16.msra.mxu1 %v9479_v52  ;;  %v1003_v51 = vunpack.c.l.bf16 %v1001_v45  ;;  %v1005_v52 = vunpack.c.l.bf16 %v1002_v46 }
  0x9b   :  { %1843 = vmatprep.subr.bf16.mxu0 %v9481_v53  ;;  %1884 = vmatprep.subr.bf16.mxu1 %v9484_v54  ;;  %v1004_v53 = vunpack.c.h.bf16 %v1001_v45 }
  0x9e   :  { %1844 = vmatpush1.bf16.msra.mxu0 %v9499_v59  ;;  %1885 = vmatpush1.bf16.msra.mxu1 %v9503_v60 }
  0x9f   :  { %1845 = vmatprep.subr.bf16.mxu0 %v9505_v61  ;;  %1886 = vmatprep.subr.bf16.mxu1 %v9508_v62 }
  0xa2   :  { %1846 = vmatpush1.bf16.msra.mxu0 %v9523_v6  ;;  %1887 = vmatpush1.bf16.msra.mxu1 %v9527_v7 }
  0xa3   :  { %1847 = vmatprep.subr.bf16.mxu0 %v9529_v8  ;;  %1888 = vmatprep.subr.bf16.mxu1 %v9532_v12 }
  0xa6   :  { %1848 = vmatpush2.bf16.msra.mxu0 %v9547_v18  ;;  %1889 = vmatpush2.bf16.msra.mxu1 %v9551_v23 }
  0xa7   :  { %1849 = vmatprep.subr.bf16.mxu0 %v9553_v24  ;;  %1890 = vmatprep.subr.bf16.mxu1 %v9556_v25 }
  0xaa   :  { %1850 = vmatpush2.bf16.msra.mxu0 %v9571_v34  ;;  %1891 = vmatpush2.bf16.msra.mxu1 %v9575_v39  ;;  %v1006_v34 = vunpack.c.h.bf16 %v1002_v46 }
  0xab   :  { %1851 = vmatprep.subr.bf16.mxu0 %v9577_v40  ;;  %1892 = vmatprep.subr.bf16.mxu1 %v9580_v41 }
  0xae   :  { %1852 = vmatpush2.bf16.msra.mxu0 %v9595_v50  ;;  %1893 = vmatpush2.bf16.msra.mxu1 %v9599_v55 }
  0xaf   :  { %1853 = vmatprep.subr.bf16.mxu0 %v9601_v56  ;;  %1894 = vmatprep.subr.bf16.mxu1 %v9604_v57 }
  0xb2   :  { %1854 = vmatpush2.bf16.msra.mxu0 %v13544_v4  ;;  %1895 = vmatpush2.bf16.msra.mxu1 %v13545_v5 }
  0xb3   :  { %1855 = vmatprep.subr.bf16.mxu0 %v13546_v9  ;;  %1896 = vmatprep.subr.bf16.mxu1 %v13547_v10  ;;  %v8201_v10 = vld [vmem:[%s13170_s1 + $0x70] sm:$0xff] }
  0xb6   :  { %1856 = vmatpush2.bf16.msra.mxu0 %v13548_v11  ;;  %1897 = vmatpush2.bf16.msra.mxu1 %v13549_v15  ;;  %v1014_v11 = vunpack.c.l.bf16 %v8201_v10  ;;  %v8202_v15 = vld [vmem:[%s13170_s1 + $0x78] sm:$0xff] }
  0xb7   :  { %1857 = vmatprep.subr.bf16.mxu0 %v13550_v19  ;;  %1898 = vmatprep.subr.bf16.mxu1 %v13551_v20  ;;  %v1015_v19 = vunpack.c.h.bf16 %v8201_v10  ;;  %v1017_v46 = vunpack.c.h.bf16 %v8202_v15  ;;  %v13579_v10 = vld [vmem:[#allocation39_spill] sm:$0xff] }
  0xba   :  { %1858 = vmatpush2.bf16.msra.mxu0 %v13552_v21  ;;  %1899 = vmatpush2.bf16.msra.mxu1 %v13553_v22 }
  0xbb   :  { %1859 = vmatprep.subr.bf16.mxu0 %v13554_v27  ;;  %1900 = vmatprep.subr.bf16.mxu1 %v13555_v28  ;;  %v1016_v27 = vunpack.c.l.bf16 %v8202_v15  ;;  %v13581_v15 = vld [vmem:[#allocation41_spill] sm:$0xff] }
  0xbe   :  { %1860 = vmatpush2.bf16.msra.mxu0 %v13556_v29  ;;  %1901 = vmatpush2.bf16.msra.mxu1 %v13557_v30 }
  0xbf   :  { %1861 = vmatprep.subr.bf16.mxu0 %v13558_v35  ;;  %1902 = vmatprep.subr.bf16.mxu1 %v13559_v36 }
  0xc2   :  { %1862 = vmatpush2.bf16.msra.mxu0 %v13560_v37  ;;  %1903 = vmatpush2.bf16.msra.mxu1 %v13561_v38 }
  0xc3   :  { %1913 = vmatprep.subr.bf16.mxu0 %v13562_v43  ;;  %1954 = vmatprep.subr.bf16.mxu1 %v13563_v44 }
 0x105   :  { %v871_v54 = vpop.f32.mrf.mxu0  ;;  %v912_v60 = vpop.f32.mrf.mxu1 }
 0x106   :  { %v1007_v59 = vadd.f32 %v1003_v51, %v871_v54  ;;  %v1009_v62 = vadd.f32 %v1005_v52, %v912_v60 }
 0x107   :  { %v873_v61 = vpop.f32.mrf.mxu0  ;;  %v914_v8 = vpop.f32.mrf.mxu1 }
 0x108   :  { %v1022_v6 = vmul.f32 0.5, %v1007_v59  ;;  %v1008_v7 = vadd.f32 %v1004_v53, %v873_v61  ;;  %v1010_v39 = vadd.f32 %v1006_v34, %v914_v8 }
 0x109   :  { %v875_v12 = vpop.f32.mrf.mxu0  ;;  %v916_v23 = vpop.f32.mrf.mxu1 }
 0x10a   :  { %9140 = vtanh.f32 %v1022_v6  ;;  %v1026_v18 = vmul.f32 0.5, %v1008_v7  ;;  %v1031_v40 = vmul.f32 0.5, %v1010_v39 }
 0x10b   :  { %9142 = vtanh.f32 %v1009_v62  ;;  %v876_v24 = vpop.f32.mrf.mxu0  ;;  %v917_v25 = vpop.f32.mrf.mxu1 }
 0x10c   :  { %9144 = vtanh.f32 %v1026_v18 }
 0x10d   :  { %9146 = vtanh.f32 %v1031_v40  ;;  %v13564_v40 = vld [vmem:[#allocation24_spill] sm:$0xff] }
 0x117   :  { %v9141_v41 = vpop.eup %9140 }
 0x118   :  { %v9143_v50 = vpop.eup %9142  ;;  %v1024_v55 = vmul.f32 0.5, %v9141_v41  ;;  %v13565_v41 = vld [vmem:[#allocation25_spill] sm:$0xff] }
 0x119   :  { %v9145_v56 = vpop.eup %9144 }
 0x11a   :  { %v1025_v57 = vadd.f32 0.5, %v1024_v55  ;;  %v1028_v49 = vmul.f32 0.5, %v9145_v56  ;;  %v9147_v32 = vpop.eup %9146  ;;  %v13567_v55 = vld [vmem:[#allocation27_spill] sm:$0xff]  ;;  %v13568_v56 = vld [vmem:[#allocation28_spill] sm:$0xff] }
 0x11b   :  { %v1033_v33 = vmul.f32 0.5, %v9147_v32  ;;  %v13574_v32 = vld [vmem:[#allocation34_spill] sm:$0xff] }
 0x11c   :  { %v1029_v2 = vadd.f32 0.5, %v1028_v49  ;;  %v1036_v1 = vmul.f32 %v9143_v50, %v1025_v57  ;;  %v13566_v50 = vld [vmem:[#allocation26_spill] sm:$0xff]  ;;  %v13569_v57 = vld [vmem:[#allocation29_spill] sm:$0xff] }
 0x11d   :  { %v1034_v58 = vadd.f32 0.5, %v1033_v33  ;;  %v13570_v49 = vld [vmem:[#allocation30_spill] sm:$0xff]  ;;  %v13575_v33 = vld [vmem:[#allocation35_spill] sm:$0xff] }
 0x11e   :  { %v1035_v13 = vmul.f32 0.0, %v1029_v2  ;;  %v13571_v2 = vld [vmem:[#allocation31_spill] sm:$0xff] }
 0x120   :  { %v10174_v17 = vadd.f32 %v1036_v1, %v1035_v13  ;;  %v13572_v1 = vld [vmem:[#allocation32_spill] sm:$0xff]  ;;  %v13573_v13 = vld [vmem:[#allocation33_spill] sm:$0xff] }
 0x122   :  { %9148 = vtanh.f32 %v10174_v17 }
 0x12f   :  { %v9149_v4 = vpop.eup %9148 }
 0x130   :  { %v1039_v5 = vmul.f32 %v9149_v4, %v1034_v58  ;;  %v13576_v58 = vld [vmem:[#allocation36_spill] sm:$0xff]  ;;  %v13577_v4 = vld [vmem:[#allocation37_spill] sm:$0xff] }
 0x132   :  { %v10177_v9 = vpack.c.bf16 %v1039_v5, %v1039_v5  ;;  %v13578_v5 = vld [vmem:[#allocation38_spill] sm:$0xff] }
 0x134   :  { %1059 = vst [vmem:[%s13169_s3] sm:$0xf] %v10177_v9 }
 0x145   :  { %v953_v20 = vpop.f32.mrf.mxu0  ;;  %v994_v22 = vpop.f32.mrf.mxu1 }
 0x146   :  { %v1018_v21 = vadd.f32 %v1014_v11, %v953_v20  ;;  %v1020_v38 = vadd.f32 %v1016_v27, %v994_v22  ;;  %v13580_v11 = vld [vmem:[#allocation40_spill] sm:$0xff]  ;;  %v13583_v20 = vld [vmem:[#allocation43_spill] sm:$0xff]  ;;  %v13585_v22 = vld [vmem:[#allocation45_spill] sm:$0xff] }
 0x147   :  { %v955_v28 = vpop.f32.mrf.mxu0  ;;  %v996_v35 = vpop.f32.mrf.mxu1  ;;  %v13586_v27 = vld [vmem:[#allocation46_spill] sm:$0xff] }
 0x148   :  { %v1040_v29 = vmul.f32 0.5, %v1018_v21  ;;  %v1019_v30 = vadd.f32 %v1015_v19, %v955_v28  ;;  %v1021_v51 = vadd.f32 %v1017_v46, %v996_v35  ;;  %v13582_v19 = vld [vmem:[#allocation42_spill] sm:$0xff]  ;;  %v13584_v21 = vld [vmem:[#allocation44_spill] sm:$0xff]  ;;  %v13587_v28 = vld [vmem:[#allocation47_spill] sm:$0xff] }
 0x149   :  { %v957_v36 = vpop.f32.mrf.mxu0  ;;  %v998_v43 = vpop.f32.mrf.mxu1  ;;  %v13590_v35 = vld [vmem:[#allocation50_spill] sm:$0xff]  ;;  %v13597_v46 = vld [vmem:[#allocation57_spill] sm:$0xff] }
 0x14a   :  { %9150 = vtanh.f32 %v1040_v29  ;;  %v1044_v37 = vmul.f32 0.5, %v1019_v30  ;;  %v1049_v52 = vmul.f32 0.5, %v1021_v51  ;;  %v13588_v29 = vld [vmem:[#allocation48_spill] sm:$0xff]  ;;  %v13589_v30 = vld [vmem:[#allocation49_spill] sm:$0xff]  ;;  %v13591_v36 = vld [vmem:[#allocation51_spill] sm:$0xff] }
 0x14b   :  { %v958_v44 = vpop.f32.mrf.mxu0  ;;  %v999_v45 = vpop.f32.mrf.mxu1  ;;  %v13594_v43 = vld [vmem:[#allocation54_spill] sm:$0xff] }
 0x14c   :  { %9152 = vtanh.f32 %v1044_v37  ;;  %v13592_v37 = vld [vmem:[#allocation52_spill] sm:$0xff]  ;;  %v13595_v44 = vld [vmem:[#allocation55_spill] sm:$0xff]  ;;  %v13598_v51 = vld [vmem:[#allocation58_spill] sm:$0xff] }
 0x14d   :  { %9154 = vtanh.f32 %v1020_v38  ;;  %v13593_v38 = vld [vmem:[#allocation53_spill] sm:$0xff]  ;;  %v13596_v45 = vld [vmem:[#allocation56_spill] sm:$0xff] }
 0x14e   :  { %9156 = vtanh.f32 %v1049_v52  ;;  %v13599_v52 = vld [vmem:[#allocation59_spill] sm:$0xff] }
 0x157   :  { %v9151_v53 = vpop.eup %9150 }
 0x158   :  { %v1042_v54 = vmul.f32 0.5, %v9151_v53  ;;  %v13600_v53 = vld [vmem:[#allocation60_spill] sm:$0xff] }
 0x159   :  { %v9153_v59 = vpop.eup %9152 }
 0x15a   :  { %v1043_v60 = vadd.f32 0.5, %v1042_v54  ;;  %v1046_v61 = vmul.f32 0.5, %v9153_v59  ;;  %v9155_v62 = vpop.eup %9154  ;;  %v13601_v54 = vld [vmem:[#allocation61_spill] sm:$0xff]  ;;  %v13602_v59 = vld [vmem:[#allocation62_spill] sm:$0xff] }
 0x15b   :  { %v9157_v18 = vpop.eup %9156 }
 0x15c   :  { %v1047_v6 = vadd.f32 0.5, %v1046_v61  ;;  %v1054_v8 = vmul.f32 %v9155_v62, %v1043_v60  ;;  %v1051_v23 = vmul.f32 0.5, %v9157_v18  ;;  %v13603_v60 = vld [vmem:[#allocation63_spill] sm:$0xff]  ;;  %v13604_v61 = vld [vmem:[#allocation64_spill] sm:$0xff]  ;;  %v13605_v62 = vld [vmem:[#allocation65_spill] sm:$0xff] }
 0x15d   :  { %v13609_v18 = vld [vmem:[#allocation69_spill] sm:$0xff] }
 0x15e   :  { %v1053_v7 = vmul.f32 0.0, %v1047_v6  ;;  %v1052_v24 = vadd.f32 0.5, %v1051_v23  ;;  %v13606_v6 = vld [vmem:[#allocation66_spill] sm:$0xff] }
 0x15f   :  { %v13610_v23 = vld [vmem:[#allocation70_spill] sm:$0xff] }
 0x160   :  { %v10189_v12 = vadd.f32 %v1054_v8, %v1053_v7  ;;  %v13607_v7 = vld [vmem:[#allocation67_spill] sm:$0xff]  ;;  %v13608_v8 = vld [vmem:[#allocation68_spill] sm:$0xff] }
 0x162   :  { %9158 = vtanh.f32 %v10189_v12 }
 0x16f   :  { %v9159_v25 = vpop.eup %9158 }
 0x170   :  { %v1057_v34 = vmul.f32 %v9159_v25, %v1052_v24  ;;  %v13611_v24 = vld [vmem:[#allocation71_spill] sm:$0xff]  ;;  %v13612_v25 = vld [vmem:[#allocation72_spill] sm:$0xff] }
 0x172   :  { %v1060_v39 = vpack.c.bf16 %v1057_v34, %v1057_v34  ;;  %v13613_v34 = vld [vmem:[#allocation73_spill] sm:$0xff] }
 0x174   :  { %8203 = vst [vmem:[%s13171_s4 + $0x1c] sm:$0xf] %v1060_v39  ;;  %1863 = vmatprep.mubr.bf16.mxu0 %v1060_v39  ;;  %1904 = vmatprep.mubr.bf16.mxu1 %v1060_v39 }
 0x175   :  { %1864 = vmatmul.mubr.bf16.vlgmr.msra.gmra.mxu0 %v10177_v9  ;;  %1905 = vmatmul.mubr.bf16.vlgmr.msra.gmra.mxu1 %v10177_v9 }
 0x176   :  { %1914 = vmatpush1.bf16.msra.mxu0 %v13564_v40  ;;  %1955 = vmatpush1.bf16.msra.mxu1 %v13565_v41  ;;  %v13615_v40 = vld [vmem:[#allocation75_spill] sm:$0xff] }
 0x177   :  { %1945 = vmatprep.mubr.bf16.mxu0 %v1060_v39  ;;  %1986 = vmatprep.mubr.bf16.mxu1 %v1060_v39  ;;  %v13614_v39 = vld [vmem:[#allocation74_spill] sm:$0xff] }
 0x178   :  { %1915 = vmatprep.subr.bf16.mxu0 %v13566_v50  ;;  %1956 = vmatprep.subr.bf16.mxu1 %v13567_v55  ;;  %v2112_v55 = vld [vmem:[%s13167_s2 + $0x1a8] sm:$0xff] }
 0x17a   :  { %1916 = vmatpush1.bf16.msra.mxu0 %v13568_v56  ;;  %1957 = vmatpush1.bf16.msra.mxu1 %v13569_v57  ;;  %v2099_v56 = vld [vmem:[%s13167_s2 + $0x140] sm:$0xff] }
 0x17b   :  { %1917 = vmatprep.subr.bf16.mxu0 %v13570_v49  ;;  %1958 = vmatprep.subr.bf16.mxu1 %v13571_v2  ;;  %v2103_v57 = vld [vmem:[%s13167_s2 + $0x160] sm:$0xff] }
 0x17e   :  { %1918 = vmatpush1.bf16.msra.mxu0 %v13572_v1  ;;  %1959 = vmatpush1.bf16.msra.mxu1 %v13573_v13  ;;  %v10311_v1 = vcombine.high %v2099_v56, %v2103_v57  ;;  %v2100_v13 = vld [vmem:[%s13167_s2 + $0x148] sm:$0xff] }
 0x17f   :  { %1919 = vmatprep.subr.bf16.mxu0 %v13574_v32  ;;  %1960 = vmatprep.subr.bf16.mxu1 %v13575_v33  ;;  %v2104_v32 = vld [vmem:[%s13167_s2 + $0x168] sm:$0xff] }
 0x180   :  { %v10320_v33 = vcombine.high %v2100_v13, %v2104_v32 }
 0x182   :  { %1920 = vmatpush1.bf16.msra.mxu0 %v13576_v58  ;;  %1961 = vmatpush1.bf16.msra.mxu1 %v13577_v4  ;;  %v2091_v58 = vld [vmem:[%s13167_s2 + $0x100] sm:$0xff] }
 0x183   :  { %1921 = vmatprep.subr.bf16.mxu0 %v13578_v5  ;;  %1962 = vmatprep.subr.bf16.mxu1 %v13579_v10  ;;  %v2095_v4 = vld [vmem:[%s13167_s2 + $0x120] sm:$0xff]  ;;  %v2092_v5 = vld [vmem:[%s13167_s2 + $0x108] sm:$0xff] }
 0x184   :  { %v2096_v10 = vld [vmem:[%s13167_s2 + $0x128] sm:$0xff] }
 0x186   :  { %1922 = vmatpush1.bf16.msra.mxu0 %v13580_v11  ;;  %1963 = vmatpush1.bf16.msra.mxu1 %v13581_v15  ;;  %v10336_v11 = vcombine.low %v2099_v56, %v2103_v57  ;;  %v10340_v15 = vcombine.low %v2100_v13, %v2104_v32  ;;  %v2171_v13 = vld [vmem:[%s13167_s2 + $0x380] sm:$0xff] }
 0x187   :  { %1923 = vmatprep.subr.bf16.mxu0 %v13582_v19  ;;  %1964 = vmatprep.subr.bf16.mxu1 %v13583_v20  ;;  %v10342_v19 = vcombine.high %v2091_v58, %v2095_v4  ;;  %v10345_v20 = vcombine.high %v2092_v5, %v2096_v10  ;;  %v2175_v32 = vld [vmem:[%s13167_s2 + $0x3a0] sm:$0xff] }
 0x18a   :  { %1924 = vmatpush1.bf16.msra.mxu0 %v13584_v21  ;;  %1965 = vmatpush1.bf16.msra.mxu1 %v13585_v22  ;;  %v2083_v21 = vld [vmem:[%s13167_s2 + $0xc0] sm:$0xff] }
 0x18b   :  { %1925 = vmatprep.subr.bf16.mxu0 %v13586_v27  ;;  %1966 = vmatprep.subr.bf16.mxu1 %v13587_v28  ;;  %v2087_v22 = vld [vmem:[%s13167_s2 + $0xe0] sm:$0xff]  ;;  %v2084_v27 = vld [vmem:[%s13167_s2 + $0xc8] sm:$0xff] }
 0x18c   :  { %v2088_v28 = vld [vmem:[%s13167_s2 + $0xe8] sm:$0xff] }
 0x18e   :  { %1926 = vmatpush1.bf16.msra.mxu0 %v13588_v29  ;;  %1967 = vmatpush1.bf16.msra.mxu1 %v13589_v30  ;;  %v10360_v29 = vcombine.low %v2091_v58, %v2095_v4  ;;  %v10364_v30 = vcombine.low %v2092_v5, %v2096_v10  ;;  %v2172_v58 = vld [vmem:[%s13167_s2 + $0x388] sm:$0xff]  ;;  %v10486_v4 = vcombine.high %v2171_v13, %v2175_v32 }
 0x18f   :  { %1927 = vmatprep.subr.bf16.mxu0 %v13590_v35  ;;  %1968 = vmatprep.subr.bf16.mxu1 %v13591_v36  ;;  %v10366_v35 = vcombine.high %v2083_v21, %v2087_v22  ;;  %v10369_v36 = vcombine.high %v2084_v27, %v2088_v28  ;;  %v2176_v5 = vld [vmem:[%s13167_s2 + $0x3a8] sm:$0xff]  ;;  %v10491_v10 = vcombine.low %v2171_v13, %v2175_v32 }
 0x190   :  { %v2148_v13 = vld [vmem:[%s13167_s2 + $0x2c8] sm:$0xff] }
 0x191   :  { %13616 = vst [vmem:[#allocation4_spill] sm:$0xff] %v10491_v10 }
 0x192   :  { %1928 = vmatpush1.bf16.msra.mxu0 %v13592_v37  ;;  %1969 = vmatpush1.bf16.msra.mxu1 %v13593_v38  ;;  %v10372_v37 = vcombine.low %v2083_v21, %v2087_v22  ;;  %v10376_v38 = vcombine.low %v2084_v27, %v2088_v28  ;;  %v10493_v21 = vcombine.low %v2172_v58, %v2176_v5  ;;  %v2163_v27 = vld [vmem:[%s13167_s2 + $0x340] sm:$0xff] }
 0x193   :  { %1929 = vmatprep.subr.bf16.mxu0 %v13594_v43  ;;  %1970 = vmatprep.subr.bf16.mxu1 %v13595_v44  ;;  %v2075_v43 = vld [vmem:[%s13167_s2 + $0x80] sm:$0xff]  ;;  %v10495_v22 = vcombine.high %v2172_v58, %v2176_v5  ;;  %v2152_v58 = vld [vmem:[%s13167_s2 + $0x2e8] sm:$0xff] }
 0x194   :  { %v2079_v44 = vld [vmem:[%s13167_s2 + $0xa0] sm:$0xff]  ;;  %13617 = vst [vmem:[#allocation5_spill] sm:$0xff] %v10493_v21 }
 0x195   :  { %13618 = vst [vmem:[#allocation6_spill] sm:$0xff] %v10495_v22  ;;  %v2167_v28 = vld [vmem:[%s13167_s2 + $0x360] sm:$0xff] }
 0x196   :  { %1930 = vmatpush2.bf16.msra.mxu0 %v13596_v45  ;;  %1971 = vmatpush2.bf16.msra.mxu1 %v13597_v46  ;;  %v2076_v45 = vld [vmem:[%s13167_s2 + $0x88] sm:$0xff]  ;;  %v10390_v46 = vcombine.high %v2075_v43, %v2079_v44 }
 0x197   :  { %1931 = vmatprep.subr.bf16.mxu0 %v13598_v51  ;;  %1972 = vmatprep.subr.bf16.mxu1 %v13599_v52  ;;  %v2080_v51 = vld [vmem:[%s13167_s2 + $0xa8] sm:$0xff]  ;;  %v10395_v52 = vcombine.low %v2075_v43, %v2079_v44  ;;  %v10510_v44 = vcombine.high %v2163_v27, %v2167_v28 }
 0x198   :  { %v2164_v43 = vld [vmem:[%s13167_s2 + $0x348] sm:$0xff] }
 0x199   :  { %13619 = vst [vmem:[#allocation7_spill] sm:$0xff] %v10510_v44 }
 0x19a   :  { %1932 = vmatpush2.bf16.msra.mxu0 %v13600_v53  ;;  %1973 = vmatpush2.bf16.msra.mxu1 %v13601_v54  ;;  %v10397_v53 = vcombine.low %v2076_v45, %v2080_v51  ;;  %v10399_v54 = vcombine.high %v2076_v45, %v2080_v51  ;;  %v2168_v45 = vld [vmem:[%s13167_s2 + $0x368] sm:$0xff]  ;;  %v10515_v51 = vcombine.low %v2163_v27, %v2167_v28 }
 0x19b   :  { %1933 = vmatprep.subr.bf16.mxu0 %v13602_v59  ;;  %1974 = vmatprep.subr.bf16.mxu1 %v13603_v60  ;;  %v2067_v59 = vld [vmem:[%s13167_s2 + $0x40] sm:$0xff]  ;;  %v10565_v27 = vcombine.low %v2148_v13, %v2152_v58  ;;  %v10567_v28 = vcombine.high %v2148_v13, %v2152_v58 }
 0x19c   :  { %v2071_v60 = vld [vmem:[%s13167_s2 + $0x60] sm:$0xff]  ;;  %13620 = vst [vmem:[#allocation8_spill] sm:$0xff] %v10515_v51 }
 0x19d   :  { %13629 = vst [vmem:[#allocation17_spill] sm:$0xff] %v10565_v27  ;;  %13630 = vst [vmem:[#allocation18_spill] sm:$0xff] %v10567_v28  ;;  %v2131_v13 = vld [vmem:[%s13167_s2 + $0x240] sm:$0xff] }
 0x19e   :  { %1934 = vmatpush2.bf16.msra.mxu0 %v13604_v61  ;;  %1975 = vmatpush2.bf16.msra.mxu1 %v13605_v62  ;;  %v2068_v61 = vld [vmem:[%s13167_s2 + $0x48] sm:$0xff]  ;;  %v10414_v62 = vcombine.high %v2067_v59, %v2071_v60  ;;  %v2135_v58 = vld [vmem:[%s13167_s2 + $0x260] sm:$0xff] }
 0x19f   :  { %1935 = vmatprep.subr.bf16.mxu0 %v13606_v6  ;;  %1976 = vmatprep.subr.bf16.mxu1 %v13607_v7  ;;  %v2072_v6 = vld [vmem:[%s13167_s2 + $0x68] sm:$0xff]  ;;  %v10419_v7 = vcombine.low %v2067_v59, %v2071_v60  ;;  %v10517_v59 = vcombine.low %v2164_v43, %v2168_v45  ;;  %v10519_v60 = vcombine.high %v2164_v43, %v2168_v45  ;;  %v2139_v43 = vld [vmem:[%s13167_s2 + $0x280] sm:$0xff] }
 0x1a0   :  { %v2143_v45 = vld [vmem:[%s13167_s2 + $0x2a0] sm:$0xff] }
 0x1a1   :  { %13621 = vst [vmem:[#allocation9_spill] sm:$0xff] %v10517_v59  ;;  %13622 = vst [vmem:[#allocation10_spill] sm:$0xff] %v10519_v60 }
 0x1a2   :  { %1936 = vmatpush2.bf16.msra.mxu0 %v13608_v8  ;;  %1977 = vmatpush2.bf16.msra.mxu1 %v13609_v18  ;;  %v10421_v8 = vcombine.low %v2068_v61, %v2072_v6  ;;  %v10423_v18 = vcombine.high %v2068_v61, %v2072_v6  ;;  %v2155_v61 = vld [vmem:[%s13167_s2 + $0x300] sm:$0xff] }
 0x1a3   :  { %1937 = vmatprep.subr.bf16.mxu0 %v13610_v23  ;;  %1978 = vmatprep.subr.bf16.mxu1 %v13611_v24  ;;  %v2059_v23 = vld [vmem:[%s13167_s2] sm:$0xff] }
 0x1a4   :  { %v2063_v24 = vld [vmem:[%s13167_s2 + $0x20] sm:$0xff] }
 0x1a5   :  { %v2159_v6 = vld [vmem:[%s13167_s2 + $0x320] sm:$0xff] }
 0x1a6   :  { %1938 = vmatpush2.bf16.msra.mxu0 %v13612_v25  ;;  %1979 = vmatpush2.bf16.msra.mxu1 %v13613_v34  ;;  %v2060_v25 = vld [vmem:[%s13167_s2 + $0x8] sm:$0xff]  ;;  %v10438_v34 = vcombine.high %v2059_v23, %v2063_v24 }
 0x1a7   :  { %1939 = vmatprep.subr.bf16.mxu0 %v13614_v39  ;;  %1980 = vmatprep.subr.bf16.mxu1 %v13615_v40  ;;  %v2064_v39 = vld [vmem:[%s13167_s2 + $0x28] sm:$0xff]  ;;  %v10443_v40 = vcombine.low %v2059_v23, %v2063_v24  ;;  %v10534_v24 = vcombine.high %v2155_v61, %v2159_v6 }
 0x1a8   :  { %v2156_v23 = vld [vmem:[%s13167_s2 + $0x308] sm:$0xff] }
 0x1a9   :  { %13623 = vst [vmem:[#allocation11_spill] sm:$0xff] %v10534_v24 }
 0x1aa   :  { %1940 = vmatpush2.bf16.msra.mxu0 %v10055_v26  ;;  %1981 = vmatpush2.bf16.msra.mxu1 %v10059_v16  ;;  %v2119_v16 = vld [vmem:[%s13167_s2 + $0x1e0] sm:$0xff] }
 0x1ab   :  { %1941 = vmatprep.subr.bf16.mxu0 %v10061_v14  ;;  %1982 = vmatprep.subr.bf16.mxu1 %v10064_v0  ;;  %v2115_v14 = vld [vmem:[%s13167_s2 + $0x1c0] sm:$0xff] }
 0x1ac   :  { %v10275_v0 = vcombine.low %v2115_v14, %v2119_v16 }
 0x1ae   :  { %1942 = vmatpush2.bf16.msra.mxu0 %v10079_v63  ;;  %1983 = vmatpush2.bf16.msra.mxu1 %v10083_v48  ;;  %v2120_v48 = vld [vmem:[%s13167_s2 + $0x1e8] sm:$0xff]  ;;  %v2107_v63 = vld [vmem:[%s13167_s2 + $0x180] sm:$0xff] }
 0x1af   :  { %1943 = vmatprep.subr.bf16.mxu0 %v10085_v47  ;;  %1984 = vmatprep.subr.bf16.mxu1 %v10088_v42  ;;  %v2116_v42 = vld [vmem:[%s13167_s2 + $0x1c8] sm:$0xff]  ;;  %v10270_v47 = vcombine.high %v2115_v14, %v2119_v16  ;;  %v10445_v14 = vcombine.low %v2060_v25, %v2064_v39  ;;  %v10447_v16 = vcombine.high %v2060_v25, %v2064_v39 }
 0x1b0   :  { %v10279_v26 = vcombine.high %v2116_v42, %v2120_v48  ;;  %v2160_v25 = vld [vmem:[%s13167_s2 + $0x328] sm:$0xff]  ;;  %v10539_v39 = vcombine.low %v2155_v61, %v2159_v6  ;;  %v10582_v6 = vcombine.high %v2139_v43, %v2143_v45 }
 0x1b1   :  { %v2140_v61 = vld [vmem:[%s13167_s2 + $0x288] sm:$0xff] }
 0x1b2   :  { %1944 = vmatpush2.bf16.msra.mxu0 %v10091_v3  ;;  %1985 = vmatpush2.bf16.msra.mxu1 %v10095_v31  ;;  %v10277_v3 = vcombine.low %v2116_v42, %v2120_v48  ;;  %v2111_v31 = vld [vmem:[%s13167_s2 + $0x1a0] sm:$0xff]  ;;  %13624 = vst [vmem:[#allocation12_spill] sm:$0xff] %v10539_v39  ;;  %13631 = vst [vmem:[#allocation19_spill] sm:$0xff] %v10582_v6 }
 0x1b3   :  { %2827 = vmatprep.subr.bf16.mxu0 %v10270_v47  ;;  %2868 = vmatprep.subr.bf16.mxu1 %v10279_v26  ;;  %v10293_v41 = vcombine.low %v2107_v63, %v2111_v31  ;;  %v10295_v50 = vcombine.high %v2107_v63, %v2111_v31  ;;  %v2179_v42 = vld [vmem:[%s13167_s2 + $0x3c0] sm:$0xff]  ;;  %v2180_v63 = vld [vmem:[%s13167_s2 + $0x3c8] sm:$0xff] }
 0x1b4   :  { %v2183_v48 = vld [vmem:[%s13167_s2 + $0x3e0] sm:$0xff] }
 0x1b5   :  { %1946 = vmatmul.mubr.bf16.vlgmr.msra.gmra.mxu0 %v10177_v9  ;;  %1987 = vmatmul.mubr.bf16.vlgmr.msra.gmra.mxu1 %v10177_v9  ;;  %v2108_v9 = vld [vmem:[%s13167_s2 + $0x188] sm:$0xff]  ;;  %v10462_v31 = vcombine.high %v2179_v42, %v2183_v48 }
 0x1b6   :  { %2828 = vmatpush1.bf16.msra.mxu0 %v10275_v0  ;;  %2869 = vmatpush1.bf16.msra.mxu1 %v10277_v3  ;;  %v10307_v49 = vcombine.low %v2108_v9, %v2112_v55  ;;  %v10309_v2 = vcombine.high %v2108_v9, %v2112_v55  ;;  %v2184_v9 = vld [vmem:[%s13167_s2 + $0x3e8] sm:$0xff]  ;;  %v10467_v55 = vcombine.low %v2179_v42, %v2183_v48 }
 0x1b7   :  { %2829 = vmatprep.subr.bf16.mxu0 %v10295_v50  ;;  %v10469_v56 = vcombine.low %v2180_v63, %v2184_v9  ;;  %v10471_v57 = vcombine.high %v2180_v63, %v2184_v9  ;;  %v10541_v42 = vcombine.low %v2156_v23, %v2160_v25  ;;  %v10543_v48 = vcombine.high %v2156_v23, %v2160_v25  ;;  %v2147_v63 = vld [vmem:[%s13167_s2 + $0x2c0] sm:$0xff]  ;;  %v2144_v23 = vld [vmem:[%s13167_s2 + $0x2a8] sm:$0xff] }
 0x1b8   :  { %2870 = vmatprep.subr.bf16.mxu1 %v10309_v2  ;;  %v2151_v9 = vld [vmem:[%s13167_s2 + $0x2e0] sm:$0xff]  ;;  %v10587_v25 = vcombine.low %v2139_v43, %v2143_v45  ;;  %v2132_v43 = vld [vmem:[%s13167_s2 + $0x248] sm:$0xff]  ;;  %v10606_v45 = vcombine.high %v2131_v13, %v2135_v58 }
 0x1b9   :  { %13625 = vst [vmem:[#allocation13_spill] sm:$0xff] %v10541_v42  ;;  %13626 = vst [vmem:[#allocation14_spill] sm:$0xff] %v10543_v48  ;;  %v10558_v32 = vcombine.high %v2147_v63, %v2151_v9  ;;  %v10563_v5 = vcombine.low %v2147_v63, %v2151_v9  ;;  %v10589_v63 = vcombine.low %v2140_v61, %v2144_v23 }
 0x1ba   :  { %2830 = vmatpush1.bf16.msra.mxu0 %v10293_v41  ;;  %2871 = vmatpush1.bf16.msra.mxu1 %v10307_v49  ;;  %13632 = vst [vmem:[#allocation20_spill] sm:$0xff] %v10587_v25  ;;  %v10591_v9 = vcombine.high %v2140_v61, %v2144_v23  ;;  %13635 = vst [vmem:[#allocation23_spill] sm:$0xff] %v10606_v45  ;;  %v2136_v61 = vld [vmem:[%s13167_s2 + $0x268] sm:$0xff]  ;;  %v10611_v23 = vcombine.low %v2131_v13, %v2135_v58 }
 0x1bb   :  { %2831 = vmatprep.subr.bf16.mxu0 %v10311_v1  ;;  %2872 = vmatprep.subr.bf16.mxu1 %v10320_v33  ;;  %13627 = vst [vmem:[#allocation15_spill] sm:$0xff] %v10558_v32  ;;  %13628 = vst [vmem:[#allocation16_spill] sm:$0xff] %v10563_v5  ;;  %v2124_v13 = vld [vmem:[%s13167_s2 + $0x208] sm:$0xff] }
 0x1bc   :  { %13633 = vst [vmem:[#allocation21_spill] sm:$0xff] %v10589_v63  ;;  %13634 = vst [vmem:[#allocation22_spill] sm:$0xff] %v10591_v9 }
 0x1bd   :  { %13636 = vst [vmem:[#allocation24_spill] sm:$0xff] %v10611_v23 }
 0x1be   :  { %2832 = vmatpush1.bf16.msra.mxu0 %v10336_v11  ;;  %2873 = vmatpush1.bf16.msra.mxu1 %v10340_v15 }
 0x1bf   :  { %2833 = vmatprep.subr.bf16.mxu0 %v10342_v19  ;;  %2874 = vmatprep.subr.bf16.mxu1 %v10345_v20 }
 0x1c2   :  { %2834 = vmatpush1.bf16.msra.mxu0 %v10360_v29  ;;  %2875 = vmatpush1.bf16.msra.mxu1 %v10364_v30 }
 0x1c3   :  { %2835 = vmatprep.subr.bf16.mxu0 %v10366_v35  ;;  %2876 = vmatprep.subr.bf16.mxu1 %v10369_v36 }
 0x1c6   :  { %2836 = vmatpush1.bf16.msra.mxu0 %v10372_v37  ;;  %2877 = vmatpush1.bf16.msra.mxu1 %v10376_v38 }
 0x1c7   :  { %2837 = vmatprep.subr.bf16.mxu0 %v10390_v46  ;;  %2878 = vmatprep.subr.bf16.mxu1 %v10399_v54 }
 0x1ca   :  { %2838 = vmatpush1.bf16.msra.mxu0 %v10395_v52  ;;  %2879 = vmatpush1.bf16.msra.mxu1 %v10397_v53 }
 0x1cb   :  { %2839 = vmatprep.subr.bf16.mxu0 %v10414_v62  ;;  %2880 = vmatprep.subr.bf16.mxu1 %v10423_v18 }
 0x1ce   :  { %2840 = vmatpush1.bf16.msra.mxu0 %v10419_v7  ;;  %2881 = vmatpush1.bf16.msra.mxu1 %v10421_v8 }
 0x1cf   :  { %2841 = vmatprep.subr.bf16.mxu0 %v10438_v34  ;;  %2882 = vmatprep.subr.bf16.mxu1 %v10447_v16 }
 0x1d2   :  { %2842 = vmatpush1.bf16.msra.mxu0 %v10443_v40  ;;  %2883 = vmatpush1.bf16.msra.mxu1 %v10445_v14 }
 0x1d3   :  { %2843 = vmatprep.subr.bf16.mxu0 %v10462_v31  ;;  %2884 = vmatprep.subr.bf16.mxu1 %v10471_v57 }
 0x1d6   :  { %2844 = vmatpush2.bf16.msra.mxu0 %v10467_v55  ;;  %2885 = vmatpush2.bf16.msra.mxu1 %v10469_v56 }
 0x1d7   :  { %2845 = vmatprep.subr.bf16.mxu0 %v10486_v4  ;;  %2886 = vmatprep.subr.bf16.mxu1 %v10495_v22 }
 0x1da   :  { %2846 = vmatpush2.bf16.msra.mxu0 %v10491_v10  ;;  %2887 = vmatpush2.bf16.msra.mxu1 %v10493_v21 }
 0x1db   :  { %2847 = vmatprep.subr.bf16.mxu0 %v10510_v44  ;;  %2888 = vmatprep.subr.bf16.mxu1 %v10519_v60 }
 0x1de   :  { %2848 = vmatpush2.bf16.msra.mxu0 %v10515_v51  ;;  %2889 = vmatpush2.bf16.msra.mxu1 %v10517_v59 }
 0x1df   :  { %2849 = vmatprep.subr.bf16.mxu0 %v10534_v24  ;;  %2890 = vmatprep.subr.bf16.mxu1 %v10543_v48 }
 0x1e2   :  { %2850 = vmatpush2.bf16.msra.mxu0 %v10539_v39  ;;  %2891 = vmatpush2.bf16.msra.mxu1 %v10541_v42 }
 0x1e3   :  { %2851 = vmatprep.subr.bf16.mxu0 %v10558_v32  ;;  %2892 = vmatprep.subr.bf16.mxu1 %v10567_v28 }
 0x1e6   :  { %2852 = vmatpush2.bf16.msra.mxu0 %v10563_v5  ;;  %2893 = vmatpush2.bf16.msra.mxu1 %v10565_v27 }
 0x1e7   :  { %2853 = vmatprep.subr.bf16.mxu0 %v10582_v6  ;;  %2894 = vmatprep.subr.bf16.mxu1 %v10591_v9  ;;  %v10615_v9 = vcombine.high %v2132_v43, %v2136_v61  ;;  %v2127_v6 = vld [vmem:[%s13167_s2 + $0x220] sm:$0xff] }
 0x1e9   :  { %13638 = vst [vmem:[#allocation26_spill] sm:$0xff] %v10615_v9 }
 0x1ea   :  { %2854 = vmatpush2.bf16.msra.mxu0 %v10587_v25  ;;  %2895 = vmatpush2.bf16.msra.mxu1 %v10589_v63  ;;  %v10613_v25 = vcombine.low %v2132_v43, %v2136_v61  ;;  %v2123_v63 = vld [vmem:[%s13167_s2 + $0x200] sm:$0xff]  ;;  %v2128_v43 = vld [vmem:[%s13167_s2 + $0x228] sm:$0xff] }
 0x1eb   :  { %2855 = vmatprep.subr.bf16.mxu0 %v10606_v45  ;;  %2896 = vmatprep.subr.bf16.mxu1 %v10615_v9  ;;  %v10630_v58 = vcombine.high %v2123_v63, %v2127_v6  ;;  %v10635_v61 = vcombine.low %v2123_v63, %v2127_v6  ;;  %v10639_v9 = vcombine.high %v2124_v13, %v2128_v43  ;;  %v2121_v45 = vld [vmem:[%s13167_s2 + $0x1f0] sm:$0xff]  ;;  %v2118_v6 = vld [vmem:[%s13167_s2 + $0x1d8] sm:$0xff] }
 0x1ec   :  { %13637 = vst [vmem:[#allocation25_spill] sm:$0xff] %v10613_v25 }
 0x1ed   :  { %13639 = vst [vmem:[#allocation27_spill] sm:$0xff] %v10630_v58  ;;  %13640 = vst [vmem:[#allocation28_spill] sm:$0xff] %v10635_v61 }
 0x1ee   :  { %2856 = vmatpush2.bf16.msra.mxu0 %v10611_v23  ;;  %2897 = vmatpush2.bf16.msra.mxu1 %v10613_v25  ;;  %v10637_v23 = vcombine.low %v2124_v13, %v2128_v43  ;;  %13642 = vst [vmem:[#allocation30_spill] sm:$0xff] %v10639_v9  ;;  %v2117_v25 = vld [vmem:[%s13167_s2 + $0x1d0] sm:$0xff]  ;;  %v2122_v13 = vld [vmem:[%s13167_s2 + $0x1f8] sm:$0xff] }
 0x1ef   :  { %2857 = vmatprep.subr.bf16.mxu0 %v10630_v58  ;;  %2898 = vmatprep.subr.bf16.mxu1 %v10639_v9  ;;  %v10654_v63 = vcombine.high %v2117_v25, %v2121_v45  ;;  %v10659_v43 = vcombine.low %v2117_v25, %v2121_v45  ;;  %v10663_v9 = vcombine.high %v2118_v6, %v2122_v13  ;;  %v8333_v25 = vld [vmem:[%s13168_s0 + $0x18] sm:$0xff] }
 0x1f0   :  { %13641 = vst [vmem:[#allocation29_spill] sm:$0xff] %v10637_v23  ;;  %v2000_v42 = vunpack.c.l.bf16 %v8333_v25 }
 0x1f1   :  { %13643 = vst [vmem:[#allocation31_spill] sm:$0xff] %v10654_v63  ;;  %13644 = vst [vmem:[#allocation32_spill] sm:$0xff] %v10663_v9 }
 0x1f2   :  { %2858 = vmatpush2.bf16.msra.mxu0 %v10635_v61  ;;  %2899 = vmatpush2.bf16.msra.mxu1 %v10637_v23  ;;  %v10661_v61 = vcombine.low %v2118_v6, %v2122_v13  ;;  %v8332_v23 = vld [vmem:[%s13168_s0 + $0x10] sm:$0xff] }
 0x1f3   :  { %2909 = vmatprep.subr.bf16.mxu0 %v10654_v63  ;;  %2950 = vmatprep.subr.bf16.mxu1 %v10663_v9  ;;  %v1998_v58 = vunpack.c.l.bf16 %v8332_v23  ;;  %v1999_v27 = vunpack.c.h.bf16 %v8332_v23  ;;  %v2001_v23 = vunpack.c.h.bf16 %v8333_v25 }
 0x235   :  { %v1865_v5 = vpop.f32.mrf.mxu0  ;;  %v1906_v28 = vpop.f32.mrf.mxu1 }
 0x236   :  { %v2002_v45 = vadd.f32 %v1998_v58, %v1865_v5  ;;  %v2004_v51 = vadd.f32 %v2000_v42, %v1906_v28  ;;  %v8335_v28 = vld [vmem:[%s13170_s1 + $0x68] sm:$0xff] }
 0x237   :  { %v1867_v32 = vpop.f32.mrf.mxu0  ;;  %v1908_v6 = vpop.f32.mrf.mxu1 }
 0x238   :  { %v2017_v13 = vmul.f32 0.5, %v2002_v45  ;;  %v2003_v63 = vadd.f32 %v1999_v27, %v1867_v32  ;;  %v2005_v60 = vadd.f32 %v2001_v23, %v1908_v6  ;;  %v2011_v23 = vunpack.c.l.bf16 %v8335_v28 }
 0x239   :  { %v1869_v39 = vpop.f32.mrf.mxu0  ;;  %v1910_v9 = vpop.f32.mrf.mxu1 }
 0x23a   :  { %9160 = vtanh.f32 %v2017_v13  ;;  %v2021_v48 = vmul.f32 0.5, %v2003_v63  ;;  %v2026_v44 = vmul.f32 0.5, %v2005_v60 }
 0x23b   :  { %v1870_v24 = vpop.f32.mrf.mxu0  ;;  %v1911_v59 = vpop.f32.mrf.mxu1 }
 0x23c   :  { %9162 = vtanh.f32 %v2021_v48 }
 0x23d   :  { %9164 = vtanh.f32 %v2004_v51 }
 0x23e   :  { %9166 = vtanh.f32 %v2026_v44 }
 0x247   :  { %v9161_v21 = vpop.eup %9160 }
 0x248   :  { %v2019_v10 = vmul.f32 0.5, %v9161_v21 }
 0x249   :  { %v9163_v5 = vpop.eup %9162 }
 0x24a   :  { %v2020_v58 = vadd.f32 0.5, %v2019_v10  ;;  %v2023_v22 = vmul.f32 0.5, %v9163_v5  ;;  %v9165_v32 = vpop.eup %9164 }
 0x24b   :  { %v9167_v59 = vpop.eup %9166 }
 0x24c   :  { %v2024_v45 = vadd.f32 0.5, %v2023_v22  ;;  %v2031_v27 = vmul.f32 %v9165_v32, %v2020_v58  ;;  %v2028_v24 = vmul.f32 0.5, %v9167_v59 }
 0x24e   :  { %v2030_v39 = vmul.f32 %v2024_v45, %v10174_v17  ;;  %v2029_v51 = vadd.f32 0.5, %v2028_v24  ;;  %v8334_v17 = vld [vmem:[%s13170_s1 + $0x60] sm:$0xff]  ;;  %v2012_v24 = vunpack.c.h.bf16 %v8335_v28 }
 0x24f   :  { %v2009_v10 = vunpack.c.l.bf16 %v8334_v17  ;;  %v2010_v21 = vunpack.c.h.bf16 %v8334_v17 }
 0x250   :  { %v10674_v9 = vadd.f32 %v2031_v27, %v2030_v39 }
 0x252   :  { %13645 = vst [vmem:[#allocation33_spill] sm:$0xff] %v10674_v9  ;;  %9168 = vtanh.f32 %v10674_v9 }
 0x25f   :  { %v9169_v42 = vpop.eup %9168 }
 0x260   :  { %v2034_v60 = vmul.f32 %v9169_v42, %v2029_v51 }
 0x262   :  { %v10677_v48 = vpack.c.bf16 %v2034_v60, %v2034_v60 }
 0x264   :  { %8336 = vst [vmem:[%s13169_s3 + $0x4] sm:$0xf] %v10677_v48 }
 0x275   :  { %v1947_v22 = vpop.f32.mrf.mxu0  ;;  %v1988_v44 = vpop.f32.mrf.mxu1 }
 0x276   :  { %v2013_v63 = vadd.f32 %v2009_v10, %v1947_v22  ;;  %v2015_v59 = vadd.f32 %v2011_v23, %v1988_v44 }
 0x277   :  { %v1949_v25 = vpop.f32.mrf.mxu0  ;;  %v1990_v6 = vpop.f32.mrf.mxu1 }
 0x278   :  { %v2035_v13 = vmul.f32 0.5, %v2013_v63  ;;  %v2014_v5 = vadd.f32 %v2010_v21, %v1949_v25  ;;  %v2016_v51 = vadd.f32 %v2012_v24, %v1990_v6 }
 0x279   :  { %v1951_v58 = vpop.f32.mrf.mxu0  ;;  %v1992_v45 = vpop.f32.mrf.mxu1 }
 0x27a   :  { %9170 = vtanh.f32 %v2035_v13  ;;  %v2039_v32 = vmul.f32 0.5, %v2014_v5  ;;  %v2044_v42 = vmul.f32 0.5, %v2016_v51  ;;  %v2109_v45 = vld [vmem:[%s13167_s2 + $0x190] sm:$0xff] }
 0x27b   :  { %v1952_v39 = vpop.f32.mrf.mxu0  ;;  %v1993_v27 = vpop.f32.mrf.mxu1  ;;  %v2105_v51 = vld [vmem:[%s13167_s2 + $0x170] sm:$0xff] }
 0x27c   :  { %9172 = vtanh.f32 %v2039_v32  ;;  %v2114_v32 = vld [vmem:[%s13167_s2 + $0x1b8] sm:$0xff]  ;;  %v2101_v27 = vld [vmem:[%s13167_s2 + $0x150] sm:$0xff] }
 0x27d   :  { %9174 = vtanh.f32 %v2015_v59 }
 0x27e   :  { %9176 = vtanh.f32 %v2044_v42  ;;  %v2102_v42 = vld [vmem:[%s13167_s2 + $0x158] sm:$0xff] }
 0x287   :  { %v9171_v60 = vpop.eup %9170 }
 0x288   :  { %v2037_v17 = vmul.f32 0.5, %v9171_v60  ;;  %v2106_v60 = vld [vmem:[%s13167_s2 + $0x178] sm:$0xff] }
 0x289   :  { %v9173_v10 = vpop.eup %9172 }
 0x28a   :  { %v2038_v22 = vadd.f32 0.5, %v2037_v17  ;;  %v2041_v9 = vmul.f32 0.5, %v9173_v10  ;;  %v9175_v21 = vpop.eup %9174 }
 0x28b   :  { %v9177_v44 = vpop.eup %9176 }
 0x28c   :  { %v2042_v63 = vadd.f32 0.5, %v2041_v9  ;;  %v2049_v13 = vmul.f32 %v9175_v21, %v2038_v22  ;;  %v2046_v28 = vmul.f32 0.5, %v9177_v44  ;;  %v2113_v9 = vld [vmem:[%s13167_s2 + $0x1b0] sm:$0xff]  ;;  %v10732_v22 = vcombine.high %v2101_v27, %v2105_v51  ;;  %v2098_v44 = vld [vmem:[%s13167_s2 + $0x138] sm:$0xff] }
 0x28d   :  { %v10711_v59 = vcombine.high %v2109_v45, %v2113_v9  ;;  %v10728_v17 = vcombine.low %v2109_v45, %v2113_v9  ;;  %v2093_v21 = vld [vmem:[%s13167_s2 + $0x110] sm:$0xff] }
 0x28e   :  { %v2048_v25 = vmul.f32 %v2042_v63, %v10189_v12  ;;  %v2047_v23 = vadd.f32 0.5, %v2046_v28  ;;  %v2110_v12 = vld [vmem:[%s13167_s2 + $0x198] sm:$0xff]  ;;  %v10734_v63 = vcombine.high %v2102_v42, %v2106_v60  ;;  %v10752_v28 = vcombine.low %v2101_v27, %v2105_v51  ;;  %v2085_v45 = vld [vmem:[%s13167_s2 + $0xd0] sm:$0xff] }
 0x28f   :  { %v10713_v24 = vcombine.high %v2110_v12, %v2114_v32  ;;  %v10730_v10 = vcombine.low %v2110_v12, %v2114_v32  ;;  %v2089_v9 = vld [vmem:[%s13167_s2 + $0xf0] sm:$0xff]  ;;  %v2086_v12 = vld [vmem:[%s13167_s2 + $0xd8] sm:$0xff] }
 0x290   :  { %v10690_v5 = vadd.f32 %v2049_v13, %v2048_v25  ;;  %v2097_v25 = vld [vmem:[%s13167_s2 + $0x130] sm:$0xff]  ;;  %v2094_v13 = vld [vmem:[%s13167_s2 + $0x118] sm:$0xff]  ;;  %13646 = vst [vmem:[#allocation34_spill] sm:$0xff] %v10752_v28  ;;  %v10782_v51 = vcombine.high %v2085_v45, %v2089_v9 }
 0x291   :  { %v2090_v32 = vld [vmem:[%s13167_s2 + $0xf8] sm:$0xff]  ;;  %v10778_v27 = vcombine.low %v2094_v13, %v2098_v44 }
 0x292   :  { %9178 = vtanh.f32 %v10690_v5  ;;  %13652 = vst [vmem:[#allocation40_spill] sm:$0xff] %v10782_v51 }
 0x293   :  { %13651 = vst [vmem:[#allocation39_spill] sm:$0xff] %v10778_v27 }
 0x29f   :  { %v9179_v6 = vpop.eup %9178 }
 0x2a0   :  { %v2052_v58 = vmul.f32 %v9179_v6, %v2047_v23  ;;  %v10754_v23 = vcombine.low %v2102_v42, %v2106_v60  ;;  %v10758_v6 = vcombine.high %v2093_v21, %v2097_v25  ;;  %v10784_v42 = vcombine.high %v2086_v12, %v2090_v32  ;;  %v2077_v60 = vld [vmem:[%s13167_s2 + $0x90] sm:$0xff] }
 0x2a2   :  { %v2056_v39 = vpack.c.bf16 %v2052_v58, %v2052_v58  ;;  %13647 = vst [vmem:[#allocation35_spill] sm:$0xff] %v10754_v23  ;;  %13648 = vst [vmem:[#allocation36_spill] sm:$0xff] %v10758_v6  ;;  %v10760_v58 = vcombine.high %v2094_v13, %v2098_v44  ;;  %v10800_v13 = vcombine.low %v2085_v45, %v2089_v9  ;;  %v2070_v45 = vld [vmem:[%s13167_s2 + $0x58] sm:$0xff] }
 0x2a3   :  { %13653 = vst [vmem:[#allocation41_spill] sm:$0xff] %v10784_v42  ;;  %v10802_v44 = vcombine.low %v2086_v12, %v2090_v32  ;;  %v2074_v9 = vld [vmem:[%s13167_s2 + $0x78] sm:$0xff] }
 0x2a4   :  { %8337 = vst [vmem:[%s13171_s4 + $0x18] sm:$0xf] %v2056_v39  ;;  %2859 = vmatprep.mubr.bf16.mxu0 %v2056_v39  ;;  %2900 = vmatprep.mubr.bf16.mxu1 %v2056_v39  ;;  %13649 = vst [vmem:[#allocation37_spill] sm:$0xff] %v10760_v58 }
 0x2a5   :  { %2860 = vmatmul.mubr.bf16.vlgmr.msra.gmra.mxu0 %v10677_v48  ;;  %2901 = vmatmul.mubr.bf16.vlgmr.msra.gmra.mxu1 %v10677_v48  ;;  %13654 = vst [vmem:[#allocation42_spill] sm:$0xff] %v10800_v13  ;;  %13655 = vst [vmem:[#allocation43_spill] sm:$0xff] %v10802_v44 }
 0x2a6   :  { %2910 = vmatpush1.bf16.msra.mxu0 %v10659_v43  ;;  %2951 = vmatpush1.bf16.msra.mxu1 %v10661_v61 }
 0x2a7   :  { %2941 = vmatprep.mubr.bf16.mxu0 %v2056_v39  ;;  %2982 = vmatprep.mubr.bf16.mxu1 %v2056_v39  ;;  %v10776_v39 = vcombine.low %v2093_v21, %v2097_v25  ;;  %v2078_v21 = vld [vmem:[%s13167_s2 + $0x98] sm:$0xff] }
 0x2a8   :  { %2911 = vmatprep.subr.bf16.mxu0 %v10711_v59  ;;  %2952 = vmatprep.subr.bf16.mxu1 %v10713_v24  ;;  %v2082_v25 = vld [vmem:[%s13167_s2 + $0xb8] sm:$0xff] }
 0x2a9   :  { %13650 = vst [vmem:[#allocation38_spill] sm:$0xff] %v10776_v39  ;;  %v10826_v32 = vcombine.low %v2078_v21, %v2082_v25 }
 0x2aa   :  { %2912 = vmatpush1.bf16.msra.mxu0 %v10728_v17  ;;  %2953 = vmatpush1.bf16.msra.mxu1 %v10730_v10 }
 0x2ab   :  { %2913 = vmatprep.subr.bf16.mxu0 %v10732_v22  ;;  %2954 = vmatprep.subr.bf16.mxu1 %v10734_v63  ;;  %13659 = vst [vmem:[#allocation47_spill] sm:$0xff] %v10826_v32 }
 0x2ae   :  { %2914 = vmatpush1.bf16.msra.mxu0 %v10752_v28  ;;  %2955 = vmatpush1.bf16.msra.mxu1 %v10754_v23  ;;  %v2081_v23 = vld [vmem:[%s13167_s2 + $0xb0] sm:$0xff] }
 0x2af   :  { %2915 = vmatprep.subr.bf16.mxu0 %v10758_v6  ;;  %2956 = vmatprep.subr.bf16.mxu1 %v10760_v58  ;;  %v10806_v58 = vcombine.high %v2077_v60, %v2081_v23  ;;  %v10808_v6 = vcombine.high %v2078_v21, %v2082_v25  ;;  %v2069_v28 = vld [vmem:[%s13167_s2 + $0x50] sm:$0xff]  ;;  %v10824_v12 = vcombine.low %v2077_v60, %v2081_v23  ;;  %v2062_v23 = vld [vmem:[%s13167_s2 + $0x18] sm:$0xff] }
 0x2b0   :  { %v2066_v60 = vld [vmem:[%s13167_s2 + $0x38] sm:$0xff]  ;;  %v10850_v25 = vcombine.low %v2070_v45, %v2074_v9 }
 0x2b1   :  { %13656 = vst [vmem:[#allocation44_spill] sm:$0xff] %v10806_v58  ;;  %13657 = vst [vmem:[#allocation45_spill] sm:$0xff] %v10808_v6 }
 0x2b2   :  { %2916 = vmatpush1.bf16.msra.mxu0 %v10776_v39  ;;  %2957 = vmatpush1.bf16.msra.mxu1 %v10778_v27  ;;  %v2073_v27 = vld [vmem:[%s13167_s2 + $0x70] sm:$0xff]  ;;  %13658 = vst [vmem:[#allocation46_spill] sm:$0xff] %v10824_v12  ;;  %13663 = vst [vmem:[#allocation51_spill] sm:$0xff] %v10850_v25 }
 0x2b3   :  { %2917 = vmatprep.subr.bf16.mxu0 %v10782_v51  ;;  %2958 = vmatprep.subr.bf16.mxu1 %v10784_v42  ;;  %v10830_v42 = vcombine.high %v2069_v28, %v2073_v27  ;;  %v10832_v51 = vcombine.high %v2070_v45, %v2074_v9  ;;  %v2061_v39 = vld [vmem:[%s13167_s2 + $0x10] sm:$0xff]  ;;  %v10848_v21 = vcombine.low %v2069_v28, %v2073_v27  ;;  %v2182_v28 = vld [vmem:[%s13167_s2 + $0x3d8] sm:$0xff] }
 0x2b4   :  { %v2186_v27 = vld [vmem:[%s13167_s2 + $0x3f8] sm:$0xff]  ;;  %v10874_v9 = vcombine.low %v2062_v23, %v2066_v60 }
 0x2b5   :  { %13660 = vst [vmem:[#allocation48_spill] sm:$0xff] %v10830_v42  ;;  %13661 = vst [vmem:[#allocation49_spill] sm:$0xff] %v10832_v51 }
 0x2b6   :  { %2918 = vmatpush1.bf16.msra.mxu0 %v10800_v13  ;;  %2959 = vmatpush1.bf16.msra.mxu1 %v10802_v44  ;;  %v2065_v44 = vld [vmem:[%s13167_s2 + $0x30] sm:$0xff]  ;;  %13662 = vst [vmem:[#allocation50_spill] sm:$0xff] %v10848_v21  ;;  %13667 = vst [vmem:[#allocation55_spill] sm:$0xff] %v10874_v9 }
 0x2b7   :  { %2919 = vmatprep.subr.bf16.mxu0 %v10806_v58  ;;  %2960 = vmatprep.subr.bf16.mxu1 %v10808_v6  ;;  %v10854_v6 = vcombine.high %v2061_v39, %v2065_v44  ;;  %v10856_v58 = vcombine.high %v2062_v23, %v2066_v60  ;;  %v2181_v13 = vld [vmem:[%s13167_s2 + $0x3d0] sm:$0xff]  ;;  %v10872_v45 = vcombine.low %v2061_v39, %v2065_v44  ;;  %v2174_v39 = vld [vmem:[%s13167_s2 + $0x398] sm:$0xff] }
 0x2b8   :  { %v2178_v44 = vld [vmem:[%s13167_s2 + $0x3b8] sm:$0xff]  ;;  %v10898_v60 = vcombine.low %v2182_v28, %v2186_v27 }
 0x2b9   :  { %13664 = vst [vmem:[#allocation52_spill] sm:$0xff] %v10854_v6  ;;  %13665 = vst [vmem:[#allocation53_spill] sm:$0xff] %v10856_v58 }
 0x2ba   :  { %2920 = vmatpush1.bf16.msra.mxu0 %v10824_v12  ;;  %2961 = vmatpush1.bf16.msra.mxu1 %v10826_v32  ;;  %v2185_v32 = vld [vmem:[%s13167_s2 + $0x3f0] sm:$0xff]  ;;  %13666 = vst [vmem:[#allocation54_spill] sm:$0xff] %v10872_v45  ;;  %13671 = vst [vmem:[#allocation59_spill] sm:$0xff] %v10898_v60 }
 0x2bb   :  { %2921 = vmatprep.subr.bf16.mxu0 %v10830_v42  ;;  %2962 = vmatprep.subr.bf16.mxu1 %v10832_v51  ;;  %v10878_v51 = vcombine.high %v2181_v13, %v2185_v32  ;;  %v10880_v42 = vcombine.high %v2182_v28, %v2186_v27  ;;  %v2173_v12 = vld [vmem:[%s13167_s2 + $0x390] sm:$0xff]  ;;  %v10896_v23 = vcombine.low %v2181_v13, %v2185_v32  ;;  %v2166_v13 = vld [vmem:[%s13167_s2 + $0x358] sm:$0xff] }
 0x2bc   :  { %v2170_v32 = vld [vmem:[%s13167_s2 + $0x378] sm:$0xff]  ;;  %v10922_v27 = vcombine.low %v2174_v39, %v2178_v44 }
 0x2bd   :  { %13668 = vst [vmem:[#allocation56_spill] sm:$0xff] %v10878_v51  ;;  %13669 = vst [vmem:[#allocation57_spill] sm:$0xff] %v10880_v42 }
 0x2be   :  { %2922 = vmatpush1.bf16.msra.mxu0 %v10848_v21  ;;  %2963 = vmatpush1.bf16.msra.mxu1 %v10850_v25  ;;  %v2177_v25 = vld [vmem:[%s13167_s2 + $0x3b0] sm:$0xff]  ;;  %13670 = vst [vmem:[#allocation58_spill] sm:$0xff] %v10896_v23  ;;  %13675 = vst [vmem:[#allocation63_spill] sm:$0xff] %v10922_v27 }
 0x2bf   :  { %2923 = vmatprep.subr.bf16.mxu0 %v10854_v6  ;;  %2964 = vmatprep.subr.bf16.mxu1 %v10856_v58  ;;  %v10902_v58 = vcombine.high %v2173_v12, %v2177_v25  ;;  %v10904_v6 = vcombine.high %v2174_v39, %v2178_v44  ;;  %v2165_v21 = vld [vmem:[%s13167_s2 + $0x350] sm:$0xff]  ;;  %v10920_v28 = vcombine.low %v2173_v12, %v2177_v25  ;;  %v2158_v12 = vld [vmem:[%s13167_s2 + $0x318] sm:$0xff] }
 0x2c0   :  { %v2162_v25 = vld [vmem:[%s13167_s2 + $0x338] sm:$0xff]  ;;  %v10946_v44 = vcombine.low %v2166_v13, %v2170_v32 }
 0x2c1   :  { %13672 = vst [vmem:[#allocation60_spill] sm:$0xff] %v10902_v58  ;;  %13673 = vst [vmem:[#allocation61_spill] sm:$0xff] %v10904_v6 }
 0x2c2   :  { %2924 = vmatpush1.bf16.msra.mxu0 %v10872_v45  ;;  %2965 = vmatpush1.bf16.msra.mxu1 %v10874_v9  ;;  %v2169_v9 = vld [vmem:[%s13167_s2 + $0x370] sm:$0xff]  ;;  %13674 = vst [vmem:[#allocation62_spill] sm:$0xff] %v10920_v28  ;;  %13679 = vst [vmem:[#allocation67_spill] sm:$0xff] %v10946_v44 }
 0x2c3   :  { %2925 = vmatprep.subr.bf16.mxu0 %v10878_v51  ;;  %2966 = vmatprep.subr.bf16.mxu1 %v10880_v42  ;;  %v10926_v42 = vcombine.high %v2165_v21, %v2169_v9  ;;  %v10928_v51 = vcombine.high %v2166_v13, %v2170_v32  ;;  %v2157_v45 = vld [vmem:[%s13167_s2 + $0x310] sm:$0xff]  ;;  %v10944_v39 = vcombine.low %v2165_v21, %v2169_v9  ;;  %v2150_v21 = vld [vmem:[%s13167_s2 + $0x2d8] sm:$0xff] }
 0x2c4   :  { %v2154_v9 = vld [vmem:[%s13167_s2 + $0x2f8] sm:$0xff]  ;;  %v10970_v32 = vcombine.low %v2158_v12, %v2162_v25 }
 0x2c5   :  { %13676 = vst [vmem:[#allocation64_spill] sm:$0xff] %v10926_v42  ;;  %13677 = vst [vmem:[#allocation65_spill] sm:$0xff] %v10928_v51 }
 0x2c6   :  { %2926 = vmatpush2.bf16.msra.mxu0 %v10896_v23  ;;  %2967 = vmatpush2.bf16.msra.mxu1 %v10898_v60  ;;  %v2161_v60 = vld [vmem:[%s13167_s2 + $0x330] sm:$0xff]  ;;  %13678 = vst [vmem:[#allocation66_spill] sm:$0xff] %v10944_v39  ;;  %13683 = vst [vmem:[#allocation71_spill] sm:$0xff] %v10970_v32 }
 0x2c7   :  { %2927 = vmatprep.subr.bf16.mxu0 %v10902_v58  ;;  %2968 = vmatprep.subr.bf16.mxu1 %v10904_v6  ;;  %v10950_v6 = vcombine.high %v2157_v45, %v2161_v60  ;;  %v10952_v58 = vcombine.high %v2158_v12, %v2162_v25  ;;  %v2149_v23 = vld [vmem:[%s13167_s2 + $0x2d0] sm:$0xff]  ;;  %v10968_v13 = vcombine.low %v2157_v45, %v2161_v60  ;;  %v2142_v45 = vld [vmem:[%s13167_s2 + $0x298] sm:$0xff] }
 0x2c8   :  { %v2146_v60 = vld [vmem:[%s13167_s2 + $0x2b8] sm:$0xff]  ;;  %v10994_v25 = vcombine.low %v2150_v21, %v2154_v9 }
 0x2c9   :  { %13680 = vst [vmem:[#allocation68_spill] sm:$0xff] %v10950_v6  ;;  %13681 = vst [vmem:[#allocation69_spill] sm:$0xff] %v10952_v58 }
 0x2ca   :  { %2928 = vmatpush2.bf16.msra.mxu0 %v10920_v28  ;;  %2969 = vmatpush2.bf16.msra.mxu1 %v10922_v27  ;;  %v2153_v27 = vld [vmem:[%s13167_s2 + $0x2f0] sm:$0xff]  ;;  %13682 = vst [vmem:[#allocation70_spill] sm:$0xff] %v10968_v13  ;;  %13687 = vst [vmem:[#allocation75_spill] sm:$0xff] %v10994_v25 }
 0x2cb   :  { %2929 = vmatprep.subr.bf16.mxu0 %v10926_v42  ;;  %2970 = vmatprep.subr.bf16.mxu1 %v10928_v51  ;;  %v10974_v51 = vcombine.high %v2149_v23, %v2153_v27  ;;  %v10976_v42 = vcombine.high %v2150_v21, %v2154_v9  ;;  %v2141_v28 = vld [vmem:[%s13167_s2 + $0x290] sm:$0xff]  ;;  %v10992_v12 = vcombine.low %v2149_v23, %v2153_v27  ;;  %v2134_v23 = vld [vmem:[%s13167_s2 + $0x258] sm:$0xff] }
 0x2cc   :  { %v2138_v27 = vld [vmem:[%s13167_s2 + $0x278] sm:$0xff]  ;;  %v11018_v9 = vcombine.low %v2142_v45, %v2146_v60 }
 0x2cd   :  { %13684 = vst [vmem:[#allocation72_spill] sm:$0xff] %v10974_v51  ;;  %13685 = vst [vmem:[#allocation73_spill] sm:$0xff] %v10976_v42 }
 0x2ce   :  { %2930 = vmatpush2.bf16.msra.mxu0 %v10944_v39  ;;  %2971 = vmatpush2.bf16.msra.mxu1 %v10946_v44  ;;  %v2145_v44 = vld [vmem:[%s13167_s2 + $0x2b0] sm:$0xff]  ;;  %13686 = vst [vmem:[#allocation74_spill] sm:$0xff] %v10992_v12 }
 0x2cf   :  { %2931 = vmatprep.subr.bf16.mxu0 %v10950_v6  ;;  %2972 = vmatprep.subr.bf16.mxu1 %v10952_v58  ;;  %v10998_v58 = vcombine.high %v2141_v28, %v2145_v44  ;;  %v11000_v6 = vcombine.high %v2142_v45, %v2146_v60  ;;  %v2133_v39 = vld [vmem:[%s13167_s2 + $0x250] sm:$0xff]  ;;  %v11016_v21 = vcombine.low %v2141_v28, %v2145_v44  ;;  %v2126_v28 = vld [vmem:[%s13167_s2 + $0x218] sm:$0xff] }
 0x2d0   :  { %v2130_v44 = vld [vmem:[%s13167_s2 + $0x238] sm:$0xff]  ;;  %v11042_v60 = vcombine.low %v2134_v23, %v2138_v27 }
 0x2d1   :  { %13688 = vst [vmem:[#allocation76_spill] sm:$0xff] %v10998_v58  ;;  %13689 = vst [vmem:[#allocation77_spill] sm:$0xff] %v11000_v6 }
 0x2d2   :  { %2932 = vmatpush2.bf16.msra.mxu0 %v10968_v13  ;;  %2973 = vmatpush2.bf16.msra.mxu1 %v10970_v32  ;;  %v2137_v32 = vld [vmem:[%s13167_s2 + $0x270] sm:$0xff]  ;;  %13690 = vst [vmem:[#allocation78_spill] sm:$0xff] %v11016_v21 }
 0x2d3   :  { %2933 = vmatprep.subr.bf16.mxu0 %v10974_v51  ;;  %2974 = vmatprep.subr.bf16.mxu1 %v10976_v42  ;;  %v11022_v42 = vcombine.high %v2133_v39, %v2137_v32  ;;  %v11024_v51 = vcombine.high %v2134_v23, %v2138_v27  ;;  %v2125_v13 = vld [vmem:[%s13167_s2 + $0x210] sm:$0xff]  ;;  %v11040_v45 = vcombine.low %v2133_v39, %v2137_v32 }
 0x2d6   :  { %2934 = vmatpush2.bf16.msra.mxu0 %v10992_v12  ;;  %2975 = vmatpush2.bf16.msra.mxu1 %v10994_v25  ;;  %v2129_v25 = vld [vmem:[%s13167_s2 + $0x230] sm:$0xff] }
 0x2d7   :  { %2935 = vmatprep.subr.bf16.mxu0 %v10998_v58  ;;  %2976 = vmatprep.subr.bf16.mxu1 %v11000_v6  ;;  %v11046_v6 = vcombine.high %v2125_v13, %v2129_v25  ;;  %v11048_v58 = vcombine.high %v2126_v28, %v2130_v44  ;;  %v11052_v12 = vcombine.low %v2125_v13, %v2129_v25 }
 0x2da   :  { %2936 = vmatpush2.bf16.msra.mxu0 %v11016_v21  ;;  %2977 = vmatpush2.bf16.msra.mxu1 %v11018_v9  ;;  %v11054_v21 = vcombine.low %v2126_v28, %v2130_v44 }
 0x2db   :  { %2937 = vmatprep.subr.bf16.mxu0 %v11022_v42  ;;  %2978 = vmatprep.subr.bf16.mxu1 %v11024_v51 }
 0x2de   :  { %2938 = vmatpush2.bf16.msra.mxu0 %v11040_v45  ;;  %2979 = vmatpush2.bf16.msra.mxu1 %v11042_v60 }
 0x2df   :  { %2939 = vmatprep.subr.bf16.mxu0 %v11046_v6  ;;  %2980 = vmatprep.subr.bf16.mxu1 %v11048_v58 }
 0x2e2   :  { %2940 = vmatpush2.bf16.msra.mxu0 %v11052_v12  ;;  %2981 = vmatpush2.bf16.msra.mxu1 %v11054_v21 }
 0x2e3   :  { %3823 = vmatprep.subr.bf16.mxu0 %v10270_v47  ;;  %3864 = vmatprep.subr.bf16.mxu1 %v10279_v26  ;;  %v13691_v47 = vld [vmem:[#allocation6_spill] sm:$0xff]  ;;  %v13694_v26 = vld [vmem:[#allocation7_spill] sm:$0xff] }
 0x2e5   :  { %2942 = vmatmul.mubr.bf16.vlgmr.msra.gmra.mxu0 %v10677_v48  ;;  %2983 = vmatmul.mubr.bf16.vlgmr.msra.gmra.mxu1 %v10677_v48 }
 0x2e6   :  { %3824 = vmatpush1.bf16.msra.mxu0 %v10275_v0  ;;  %3865 = vmatpush1.bf16.msra.mxu1 %v10277_v3  ;;  %v13692_v0 = vld [vmem:[#allocation4_spill] sm:$0xff]  ;;  %v13693_v3 = vld [vmem:[#allocation5_spill] sm:$0xff] }
 0x2e7   :  { %3825 = vmatprep.subr.bf16.mxu0 %v10295_v50  ;;  %3866 = vmatprep.subr.bf16.mxu1 %v10309_v2  ;;  %v13696_v50 = vld [vmem:[#allocation8_spill] sm:$0xff]  ;;  %v13698_v2 = vld [vmem:[#allocation11_spill] sm:$0xff] }
 0x2ea   :  { %3826 = vmatpush1.bf16.msra.mxu0 %v10293_v41  ;;  %3867 = vmatpush1.bf16.msra.mxu1 %v10307_v49  ;;  %v13695_v41 = vld [vmem:[#allocation10_spill] sm:$0xff]  ;;  %v13697_v49 = vld [vmem:[#allocation9_spill] sm:$0xff] }
 0x2eb   :  { %3827 = vmatprep.subr.bf16.mxu0 %v10311_v1  ;;  %3868 = vmatprep.subr.bf16.mxu1 %v10320_v33  ;;  %v13699_v1 = vld [vmem:[#allocation14_spill] sm:$0xff]  ;;  %v13700_v33 = vld [vmem:[#allocation12_spill] sm:$0xff] }
 0x2ee   :  { %3828 = vmatpush1.bf16.msra.mxu0 %v10336_v11  ;;  %3869 = vmatpush1.bf16.msra.mxu1 %v10340_v15  ;;  %v13701_v11 = vld [vmem:[#allocation13_spill] sm:$0xff]  ;;  %v13702_v15 = vld [vmem:[#allocation15_spill] sm:$0xff] }
 0x2ef   :  { %3829 = vmatprep.subr.bf16.mxu0 %v10342_v19  ;;  %3870 = vmatprep.subr.bf16.mxu1 %v10345_v20  ;;  %v13703_v19 = vld [vmem:[#allocation18_spill] sm:$0xff]  ;;  %v13704_v20 = vld [vmem:[#allocation16_spill] sm:$0xff] }
 0x2f2   :  { %3830 = vmatpush1.bf16.msra.mxu0 %v10360_v29  ;;  %3871 = vmatpush1.bf16.msra.mxu1 %v10364_v30  ;;  %v13705_v29 = vld [vmem:[#allocation17_spill] sm:$0xff]  ;;  %v13706_v30 = vld [vmem:[#allocation19_spill] sm:$0xff] }
 0x2f3   :  { %3831 = vmatprep.subr.bf16.mxu0 %v10366_v35  ;;  %3872 = vmatprep.subr.bf16.mxu1 %v10369_v36  ;;  %v13707_v35 = vld [vmem:[#allocation22_spill] sm:$0xff]  ;;  %v13708_v36 = vld [vmem:[#allocation20_spill] sm:$0xff] }
 0x2f6   :  { %3832 = vmatpush1.bf16.msra.mxu0 %v10372_v37  ;;  %3873 = vmatpush1.bf16.msra.mxu1 %v10376_v38  ;;  %v13709_v37 = vld [vmem:[#allocation21_spill] sm:$0xff]  ;;  %v13710_v38 = vld [vmem:[#allocation23_spill] sm:$0xff] }
 0x2f7   :  { %3833 = vmatprep.subr.bf16.mxu0 %v10390_v46  ;;  %3874 = vmatprep.subr.bf16.mxu1 %v10399_v54  ;;  %v13711_v46 = vld [vmem:[#allocation26_spill] sm:$0xff]  ;;  %v13714_v54 = vld [vmem:[#allocation27_spill] sm:$0xff] }
 0x2fa   :  { %3834 = vmatpush1.bf16.msra.mxu0 %v10395_v52  ;;  %3875 = vmatpush1.bf16.msra.mxu1 %v10397_v53  ;;  %v13712_v52 = vld [vmem:[#allocation24_spill] sm:$0xff]  ;;  %v13713_v53 = vld [vmem:[#allocation25_spill] sm:$0xff] }
 0x2fb   :  { %3835 = vmatprep.subr.bf16.mxu0 %v10414_v62  ;;  %3876 = vmatprep.subr.bf16.mxu1 %v10423_v18  ;;  %v13715_v62 = vld [vmem:[#allocation30_spill] sm:$0xff]  ;;  %v13718_v18 = vld [vmem:[#allocation31_spill] sm:$0xff] }
 0x2fe   :  { %3836 = vmatpush1.bf16.msra.mxu0 %v10419_v7  ;;  %3877 = vmatpush1.bf16.msra.mxu1 %v10421_v8  ;;  %v13716_v7 = vld [vmem:[#allocation28_spill] sm:$0xff]  ;;  %v13717_v8 = vld [vmem:[#allocation29_spill] sm:$0xff] }
 0x2ff   :  { %3837 = vmatprep.subr.bf16.mxu0 %v10438_v34  ;;  %3878 = vmatprep.subr.bf16.mxu1 %v10447_v16  ;;  %v13719_v34 = vld [vmem:[#allocation32_spill] sm:$0xff] }
 0x302   :  { %3838 = vmatpush1.bf16.msra.mxu0 %v10443_v40  ;;  %3879 = vmatpush1.bf16.msra.mxu1 %v10445_v14  ;;  %v8466_v40 = vld [vmem:[%s13168_s0 + $0x20] sm:$0xff] }
 0x303   :  { %3839 = vmatprep.subr.bf16.mxu0 %v10462_v31  ;;  %3880 = vmatprep.subr.bf16.mxu1 %v10471_v57  ;;  %v2994_v14 = vunpack.c.l.bf16 %v8466_v40  ;;  %v2995_v16 = vunpack.c.h.bf16 %v8466_v40 }
 0x306   :  { %3840 = vmatpush2.bf16.msra.mxu0 %v10467_v55  ;;  %3881 = vmatpush2.bf16.msra.mxu1 %v10469_v56  ;;  %v8467_v56 = vld [vmem:[%s13168_s0 + $0x28] sm:$0xff] }
 0x307   :  { %3841 = vmatprep.subr.bf16.mxu0 %v10486_v4  ;;  %3882 = vmatprep.subr.bf16.mxu1 %v13691_v47  ;;  %v2996_v13 = vunpack.c.l.bf16 %v8467_v56 }
 0x30a   :  { %3842 = vmatpush2.bf16.msra.mxu0 %v13692_v0  ;;  %3883 = vmatpush2.bf16.msra.mxu1 %v13693_v3  ;;  %v2997_v0 = vunpack.c.h.bf16 %v8467_v56 }
 0x30b   :  { %3843 = vmatprep.subr.bf16.mxu0 %v13694_v26  ;;  %3884 = vmatprep.subr.bf16.mxu1 %v13695_v41 }
 0x30e   :  { %3844 = vmatpush2.bf16.msra.mxu0 %v13696_v50  ;;  %3885 = vmatpush2.bf16.msra.mxu1 %v13697_v49 }
 0x30f   :  { %3845 = vmatprep.subr.bf16.mxu0 %v13698_v2  ;;  %3886 = vmatprep.subr.bf16.mxu1 %v13699_v1 }
 0x312   :  { %3846 = vmatpush2.bf16.msra.mxu0 %v13700_v33  ;;  %3887 = vmatpush2.bf16.msra.mxu1 %v13701_v11 }
 0x313   :  { %3847 = vmatprep.subr.bf16.mxu0 %v13702_v15  ;;  %3888 = vmatprep.subr.bf16.mxu1 %v13703_v19  ;;  %v13720_v15 = vld [vmem:[#allocation33_spill] sm:$0xff] }
 0x316   :  { %3848 = vmatpush2.bf16.msra.mxu0 %v13704_v20  ;;  %3889 = vmatpush2.bf16.msra.mxu1 %v13705_v29 }
 0x317   :  { %3849 = vmatprep.subr.bf16.mxu0 %v13706_v30  ;;  %3890 = vmatprep.subr.bf16.mxu1 %v13707_v35 }
 0x31a   :  { %3850 = vmatpush2.bf16.msra.mxu0 %v13708_v36  ;;  %3891 = vmatpush2.bf16.msra.mxu1 %v13709_v37 }
 0x31b   :  { %3851 = vmatprep.subr.bf16.mxu0 %v13710_v38  ;;  %3892 = vmatprep.subr.bf16.mxu1 %v13711_v46 }
 0x31e   :  { %3852 = vmatpush2.bf16.msra.mxu0 %v13712_v52  ;;  %3893 = vmatpush2.bf16.msra.mxu1 %v13713_v53  ;;  %v8468_v52 = vld [vmem:[%s13170_s1 + $0x50] sm:$0xff] }
 0x31f   :  { %3853 = vmatprep.subr.bf16.mxu0 %v13714_v54  ;;  %3894 = vmatprep.subr.bf16.mxu1 %v13715_v62  ;;  %v3005_v53 = vunpack.c.l.bf16 %v8468_v52  ;;  %v3006_v54 = vunpack.c.h.bf16 %v8468_v52  ;;  %v13737_v52 = vld [vmem:[#allocation50_spill] sm:$0xff] }
 0x322   :  { %3854 = vmatpush2.bf16.msra.mxu0 %v13716_v7  ;;  %3895 = vmatpush2.bf16.msra.mxu1 %v13717_v8  ;;  %v8469_v8 = vld [vmem:[%s13170_s1 + $0x58] sm:$0xff] }
 0x323   :  { %3905 = vmatprep.subr.bf16.mxu0 %v13718_v18  ;;  %3946 = vmatprep.subr.bf16.mxu1 %v13719_v34 }
 0x365   :  { %v2861_v31 = vpop.f32.mrf.mxu0  ;;  %v2902_v55 = vpop.f32.mrf.mxu1 }
 0x366   :  { %v2998_v57 = vadd.f32 %v2994_v14, %v2861_v31  ;;  %v3000_v47 = vadd.f32 %v2996_v13, %v2902_v55  ;;  %v3008_v13 = vunpack.c.h.bf16 %v8469_v8 }
 0x367   :  { %v2863_v4 = vpop.f32.mrf.mxu0  ;;  %v2904_v48 = vpop.f32.mrf.mxu1 }
 0x368   :  { %v3013_v39 = vmul.f32 0.5, %v2998_v57  ;;  %v2999_v32 = vadd.f32 %v2995_v16, %v2863_v4  ;;  %v3001_v3 = vadd.f32 %v2997_v0, %v2904_v48  ;;  %v3007_v16 = vunpack.c.l.bf16 %v8469_v8  ;;  %v13742_v8 = vld [vmem:[#allocation55_spill] sm:$0xff] }
 0x369   :  { %v2865_v25 = vpop.f32.mrf.mxu0  ;;  %v2906_v23 = vpop.f32.mrf.mxu1 }
 0x36a   :  { %9180 = vtanh.f32 %v3013_v39  ;;  %v3017_v27 = vmul.f32 0.5, %v2999_v32  ;;  %v3022_v26 = vmul.f32 0.5, %v3001_v3 }
 0x36b   :  { %v2866_v28 = vpop.f32.mrf.mxu0  ;;  %v2907_v44 = vpop.f32.mrf.mxu1 }
 0x36c   :  { %9182 = vtanh.f32 %v3017_v27 }
 0x36d   :  { %9184 = vtanh.f32 %v3000_v47 }
 0x36e   :  { %9186 = vtanh.f32 %v3022_v26 }
 0x377   :  { %v9181_v41 = vpop.eup %9180 }
 0x378   :  { %v3015_v50 = vmul.f32 0.5, %v9181_v41 }
 0x379   :  { %v9183_v49 = vpop.eup %9182 }
 0x37a   :  { %v3016_v2 = vadd.f32 0.5, %v3015_v50  ;;  %v3019_v1 = vmul.f32 0.5, %v9183_v49  ;;  %v9185_v11 = vpop.eup %9184 }
 0x37b   :  { %v9187_v30 = vpop.eup %9186 }
 0x37c   :  { %v3020_v33 = vadd.f32 0.5, %v3019_v1  ;;  %v3027_v20 = vmul.f32 %v9185_v11, %v3016_v2  ;;  %v3024_v35 = vmul.f32 0.5, %v9187_v30  ;;  %v13732_v30 = vld [vmem:[#allocation45_spill] sm:$0xff] }
 0x37e   :  { %v3026_v19 = vmul.f32 %v3020_v33, %v13720_v15  ;;  %v3025_v36 = vadd.f32 0.5, %v3024_v35  ;;  %v13733_v35 = vld [vmem:[#allocation46_spill] sm:$0xff] }
 0x380   :  { %v11135_v29 = vadd.f32 %v3027_v20, %v3026_v19  ;;  %v13722_v19 = vld [vmem:[#allocation35_spill] sm:$0xff]  ;;  %v13725_v20 = vld [vmem:[#allocation38_spill] sm:$0xff] }
 0x382   :  { %9188 = vtanh.f32 %v11135_v29 }
 0x38f   :  { %v9189_v37 = vpop.eup %9188 }
 0x390   :  { %v3030_v38 = vmul.f32 %v9189_v37, %v3025_v36  ;;  %v13734_v36 = vld [vmem:[#allocation47_spill] sm:$0xff]  ;;  %v13735_v37 = vld [vmem:[#allocation48_spill] sm:$0xff] }
 0x392   :  { %v11138_v46 = vpack.c.bf16 %v3030_v38, %v3030_v38  ;;  %v13736_v38 = vld [vmem:[#allocation49_spill] sm:$0xff] }
 0x394   :  { %8470 = vst [vmem:[%s13169_s3 + $0x8] sm:$0xf] %v11138_v46 }
 0x3a5   :  { %v2943_v62 = vpop.f32.mrf.mxu0  ;;  %v2984_v7 = vpop.f32.mrf.mxu1 }
 0x3a6   :  { %v3009_v18 = vadd.f32 %v3005_v53, %v2943_v62  ;;  %v3011_v39 = vadd.f32 %v3007_v16, %v2984_v7  ;;  %v13738_v53 = vld [vmem:[#allocation51_spill] sm:$0xff]  ;;  %v13740_v62 = vld [vmem:[#allocation53_spill] sm:$0xff]  ;;  %v13741_v7 = vld [vmem:[#allocation54_spill] sm:$0xff] }
 0x3a7   :  { %v2945_v34 = vpop.f32.mrf.mxu0  ;;  %v2986_v40 = vpop.f32.mrf.mxu1  ;;  %v13747_v16 = vld [vmem:[#allocation60_spill] sm:$0xff] }
 0x3a8   :  { %v3031_v14 = vmul.f32 0.5, %v3009_v18  ;;  %v3010_v31 = vadd.f32 %v3006_v54, %v2945_v34  ;;  %v3012_v32 = vadd.f32 %v3008_v13, %v2986_v40  ;;  %v13739_v54 = vld [vmem:[#allocation52_spill] sm:$0xff]  ;;  %v13744_v34 = vld [vmem:[#allocation57_spill] sm:$0xff]  ;;  %v13745_v40 = vld [vmem:[#allocation58_spill] sm:$0xff] }
 0x3a9   :  { %v2947_v55 = vpop.f32.mrf.mxu0  ;;  %v2988_v56 = vpop.f32.mrf.mxu1  ;;  %v13743_v18 = vld [vmem:[#allocation56_spill] sm:$0xff] }
 0x3aa   :  { %9190 = vtanh.f32 %v3031_v14  ;;  %v3035_v57 = vmul.f32 0.5, %v3010_v31  ;;  %v3040_v25 = vmul.f32 0.5, %v3012_v32  ;;  %v13746_v14 = vld [vmem:[#allocation59_spill] sm:$0xff]  ;;  %v13748_v31 = vld [vmem:[#allocation61_spill] sm:$0xff]  ;;  %v13749_v55 = vld [vmem:[#allocation62_spill] sm:$0xff] }
 0x3ab   :  { %v2948_v4 = vpop.f32.mrf.mxu0  ;;  %v2989_v48 = vpop.f32.mrf.mxu1  ;;  %v13750_v56 = vld [vmem:[#allocation63_spill] sm:$0xff]  ;;  %v13755_v13 = vld [vmem:[#allocation68_spill] sm:$0xff]  ;;  %v13756_v32 = vld [vmem:[#allocation69_spill] sm:$0xff] }
 0x3ac   :  { %9192 = vtanh.f32 %v3035_v57  ;;  %v13751_v57 = vld [vmem:[#allocation64_spill] sm:$0xff]  ;;  %v13752_v4 = vld [vmem:[#allocation65_spill] sm:$0xff]  ;;  %v13753_v48 = vld [vmem:[#allocation66_spill] sm:$0xff] }
 0x3ad   :  { %9194 = vtanh.f32 %v3011_v39  ;;  %v13754_v39 = vld [vmem:[#allocation67_spill] sm:$0xff] }
 0x3ae   :  { %9196 = vtanh.f32 %v3040_v25  ;;  %v13757_v25 = vld [vmem:[#allocation70_spill] sm:$0xff] }
 0x3b7   :  { %v9191_v23 = vpop.eup %9190 }
 0x3b8   :  { %v3033_v27 = vmul.f32 0.5, %v9191_v23  ;;  %v13758_v23 = vld [vmem:[#allocation71_spill] sm:$0xff] }
 0x3b9   :  { %v9193_v28 = vpop.eup %9192 }
 0x3ba   :  { %v3034_v44 = vadd.f32 0.5, %v3033_v27  ;;  %v3037_v47 = vmul.f32 0.5, %v9193_v28  ;;  %v9195_v3 = vpop.eup %9194  ;;  %v13759_v27 = vld [vmem:[#allocation72_spill] sm:$0xff]  ;;  %v13760_v28 = vld [vmem:[#allocation73_spill] sm:$0xff] }
 0x3bb   :  { %v9197_v49 = vpop.eup %9196 }
 0x3bc   :  { %v3038_v0 = vadd.f32 0.5, %v3037_v47  ;;  %v3045_v41 = vmul.f32 %v9195_v3, %v3034_v44  ;;  %v3042_v2 = vmul.f32 0.5, %v9197_v49  ;;  %v13761_v44 = vld [vmem:[#allocation74_spill] sm:$0xff]  ;;  %v13762_v47 = vld [vmem:[#allocation75_spill] sm:$0xff]  ;;  %v13764_v3 = vld [vmem:[#allocation77_spill] sm:$0xff] }
 0x3be   :  { %v3044_v26 = vmul.f32 %v3038_v0, %v10690_v5  ;;  %v3043_v1 = vadd.f32 0.5, %v3042_v2  ;;  %v13721_v5 = vld [vmem:[#allocation34_spill] sm:$0xff]  ;;  %v13763_v0 = vld [vmem:[#allocation76_spill] sm:$0xff] }
 0x3c0   :  { %v11151_v50 = vadd.f32 %v3045_v41, %v3044_v26  ;;  %v13765_v26 = vld [vmem:[#allocation78_spill] sm:$0xff]  ;;  %v4100_v41 = vld [vmem:[%s13167_s2 + $0x188] sm:$0xff] }
 0x3c2   :  { %9198 = vtanh.f32 %v11151_v50 }
 0x3cf   :  { %v9199_v33 = vpop.eup %9198 }
 0x3d0   :  { %v3048_v11 = vmul.f32 %v9199_v33, %v3043_v1  ;;  %v4104_v1 = vld [vmem:[%s13167_s2 + $0x1a8] sm:$0xff]  ;;  %v4091_v33 = vld [vmem:[%s13167_s2 + $0x140] sm:$0xff] }
 0x3d2   :  { %v3052_v15 = vpack.c.bf16 %v3048_v11, %v3048_v11  ;;  %v4095_v11 = vld [vmem:[%s13167_s2 + $0x160] sm:$0xff] }
 0x3d4   :  { %8471 = vst [vmem:[%s13171_s4 + $0x14] sm:$0xf] %v3052_v15  ;;  %3855 = vmatprep.mubr.bf16.mxu0 %v3052_v15  ;;  %3896 = vmatprep.mubr.bf16.mxu1 %v3052_v15 }
 0x3d5   :  { %3856 = vmatmul.mubr.bf16.vlgmr.msra.gmra.mxu0 %v11138_v46  ;;  %3897 = vmatmul.mubr.bf16.vlgmr.msra.gmra.mxu1 %v11138_v46 }
 0x3d6   :  { %3906 = vmatpush1.bf16.msra.mxu0 %v10659_v43  ;;  %3947 = vmatpush1.bf16.msra.mxu1 %v10661_v61  ;;  %v13723_v43 = vld [vmem:[#allocation36_spill] sm:$0xff]  ;;  %v13724_v61 = vld [vmem:[#allocation37_spill] sm:$0xff] }
 0x3d7   :  { %3937 = vmatprep.mubr.bf16.mxu0 %v3052_v15  ;;  %3978 = vmatprep.mubr.bf16.mxu1 %v3052_v15  ;;  %v11269_v15 = vcombine.low %v4100_v41, %v4104_v1 }
 0x3d8   :  { %3907 = vmatprep.subr.bf16.mxu0 %v10711_v59  ;;  %3948 = vmatprep.subr.bf16.mxu1 %v10713_v24  ;;  %v13726_v59 = vld [vmem:[#allocation39_spill] sm:$0xff]  ;;  %v13727_v24 = vld [vmem:[#allocation40_spill] sm:$0xff] }
 0x3da   :  { %3908 = vmatpush1.bf16.msra.mxu0 %v10728_v17  ;;  %3949 = vmatpush1.bf16.msra.mxu1 %v10730_v10  ;;  %v13728_v17 = vld [vmem:[#allocation41_spill] sm:$0xff]  ;;  %v13729_v10 = vld [vmem:[#allocation42_spill] sm:$0xff] }
 0x3db   :  { %3909 = vmatprep.subr.bf16.mxu0 %v10732_v22  ;;  %3950 = vmatprep.subr.bf16.mxu1 %v10734_v63  ;;  %v13730_v22 = vld [vmem:[#allocation43_spill] sm:$0xff]  ;;  %v13731_v63 = vld [vmem:[#allocation44_spill] sm:$0xff] }
 0x3de   :  { %3910 = vmatpush1.bf16.msra.mxu0 %v13721_v5  ;;  %3951 = vmatpush1.bf16.msra.mxu1 %v13722_v19  ;;  %v11271_v5 = vcombine.high %v4100_v41, %v4104_v1  ;;  %v11273_v19 = vcombine.high %v4091_v33, %v4095_v11  ;;  %v4176_v41 = vld [vmem:[%s13167_s2 + $0x3e8] sm:$0xff] }
 0x3df   :  { %3911 = vmatprep.subr.bf16.mxu0 %v13723_v43  ;;  %3952 = vmatprep.subr.bf16.mxu1 %v13724_v61  ;;  %v4092_v43 = vld [vmem:[%s13167_s2 + $0x148] sm:$0xff] }
 0x3e0   :  { %v4096_v61 = vld [vmem:[%s13167_s2 + $0x168] sm:$0xff] }
 0x3e2   :  { %3912 = vmatpush1.bf16.msra.mxu0 %v13725_v20  ;;  %3953 = vmatpush1.bf16.msra.mxu1 %v13726_v59  ;;  %v11282_v20 = vcombine.high %v4092_v43, %v4096_v61  ;;  %v4083_v59 = vld [vmem:[%s13167_s2 + $0x100] sm:$0xff] }
 0x3e3   :  { %3913 = vmatprep.subr.bf16.mxu0 %v13727_v24  ;;  %3954 = vmatprep.subr.bf16.mxu1 %v13728_v17  ;;  %v4087_v24 = vld [vmem:[%s13167_s2 + $0x120] sm:$0xff]  ;;  %v4084_v17 = vld [vmem:[%s13167_s2 + $0x108] sm:$0xff] }
 0x3e6   :  { %3914 = vmatpush1.bf16.msra.mxu0 %v13729_v10  ;;  %3955 = vmatpush1.bf16.msra.mxu1 %v13730_v22  ;;  %v4088_v10 = vld [vmem:[%s13167_s2 + $0x128] sm:$0xff]  ;;  %v11298_v22 = vcombine.low %v4091_v33, %v4095_v11 }
 0x3e7   :  { %3915 = vmatprep.subr.bf16.mxu0 %v13731_v63  ;;  %3956 = vmatprep.subr.bf16.mxu1 %v13732_v30  ;;  %v11302_v63 = vcombine.low %v4092_v43, %v4096_v61  ;;  %v11304_v30 = vcombine.high %v4083_v59, %v4087_v24  ;;  %v4163_v43 = vld [vmem:[%s13167_s2 + $0x380] sm:$0xff] }
 0x3e8   :  { %v4167_v61 = vld [vmem:[%s13167_s2 + $0x3a0] sm:$0xff] }
 0x3ea   :  { %3916 = vmatpush1.bf16.msra.mxu0 %v13733_v35  ;;  %3957 = vmatpush1.bf16.msra.mxu1 %v13734_v36  ;;  %v11307_v35 = vcombine.high %v4084_v17, %v4088_v10  ;;  %v4075_v36 = vld [vmem:[%s13167_s2 + $0xc0] sm:$0xff] }
 0x3eb   :  { %3917 = vmatprep.subr.bf16.mxu0 %v13735_v37  ;;  %3958 = vmatprep.subr.bf16.mxu1 %v13736_v38  ;;  %v4079_v37 = vld [vmem:[%s13167_s2 + $0xe0] sm:$0xff]  ;;  %v4076_v38 = vld [vmem:[%s13167_s2 + $0xc8] sm:$0xff] }
 0x3ee   :  { %3918 = vmatpush1.bf16.msra.mxu0 %v13737_v52  ;;  %3959 = vmatpush1.bf16.msra.mxu1 %v13738_v53  ;;  %v4080_v52 = vld [vmem:[%s13167_s2 + $0xe8] sm:$0xff]  ;;  %v11322_v53 = vcombine.low %v4083_v59, %v4087_v24  ;;  %v11448_v24 = vcombine.high %v4163_v43, %v4167_v61 }
 0x3ef   :  { %3919 = vmatprep.subr.bf16.mxu0 %v13739_v54  ;;  %3960 = vmatprep.subr.bf16.mxu1 %v13740_v62  ;;  %v11326_v54 = vcombine.low %v4084_v17, %v4088_v10  ;;  %v11328_v62 = vcombine.high %v4075_v36, %v4079_v37  ;;  %v4164_v59 = vld [vmem:[%s13167_s2 + $0x388] sm:$0xff]  ;;  %v11453_v10 = vcombine.low %v4163_v43, %v4167_v61 }
 0x3f0   :  { %v4168_v17 = vld [vmem:[%s13167_s2 + $0x3a8] sm:$0xff] }
 0x3f1   :  { %13766 = vst [vmem:[#allocation6_spill] sm:$0xff] %v11453_v10  ;;  %v4140_v43 = vld [vmem:[%s13167_s2 + $0x2c8] sm:$0xff] }
 0x3f2   :  { %3920 = vmatpush1.bf16.msra.mxu0 %v13741_v7  ;;  %3961 = vmatpush1.bf16.msra.mxu1 %v13742_v8  ;;  %v11331_v7 = vcombine.high %v4076_v38, %v4080_v52  ;;  %v11334_v8 = vcombine.low %v4075_v36, %v4079_v37  ;;  %v11455_v36 = vcombine.low %v4164_v59, %v4168_v17 }
 0x3f3   :  { %3921 = vmatprep.subr.bf16.mxu0 %v13743_v18  ;;  %3962 = vmatprep.subr.bf16.mxu1 %v13744_v34  ;;  %v11338_v18 = vcombine.low %v4076_v38, %v4080_v52  ;;  %v4067_v34 = vld [vmem:[%s13167_s2 + $0x80] sm:$0xff]  ;;  %v11457_v37 = vcombine.high %v4164_v59, %v4168_v17  ;;  %v4144_v59 = vld [vmem:[%s13167_s2 + $0x2e8] sm:$0xff] }
 0x3f4   :  { %13767 = vst [vmem:[#allocation4_spill] sm:$0xff] %v11455_v36  ;;  %v4155_v38 = vld [vmem:[%s13167_s2 + $0x340] sm:$0xff] }
 0x3f5   :  { %13768 = vst [vmem:[#allocation5_spill] sm:$0xff] %v11457_v37  ;;  %v4159_v52 = vld [vmem:[%s13167_s2 + $0x360] sm:$0xff] }
 0x3f6   :  { %3922 = vmatpush2.bf16.msra.mxu0 %v13745_v40  ;;  %3963 = vmatpush2.bf16.msra.mxu1 %v13746_v14  ;;  %v4071_v40 = vld [vmem:[%s13167_s2 + $0xa0] sm:$0xff]  ;;  %v4068_v14 = vld [vmem:[%s13167_s2 + $0x88] sm:$0xff] }
 0x3f7   :  { %3923 = vmatprep.subr.bf16.mxu0 %v13747_v16  ;;  %3964 = vmatprep.subr.bf16.mxu1 %v13748_v31  ;;  %v11352_v16 = vcombine.high %v4067_v34, %v4071_v40  ;;  %v4072_v31 = vld [vmem:[%s13167_s2 + $0xa8] sm:$0xff] }
 0x3fa   :  { %3924 = vmatpush2.bf16.msra.mxu0 %v13749_v55  ;;  %3965 = vmatpush2.bf16.msra.mxu1 %v13750_v56  ;;  %v11357_v55 = vcombine.low %v4067_v34, %v4071_v40  ;;  %v11359_v56 = vcombine.low %v4068_v14, %v4072_v31  ;;  %v4156_v34 = vld [vmem:[%s13167_s2 + $0x348] sm:$0xff]  ;;  %v11472_v40 = vcombine.high %v4155_v38, %v4159_v52 }
 0x3fb   :  { %3925 = vmatprep.subr.bf16.mxu0 %v13751_v57  ;;  %3966 = vmatprep.subr.bf16.mxu1 %v13752_v4  ;;  %v11361_v57 = vcombine.high %v4068_v14, %v4072_v31  ;;  %v4059_v4 = vld [vmem:[%s13167_s2 + $0x40] sm:$0xff]  ;;  %v4160_v14 = vld [vmem:[%s13167_s2 + $0x368] sm:$0xff]  ;;  %v11477_v31 = vcombine.low %v4155_v38, %v4159_v52  ;;  %v11527_v38 = vcombine.low %v4140_v43, %v4144_v59 }
 0x3fc   :  { %13769 = vst [vmem:[#allocation7_spill] sm:$0xff] %v11472_v40  ;;  %v11529_v52 = vcombine.high %v4140_v43, %v4144_v59  ;;  %v4123_v43 = vld [vmem:[%s13167_s2 + $0x240] sm:$0xff] }
 0x3fd   :  { %13770 = vst [vmem:[#allocation10_spill] sm:$0xff] %v11477_v31  ;;  %13779 = vst [vmem:[#allocation16_spill] sm:$0xff] %v11527_v38  ;;  %v4127_v59 = vld [vmem:[%s13167_s2 + $0x260] sm:$0xff] }
 0x3fe   :  { %3926 = vmatpush2.bf16.msra.mxu0 %v13753_v48  ;;  %3967 = vmatpush2.bf16.msra.mxu1 %v13754_v39  ;;  %v4063_v48 = vld [vmem:[%s13167_s2 + $0x60] sm:$0xff]  ;;  %v4060_v39 = vld [vmem:[%s13167_s2 + $0x48] sm:$0xff]  ;;  %13780 = vst [vmem:[#allocation17_spill] sm:$0xff] %v11529_v52 }
 0x3ff   :  { %3927 = vmatprep.subr.bf16.mxu0 %v13755_v13  ;;  %3968 = vmatprep.subr.bf16.mxu1 %v13756_v32  ;;  %v11376_v13 = vcombine.high %v4059_v4, %v4063_v48  ;;  %v4064_v32 = vld [vmem:[%s13167_s2 + $0x68] sm:$0xff] }
 0x402   :  { %3928 = vmatpush2.bf16.msra.mxu0 %v13757_v25  ;;  %3969 = vmatpush2.bf16.msra.mxu1 %v13758_v23  ;;  %v11381_v25 = vcombine.low %v4059_v4, %v4063_v48  ;;  %v11383_v23 = vcombine.low %v4060_v39, %v4064_v32  ;;  %v11479_v4 = vcombine.low %v4156_v34, %v4160_v14 }
 0x403   :  { %3929 = vmatprep.subr.bf16.mxu0 %v13759_v27  ;;  %3970 = vmatprep.subr.bf16.mxu1 %v13760_v28  ;;  %v11385_v27 = vcombine.high %v4060_v39, %v4064_v32  ;;  %v4051_v28 = vld [vmem:[%s13167_s2] sm:$0xff]  ;;  %v11481_v48 = vcombine.high %v4156_v34, %v4160_v14 }
 0x404   :  { %13771 = vst [vmem:[#allocation8_spill] sm:$0xff] %v11479_v4  ;;  %v4147_v39 = vld [vmem:[%s13167_s2 + $0x300] sm:$0xff] }
 0x405   :  { %13772 = vst [vmem:[#allocation9_spill] sm:$0xff] %v11481_v48  ;;  %v4151_v32 = vld [vmem:[%s13167_s2 + $0x320] sm:$0xff] }
 0x406   :  { %3930 = vmatpush2.bf16.msra.mxu0 %v13761_v44  ;;  %3971 = vmatpush2.bf16.msra.mxu1 %v13762_v47  ;;  %v4055_v44 = vld [vmem:[%s13167_s2 + $0x20] sm:$0xff]  ;;  %v4052_v47 = vld [vmem:[%s13167_s2 + $0x8] sm:$0xff] }
 0x407   :  { %3931 = vmatprep.subr.bf16.mxu0 %v13763_v0  ;;  %3972 = vmatprep.subr.bf16.mxu1 %v13764_v3  ;;  %v11400_v0 = vcombine.high %v4051_v28, %v4055_v44  ;;  %v4056_v3 = vld [vmem:[%s13167_s2 + $0x28] sm:$0xff]  ;;  %v4131_v34 = vld [vmem:[%s13167_s2 + $0x280] sm:$0xff] }
 0x408   :  { %v4135_v14 = vld [vmem:[%s13167_s2 + $0x2a0] sm:$0xff] }
 0x40a   :  { %3932 = vmatpush2.bf16.msra.mxu0 %v13765_v26  ;;  %3973 = vmatpush2.bf16.msra.mxu1 %v11018_v9  ;;  %v11405_v26 = vcombine.low %v4051_v28, %v4055_v44  ;;  %v4148_v28 = vld [vmem:[%s13167_s2 + $0x308] sm:$0xff]  ;;  %v11496_v44 = vcombine.high %v4147_v39, %v4151_v32 }
 0x40b   :  { %3933 = vmatprep.subr.bf16.mxu0 %v11022_v42  ;;  %3974 = vmatprep.subr.bf16.mxu1 %v11024_v51  ;;  %v4107_v51 = vld [vmem:[%s13167_s2 + $0x1c0] sm:$0xff] }
 0x40c   :  { %v4111_v42 = vld [vmem:[%s13167_s2 + $0x1e0] sm:$0xff]  ;;  %13773 = vst [vmem:[#allocation11_spill] sm:$0xff] %v11496_v44 }
 0x40e   :  { %3934 = vmatpush2.bf16.msra.mxu0 %v11040_v45  ;;  %3975 = vmatpush2.bf16.msra.mxu1 %v11042_v60  ;;  %v4099_v60 = vld [vmem:[%s13167_s2 + $0x180] sm:$0xff] }
 0x40f   :  { %3935 = vmatprep.subr.bf16.mxu0 %v11046_v6  ;;  %3976 = vmatprep.subr.bf16.mxu1 %v11048_v58  ;;  %v4108_v6 = vld [vmem:[%s13167_s2 + $0x1c8] sm:$0xff]  ;;  %v11232_v58 = vcombine.high %v4107_v51, %v4111_v42 }
 0x412   :  { %3936 = vmatpush2.bf16.msra.mxu0 %v11052_v12  ;;  %3977 = vmatpush2.bf16.msra.mxu1 %v11054_v21  ;;  %v4112_v12 = vld [vmem:[%s13167_s2 + $0x1e8] sm:$0xff]  ;;  %v11237_v21 = vcombine.low %v4107_v51, %v4111_v42  ;;  %v11407_v51 = vcombine.low %v4052_v47, %v4056_v3  ;;  %v11409_v42 = vcombine.high %v4052_v47, %v4056_v3 }
 0x413   :  { %v11239_v9 = vcombine.low %v4108_v6, %v4112_v12  ;;  %v11241_v45 = vcombine.high %v4108_v6, %v4112_v12  ;;  %4819 = vmatprep.subr.bf16.mxu0 %v11232_v58  ;;  %v4171_v6 = vld [vmem:[%s13167_s2 + $0x3c0] sm:$0xff]  ;;  %v4152_v47 = vld [vmem:[%s13167_s2 + $0x328] sm:$0xff]  ;;  %v11501_v3 = vcombine.low %v4147_v39, %v4151_v32  ;;  %v11544_v32 = vcombine.high %v4131_v34, %v4135_v14 }
 0x414   :  { %v4175_v12 = vld [vmem:[%s13167_s2 + $0x3e0] sm:$0xff]  ;;  %v4132_v39 = vld [vmem:[%s13167_s2 + $0x288] sm:$0xff] }
 0x415   :  { %3938 = vmatmul.mubr.bf16.vlgmr.msra.gmra.mxu0 %v11138_v46  ;;  %3979 = vmatmul.mubr.bf16.vlgmr.msra.gmra.mxu1 %v11138_v46  ;;  %v4103_v46 = vld [vmem:[%s13167_s2 + $0x1a0] sm:$0xff]  ;;  %v11429_v1 = vcombine.low %v4171_v6, %v4175_v12  ;;  %13774 = vst [vmem:[#allocation14_spill] sm:$0xff] %v11501_v3  ;;  %13781 = vst [vmem:[#allocation19_spill] sm:$0xff] %v11544_v32 }
 0x416   :  { %4860 = vmatprep.subr.bf16.mxu1 %v11241_v45  ;;  %4820 = vmatpush1.bf16.msra.mxu0 %v11237_v21  ;;  %v11255_v49 = vcombine.low %v4099_v60, %v4103_v46  ;;  %v11257_v2 = vcombine.high %v4099_v60, %v4103_v46  ;;  %v4172_v60 = vld [vmem:[%s13167_s2 + $0x3c8] sm:$0xff]  ;;  %v11424_v46 = vcombine.high %v4171_v6, %v4175_v12 }
 0x417   :  { %4861 = vmatpush1.bf16.msra.mxu1 %v11239_v9  ;;  %v11431_v33 = vcombine.low %v4172_v60, %v4176_v41  ;;  %v11433_v11 = vcombine.high %v4172_v60, %v4176_v41  ;;  %v11503_v6 = vcombine.low %v4148_v28, %v4152_v47  ;;  %v11505_v12 = vcombine.high %v4148_v28, %v4152_v47  ;;  %v4139_v60 = vld [vmem:[%s13167_s2 + $0x2c0] sm:$0xff]  ;;  %v4136_v28 = vld [vmem:[%s13167_s2 + $0x2a8] sm:$0xff] }
 0x418   :  { %4821 = vmatprep.subr.bf16.mxu0 %v11257_v2  ;;  %4862 = vmatprep.subr.bf16.mxu1 %v11271_v5  ;;  %v4143_v41 = vld [vmem:[%s13167_s2 + $0x2e0] sm:$0xff]  ;;  %v11549_v47 = vcombine.low %v4131_v34, %v4135_v14  ;;  %v4124_v34 = vld [vmem:[%s13167_s2 + $0x248] sm:$0xff]  ;;  %v11568_v14 = vcombine.high %v4123_v43, %v4127_v59 }
 0x419   :  { %13775 = vst [vmem:[#allocation12_spill] sm:$0xff] %v11503_v6  ;;  %13776 = vst [vmem:[#allocation13_spill] sm:$0xff] %v11505_v12  ;;  %v11520_v61 = vcombine.high %v4139_v60, %v4143_v41  ;;  %v11525_v17 = vcombine.low %v4139_v60, %v4143_v41  ;;  %v11551_v60 = vcombine.low %v4132_v39, %v4136_v28 }
 0x41a   :  { %4822 = vmatpush1.bf16.msra.mxu0 %v11255_v49  ;;  %13782 = vst [vmem:[#allocation22_spill] sm:$0xff] %v11549_v47  ;;  %v11553_v41 = vcombine.high %v4132_v39, %v4136_v28  ;;  %13785 = vst [vmem:[#allocation23_spill] sm:$0xff] %v11568_v14  ;;  %v4128_v39 = vld [vmem:[%s13167_s2 + $0x268] sm:$0xff]  ;;  %v11573_v28 = vcombine.low %v4123_v43, %v4127_v59 }
 0x41b   :  { %4863 = vmatpush1.bf16.msra.mxu1 %v11269_v15  ;;  %4823 = vmatprep.subr.bf16.mxu0 %v11273_v19  ;;  %13777 = vst [vmem:[#allocation15_spill] sm:$0xff] %v11520_v61  ;;  %13778 = vst [vmem:[#allocation18_spill] sm:$0xff] %v11525_v17  ;;  %v4116_v43 = vld [vmem:[%s13167_s2 + $0x208] sm:$0xff] }
 0x41c   :  { %4864 = vmatprep.subr.bf16.mxu1 %v11282_v20  ;;  %13783 = vst [vmem:[#allocation20_spill] sm:$0xff] %v11551_v60  ;;  %13784 = vst [vmem:[#allocation21_spill] sm:$0xff] %v11553_v41 }
 0x41d   :  { %13786 = vst [vmem:[#allocation26_spill] sm:$0xff] %v11573_v28 }
 0x41e   :  { %4824 = vmatpush1.bf16.msra.mxu0 %v11298_v22 }
 0x41f   :  { %4865 = vmatpush1.bf16.msra.mxu1 %v11302_v63  ;;  %4825 = vmatprep.subr.bf16.mxu0 %v11304_v30 }
 0x420   :  { %4866 = vmatprep.subr.bf16.mxu1 %v11307_v35 }
 0x422   :  { %4826 = vmatpush1.bf16.msra.mxu0 %v11322_v53 }
 0x423   :  { %4867 = vmatpush1.bf16.msra.mxu1 %v11326_v54  ;;  %4827 = vmatprep.subr.bf16.mxu0 %v11328_v62 }
 0x424   :  { %4868 = vmatprep.subr.bf16.mxu1 %v11331_v7 }
 0x426   :  { %4828 = vmatpush1.bf16.msra.mxu0 %v11334_v8 }
 0x427   :  { %4869 = vmatpush1.bf16.msra.mxu1 %v11338_v18  ;;  %4829 = vmatprep.subr.bf16.mxu0 %v11352_v16 }
 0x428   :  { %4870 = vmatprep.subr.bf16.mxu1 %v11361_v57 }
 0x42a   :  { %4830 = vmatpush1.bf16.msra.mxu0 %v11357_v55 }
 0x42b   :  { %4871 = vmatpush1.bf16.msra.mxu1 %v11359_v56  ;;  %4831 = vmatprep.subr.bf16.mxu0 %v11376_v13 }
 0x42c   :  { %4872 = vmatprep.subr.bf16.mxu1 %v11385_v27 }
 0x42e   :  { %4832 = vmatpush1.bf16.msra.mxu0 %v11381_v25 }
 0x42f   :  { %4873 = vmatpush1.bf16.msra.mxu1 %v11383_v23  ;;  %4833 = vmatprep.subr.bf16.mxu0 %v11400_v0 }
 0x430   :  { %4874 = vmatprep.subr.bf16.mxu1 %v11409_v42 }
 0x432   :  { %4834 = vmatpush1.bf16.msra.mxu0 %v11405_v26 }
 0x433   :  { %4875 = vmatpush1.bf16.msra.mxu1 %v11407_v51  ;;  %4835 = vmatprep.subr.bf16.mxu0 %v11424_v46 }
 0x434   :  { %4876 = vmatprep.subr.bf16.mxu1 %v11433_v11 }
 0x436   :  { %4836 = vmatpush2.bf16.msra.mxu0 %v11429_v1 }
 0x437   :  { %4877 = vmatpush2.bf16.msra.mxu1 %v11431_v33  ;;  %4837 = vmatprep.subr.bf16.mxu0 %v11448_v24 }
 0x438   :  { %4878 = vmatprep.subr.bf16.mxu1 %v11457_v37 }
 0x43a   :  { %4838 = vmatpush2.bf16.msra.mxu0 %v11453_v10 }
 0x43b   :  { %4879 = vmatpush2.bf16.msra.mxu1 %v11455_v36  ;;  %4839 = vmatprep.subr.bf16.mxu0 %v11472_v40 }
 0x43c   :  { %4880 = vmatprep.subr.bf16.mxu1 %v11481_v48 }
 0x43e   :  { %4840 = vmatpush2.bf16.msra.mxu0 %v11477_v31 }
 0x43f   :  { %4881 = vmatpush2.bf16.msra.mxu1 %v11479_v4  ;;  %4841 = vmatprep.subr.bf16.mxu0 %v11496_v44 }
 0x440   :  { %4882 = vmatprep.subr.bf16.mxu1 %v11505_v12 }
 0x442   :  { %4842 = vmatpush2.bf16.msra.mxu0 %v11501_v3 }
 0x443   :  { %4883 = vmatpush2.bf16.msra.mxu1 %v11503_v6  ;;  %4843 = vmatprep.subr.bf16.mxu0 %v11520_v61 }
 0x444   :  { %4884 = vmatprep.subr.bf16.mxu1 %v11529_v52 }
 0x446   :  { %4844 = vmatpush2.bf16.msra.mxu0 %v11525_v17 }
 0x447   :  { %4885 = vmatpush2.bf16.msra.mxu1 %v11527_v38  ;;  %4845 = vmatprep.subr.bf16.mxu0 %v11544_v32  ;;  %v4119_v32 = vld [vmem:[%s13167_s2 + $0x220] sm:$0xff] }
 0x448   :  { %4886 = vmatprep.subr.bf16.mxu1 %v11553_v41  ;;  %v11577_v41 = vcombine.high %v4124_v34, %v4128_v39 }
 0x44a   :  { %4846 = vmatpush2.bf16.msra.mxu0 %v11549_v47  ;;  %v11575_v47 = vcombine.low %v4124_v34, %v4128_v39  ;;  %13788 = vst [vmem:[#allocation25_spill] sm:$0xff] %v11577_v41  ;;  %v4120_v34 = vld [vmem:[%s13167_s2 + $0x228] sm:$0xff] }
 0x44b   :  { %4887 = vmatpush2.bf16.msra.mxu1 %v11551_v60  ;;  %4847 = vmatprep.subr.bf16.mxu0 %v11568_v14  ;;  %v4115_v60 = vld [vmem:[%s13167_s2 + $0x200] sm:$0xff]  ;;  %v4113_v14 = vld [vmem:[%s13167_s2 + $0x1f0] sm:$0xff] }
 0x44c   :  { %13787 = vst [vmem:[#allocation24_spill] sm:$0xff] %v11575_v47  ;;  %4888 = vmatprep.subr.bf16.mxu1 %v11577_v41  ;;  %v11592_v59 = vcombine.high %v4115_v60, %v4119_v32  ;;  %v11597_v39 = vcombine.low %v4115_v60, %v4119_v32  ;;  %v11601_v41 = vcombine.high %v4116_v43, %v4120_v34  ;;  %v4110_v32 = vld [vmem:[%s13167_s2 + $0x1d8] sm:$0xff] }
 0x44e   :  { %4848 = vmatpush2.bf16.msra.mxu0 %v11573_v28  ;;  %13789 = vst [vmem:[#allocation27_spill] sm:$0xff] %v11592_v59  ;;  %13790 = vst [vmem:[#allocation30_spill] sm:$0xff] %v11597_v39  ;;  %v11599_v28 = vcombine.low %v4116_v43, %v4120_v34  ;;  %v4114_v43 = vld [vmem:[%s13167_s2 + $0x1f8] sm:$0xff] }
 0x44f   :  { %4889 = vmatpush2.bf16.msra.mxu1 %v11575_v47  ;;  %13792 = vst [vmem:[#allocation29_spill] sm:$0xff] %v11601_v41  ;;  %4849 = vmatprep.subr.bf16.mxu0 %v11592_v59  ;;  %v4109_v47 = vld [vmem:[%s13167_s2 + $0x1d0] sm:$0xff] }
 0x450   :  { %13791 = vst [vmem:[#allocation28_spill] sm:$0xff] %v11599_v28  ;;  %4890 = vmatprep.subr.bf16.mxu1 %v11601_v41  ;;  %v11616_v60 = vcombine.high %v4109_v47, %v4113_v14  ;;  %v11621_v34 = vcombine.low %v4109_v47, %v4113_v14  ;;  %v11625_v41 = vcombine.high %v4110_v32, %v4114_v43  ;;  %v8601_v47 = vld [vmem:[%s13168_s0 + $0x38] sm:$0xff] }
 0x451   :  { %v3992_v6 = vunpack.c.l.bf16 %v8601_v47 }
 0x452   :  { %4850 = vmatpush2.bf16.msra.mxu0 %v11597_v39  ;;  %13793 = vst [vmem:[#allocation31_spill] sm:$0xff] %v11616_v60  ;;  %v11623_v39 = vcombine.low %v4110_v32, %v4114_v43  ;;  %13794 = vst [vmem:[#allocation32_spill] sm:$0xff] %v11625_v41 }
 0x453   :  { %4891 = vmatpush2.bf16.msra.mxu1 %v11599_v28  ;;  %4901 = vmatprep.subr.bf16.mxu0 %v11616_v60  ;;  %v8600_v28 = vld [vmem:[%s13168_s0 + $0x30] sm:$0xff] }
 0x454   :  { %4942 = vmatprep.subr.bf16.mxu1 %v11625_v41  ;;  %v3990_v59 = vunpack.c.l.bf16 %v8600_v28  ;;  %v3991_v38 = vunpack.c.h.bf16 %v8600_v28  ;;  %v3993_v28 = vunpack.c.h.bf16 %v8601_v47 }
 0x495   :  { %v3857_v17 = vpop.f32.mrf.mxu0  ;;  %v3898_v52 = vpop.f32.mrf.mxu1 }
 0x496   :  { %v3994_v14 = vadd.f32 %v3990_v59, %v3857_v17  ;;  %v3996_v31 = vadd.f32 %v3992_v6, %v3898_v52  ;;  %v8603_v52 = vld [vmem:[%s13170_s1 + $0x48] sm:$0xff] }
 0x497   :  { %v3859_v61 = vpop.f32.mrf.mxu0  ;;  %v3900_v32 = vpop.f32.mrf.mxu1 }
 0x498   :  { %v4009_v43 = vmul.f32 0.5, %v3994_v14  ;;  %v3995_v60 = vadd.f32 %v3991_v38, %v3859_v61  ;;  %v3997_v48 = vadd.f32 %v3993_v28, %v3900_v32  ;;  %v4003_v28 = vunpack.c.l.bf16 %v8603_v52 }
 0x499   :  { %v3861_v3 = vpop.f32.mrf.mxu0  ;;  %v3902_v41 = vpop.f32.mrf.mxu1 }
 0x49a   :  { %9200 = vtanh.f32 %v4009_v43  ;;  %v4013_v12 = vmul.f32 0.5, %v3995_v60  ;;  %v4018_v40 = vmul.f32 0.5, %v3997_v48 }
 0x49b   :  { %v3862_v44 = vpop.f32.mrf.mxu0  ;;  %v3903_v4 = vpop.f32.mrf.mxu1 }
 0x49c   :  { %9202 = vtanh.f32 %v4013_v12 }
 0x49d   :  { %9204 = vtanh.f32 %v3996_v31 }
 0x49e   :  { %9206 = vtanh.f32 %v4018_v40 }
 0x4a7   :  { %v9201_v36 = vpop.eup %9200 }
 0x4a8   :  { %v4011_v10 = vmul.f32 0.5, %v9201_v36 }
 0x4a9   :  { %v9203_v17 = vpop.eup %9202 }
 0x4aa   :  { %v4012_v59 = vadd.f32 0.5, %v4011_v10  ;;  %v4015_v37 = vmul.f32 0.5, %v9203_v17  ;;  %v9205_v61 = vpop.eup %9204 }
 0x4ab   :  { %v9207_v4 = vpop.eup %9206 }
 0x4ac   :  { %v4016_v14 = vadd.f32 0.5, %v4015_v37  ;;  %v4023_v38 = vmul.f32 %v9205_v61, %v4012_v59  ;;  %v4020_v44 = vmul.f32 0.5, %v9207_v4 }
 0x4ae   :  { %v4022_v3 = vmul.f32 %v4016_v14, %v11135_v29  ;;  %v4021_v31 = vadd.f32 0.5, %v4020_v44  ;;  %v8602_v29 = vld [vmem:[%s13170_s1 + $0x40] sm:$0xff]  ;;  %v4004_v44 = vunpack.c.h.bf16 %v8603_v52 }
 0x4af   :  { %v4001_v10 = vunpack.c.l.bf16 %v8602_v29  ;;  %v4002_v36 = vunpack.c.h.bf16 %v8602_v29 }
 0x4b0   :  { %v11636_v41 = vadd.f32 %v4023_v38, %v4022_v3 }
 0x4b2   :  { %13795 = vst [vmem:[#allocation33_spill] sm:$0xff] %v11636_v41  ;;  %9208 = vtanh.f32 %v11636_v41 }
 0x4bf   :  { %v9209_v6 = vpop.eup %9208 }
 0x4c0   :  { %v4026_v48 = vmul.f32 %v9209_v6, %v4021_v31 }
 0x4c2   :  { %v11639_v12 = vpack.c.bf16 %v4026_v48, %v4026_v48 }
 0x4c4   :  { %8604 = vst [vmem:[%s13169_s3 + $0xc] sm:$0xf] %v11639_v12 }
 0x4d5   :  { %v3939_v37 = vpop.f32.mrf.mxu0  ;;  %v3980_v40 = vpop.f32.mrf.mxu1 }
 0x4d6   :  { %v4005_v60 = vadd.f32 %v4001_v10, %v3939_v37  ;;  %v4007_v4 = vadd.f32 %v4003_v28, %v3980_v40 }
 0x4d7   :  { %v3941_v47 = vpop.f32.mrf.mxu0  ;;  %v3982_v32 = vpop.f32.mrf.mxu1 }
 0x4d8   :  { %v4027_v43 = vmul.f32 0.5, %v4005_v60  ;;  %v4006_v17 = vadd.f32 %v4002_v36, %v3941_v47  ;;  %v4008_v31 = vadd.f32 %v4004_v44, %v3982_v32 }
 0x4d9   :  { %v3943_v59 = vpop.f32.mrf.mxu0  ;;  %v3984_v14 = vpop.f32.mrf.mxu1 }
 0x4da   :  { %9210 = vtanh.f32 %v4027_v43  ;;  %v4031_v61 = vmul.f32 0.5, %v4006_v17  ;;  %v4036_v6 = vmul.f32 0.5, %v4008_v31  ;;  %v4101_v14 = vld [vmem:[%s13167_s2 + $0x190] sm:$0xff] }
 0x4db   :  { %v3944_v3 = vpop.f32.mrf.mxu0  ;;  %v3985_v38 = vpop.f32.mrf.mxu1  ;;  %v4097_v31 = vld [vmem:[%s13167_s2 + $0x170] sm:$0xff] }
 0x4dc   :  { %9212 = vtanh.f32 %v4031_v61  ;;  %v4106_v61 = vld [vmem:[%s13167_s2 + $0x1b8] sm:$0xff]  ;;  %v4093_v38 = vld [vmem:[%s13167_s2 + $0x150] sm:$0xff] }
 0x4dd   :  { %9214 = vtanh.f32 %v4007_v4 }
 0x4de   :  { %9216 = vtanh.f32 %v4036_v6  ;;  %v4094_v6 = vld [vmem:[%s13167_s2 + $0x158] sm:$0xff] }
 0x4e7   :  { %v9211_v48 = vpop.eup %9210 }
 0x4e8   :  { %v4029_v29 = vmul.f32 0.5, %v9211_v48  ;;  %v4098_v48 = vld [vmem:[%s13167_s2 + $0x178] sm:$0xff] }
 0x4e9   :  { %v9213_v10 = vpop.eup %9212 }
 0x4ea   :  { %v4030_v37 = vadd.f32 0.5, %v4029_v29  ;;  %v4033_v41 = vmul.f32 0.5, %v9213_v10  ;;  %v9215_v36 = vpop.eup %9214 }
 0x4eb   :  { %v9217_v40 = vpop.eup %9216 }
 0x4ec   :  { %v4034_v60 = vadd.f32 0.5, %v4033_v41  ;;  %v4041_v43 = vmul.f32 %v9215_v36, %v4030_v37  ;;  %v4038_v52 = vmul.f32 0.5, %v9217_v40  ;;  %v4105_v41 = vld [vmem:[%s13167_s2 + $0x1b0] sm:$0xff]  ;;  %v11694_v37 = vcombine.high %v4093_v38, %v4097_v31  ;;  %v4090_v40 = vld [vmem:[%s13167_s2 + $0x138] sm:$0xff] }
 0x4ed   :  { %v11673_v4 = vcombine.high %v4101_v14, %v4105_v41  ;;  %v11690_v29 = vcombine.low %v4101_v14, %v4105_v41  ;;  %v4085_v36 = vld [vmem:[%s13167_s2 + $0x110] sm:$0xff] }
 0x4ee   :  { %v4040_v47 = vmul.f32 %v4034_v60, %v11151_v50  ;;  %v4039_v28 = vadd.f32 0.5, %v4038_v52  ;;  %v4102_v50 = vld [vmem:[%s13167_s2 + $0x198] sm:$0xff]  ;;  %v11696_v60 = vcombine.high %v4094_v6, %v4098_v48  ;;  %v11714_v52 = vcombine.low %v4093_v38, %v4097_v31  ;;  %v4077_v14 = vld [vmem:[%s13167_s2 + $0xd0] sm:$0xff] }
 0x4ef   :  { %v11675_v44 = vcombine.high %v4102_v50, %v4106_v61  ;;  %v11692_v10 = vcombine.low %v4102_v50, %v4106_v61  ;;  %v4081_v41 = vld [vmem:[%s13167_s2 + $0xf0] sm:$0xff]  ;;  %v4078_v50 = vld [vmem:[%s13167_s2 + $0xd8] sm:$0xff] }
 0x4f0   :  { %v11652_v17 = vadd.f32 %v4041_v43, %v4040_v47  ;;  %v4089_v47 = vld [vmem:[%s13167_s2 + $0x130] sm:$0xff]  ;;  %v4086_v43 = vld [vmem:[%s13167_s2 + $0x118] sm:$0xff]  ;;  %13796 = vst [vmem:[#allocation34_spill] sm:$0xff] %v11714_v52  ;;  %v11744_v31 = vcombine.high %v4077_v14, %v4081_v41 }
 0x4f1   :  { %v4082_v61 = vld [vmem:[%s13167_s2 + $0xf8] sm:$0xff]  ;;  %v11740_v38 = vcombine.low %v4086_v43, %v4090_v40 }
 0x4f2   :  { %9218 = vtanh.f32 %v11652_v17  ;;  %13802 = vst [vmem:[#allocation40_spill] sm:$0xff] %v11744_v31 }
 0x4f3   :  { %13801 = vst [vmem:[#allocation39_spill] sm:$0xff] %v11740_v38 }
 0x4ff   :  { %v9219_v32 = vpop.eup %9218 }
 0x500   :  { %v4044_v59 = vmul.f32 %v9219_v32, %v4039_v28  ;;  %v11716_v28 = vcombine.low %v4094_v6, %v4098_v48  ;;  %v11720_v32 = vcombine.high %v4085_v36, %v4089_v47  ;;  %v11746_v6 = vcombine.high %v4078_v50, %v4082_v61  ;;  %v4069_v48 = vld [vmem:[%s13167_s2 + $0x90] sm:$0xff] }
 0x502   :  { %v4048_v3 = vpack.c.bf16 %v4044_v59, %v4044_v59  ;;  %13797 = vst [vmem:[#allocation35_spill] sm:$0xff] %v11716_v28  ;;  %13798 = vst [vmem:[#allocation36_spill] sm:$0xff] %v11720_v32  ;;  %v11722_v59 = vcombine.high %v4086_v43, %v4090_v40  ;;  %v11762_v43 = vcombine.low %v4077_v14, %v4081_v41  ;;  %v4062_v14 = vld [vmem:[%s13167_s2 + $0x58] sm:$0xff] }
 0x503   :  { %13803 = vst [vmem:[#allocation41_spill] sm:$0xff] %v11746_v6  ;;  %v11764_v40 = vcombine.low %v4078_v50, %v4082_v61  ;;  %v4066_v41 = vld [vmem:[%s13167_s2 + $0x78] sm:$0xff] }
 0x504   :  { %8605 = vst [vmem:[%s13171_s4 + $0x10] sm:$0xf] %v4048_v3  ;;  %4851 = vmatprep.mubr.bf16.mxu0 %v4048_v3  ;;  %4892 = vmatprep.mubr.bf16.mxu1 %v4048_v3  ;;  %13799 = vst [vmem:[#allocation37_spill] sm:$0xff] %v11722_v59 }
 0x505   :  { %4852 = vmatmul.mubr.bf16.vlgmr.msra.gmra.mxu0 %v11639_v12  ;;  %4893 = vmatmul.mubr.bf16.vlgmr.msra.gmra.mxu1 %v11639_v12  ;;  %13804 = vst [vmem:[#allocation42_spill] sm:$0xff] %v11762_v43  ;;  %13805 = vst [vmem:[#allocation43_spill] sm:$0xff] %v11764_v40 }
 0x506   :  { %4902 = vmatpush1.bf16.msra.mxu0 %v11621_v34  ;;  %4943 = vmatpush1.bf16.msra.mxu1 %v11623_v39 }
 0x507   :  { %4933 = vmatprep.mubr.bf16.mxu0 %v4048_v3  ;;  %4974 = vmatprep.mubr.bf16.mxu1 %v4048_v3  ;;  %v11738_v3 = vcombine.low %v4085_v36, %v4089_v47  ;;  %v4070_v36 = vld [vmem:[%s13167_s2 + $0x98] sm:$0xff] }
 0x508   :  { %4903 = vmatprep.subr.bf16.mxu0 %v11673_v4  ;;  %4944 = vmatprep.subr.bf16.mxu1 %v11675_v44  ;;  %v4074_v47 = vld [vmem:[%s13167_s2 + $0xb8] sm:$0xff] }
 0x509   :  { %13800 = vst [vmem:[#allocation38_spill] sm:$0xff] %v11738_v3  ;;  %v11788_v61 = vcombine.low %v4070_v36, %v4074_v47 }
 0x50a   :  { %4904 = vmatpush1.bf16.msra.mxu0 %v11690_v29  ;;  %4945 = vmatpush1.bf16.msra.mxu1 %v11692_v10 }
 0x50b   :  { %4905 = vmatprep.subr.bf16.mxu0 %v11694_v37  ;;  %4946 = vmatprep.subr.bf16.mxu1 %v11696_v60  ;;  %13809 = vst [vmem:[#allocation47_spill] sm:$0xff] %v11788_v61 }
 0x50e   :  { %4906 = vmatpush1.bf16.msra.mxu0 %v11714_v52  ;;  %4947 = vmatpush1.bf16.msra.mxu1 %v11716_v28  ;;  %v4073_v28 = vld [vmem:[%s13167_s2 + $0xb0] sm:$0xff] }
 0x50f   :  { %4907 = vmatprep.subr.bf16.mxu0 %v11720_v32  ;;  %4948 = vmatprep.subr.bf16.mxu1 %v11722_v59  ;;  %v11768_v59 = vcombine.high %v4069_v48, %v4073_v28  ;;  %v11770_v32 = vcombine.high %v4070_v36, %v4074_v47  ;;  %v4061_v52 = vld [vmem:[%s13167_s2 + $0x50] sm:$0xff]  ;;  %v11786_v50 = vcombine.low %v4069_v48, %v4073_v28  ;;  %v4054_v28 = vld [vmem:[%s13167_s2 + $0x18] sm:$0xff] }
 0x510   :  { %v4058_v48 = vld [vmem:[%s13167_s2 + $0x38] sm:$0xff]  ;;  %v11812_v47 = vcombine.low %v4062_v14, %v4066_v41 }
 0x511   :  { %13806 = vst [vmem:[#allocation44_spill] sm:$0xff] %v11768_v59  ;;  %13807 = vst [vmem:[#allocation45_spill] sm:$0xff] %v11770_v32 }
 0x512   :  { %4908 = vmatpush1.bf16.msra.mxu0 %v11738_v3  ;;  %4949 = vmatpush1.bf16.msra.mxu1 %v11740_v38  ;;  %v4065_v38 = vld [vmem:[%s13167_s2 + $0x70] sm:$0xff]  ;;  %13808 = vst [vmem:[#allocation46_spill] sm:$0xff] %v11786_v50  ;;  %13813 = vst [vmem:[#allocation51_spill] sm:$0xff] %v11812_v47 }
 0x513   :  { %4909 = vmatprep.subr.bf16.mxu0 %v11744_v31  ;;  %4950 = vmatprep.subr.bf16.mxu1 %v11746_v6  ;;  %v11792_v6 = vcombine.high %v4061_v52, %v4065_v38  ;;  %v11794_v31 = vcombine.high %v4062_v14, %v4066_v41  ;;  %v4053_v3 = vld [vmem:[%s13167_s2 + $0x10] sm:$0xff]  ;;  %v11810_v36 = vcombine.low %v4061_v52, %v4065_v38  ;;  %v4174_v52 = vld [vmem:[%s13167_s2 + $0x3d8] sm:$0xff] }
 0x514   :  { %v4178_v38 = vld [vmem:[%s13167_s2 + $0x3f8] sm:$0xff]  ;;  %v11836_v41 = vcombine.low %v4054_v28, %v4058_v48 }
 0x515   :  { %13810 = vst [vmem:[#allocation48_spill] sm:$0xff] %v11792_v6  ;;  %13811 = vst [vmem:[#allocation49_spill] sm:$0xff] %v11794_v31 }
 0x516   :  { %4910 = vmatpush1.bf16.msra.mxu0 %v11762_v43  ;;  %4951 = vmatpush1.bf16.msra.mxu1 %v11764_v40  ;;  %v4057_v40 = vld [vmem:[%s13167_s2 + $0x30] sm:$0xff]  ;;  %13812 = vst [vmem:[#allocation50_spill] sm:$0xff] %v11810_v36  ;;  %13817 = vst [vmem:[#allocation55_spill] sm:$0xff] %v11836_v41 }
 0x517   :  { %4911 = vmatprep.subr.bf16.mxu0 %v11768_v59  ;;  %4952 = vmatprep.subr.bf16.mxu1 %v11770_v32  ;;  %v11816_v32 = vcombine.high %v4053_v3, %v4057_v40  ;;  %v11818_v59 = vcombine.high %v4054_v28, %v4058_v48  ;;  %v4173_v43 = vld [vmem:[%s13167_s2 + $0x3d0] sm:$0xff]  ;;  %v11834_v14 = vcombine.low %v4053_v3, %v4057_v40  ;;  %v4166_v3 = vld [vmem:[%s13167_s2 + $0x398] sm:$0xff] }
 0x518   :  { %v4170_v40 = vld [vmem:[%s13167_s2 + $0x3b8] sm:$0xff]  ;;  %v11860_v48 = vcombine.low %v4174_v52, %v4178_v38 }
 0x519   :  { %13814 = vst [vmem:[#allocation52_spill] sm:$0xff] %v11816_v32  ;;  %13815 = vst [vmem:[#allocation53_spill] sm:$0xff] %v11818_v59 }
 0x51a   :  { %4912 = vmatpush1.bf16.msra.mxu0 %v11786_v50  ;;  %4953 = vmatpush1.bf16.msra.mxu1 %v11788_v61  ;;  %v4177_v61 = vld [vmem:[%s13167_s2 + $0x3f0] sm:$0xff]  ;;  %13816 = vst [vmem:[#allocation54_spill] sm:$0xff] %v11834_v14  ;;  %13821 = vst [vmem:[#allocation59_spill] sm:$0xff] %v11860_v48 }
 0x51b   :  { %4913 = vmatprep.subr.bf16.mxu0 %v11792_v6  ;;  %4954 = vmatprep.subr.bf16.mxu1 %v11794_v31  ;;  %v11840_v31 = vcombine.high %v4173_v43, %v4177_v61  ;;  %v11842_v6 = vcombine.high %v4174_v52, %v4178_v38  ;;  %v4165_v50 = vld [vmem:[%s13167_s2 + $0x390] sm:$0xff]  ;;  %v11858_v28 = vcombine.low %v4173_v43, %v4177_v61  ;;  %v4158_v43 = vld [vmem:[%s13167_s2 + $0x358] sm:$0xff] }
 0x51c   :  { %v4162_v61 = vld [vmem:[%s13167_s2 + $0x378] sm:$0xff]  ;;  %v11884_v38 = vcombine.low %v4166_v3, %v4170_v40 }
 0x51d   :  { %13818 = vst [vmem:[#allocation56_spill] sm:$0xff] %v11840_v31  ;;  %13819 = vst [vmem:[#allocation57_spill] sm:$0xff] %v11842_v6 }
 0x51e   :  { %4914 = vmatpush1.bf16.msra.mxu0 %v11810_v36  ;;  %4955 = vmatpush1.bf16.msra.mxu1 %v11812_v47  ;;  %v4169_v47 = vld [vmem:[%s13167_s2 + $0x3b0] sm:$0xff]  ;;  %13820 = vst [vmem:[#allocation58_spill] sm:$0xff] %v11858_v28  ;;  %13825 = vst [vmem:[#allocation63_spill] sm:$0xff] %v11884_v38 }
 0x51f   :  { %4915 = vmatprep.subr.bf16.mxu0 %v11816_v32  ;;  %4956 = vmatprep.subr.bf16.mxu1 %v11818_v59  ;;  %v11864_v59 = vcombine.high %v4165_v50, %v4169_v47  ;;  %v11866_v32 = vcombine.high %v4166_v3, %v4170_v40  ;;  %v4157_v36 = vld [vmem:[%s13167_s2 + $0x350] sm:$0xff]  ;;  %v11882_v52 = vcombine.low %v4165_v50, %v4169_v47  ;;  %v4150_v50 = vld [vmem:[%s13167_s2 + $0x318] sm:$0xff] }
 0x520   :  { %v4154_v47 = vld [vmem:[%s13167_s2 + $0x338] sm:$0xff]  ;;  %v11908_v40 = vcombine.low %v4158_v43, %v4162_v61 }
 0x521   :  { %13822 = vst [vmem:[#allocation60_spill] sm:$0xff] %v11864_v59  ;;  %13823 = vst [vmem:[#allocation61_spill] sm:$0xff] %v11866_v32 }
 0x522   :  { %4916 = vmatpush1.bf16.msra.mxu0 %v11834_v14  ;;  %4957 = vmatpush1.bf16.msra.mxu1 %v11836_v41  ;;  %v4161_v41 = vld [vmem:[%s13167_s2 + $0x370] sm:$0xff]  ;;  %13824 = vst [vmem:[#allocation62_spill] sm:$0xff] %v11882_v52  ;;  %13829 = vst [vmem:[#allocation67_spill] sm:$0xff] %v11908_v40 }
 0x523   :  { %4917 = vmatprep.subr.bf16.mxu0 %v11840_v31  ;;  %4958 = vmatprep.subr.bf16.mxu1 %v11842_v6  ;;  %v11888_v6 = vcombine.high %v4157_v36, %v4161_v41  ;;  %v11890_v31 = vcombine.high %v4158_v43, %v4162_v61  ;;  %v4149_v14 = vld [vmem:[%s13167_s2 + $0x310] sm:$0xff]  ;;  %v11906_v3 = vcombine.low %v4157_v36, %v4161_v41  ;;  %v4142_v36 = vld [vmem:[%s13167_s2 + $0x2d8] sm:$0xff] }
 0x524   :  { %v4146_v41 = vld [vmem:[%s13167_s2 + $0x2f8] sm:$0xff]  ;;  %v11932_v61 = vcombine.low %v4150_v50, %v4154_v47 }
 0x525   :  { %13826 = vst [vmem:[#allocation64_spill] sm:$0xff] %v11888_v6  ;;  %13827 = vst [vmem:[#allocation65_spill] sm:$0xff] %v11890_v31 }
 0x526   :  { %4918 = vmatpush2.bf16.msra.mxu0 %v11858_v28  ;;  %4959 = vmatpush2.bf16.msra.mxu1 %v11860_v48  ;;  %v4153_v48 = vld [vmem:[%s13167_s2 + $0x330] sm:$0xff]  ;;  %13828 = vst [vmem:[#allocation66_spill] sm:$0xff] %v11906_v3  ;;  %13833 = vst [vmem:[#allocation71_spill] sm:$0xff] %v11932_v61 }
 0x527   :  { %4919 = vmatprep.subr.bf16.mxu0 %v11864_v59  ;;  %4960 = vmatprep.subr.bf16.mxu1 %v11866_v32  ;;  %v11912_v32 = vcombine.high %v4149_v14, %v4153_v48  ;;  %v11914_v59 = vcombine.high %v4150_v50, %v4154_v47  ;;  %v4141_v28 = vld [vmem:[%s13167_s2 + $0x2d0] sm:$0xff]  ;;  %v11930_v43 = vcombine.low %v4149_v14, %v4153_v48  ;;  %v4134_v14 = vld [vmem:[%s13167_s2 + $0x298] sm:$0xff] }
 0x528   :  { %v4138_v48 = vld [vmem:[%s13167_s2 + $0x2b8] sm:$0xff]  ;;  %v11956_v47 = vcombine.low %v4142_v36, %v4146_v41 }
 0x529   :  { %13830 = vst [vmem:[#allocation68_spill] sm:$0xff] %v11912_v32  ;;  %13831 = vst [vmem:[#allocation69_spill] sm:$0xff] %v11914_v59 }
 0x52a   :  { %4920 = vmatpush2.bf16.msra.mxu0 %v11882_v52  ;;  %4961 = vmatpush2.bf16.msra.mxu1 %v11884_v38  ;;  %v4145_v38 = vld [vmem:[%s13167_s2 + $0x2f0] sm:$0xff]  ;;  %13832 = vst [vmem:[#allocation70_spill] sm:$0xff] %v11930_v43  ;;  %13837 = vst [vmem:[#allocation75_spill] sm:$0xff] %v11956_v47 }
 0x52b   :  { %4921 = vmatprep.subr.bf16.mxu0 %v11888_v6  ;;  %4962 = vmatprep.subr.bf16.mxu1 %v11890_v31  ;;  %v11936_v31 = vcombine.high %v4141_v28, %v4145_v38  ;;  %v11938_v6 = vcombine.high %v4142_v36, %v4146_v41  ;;  %v4133_v52 = vld [vmem:[%s13167_s2 + $0x290] sm:$0xff]  ;;  %v11954_v50 = vcombine.low %v4141_v28, %v4145_v38  ;;  %v4126_v28 = vld [vmem:[%s13167_s2 + $0x258] sm:$0xff] }
 0x52c   :  { %v4130_v38 = vld [vmem:[%s13167_s2 + $0x278] sm:$0xff]  ;;  %v11980_v41 = vcombine.low %v4134_v14, %v4138_v48 }
 0x52d   :  { %13834 = vst [vmem:[#allocation72_spill] sm:$0xff] %v11936_v31  ;;  %13835 = vst [vmem:[#allocation73_spill] sm:$0xff] %v11938_v6 }
 0x52e   :  { %4922 = vmatpush2.bf16.msra.mxu0 %v11906_v3  ;;  %4963 = vmatpush2.bf16.msra.mxu1 %v11908_v40  ;;  %v4137_v40 = vld [vmem:[%s13167_s2 + $0x2b0] sm:$0xff]  ;;  %13836 = vst [vmem:[#allocation74_spill] sm:$0xff] %v11954_v50 }
 0x52f   :  { %4923 = vmatprep.subr.bf16.mxu0 %v11912_v32  ;;  %4964 = vmatprep.subr.bf16.mxu1 %v11914_v59  ;;  %v11960_v59 = vcombine.high %v4133_v52, %v4137_v40  ;;  %v11962_v32 = vcombine.high %v4134_v14, %v4138_v48  ;;  %v4125_v3 = vld [vmem:[%s13167_s2 + $0x250] sm:$0xff]  ;;  %v11978_v36 = vcombine.low %v4133_v52, %v4137_v40  ;;  %v4118_v52 = vld [vmem:[%s13167_s2 + $0x218] sm:$0xff] }
 0x530   :  { %v4122_v40 = vld [vmem:[%s13167_s2 + $0x238] sm:$0xff]  ;;  %v12004_v48 = vcombine.low %v4126_v28, %v4130_v38 }
 0x531   :  { %13838 = vst [vmem:[#allocation76_spill] sm:$0xff] %v11960_v59  ;;  %13839 = vst [vmem:[#allocation77_spill] sm:$0xff] %v11962_v32 }
 0x532   :  { %4924 = vmatpush2.bf16.msra.mxu0 %v11930_v43  ;;  %4965 = vmatpush2.bf16.msra.mxu1 %v11932_v61  ;;  %v4129_v61 = vld [vmem:[%s13167_s2 + $0x270] sm:$0xff]  ;;  %13840 = vst [vmem:[#allocation78_spill] sm:$0xff] %v11978_v36 }
 0x533   :  { %4925 = vmatprep.subr.bf16.mxu0 %v11936_v31  ;;  %4966 = vmatprep.subr.bf16.mxu1 %v11938_v6  ;;  %v11984_v6 = vcombine.high %v4125_v3, %v4129_v61  ;;  %v11986_v31 = vcombine.high %v4126_v28, %v4130_v38  ;;  %v4117_v43 = vld [vmem:[%s13167_s2 + $0x210] sm:$0xff]  ;;  %v12002_v14 = vcombine.low %v4125_v3, %v4129_v61 }
 0x536   :  { %4926 = vmatpush2.bf16.msra.mxu0 %v11954_v50  ;;  %4967 = vmatpush2.bf16.msra.mxu1 %v11956_v47  ;;  %v4121_v47 = vld [vmem:[%s13167_s2 + $0x230] sm:$0xff] }
 0x537   :  { %4927 = vmatprep.subr.bf16.mxu0 %v11960_v59  ;;  %4968 = vmatprep.subr.bf16.mxu1 %v11962_v32  ;;  %v12008_v32 = vcombine.high %v4117_v43, %v4121_v47  ;;  %v12010_v59 = vcombine.high %v4118_v52, %v4122_v40  ;;  %v12014_v50 = vcombine.low %v4117_v43, %v4121_v47 }
 0x53a   :  { %4928 = vmatpush2.bf16.msra.mxu0 %v11978_v36  ;;  %4969 = vmatpush2.bf16.msra.mxu1 %v11980_v41  ;;  %v12016_v36 = vcombine.low %v4118_v52, %v4122_v40 }
 0x53b   :  { %4929 = vmatprep.subr.bf16.mxu0 %v11984_v6  ;;  %4970 = vmatprep.subr.bf16.mxu1 %v11986_v31 }
 0x53e   :  { %4930 = vmatpush2.bf16.msra.mxu0 %v12002_v14  ;;  %4971 = vmatpush2.bf16.msra.mxu1 %v12004_v48 }
 0x53f   :  { %4931 = vmatprep.subr.bf16.mxu0 %v12008_v32  ;;  %4972 = vmatprep.subr.bf16.mxu1 %v12010_v59 }
 0x542   :  { %4932 = vmatpush2.bf16.msra.mxu0 %v12014_v50  ;;  %4973 = vmatpush2.bf16.msra.mxu1 %v12016_v36 }
 0x543   :  { %5815 = vmatprep.subr.bf16.mxu0 %v11232_v58  ;;  %5856 = vmatprep.subr.bf16.mxu1 %v11241_v45  ;;  %v13841_v58 = vld [vmem:[#allocation5_spill] sm:$0xff]  ;;  %v13844_v45 = vld [vmem:[#allocation7_spill] sm:$0xff] }
 0x545   :  { %4934 = vmatmul.mubr.bf16.vlgmr.msra.gmra.mxu0 %v11639_v12  ;;  %4975 = vmatmul.mubr.bf16.vlgmr.msra.gmra.mxu1 %v11639_v12 }
 0x546   :  { %5816 = vmatpush1.bf16.msra.mxu0 %v11237_v21  ;;  %5857 = vmatpush1.bf16.msra.mxu1 %v11239_v9  ;;  %v13842_v21 = vld [vmem:[#allocation6_spill] sm:$0xff]  ;;  %v13843_v9 = vld [vmem:[#allocation4_spill] sm:$0xff] }
 0x547   :  { %5817 = vmatprep.subr.bf16.mxu0 %v11257_v2  ;;  %5858 = vmatprep.subr.bf16.mxu1 %v11271_v5  ;;  %v13846_v2 = vld [vmem:[#allocation10_spill] sm:$0xff]  ;;  %v13848_v5 = vld [vmem:[#allocation11_spill] sm:$0xff] }
 0x54a   :  { %5818 = vmatpush1.bf16.msra.mxu0 %v11255_v49  ;;  %5859 = vmatpush1.bf16.msra.mxu1 %v11269_v15  ;;  %v13845_v49 = vld [vmem:[#allocation9_spill] sm:$0xff]  ;;  %v13847_v15 = vld [vmem:[#allocation8_spill] sm:$0xff] }
 0x54b   :  { %5819 = vmatprep.subr.bf16.mxu0 %v11273_v19  ;;  %5860 = vmatprep.subr.bf16.mxu1 %v11282_v20  ;;  %v13849_v19 = vld [vmem:[#allocation13_spill] sm:$0xff]  ;;  %v13850_v20 = vld [vmem:[#allocation14_spill] sm:$0xff] }
 0x54e   :  { %5820 = vmatpush1.bf16.msra.mxu0 %v11298_v22  ;;  %5861 = vmatpush1.bf16.msra.mxu1 %v11302_v63  ;;  %v13851_v22 = vld [vmem:[#allocation12_spill] sm:$0xff]  ;;  %v13852_v63 = vld [vmem:[#allocation15_spill] sm:$0xff] }
 0x54f   :  { %5821 = vmatprep.subr.bf16.mxu0 %v11304_v30  ;;  %5862 = vmatprep.subr.bf16.mxu1 %v11307_v35  ;;  %v13853_v30 = vld [vmem:[#allocation17_spill] sm:$0xff]  ;;  %v13854_v35 = vld [vmem:[#allocation18_spill] sm:$0xff] }
 0x552   :  { %5822 = vmatpush1.bf16.msra.mxu0 %v11322_v53  ;;  %5863 = vmatpush1.bf16.msra.mxu1 %v11326_v54  ;;  %v13855_v53 = vld [vmem:[#allocation16_spill] sm:$0xff]  ;;  %v13856_v54 = vld [vmem:[#allocation19_spill] sm:$0xff] }
 0x553   :  { %5823 = vmatprep.subr.bf16.mxu0 %v11328_v62  ;;  %5864 = vmatprep.subr.bf16.mxu1 %v11331_v7  ;;  %v13857_v62 = vld [vmem:[#allocation21_spill] sm:$0xff]  ;;  %v13858_v7 = vld [vmem:[#allocation22_spill] sm:$0xff] }
 0x556   :  { %5824 = vmatpush1.bf16.msra.mxu0 %v11334_v8  ;;  %5865 = vmatpush1.bf16.msra.mxu1 %v11338_v18  ;;  %v13859_v8 = vld [vmem:[#allocation20_spill] sm:$0xff]  ;;  %v13860_v18 = vld [vmem:[#allocation23_spill] sm:$0xff] }
 0x557   :  { %5825 = vmatprep.subr.bf16.mxu0 %v11352_v16  ;;  %5866 = vmatprep.subr.bf16.mxu1 %v11361_v57  ;;  %v13861_v16 = vld [vmem:[#allocation25_spill] sm:$0xff]  ;;  %v13864_v57 = vld [vmem:[#allocation27_spill] sm:$0xff] }
 0x55a   :  { %5826 = vmatpush1.bf16.msra.mxu0 %v11357_v55  ;;  %5867 = vmatpush1.bf16.msra.mxu1 %v11359_v56  ;;  %v13862_v55 = vld [vmem:[#allocation26_spill] sm:$0xff]  ;;  %v13863_v56 = vld [vmem:[#allocation24_spill] sm:$0xff] }
 0x55b   :  { %5827 = vmatprep.subr.bf16.mxu0 %v11376_v13  ;;  %5868 = vmatprep.subr.bf16.mxu1 %v11385_v27  ;;  %v13865_v13 = vld [vmem:[#allocation29_spill] sm:$0xff]  ;;  %v13868_v27 = vld [vmem:[#allocation31_spill] sm:$0xff] }
 0x55e   :  { %5828 = vmatpush1.bf16.msra.mxu0 %v11381_v25  ;;  %5869 = vmatpush1.bf16.msra.mxu1 %v11383_v23  ;;  %v13866_v25 = vld [vmem:[#allocation30_spill] sm:$0xff]  ;;  %v13867_v23 = vld [vmem:[#allocation28_spill] sm:$0xff] }
 0x55f   :  { %5829 = vmatprep.subr.bf16.mxu0 %v11400_v0  ;;  %5870 = vmatprep.subr.bf16.mxu1 %v11409_v42  ;;  %v13869_v0 = vld [vmem:[#allocation32_spill] sm:$0xff] }
 0x562   :  { %5830 = vmatpush1.bf16.msra.mxu0 %v11405_v26  ;;  %5871 = vmatpush1.bf16.msra.mxu1 %v11407_v51  ;;  %v8734_v26 = vld [vmem:[%s13168_s0 + $0x40] sm:$0xff] }
 0x563   :  { %5831 = vmatprep.subr.bf16.mxu0 %v11424_v46  ;;  %5872 = vmatprep.subr.bf16.mxu1 %v11433_v11  ;;  %v4986_v51 = vunpack.c.l.bf16 %v8734_v26  ;;  %v4987_v42 = vunpack.c.h.bf16 %v8734_v26 }
 0x566   :  { %5832 = vmatpush2.bf16.msra.mxu0 %v11429_v1  ;;  %5873 = vmatpush2.bf16.msra.mxu1 %v11431_v33  ;;  %v8735_v33 = vld [vmem:[%s13168_s0 + $0x48] sm:$0xff] }
 0x567   :  { %5833 = vmatprep.subr.bf16.mxu0 %v11448_v24  ;;  %5874 = vmatprep.subr.bf16.mxu1 %v13841_v58  ;;  %v4988_v43 = vunpack.c.l.bf16 %v8735_v33 }
 0x56a   :  { %5834 = vmatpush2.bf16.msra.mxu0 %v13842_v21  ;;  %5875 = vmatpush2.bf16.msra.mxu1 %v13843_v9  ;;  %v4989_v21 = vunpack.c.h.bf16 %v8735_v33 }
 0x56b   :  { %5835 = vmatprep.subr.bf16.mxu0 %v13844_v45  ;;  %5876 = vmatprep.subr.bf16.mxu1 %v13845_v49 }
 0x56e   :  { %5836 = vmatpush2.bf16.msra.mxu0 %v13846_v2  ;;  %5877 = vmatpush2.bf16.msra.mxu1 %v13847_v15 }
 0x56f   :  { %5837 = vmatprep.subr.bf16.mxu0 %v13848_v5  ;;  %5878 = vmatprep.subr.bf16.mxu1 %v13849_v19 }
 0x572   :  { %5838 = vmatpush2.bf16.msra.mxu0 %v13850_v20  ;;  %5879 = vmatpush2.bf16.msra.mxu1 %v13851_v22 }
 0x573   :  { %5839 = vmatprep.subr.bf16.mxu0 %v13852_v63  ;;  %5880 = vmatprep.subr.bf16.mxu1 %v13853_v30  ;;  %v13870_v63 = vld [vmem:[#allocation33_spill] sm:$0xff] }
 0x576   :  { %5840 = vmatpush2.bf16.msra.mxu0 %v13854_v35  ;;  %5881 = vmatpush2.bf16.msra.mxu1 %v13855_v53 }
 0x577   :  { %5841 = vmatprep.subr.bf16.mxu0 %v13856_v54  ;;  %5882 = vmatprep.subr.bf16.mxu1 %v13857_v62 }
 0x57a   :  { %5842 = vmatpush2.bf16.msra.mxu0 %v13858_v7  ;;  %5883 = vmatpush2.bf16.msra.mxu1 %v13859_v8 }
 0x57b   :  { %5843 = vmatprep.subr.bf16.mxu0 %v13860_v18  ;;  %5884 = vmatprep.subr.bf16.mxu1 %v13861_v16 }
 0x57e   :  { %5844 = vmatpush2.bf16.msra.mxu0 %v13862_v55  ;;  %5885 = vmatpush2.bf16.msra.mxu1 %v13863_v56  ;;  %v8736_v55 = vld [vmem:[%s13170_s1 + $0x30] sm:$0xff] }
 0x57f   :  { %5845 = vmatprep.subr.bf16.mxu0 %v13864_v57  ;;  %5886 = vmatprep.subr.bf16.mxu1 %v13865_v13  ;;  %v4997_v56 = vunpack.c.l.bf16 %v8736_v55  ;;  %v4998_v57 = vunpack.c.h.bf16 %v8736_v55  ;;  %v13887_v55 = vld [vmem:[#allocation50_spill] sm:$0xff] }
 0x582   :  { %5846 = vmatpush2.bf16.msra.mxu0 %v13866_v25  ;;  %5887 = vmatpush2.bf16.msra.mxu1 %v13867_v23  ;;  %v8737_v23 = vld [vmem:[%s13170_s1 + $0x38] sm:$0xff] }
 0x583   :  { %5897 = vmatprep.subr.bf16.mxu0 %v13868_v27  ;;  %5938 = vmatprep.subr.bf16.mxu1 %v13869_v0 }
 0x5c5   :  { %v4853_v46 = vpop.f32.mrf.mxu0  ;;  %v4894_v1 = vpop.f32.mrf.mxu1 }
 0x5c6   :  { %v4990_v11 = vadd.f32 %v4986_v51, %v4853_v46  ;;  %v4992_v58 = vadd.f32 %v4988_v43, %v4894_v1  ;;  %v5000_v43 = vunpack.c.h.bf16 %v8737_v23 }
 0x5c7   :  { %v4855_v24 = vpop.f32.mrf.mxu0  ;;  %v4896_v12 = vpop.f32.mrf.mxu1 }
 0x5c8   :  { %v5005_v3 = vmul.f32 0.5, %v4990_v11  ;;  %v4991_v61 = vadd.f32 %v4987_v42, %v4855_v24  ;;  %v4993_v9 = vadd.f32 %v4989_v21, %v4896_v12  ;;  %v4999_v42 = vunpack.c.l.bf16 %v8737_v23  ;;  %v13892_v23 = vld [vmem:[#allocation55_spill] sm:$0xff] }
 0x5c9   :  { %v4857_v47 = vpop.f32.mrf.mxu0  ;;  %v4898_v28 = vpop.f32.mrf.mxu1 }
 0x5ca   :  { %9220 = vtanh.f32 %v5005_v3  ;;  %v5009_v38 = vmul.f32 0.5, %v4991_v61  ;;  %v5014_v45 = vmul.f32 0.5, %v4993_v9 }
 0x5cb   :  { %v4858_v52 = vpop.f32.mrf.mxu0  ;;  %v4899_v40 = vpop.f32.mrf.mxu1 }
 0x5cc   :  { %9222 = vtanh.f32 %v5009_v38 }
 0x5cd   :  { %9224 = vtanh.f32 %v4992_v58 }
 0x5ce   :  { %9226 = vtanh.f32 %v5014_v45 }
 0x5d7   :  { %v9221_v49 = vpop.eup %9220 }
 0x5d8   :  { %v5007_v2 = vmul.f32 0.5, %v9221_v49 }
 0x5d9   :  { %v9223_v15 = vpop.eup %9222 }
 0x5da   :  { %v5008_v5 = vadd.f32 0.5, %v5007_v2  ;;  %v5011_v19 = vmul.f32 0.5, %v9223_v15  ;;  %v9225_v22 = vpop.eup %9224 }
 0x5db   :  { %v9227_v54 = vpop.eup %9226 }
 0x5dc   :  { %v5012_v20 = vadd.f32 0.5, %v5011_v19  ;;  %v5019_v35 = vmul.f32 %v9225_v22, %v5008_v5  ;;  %v5016_v62 = vmul.f32 0.5, %v9227_v54  ;;  %v13882_v54 = vld [vmem:[#allocation45_spill] sm:$0xff] }
 0x5de   :  { %v5018_v30 = vmul.f32 %v5012_v20, %v13870_v63  ;;  %v5017_v7 = vadd.f32 0.5, %v5016_v62  ;;  %v13883_v62 = vld [vmem:[#allocation46_spill] sm:$0xff] }
 0x5e0   :  { %v12097_v53 = vadd.f32 %v5019_v35, %v5018_v30  ;;  %v13872_v30 = vld [vmem:[#allocation35_spill] sm:$0xff]  ;;  %v13875_v35 = vld [vmem:[#allocation38_spill] sm:$0xff] }
 0x5e2   :  { %9228 = vtanh.f32 %v12097_v53 }
 0x5ef   :  { %v9229_v8 = vpop.eup %9228 }
 0x5f0   :  { %v5022_v18 = vmul.f32 %v9229_v8, %v5017_v7  ;;  %v13884_v7 = vld [vmem:[#allocation47_spill] sm:$0xff]  ;;  %v13885_v8 = vld [vmem:[#allocation48_spill] sm:$0xff] }
 0x5f2   :  { %v12100_v16 = vpack.c.bf16 %v5022_v18, %v5022_v18  ;;  %v13886_v18 = vld [vmem:[#allocation49_spill] sm:$0xff] }
 0x5f4   :  { %8738 = vst [vmem:[%s13169_s3 + $0x10] sm:$0xf] %v12100_v16 }
 0x605   :  { %v4935_v13 = vpop.f32.mrf.mxu0  ;;  %v4976_v25 = vpop.f32.mrf.mxu1 }
 0x606   :  { %v5001_v27 = vadd.f32 %v4997_v56, %v4935_v13  ;;  %v5003_v3 = vadd.f32 %v4999_v42, %v4976_v25  ;;  %v13888_v56 = vld [vmem:[#allocation51_spill] sm:$0xff]  ;;  %v13890_v13 = vld [vmem:[#allocation53_spill] sm:$0xff]  ;;  %v13891_v25 = vld [vmem:[#allocation54_spill] sm:$0xff] }
 0x607   :  { %v4937_v0 = vpop.f32.mrf.mxu0  ;;  %v4978_v26 = vpop.f32.mrf.mxu1  ;;  %v13897_v42 = vld [vmem:[#allocation60_spill] sm:$0xff] }
 0x608   :  { %v5023_v51 = vmul.f32 0.5, %v5001_v27  ;;  %v5002_v46 = vadd.f32 %v4998_v57, %v4937_v0  ;;  %v5004_v61 = vadd.f32 %v5000_v43, %v4978_v26  ;;  %v13889_v57 = vld [vmem:[#allocation52_spill] sm:$0xff]  ;;  %v13894_v0 = vld [vmem:[#allocation57_spill] sm:$0xff]  ;;  %v13895_v26 = vld [vmem:[#allocation58_spill] sm:$0xff] }
 0x609   :  { %v4939_v1 = vpop.f32.mrf.mxu0  ;;  %v4980_v33 = vpop.f32.mrf.mxu1  ;;  %v13893_v27 = vld [vmem:[#allocation56_spill] sm:$0xff] }
 0x60a   :  { %9230 = vtanh.f32 %v5023_v51  ;;  %v5027_v11 = vmul.f32 0.5, %v5002_v46  ;;  %v5032_v47 = vmul.f32 0.5, %v5004_v61  ;;  %v13896_v51 = vld [vmem:[#allocation59_spill] sm:$0xff]  ;;  %v13898_v46 = vld [vmem:[#allocation61_spill] sm:$0xff]  ;;  %v13899_v1 = vld [vmem:[#allocation62_spill] sm:$0xff] }
 0x60b   :  { %v4940_v24 = vpop.f32.mrf.mxu0  ;;  %v4981_v12 = vpop.f32.mrf.mxu1  ;;  %v13900_v33 = vld [vmem:[#allocation63_spill] sm:$0xff]  ;;  %v13905_v43 = vld [vmem:[#allocation68_spill] sm:$0xff]  ;;  %v13906_v61 = vld [vmem:[#allocation69_spill] sm:$0xff] }
 0x60c   :  { %9232 = vtanh.f32 %v5027_v11  ;;  %v13901_v11 = vld [vmem:[#allocation64_spill] sm:$0xff]  ;;  %v13902_v24 = vld [vmem:[#allocation65_spill] sm:$0xff]  ;;  %v13903_v12 = vld [vmem:[#allocation66_spill] sm:$0xff] }
 0x60d   :  { %9234 = vtanh.f32 %v5003_v3  ;;  %v13904_v3 = vld [vmem:[#allocation67_spill] sm:$0xff] }
 0x60e   :  { %9236 = vtanh.f32 %v5032_v47  ;;  %v13907_v47 = vld [vmem:[#allocation70_spill] sm:$0xff] }
 0x617   :  { %v9231_v28 = vpop.eup %9230 }
 0x618   :  { %v5025_v38 = vmul.f32 0.5, %v9231_v28  ;;  %v13908_v28 = vld [vmem:[#allocation71_spill] sm:$0xff] }
 0x619   :  { %v9233_v52 = vpop.eup %9232 }
 0x61a   :  { %v5026_v40 = vadd.f32 0.5, %v5025_v38  ;;  %v5029_v58 = vmul.f32 0.5, %v9233_v52  ;;  %v9235_v9 = vpop.eup %9234  ;;  %v13909_v38 = vld [vmem:[#allocation72_spill] sm:$0xff]  ;;  %v13910_v52 = vld [vmem:[#allocation73_spill] sm:$0xff] }
 0x61b   :  { %v9237_v15 = vpop.eup %9236 }
 0x61c   :  { %v5030_v21 = vadd.f32 0.5, %v5029_v58  ;;  %v5037_v49 = vmul.f32 %v9235_v9, %v5026_v40  ;;  %v5034_v5 = vmul.f32 0.5, %v9237_v15  ;;  %v13911_v40 = vld [vmem:[#allocation74_spill] sm:$0xff]  ;;  %v13912_v58 = vld [vmem:[#allocation75_spill] sm:$0xff]  ;;  %v13914_v9 = vld [vmem:[#allocation77_spill] sm:$0xff] }
 0x61e   :  { %v5036_v45 = vmul.f32 %v5030_v21, %v11652_v17  ;;  %v5035_v19 = vadd.f32 0.5, %v5034_v5  ;;  %v13871_v17 = vld [vmem:[#allocation34_spill] sm:$0xff]  ;;  %v13913_v21 = vld [vmem:[#allocation76_spill] sm:$0xff] }
 0x620   :  { %v12113_v2 = vadd.f32 %v5037_v49, %v5036_v45  ;;  %v13915_v45 = vld [vmem:[#allocation78_spill] sm:$0xff]  ;;  %v6092_v49 = vld [vmem:[%s13167_s2 + $0x188] sm:$0xff] }
 0x622   :  { %9238 = vtanh.f32 %v12113_v2 }
 0x62f   :  { %v9239_v20 = vpop.eup %9238 }
 0x630   :  { %v5040_v22 = vmul.f32 %v9239_v20, %v5035_v19  ;;  %v6096_v19 = vld [vmem:[%s13167_s2 + $0x1a8] sm:$0xff]  ;;  %v6083_v20 = vld [vmem:[%s13167_s2 + $0x140] sm:$0xff] }
 0x632   :  { %v5044_v63 = vpack.c.bf16 %v5040_v22, %v5040_v22  ;;  %v6087_v22 = vld [vmem:[%s13167_s2 + $0x160] sm:$0xff] }
 0x634   :  { %8739 = vst [vmem:[%s13171_s4 + $0xc] sm:$0xf] %v5044_v63  ;;  %5847 = vmatprep.mubr.bf16.mxu0 %v5044_v63  ;;  %5888 = vmatprep.mubr.bf16.mxu1 %v5044_v63 }
 0x635   :  { %5848 = vmatmul.mubr.bf16.vlgmr.msra.gmra.mxu0 %v12100_v16  ;;  %5889 = vmatmul.mubr.bf16.vlgmr.msra.gmra.mxu1 %v12100_v16 }
 0x636   :  { %5898 = vmatpush1.bf16.msra.mxu0 %v11621_v34  ;;  %5939 = vmatpush1.bf16.msra.mxu1 %v11623_v39  ;;  %v13873_v34 = vld [vmem:[#allocation36_spill] sm:$0xff]  ;;  %v13874_v39 = vld [vmem:[#allocation37_spill] sm:$0xff] }
 0x637   :  { %5929 = vmatprep.mubr.bf16.mxu0 %v5044_v63  ;;  %5970 = vmatprep.mubr.bf16.mxu1 %v5044_v63  ;;  %v12231_v63 = vcombine.low %v6092_v49, %v6096_v19 }
 0x638   :  { %5899 = vmatprep.subr.bf16.mxu0 %v11673_v4  ;;  %5940 = vmatprep.subr.bf16.mxu1 %v11675_v44  ;;  %v13876_v4 = vld [vmem:[#allocation39_spill] sm:$0xff]  ;;  %v13877_v44 = vld [vmem:[#allocation40_spill] sm:$0xff] }
 0x63a   :  { %5900 = vmatpush1.bf16.msra.mxu0 %v11690_v29  ;;  %5941 = vmatpush1.bf16.msra.mxu1 %v11692_v10  ;;  %v13878_v29 = vld [vmem:[#allocation41_spill] sm:$0xff]  ;;  %v13879_v10 = vld [vmem:[#allocation42_spill] sm:$0xff] }
 0x63b   :  { %5901 = vmatprep.subr.bf16.mxu0 %v11694_v37  ;;  %5942 = vmatprep.subr.bf16.mxu1 %v11696_v60  ;;  %v13880_v37 = vld [vmem:[#allocation43_spill] sm:$0xff]  ;;  %v13881_v60 = vld [vmem:[#allocation44_spill] sm:$0xff] }
 0x63e   :  { %5902 = vmatpush1.bf16.msra.mxu0 %v13871_v17  ;;  %5943 = vmatpush1.bf16.msra.mxu1 %v13872_v30  ;;  %v12233_v17 = vcombine.high %v6092_v49, %v6096_v19  ;;  %v12235_v30 = vcombine.high %v6083_v20, %v6087_v22  ;;  %v6168_v49 = vld [vmem:[%s13167_s2 + $0x3e8] sm:$0xff] }
 0x63f   :  { %5903 = vmatprep.subr.bf16.mxu0 %v13873_v34  ;;  %5944 = vmatprep.subr.bf16.mxu1 %v13874_v39  ;;  %v6084_v34 = vld [vmem:[%s13167_s2 + $0x148] sm:$0xff] }
 0x640   :  { %v6088_v39 = vld [vmem:[%s13167_s2 + $0x168] sm:$0xff] }
 0x642   :  { %5904 = vmatpush1.bf16.msra.mxu0 %v13875_v35  ;;  %5945 = vmatpush1.bf16.msra.mxu1 %v13876_v4  ;;  %v12244_v35 = vcombine.high %v6084_v34, %v6088_v39  ;;  %v6075_v4 = vld [vmem:[%s13167_s2 + $0x100] sm:$0xff] }
 0x643   :  { %5905 = vmatprep.subr.bf16.mxu0 %v13877_v44  ;;  %5946 = vmatprep.subr.bf16.mxu1 %v13878_v29  ;;  %v6079_v44 = vld [vmem:[%s13167_s2 + $0x120] sm:$0xff]  ;;  %v6076_v29 = vld [vmem:[%s13167_s2 + $0x108] sm:$0xff] }
 0x646   :  { %5906 = vmatpush1.bf16.msra.mxu0 %v13879_v10  ;;  %5947 = vmatpush1.bf16.msra.mxu1 %v13880_v37  ;;  %v6080_v10 = vld [vmem:[%s13167_s2 + $0x128] sm:$0xff]  ;;  %v12260_v37 = vcombine.low %v6083_v20, %v6087_v22 }
 0x647   :  { %5907 = vmatprep.subr.bf16.mxu0 %v13881_v60  ;;  %5948 = vmatprep.subr.bf16.mxu1 %v13882_v54  ;;  %v12264_v60 = vcombine.low %v6084_v34, %v6088_v39  ;;  %v12266_v54 = vcombine.high %v6075_v4, %v6079_v44  ;;  %v6155_v34 = vld [vmem:[%s13167_s2 + $0x380] sm:$0xff] }
 0x648   :  { %v6159_v39 = vld [vmem:[%s13167_s2 + $0x3a0] sm:$0xff] }
 0x64a   :  { %5908 = vmatpush1.bf16.msra.mxu0 %v13883_v62  ;;  %5949 = vmatpush1.bf16.msra.mxu1 %v13884_v7  ;;  %v12269_v62 = vcombine.high %v6076_v29, %v6080_v10  ;;  %v6067_v7 = vld [vmem:[%s13167_s2 + $0xc0] sm:$0xff] }
 0x64b   :  { %5909 = vmatprep.subr.bf16.mxu0 %v13885_v8  ;;  %5950 = vmatprep.subr.bf16.mxu1 %v13886_v18  ;;  %v6071_v8 = vld [vmem:[%s13167_s2 + $0xe0] sm:$0xff]  ;;  %v6068_v18 = vld [vmem:[%s13167_s2 + $0xc8] sm:$0xff] }
 0x64e   :  { %5910 = vmatpush1.bf16.msra.mxu0 %v13887_v55  ;;  %5951 = vmatpush1.bf16.msra.mxu1 %v13888_v56  ;;  %v6072_v55 = vld [vmem:[%s13167_s2 + $0xe8] sm:$0xff]  ;;  %v12284_v56 = vcombine.low %v6075_v4, %v6079_v44  ;;  %v12410_v44 = vcombine.high %v6155_v34, %v6159_v39 }
 0x64f   :  { %5911 = vmatprep.subr.bf16.mxu0 %v13889_v57  ;;  %5952 = vmatprep.subr.bf16.mxu1 %v13890_v13  ;;  %v12288_v57 = vcombine.low %v6076_v29, %v6080_v10  ;;  %v12290_v13 = vcombine.high %v6067_v7, %v6071_v8  ;;  %v6156_v4 = vld [vmem:[%s13167_s2 + $0x388] sm:$0xff]  ;;  %v12415_v10 = vcombine.low %v6155_v34, %v6159_v39 }
 0x650   :  { %v6160_v29 = vld [vmem:[%s13167_s2 + $0x3a8] sm:$0xff] }
 0x651   :  { %13916 = vst [vmem:[#allocation5_spill] sm:$0xff] %v12415_v10  ;;  %v6132_v34 = vld [vmem:[%s13167_s2 + $0x2c8] sm:$0xff] }
 0x652   :  { %5912 = vmatpush1.bf16.msra.mxu0 %v13891_v25  ;;  %5953 = vmatpush1.bf16.msra.mxu1 %v13892_v23  ;;  %v12293_v25 = vcombine.high %v6068_v18, %v6072_v55  ;;  %v12296_v23 = vcombine.low %v6067_v7, %v6071_v8  ;;  %v12417_v7 = vcombine.low %v6156_v4, %v6160_v29 }
 0x653   :  { %5913 = vmatprep.subr.bf16.mxu0 %v13893_v27  ;;  %5954 = vmatprep.subr.bf16.mxu1 %v13894_v0  ;;  %v12300_v27 = vcombine.low %v6068_v18, %v6072_v55  ;;  %v6059_v0 = vld [vmem:[%s13167_s2 + $0x80] sm:$0xff]  ;;  %v12419_v8 = vcombine.high %v6156_v4, %v6160_v29  ;;  %v6136_v4 = vld [vmem:[%s13167_s2 + $0x2e8] sm:$0xff] }
 0x654   :  { %13917 = vst [vmem:[#allocation6_spill] sm:$0xff] %v12417_v7  ;;  %v6147_v18 = vld [vmem:[%s13167_s2 + $0x340] sm:$0xff] }
 0x655   :  { %13918 = vst [vmem:[#allocation4_spill] sm:$0xff] %v12419_v8  ;;  %v6151_v55 = vld [vmem:[%s13167_s2 + $0x360] sm:$0xff] }
 0x656   :  { %5914 = vmatpush2.bf16.msra.mxu0 %v13895_v26  ;;  %5955 = vmatpush2.bf16.msra.mxu1 %v13896_v51  ;;  %v6063_v26 = vld [vmem:[%s13167_s2 + $0xa0] sm:$0xff]  ;;  %v6060_v51 = vld [vmem:[%s13167_s2 + $0x88] sm:$0xff] }
 0x657   :  { %5915 = vmatprep.subr.bf16.mxu0 %v13897_v42  ;;  %5956 = vmatprep.subr.bf16.mxu1 %v13898_v46  ;;  %v12314_v42 = vcombine.high %v6059_v0, %v6063_v26  ;;  %v6064_v46 = vld [vmem:[%s13167_s2 + $0xa8] sm:$0xff] }
 0x65a   :  { %5916 = vmatpush2.bf16.msra.mxu0 %v13899_v1  ;;  %5957 = vmatpush2.bf16.msra.mxu1 %v13900_v33  ;;  %v12319_v1 = vcombine.low %v6059_v0, %v6063_v26  ;;  %v12321_v33 = vcombine.low %v6060_v51, %v6064_v46  ;;  %v6148_v0 = vld [vmem:[%s13167_s2 + $0x348] sm:$0xff]  ;;  %v12434_v26 = vcombine.high %v6147_v18, %v6151_v55 }
 0x65b   :  { %5917 = vmatprep.subr.bf16.mxu0 %v13901_v11  ;;  %5958 = vmatprep.subr.bf16.mxu1 %v13902_v24  ;;  %v12323_v11 = vcombine.high %v6060_v51, %v6064_v46  ;;  %v6051_v24 = vld [vmem:[%s13167_s2 + $0x40] sm:$0xff]  ;;  %v6152_v51 = vld [vmem:[%s13167_s2 + $0x368] sm:$0xff]  ;;  %v12439_v46 = vcombine.low %v6147_v18, %v6151_v55  ;;  %v12489_v18 = vcombine.low %v6132_v34, %v6136_v4 }
 0x65c   :  { %13919 = vst [vmem:[#allocation7_spill] sm:$0xff] %v12434_v26  ;;  %v12491_v55 = vcombine.high %v6132_v34, %v6136_v4  ;;  %v6115_v34 = vld [vmem:[%s13167_s2 + $0x240] sm:$0xff] }
 0x65d   :  { %13920 = vst [vmem:[#allocation9_spill] sm:$0xff] %v12439_v46  ;;  %13929 = vst [vmem:[#allocation18_spill] sm:$0xff] %v12489_v18  ;;  %v6119_v4 = vld [vmem:[%s13167_s2 + $0x260] sm:$0xff] }
 0x65e   :  { %5918 = vmatpush2.bf16.msra.mxu0 %v13903_v12  ;;  %5959 = vmatpush2.bf16.msra.mxu1 %v13904_v3  ;;  %v6055_v12 = vld [vmem:[%s13167_s2 + $0x60] sm:$0xff]  ;;  %v6052_v3 = vld [vmem:[%s13167_s2 + $0x48] sm:$0xff]  ;;  %13930 = vst [vmem:[#allocation16_spill] sm:$0xff] %v12491_v55 }
 0x65f   :  { %5919 = vmatprep.subr.bf16.mxu0 %v13905_v43  ;;  %5960 = vmatprep.subr.bf16.mxu1 %v13906_v61  ;;  %v12338_v43 = vcombine.high %v6051_v24, %v6055_v12  ;;  %v6056_v61 = vld [vmem:[%s13167_s2 + $0x68] sm:$0xff] }
 0x662   :  { %5920 = vmatpush2.bf16.msra.mxu0 %v13907_v47  ;;  %5961 = vmatpush2.bf16.msra.mxu1 %v13908_v28  ;;  %v12343_v47 = vcombine.low %v6051_v24, %v6055_v12  ;;  %v12345_v28 = vcombine.low %v6052_v3, %v6056_v61  ;;  %v12441_v24 = vcombine.low %v6148_v0, %v6152_v51 }
 0x663   :  { %5921 = vmatprep.subr.bf16.mxu0 %v13909_v38  ;;  %5962 = vmatprep.subr.bf16.mxu1 %v13910_v52  ;;  %v12347_v38 = vcombine.high %v6052_v3, %v6056_v61  ;;  %v6043_v52 = vld [vmem:[%s13167_s2] sm:$0xff]  ;;  %v12443_v12 = vcombine.high %v6148_v0, %v6152_v51 }
 0x664   :  { %13921 = vst [vmem:[#allocation10_spill] sm:$0xff] %v12441_v24  ;;  %v6139_v3 = vld [vmem:[%s13167_s2 + $0x300] sm:$0xff] }
 0x665   :  { %13922 = vst [vmem:[#allocation8_spill] sm:$0xff] %v12443_v12  ;;  %v6143_v61 = vld [vmem:[%s13167_s2 + $0x320] sm:$0xff] }
 0x666   :  { %5922 = vmatpush2.bf16.msra.mxu0 %v13911_v40  ;;  %5963 = vmatpush2.bf16.msra.mxu1 %v13912_v58  ;;  %v6047_v40 = vld [vmem:[%s13167_s2 + $0x20] sm:$0xff]  ;;  %v6044_v58 = vld [vmem:[%s13167_s2 + $0x8] sm:$0xff] }
 0x667   :  { %5923 = vmatprep.subr.bf16.mxu0 %v13913_v21  ;;  %5964 = vmatprep.subr.bf16.mxu1 %v13914_v9  ;;  %v12362_v21 = vcombine.high %v6043_v52, %v6047_v40  ;;  %v6048_v9 = vld [vmem:[%s13167_s2 + $0x28] sm:$0xff]  ;;  %v6123_v0 = vld [vmem:[%s13167_s2 + $0x280] sm:$0xff] }
 0x668   :  { %v6127_v51 = vld [vmem:[%s13167_s2 + $0x2a0] sm:$0xff] }
 0x66a   :  { %5924 = vmatpush2.bf16.msra.mxu0 %v13915_v45  ;;  %5965 = vmatpush2.bf16.msra.mxu1 %v11980_v41  ;;  %v12367_v45 = vcombine.low %v6043_v52, %v6047_v40  ;;  %v6140_v52 = vld [vmem:[%s13167_s2 + $0x308] sm:$0xff]  ;;  %v12458_v40 = vcombine.high %v6139_v3, %v6143_v61 }
 0x66b   :  { %5925 = vmatprep.subr.bf16.mxu0 %v11984_v6  ;;  %5966 = vmatprep.subr.bf16.mxu1 %v11986_v31  ;;  %v6099_v31 = vld [vmem:[%s13167_s2 + $0x1c0] sm:$0xff] }
 0x66c   :  { %v6103_v6 = vld [vmem:[%s13167_s2 + $0x1e0] sm:$0xff]  ;;  %13923 = vst [vmem:[#allocation11_spill] sm:$0xff] %v12458_v40 }
 0x66e   :  { %5926 = vmatpush2.bf16.msra.mxu0 %v12002_v14  ;;  %5967 = vmatpush2.bf16.msra.mxu1 %v12004_v48  ;;  %v6091_v48 = vld [vmem:[%s13167_s2 + $0x180] sm:$0xff] }
 0x66f   :  { %5927 = vmatprep.subr.bf16.mxu0 %v12008_v32  ;;  %5968 = vmatprep.subr.bf16.mxu1 %v12010_v59  ;;  %v6100_v32 = vld [vmem:[%s13167_s2 + $0x1c8] sm:$0xff]  ;;  %v12194_v59 = vcombine.high %v6099_v31, %v6103_v6 }
 0x672   :  { %5928 = vmatpush2.bf16.msra.mxu0 %v12014_v50  ;;  %5969 = vmatpush2.bf16.msra.mxu1 %v12016_v36  ;;  %v6104_v50 = vld [vmem:[%s13167_s2 + $0x1e8] sm:$0xff]  ;;  %v12199_v36 = vcombine.low %v6099_v31, %v6103_v6  ;;  %v12369_v31 = vcombine.low %v6044_v58, %v6048_v9  ;;  %v12371_v6 = vcombine.high %v6044_v58, %v6048_v9 }
 0x673   :  { %v12201_v41 = vcombine.low %v6100_v32, %v6104_v50  ;;  %v12203_v14 = vcombine.high %v6100_v32, %v6104_v50  ;;  %6811 = vmatprep.subr.bf16.mxu0 %v12194_v59  ;;  %v6163_v32 = vld [vmem:[%s13167_s2 + $0x3c0] sm:$0xff]  ;;  %v6144_v58 = vld [vmem:[%s13167_s2 + $0x328] sm:$0xff]  ;;  %v12463_v9 = vcombine.low %v6139_v3, %v6143_v61  ;;  %v12506_v61 = vcombine.high %v6123_v0, %v6127_v51 }
 0x674   :  { %v6167_v50 = vld [vmem:[%s13167_s2 + $0x3e0] sm:$0xff]  ;;  %v6124_v3 = vld [vmem:[%s13167_s2 + $0x288] sm:$0xff] }
 0x675   :  { %5930 = vmatmul.mubr.bf16.vlgmr.msra.gmra.mxu0 %v12100_v16  ;;  %5971 = vmatmul.mubr.bf16.vlgmr.msra.gmra.mxu1 %v12100_v16  ;;  %v6095_v16 = vld [vmem:[%s13167_s2 + $0x1a0] sm:$0xff]  ;;  %v12391_v19 = vcombine.low %v6163_v32, %v6167_v50  ;;  %13924 = vst [vmem:[#allocation13_spill] sm:$0xff] %v12463_v9  ;;  %13931 = vst [vmem:[#allocation19_spill] sm:$0xff] %v12506_v61 }
 0x676   :  { %6852 = vmatprep.subr.bf16.mxu1 %v12203_v14  ;;  %6812 = vmatpush1.bf16.msra.mxu0 %v12199_v36  ;;  %v12217_v15 = vcombine.low %v6091_v48, %v6095_v16  ;;  %v12219_v5 = vcombine.high %v6091_v48, %v6095_v16  ;;  %v6164_v48 = vld [vmem:[%s13167_s2 + $0x3c8] sm:$0xff]  ;;  %v12386_v16 = vcombine.high %v6163_v32, %v6167_v50 }
 0x677   :  { %6853 = vmatpush1.bf16.msra.mxu1 %v12201_v41  ;;  %v12393_v20 = vcombine.low %v6164_v48, %v6168_v49  ;;  %v12395_v22 = vcombine.high %v6164_v48, %v6168_v49  ;;  %v12465_v32 = vcombine.low %v6140_v52, %v6144_v58  ;;  %v12467_v50 = vcombine.high %v6140_v52, %v6144_v58  ;;  %v6131_v48 = vld [vmem:[%s13167_s2 + $0x2c0] sm:$0xff]  ;;  %v6128_v52 = vld [vmem:[%s13167_s2 + $0x2a8] sm:$0xff] }
 0x678   :  { %6813 = vmatprep.subr.bf16.mxu0 %v12219_v5  ;;  %6854 = vmatprep.subr.bf16.mxu1 %v12233_v17  ;;  %v6135_v49 = vld [vmem:[%s13167_s2 + $0x2e0] sm:$0xff]  ;;  %v12511_v58 = vcombine.low %v6123_v0, %v6127_v51  ;;  %v6116_v0 = vld [vmem:[%s13167_s2 + $0x248] sm:$0xff]  ;;  %v12530_v51 = vcombine.high %v6115_v34, %v6119_v4 }
 0x679   :  { %13925 = vst [vmem:[#allocation14_spill] sm:$0xff] %v12465_v32  ;;  %13926 = vst [vmem:[#allocation12_spill] sm:$0xff] %v12467_v50  ;;  %v12482_v39 = vcombine.high %v6131_v48, %v6135_v49  ;;  %v12487_v29 = vcombine.low %v6131_v48, %v6135_v49  ;;  %v12513_v48 = vcombine.low %v6124_v3, %v6128_v52 }
 0x67a   :  { %6814 = vmatpush1.bf16.msra.mxu0 %v12217_v15  ;;  %13932 = vst [vmem:[#allocation21_spill] sm:$0xff] %v12511_v58  ;;  %v12515_v49 = vcombine.high %v6124_v3, %v6128_v52  ;;  %13935 = vst [vmem:[#allocation23_spill] sm:$0xff] %v12530_v51  ;;  %v6120_v3 = vld [vmem:[%s13167_s2 + $0x268] sm:$0xff]  ;;  %v12535_v52 = vcombine.low %v6115_v34, %v6119_v4 }
 0x67b   :  { %6855 = vmatpush1.bf16.msra.mxu1 %v12231_v63  ;;  %6815 = vmatprep.subr.bf16.mxu0 %v12235_v30  ;;  %13927 = vst [vmem:[#allocation15_spill] sm:$0xff] %v12482_v39  ;;  %13928 = vst [vmem:[#allocation17_spill] sm:$0xff] %v12487_v29  ;;  %v6108_v34 = vld [vmem:[%s13167_s2 + $0x208] sm:$0xff] }
 0x67c   :  { %6856 = vmatprep.subr.bf16.mxu1 %v12244_v35  ;;  %13933 = vst [vmem:[#allocation22_spill] sm:$0xff] %v12513_v48  ;;  %13934 = vst [vmem:[#allocation20_spill] sm:$0xff] %v12515_v49 }
 0x67d   :  { %13936 = vst [vmem:[#allocation25_spill] sm:$0xff] %v12535_v52 }
 0x67e   :  { %6816 = vmatpush1.bf16.msra.mxu0 %v12260_v37 }
 0x67f   :  { %6857 = vmatpush1.bf16.msra.mxu1 %v12264_v60  ;;  %6817 = vmatprep.subr.bf16.mxu0 %v12266_v54 }
 0x680   :  { %6858 = vmatprep.subr.bf16.mxu1 %v12269_v62 }
 0x682   :  { %6818 = vmatpush1.bf16.msra.mxu0 %v12284_v56 }
 0x683   :  { %6859 = vmatpush1.bf16.msra.mxu1 %v12288_v57  ;;  %6819 = vmatprep.subr.bf16.mxu0 %v12290_v13 }
 0x684   :  { %6860 = vmatprep.subr.bf16.mxu1 %v12293_v25 }
 0x686   :  { %6820 = vmatpush1.bf16.msra.mxu0 %v12296_v23 }
 0x687   :  { %6861 = vmatpush1.bf16.msra.mxu1 %v12300_v27  ;;  %6821 = vmatprep.subr.bf16.mxu0 %v12314_v42 }
 0x688   :  { %6862 = vmatprep.subr.bf16.mxu1 %v12323_v11 }
 0x68a   :  { %6822 = vmatpush1.bf16.msra.mxu0 %v12319_v1 }
 0x68b   :  { %6863 = vmatpush1.bf16.msra.mxu1 %v12321_v33  ;;  %6823 = vmatprep.subr.bf16.mxu0 %v12338_v43 }
 0x68c   :  { %6864 = vmatprep.subr.bf16.mxu1 %v12347_v38 }
 0x68e   :  { %6824 = vmatpush1.bf16.msra.mxu0 %v12343_v47 }
 0x68f   :  { %6865 = vmatpush1.bf16.msra.mxu1 %v12345_v28  ;;  %6825 = vmatprep.subr.bf16.mxu0 %v12362_v21 }
 0x690   :  { %6866 = vmatprep.subr.bf16.mxu1 %v12371_v6 }
 0x692   :  { %6826 = vmatpush1.bf16.msra.mxu0 %v12367_v45 }
 0x693   :  { %6867 = vmatpush1.bf16.msra.mxu1 %v12369_v31  ;;  %6827 = vmatprep.subr.bf16.mxu0 %v12386_v16 }
 0x694   :  { %6868 = vmatprep.subr.bf16.mxu1 %v12395_v22 }
 0x696   :  { %6828 = vmatpush2.bf16.msra.mxu0 %v12391_v19 }
 0x697   :  { %6869 = vmatpush2.bf16.msra.mxu1 %v12393_v20  ;;  %6829 = vmatprep.subr.bf16.mxu0 %v12410_v44 }
 0x698   :  { %6870 = vmatprep.subr.bf16.mxu1 %v12419_v8 }
 0x69a   :  { %6830 = vmatpush2.bf16.msra.mxu0 %v12415_v10 }
 0x69b   :  { %6871 = vmatpush2.bf16.msra.mxu1 %v12417_v7  ;;  %6831 = vmatprep.subr.bf16.mxu0 %v12434_v26 }
 0x69c   :  { %6872 = vmatprep.subr.bf16.mxu1 %v12443_v12 }
 0x69e   :  { %6832 = vmatpush2.bf16.msra.mxu0 %v12439_v46 }
 0x69f   :  { %6873 = vmatpush2.bf16.msra.mxu1 %v12441_v24  ;;  %6833 = vmatprep.subr.bf16.mxu0 %v12458_v40 }
 0x6a0   :  { %6874 = vmatprep.subr.bf16.mxu1 %v12467_v50 }
 0x6a2   :  { %6834 = vmatpush2.bf16.msra.mxu0 %v12463_v9 }
 0x6a3   :  { %6875 = vmatpush2.bf16.msra.mxu1 %v12465_v32  ;;  %6835 = vmatprep.subr.bf16.mxu0 %v12482_v39 }
 0x6a4   :  { %6876 = vmatprep.subr.bf16.mxu1 %v12491_v55 }
 0x6a6   :  { %6836 = vmatpush2.bf16.msra.mxu0 %v12487_v29 }
 0x6a7   :  { %6877 = vmatpush2.bf16.msra.mxu1 %v12489_v18  ;;  %6837 = vmatprep.subr.bf16.mxu0 %v12506_v61  ;;  %v6111_v61 = vld [vmem:[%s13167_s2 + $0x220] sm:$0xff] }
 0x6a8   :  { %6878 = vmatprep.subr.bf16.mxu1 %v12515_v49  ;;  %v12539_v49 = vcombine.high %v6116_v0, %v6120_v3 }
 0x6aa   :  { %6838 = vmatpush2.bf16.msra.mxu0 %v12511_v58  ;;  %v12537_v58 = vcombine.low %v6116_v0, %v6120_v3  ;;  %13938 = vst [vmem:[#allocation24_spill] sm:$0xff] %v12539_v49  ;;  %v6112_v0 = vld [vmem:[%s13167_s2 + $0x228] sm:$0xff] }
 0x6ab   :  { %6879 = vmatpush2.bf16.msra.mxu1 %v12513_v48  ;;  %6839 = vmatprep.subr.bf16.mxu0 %v12530_v51  ;;  %v6107_v48 = vld [vmem:[%s13167_s2 + $0x200] sm:$0xff]  ;;  %v6105_v51 = vld [vmem:[%s13167_s2 + $0x1f0] sm:$0xff] }
 0x6ac   :  { %13937 = vst [vmem:[#allocation26_spill] sm:$0xff] %v12537_v58  ;;  %6880 = vmatprep.subr.bf16.mxu1 %v12539_v49  ;;  %v12554_v4 = vcombine.high %v6107_v48, %v6111_v61  ;;  %v12559_v3 = vcombine.low %v6107_v48, %v6111_v61  ;;  %v12563_v49 = vcombine.high %v6108_v34, %v6112_v0  ;;  %v6102_v61 = vld [vmem:[%s13167_s2 + $0x1d8] sm:$0xff] }
 0x6ae   :  { %6840 = vmatpush2.bf16.msra.mxu0 %v12535_v52  ;;  %13939 = vst [vmem:[#allocation27_spill] sm:$0xff] %v12554_v4  ;;  %13940 = vst [vmem:[#allocation29_spill] sm:$0xff] %v12559_v3  ;;  %v12561_v52 = vcombine.low %v6108_v34, %v6112_v0  ;;  %v6106_v34 = vld [vmem:[%s13167_s2 + $0x1f8] sm:$0xff] }
 0x6af   :  { %6881 = vmatpush2.bf16.msra.mxu1 %v12537_v58  ;;  %13942 = vst [vmem:[#allocation28_spill] sm:$0xff] %v12563_v49  ;;  %6841 = vmatprep.subr.bf16.mxu0 %v12554_v4  ;;  %v6101_v58 = vld [vmem:[%s13167_s2 + $0x1d0] sm:$0xff] }
 0x6b0   :  { %13941 = vst [vmem:[#allocation30_spill] sm:$0xff] %v12561_v52  ;;  %6882 = vmatprep.subr.bf16.mxu1 %v12563_v49  ;;  %v12578_v48 = vcombine.high %v6101_v58, %v6105_v51  ;;  %v12583_v0 = vcombine.low %v6101_v58, %v6105_v51  ;;  %v12587_v49 = vcombine.high %v6102_v61, %v6106_v34  ;;  %v8869_v58 = vld [vmem:[%s13168_s0 + $0x58] sm:$0xff] }
 0x6b1   :  { %v5984_v32 = vunpack.c.l.bf16 %v8869_v58 }
 0x6b2   :  { %6842 = vmatpush2.bf16.msra.mxu0 %v12559_v3  ;;  %13943 = vst [vmem:[#allocation31_spill] sm:$0xff] %v12578_v48  ;;  %v12585_v3 = vcombine.low %v6102_v61, %v6106_v34  ;;  %13944 = vst [vmem:[#allocation32_spill] sm:$0xff] %v12587_v49 }
 0x6b3   :  { %6883 = vmatpush2.bf16.msra.mxu1 %v12561_v52  ;;  %6893 = vmatprep.subr.bf16.mxu0 %v12578_v48  ;;  %v8868_v52 = vld [vmem:[%s13168_s0 + $0x50] sm:$0xff] }
 0x6b4   :  { %6934 = vmatprep.subr.bf16.mxu1 %v12587_v49  ;;  %v5982_v4 = vunpack.c.l.bf16 %v8868_v52  ;;  %v5983_v18 = vunpack.c.h.bf16 %v8868_v52  ;;  %v5985_v52 = vunpack.c.h.bf16 %v8869_v58 }
 0x6f5   :  { %v5849_v29 = vpop.f32.mrf.mxu0  ;;  %v5890_v55 = vpop.f32.mrf.mxu1 }
 0x6f6   :  { %v5986_v51 = vadd.f32 %v5982_v4, %v5849_v29  ;;  %v5988_v46 = vadd.f32 %v5984_v32, %v5890_v55  ;;  %v8871_v55 = vld [vmem:[%s13170_s1 + $0x28] sm:$0xff] }
 0x6f7   :  { %v5851_v39 = vpop.f32.mrf.mxu0  ;;  %v5892_v61 = vpop.f32.mrf.mxu1 }
 0x6f8   :  { %v6001_v34 = vmul.f32 0.5, %v5986_v51  ;;  %v5987_v48 = vadd.f32 %v5983_v18, %v5851_v39  ;;  %v5989_v12 = vadd.f32 %v5985_v52, %v5892_v61  ;;  %v5995_v52 = vunpack.c.l.bf16 %v8871_v55 }
 0x6f9   :  { %v5853_v9 = vpop.f32.mrf.mxu0  ;;  %v5894_v49 = vpop.f32.mrf.mxu1 }
 0x6fa   :  { %9240 = vtanh.f32 %v6001_v34  ;;  %v6005_v50 = vmul.f32 0.5, %v5987_v48  ;;  %v6010_v26 = vmul.f32 0.5, %v5989_v12 }
 0x6fb   :  { %v5854_v40 = vpop.f32.mrf.mxu0  ;;  %v5895_v24 = vpop.f32.mrf.mxu1 }
 0x6fc   :  { %9242 = vtanh.f32 %v6005_v50 }
 0x6fd   :  { %9244 = vtanh.f32 %v5988_v46 }
 0x6fe   :  { %9246 = vtanh.f32 %v6010_v26 }
 0x707   :  { %v9241_v7 = vpop.eup %9240 }
 0x708   :  { %v6003_v10 = vmul.f32 0.5, %v9241_v7 }
 0x709   :  { %v9243_v29 = vpop.eup %9242 }
 0x70a   :  { %v6004_v4 = vadd.f32 0.5, %v6003_v10  ;;  %v6007_v8 = vmul.f32 0.5, %v9243_v29  ;;  %v9245_v39 = vpop.eup %9244 }
 0x70b   :  { %v9247_v24 = vpop.eup %9246 }
 0x70c   :  { %v6008_v51 = vadd.f32 0.5, %v6007_v8  ;;  %v6015_v18 = vmul.f32 %v9245_v39, %v6004_v4  ;;  %v6012_v40 = vmul.f32 0.5, %v9247_v24 }
 0x70e   :  { %v6014_v9 = vmul.f32 %v6008_v51, %v12097_v53  ;;  %v6013_v46 = vadd.f32 0.5, %v6012_v40  ;;  %v8870_v53 = vld [vmem:[%s13170_s1 + $0x20] sm:$0xff]  ;;  %v5996_v40 = vunpack.c.h.bf16 %v8871_v55 }
 0x70f   :  { %v5993_v10 = vunpack.c.l.bf16 %v8870_v53  ;;  %v5994_v7 = vunpack.c.h.bf16 %v8870_v53 }
 0x710   :  { %v12598_v49 = vadd.f32 %v6015_v18, %v6014_v9 }
 0x712   :  { %13945 = vst [vmem:[#allocation33_spill] sm:$0xff] %v12598_v49  ;;  %9248 = vtanh.f32 %v12598_v49 }
 0x71f   :  { %v9249_v32 = vpop.eup %9248 }
 0x720   :  { %v6018_v12 = vmul.f32 %v9249_v32, %v6013_v46 }
 0x722   :  { %v12601_v50 = vpack.c.bf16 %v6018_v12, %v6018_v12 }
 0x724   :  { %8872 = vst [vmem:[%s13169_s3 + $0x14] sm:$0xf] %v12601_v50 }
 0x735   :  { %v5931_v8 = vpop.f32.mrf.mxu0  ;;  %v5972_v26 = vpop.f32.mrf.mxu1 }
 0x736   :  { %v5997_v48 = vadd.f32 %v5993_v10, %v5931_v8  ;;  %v5999_v24 = vadd.f32 %v5995_v52, %v5972_v26 }
 0x737   :  { %v5933_v58 = vpop.f32.mrf.mxu0  ;;  %v5974_v61 = vpop.f32.mrf.mxu1 }
 0x738   :  { %v6019_v34 = vmul.f32 0.5, %v5997_v48  ;;  %v5998_v29 = vadd.f32 %v5994_v7, %v5933_v58  ;;  %v6000_v46 = vadd.f32 %v5996_v40, %v5974_v61 }
 0x739   :  { %v5935_v4 = vpop.f32.mrf.mxu0  ;;  %v5976_v51 = vpop.f32.mrf.mxu1 }
 0x73a   :  { %9250 = vtanh.f32 %v6019_v34  ;;  %v6023_v39 = vmul.f32 0.5, %v5998_v29  ;;  %v6028_v32 = vmul.f32 0.5, %v6000_v46  ;;  %v6093_v51 = vld [vmem:[%s13167_s2 + $0x190] sm:$0xff] }
 0x73b   :  { %v5936_v9 = vpop.f32.mrf.mxu0  ;;  %v5977_v18 = vpop.f32.mrf.mxu1  ;;  %v6089_v46 = vld [vmem:[%s13167_s2 + $0x170] sm:$0xff] }
 0x73c   :  { %9252 = vtanh.f32 %v6023_v39  ;;  %v6098_v39 = vld [vmem:[%s13167_s2 + $0x1b8] sm:$0xff]  ;;  %v6085_v18 = vld [vmem:[%s13167_s2 + $0x150] sm:$0xff] }
 0x73d   :  { %9254 = vtanh.f32 %v5999_v24 }
 0x73e   :  { %9256 = vtanh.f32 %v6028_v32  ;;  %v6086_v32 = vld [vmem:[%s13167_s2 + $0x158] sm:$0xff] }
 0x747   :  { %v9251_v12 = vpop.eup %9250 }
 0x748   :  { %v6021_v53 = vmul.f32 0.5, %v9251_v12  ;;  %v6090_v12 = vld [vmem:[%s13167_s2 + $0x178] sm:$0xff] }
 0x749   :  { %v9253_v10 = vpop.eup %9252 }
 0x74a   :  { %v6022_v8 = vadd.f32 0.5, %v6021_v53  ;;  %v6025_v49 = vmul.f32 0.5, %v9253_v10  ;;  %v9255_v7 = vpop.eup %9254 }
 0x74b   :  { %v9257_v26 = vpop.eup %9256 }
 0x74c   :  { %v6026_v48 = vadd.f32 0.5, %v6025_v49  ;;  %v6033_v34 = vmul.f32 %v9255_v7, %v6022_v8  ;;  %v6030_v55 = vmul.f32 0.5, %v9257_v26  ;;  %v6097_v49 = vld [vmem:[%s13167_s2 + $0x1b0] sm:$0xff]  ;;  %v12656_v8 = vcombine.high %v6085_v18, %v6089_v46  ;;  %v6082_v26 = vld [vmem:[%s13167_s2 + $0x138] sm:$0xff] }
 0x74d   :  { %v12635_v24 = vcombine.high %v6093_v51, %v6097_v49  ;;  %v12652_v53 = vcombine.low %v6093_v51, %v6097_v49  ;;  %v6077_v7 = vld [vmem:[%s13167_s2 + $0x110] sm:$0xff] }
 0x74e   :  { %v6032_v58 = vmul.f32 %v6026_v48, %v12113_v2  ;;  %v6031_v52 = vadd.f32 0.5, %v6030_v55  ;;  %v6094_v2 = vld [vmem:[%s13167_s2 + $0x198] sm:$0xff]  ;;  %v12658_v48 = vcombine.high %v6086_v32, %v6090_v12  ;;  %v12676_v55 = vcombine.low %v6085_v18, %v6089_v46  ;;  %v6069_v51 = vld [vmem:[%s13167_s2 + $0xd0] sm:$0xff] }
 0x74f   :  { %v12637_v40 = vcombine.high %v6094_v2, %v6098_v39  ;;  %v12654_v10 = vcombine.low %v6094_v2, %v6098_v39  ;;  %v6073_v49 = vld [vmem:[%s13167_s2 + $0xf0] sm:$0xff]  ;;  %v6070_v2 = vld [vmem:[%s13167_s2 + $0xd8] sm:$0xff] }
 0x750   :  { %v12614_v29 = vadd.f32 %v6033_v34, %v6032_v58  ;;  %v6081_v58 = vld [vmem:[%s13167_s2 + $0x130] sm:$0xff]  ;;  %v6078_v34 = vld [vmem:[%s13167_s2 + $0x118] sm:$0xff]  ;;  %13946 = vst [vmem:[#allocation34_spill] sm:$0xff] %v12676_v55  ;;  %v12706_v46 = vcombine.high %v6069_v51, %v6073_v49 }
 0x751   :  { %v6074_v39 = vld [vmem:[%s13167_s2 + $0xf8] sm:$0xff]  ;;  %v12702_v18 = vcombine.low %v6078_v34, %v6082_v26 }
 0x752   :  { %9258 = vtanh.f32 %v12614_v29  ;;  %13952 = vst [vmem:[#allocation40_spill] sm:$0xff] %v12706_v46 }
 0x753   :  { %13951 = vst [vmem:[#allocation39_spill] sm:$0xff] %v12702_v18 }
 0x75f   :  { %v9259_v61 = vpop.eup %9258 }
 0x760   :  { %v6036_v4 = vmul.f32 %v9259_v61, %v6031_v52  ;;  %v12678_v52 = vcombine.low %v6086_v32, %v6090_v12  ;;  %v12682_v61 = vcombine.high %v6077_v7, %v6081_v58  ;;  %v12708_v32 = vcombine.high %v6070_v2, %v6074_v39  ;;  %v6061_v12 = vld [vmem:[%s13167_s2 + $0x90] sm:$0xff] }
 0x762   :  { %v6040_v9 = vpack.c.bf16 %v6036_v4, %v6036_v4  ;;  %13947 = vst [vmem:[#allocation35_spill] sm:$0xff] %v12678_v52  ;;  %13948 = vst [vmem:[#allocation36_spill] sm:$0xff] %v12682_v61  ;;  %v12684_v4 = vcombine.high %v6078_v34, %v6082_v26  ;;  %v12724_v34 = vcombine.low %v6069_v51, %v6073_v49  ;;  %v6054_v51 = vld [vmem:[%s13167_s2 + $0x58] sm:$0xff] }
 0x763   :  { %13953 = vst [vmem:[#allocation41_spill] sm:$0xff] %v12708_v32  ;;  %v12726_v26 = vcombine.low %v6070_v2, %v6074_v39  ;;  %v6058_v49 = vld [vmem:[%s13167_s2 + $0x78] sm:$0xff] }
 0x764   :  { %8873 = vst [vmem:[%s13171_s4 + $0x8] sm:$0xf] %v6040_v9  ;;  %6843 = vmatprep.mubr.bf16.mxu0 %v6040_v9  ;;  %6884 = vmatprep.mubr.bf16.mxu1 %v6040_v9  ;;  %13949 = vst [vmem:[#allocation37_spill] sm:$0xff] %v12684_v4 }
 0x765   :  { %6844 = vmatmul.mubr.bf16.vlgmr.msra.gmra.mxu0 %v12601_v50  ;;  %6885 = vmatmul.mubr.bf16.vlgmr.msra.gmra.mxu1 %v12601_v50  ;;  %13954 = vst [vmem:[#allocation42_spill] sm:$0xff] %v12724_v34  ;;  %13955 = vst [vmem:[#allocation43_spill] sm:$0xff] %v12726_v26 }
 0x766   :  { %6894 = vmatpush1.bf16.msra.mxu0 %v12583_v0  ;;  %6935 = vmatpush1.bf16.msra.mxu1 %v12585_v3 }
 0x767   :  { %6925 = vmatprep.mubr.bf16.mxu0 %v6040_v9  ;;  %6966 = vmatprep.mubr.bf16.mxu1 %v6040_v9  ;;  %v12700_v9 = vcombine.low %v6077_v7, %v6081_v58  ;;  %v6062_v7 = vld [vmem:[%s13167_s2 + $0x98] sm:$0xff] }
 0x768   :  { %6895 = vmatprep.subr.bf16.mxu0 %v12635_v24  ;;  %6936 = vmatprep.subr.bf16.mxu1 %v12637_v40  ;;  %v6066_v58 = vld [vmem:[%s13167_s2 + $0xb8] sm:$0xff] }
 0x769   :  { %13950 = vst [vmem:[#allocation38_spill] sm:$0xff] %v12700_v9  ;;  %v12750_v39 = vcombine.low %v6062_v7, %v6066_v58 }
 0x76a   :  { %6896 = vmatpush1.bf16.msra.mxu0 %v12652_v53  ;;  %6937 = vmatpush1.bf16.msra.mxu1 %v12654_v10 }
 0x76b   :  { %6897 = vmatprep.subr.bf16.mxu0 %v12656_v8  ;;  %6938 = vmatprep.subr.bf16.mxu1 %v12658_v48  ;;  %13959 = vst [vmem:[#allocation47_spill] sm:$0xff] %v12750_v39 }
 0x76e   :  { %6898 = vmatpush1.bf16.msra.mxu0 %v12676_v55  ;;  %6939 = vmatpush1.bf16.msra.mxu1 %v12678_v52  ;;  %v6065_v52 = vld [vmem:[%s13167_s2 + $0xb0] sm:$0xff] }
 0x76f   :  { %6899 = vmatprep.subr.bf16.mxu0 %v12682_v61  ;;  %6940 = vmatprep.subr.bf16.mxu1 %v12684_v4  ;;  %v12730_v4 = vcombine.high %v6061_v12, %v6065_v52  ;;  %v12732_v61 = vcombine.high %v6062_v7, %v6066_v58  ;;  %v6053_v55 = vld [vmem:[%s13167_s2 + $0x50] sm:$0xff]  ;;  %v12748_v2 = vcombine.low %v6061_v12, %v6065_v52  ;;  %v6046_v52 = vld [vmem:[%s13167_s2 + $0x18] sm:$0xff] }
 0x770   :  { %v6050_v12 = vld [vmem:[%s13167_s2 + $0x38] sm:$0xff]  ;;  %v12774_v58 = vcombine.low %v6054_v51, %v6058_v49 }
 0x771   :  { %13956 = vst [vmem:[#allocation44_spill] sm:$0xff] %v12730_v4  ;;  %13957 = vst [vmem:[#allocation45_spill] sm:$0xff] %v12732_v61 }
 0x772   :  { %6900 = vmatpush1.bf16.msra.mxu0 %v12700_v9  ;;  %6941 = vmatpush1.bf16.msra.mxu1 %v12702_v18  ;;  %v6057_v18 = vld [vmem:[%s13167_s2 + $0x70] sm:$0xff]  ;;  %13958 = vst [vmem:[#allocation46_spill] sm:$0xff] %v12748_v2  ;;  %13963 = vst [vmem:[#allocation51_spill] sm:$0xff] %v12774_v58 }
 0x773   :  { %6901 = vmatprep.subr.bf16.mxu0 %v12706_v46  ;;  %6942 = vmatprep.subr.bf16.mxu1 %v12708_v32  ;;  %v12754_v32 = vcombine.high %v6053_v55, %v6057_v18  ;;  %v12756_v46 = vcombine.high %v6054_v51, %v6058_v49  ;;  %v6045_v9 = vld [vmem:[%s13167_s2 + $0x10] sm:$0xff]  ;;  %v12772_v7 = vcombine.low %v6053_v55, %v6057_v18  ;;  %v6166_v55 = vld [vmem:[%s13167_s2 + $0x3d8] sm:$0xff] }
 0x774   :  { %v6170_v18 = vld [vmem:[%s13167_s2 + $0x3f8] sm:$0xff]  ;;  %v12798_v49 = vcombine.low %v6046_v52, %v6050_v12 }
 0x775   :  { %13960 = vst [vmem:[#allocation48_spill] sm:$0xff] %v12754_v32  ;;  %13961 = vst [vmem:[#allocation49_spill] sm:$0xff] %v12756_v46 }
 0x776   :  { %6902 = vmatpush1.bf16.msra.mxu0 %v12724_v34  ;;  %6943 = vmatpush1.bf16.msra.mxu1 %v12726_v26  ;;  %v6049_v26 = vld [vmem:[%s13167_s2 + $0x30] sm:$0xff]  ;;  %13962 = vst [vmem:[#allocation50_spill] sm:$0xff] %v12772_v7  ;;  %13967 = vst [vmem:[#allocation55_spill] sm:$0xff] %v12798_v49 }
 0x777   :  { %6903 = vmatprep.subr.bf16.mxu0 %v12730_v4  ;;  %6944 = vmatprep.subr.bf16.mxu1 %v12732_v61  ;;  %v12778_v61 = vcombine.high %v6045_v9, %v6049_v26  ;;  %v12780_v4 = vcombine.high %v6046_v52, %v6050_v12  ;;  %v6165_v34 = vld [vmem:[%s13167_s2 + $0x3d0] sm:$0xff]  ;;  %v12796_v51 = vcombine.low %v6045_v9, %v6049_v26  ;;  %v6158_v9 = vld [vmem:[%s13167_s2 + $0x398] sm:$0xff] }
 0x778   :  { %v6162_v26 = vld [vmem:[%s13167_s2 + $0x3b8] sm:$0xff]  ;;  %v12822_v12 = vcombine.low %v6166_v55, %v6170_v18 }
 0x779   :  { %13964 = vst [vmem:[#allocation52_spill] sm:$0xff] %v12778_v61  ;;  %13965 = vst [vmem:[#allocation53_spill] sm:$0xff] %v12780_v4 }
 0x77a   :  { %6904 = vmatpush1.bf16.msra.mxu0 %v12748_v2  ;;  %6945 = vmatpush1.bf16.msra.mxu1 %v12750_v39  ;;  %v6169_v39 = vld [vmem:[%s13167_s2 + $0x3f0] sm:$0xff]  ;;  %13966 = vst [vmem:[#allocation54_spill] sm:$0xff] %v12796_v51  ;;  %13971 = vst [vmem:[#allocation59_spill] sm:$0xff] %v12822_v12 }
 0x77b   :  { %6905 = vmatprep.subr.bf16.mxu0 %v12754_v32  ;;  %6946 = vmatprep.subr.bf16.mxu1 %v12756_v46  ;;  %v12802_v46 = vcombine.high %v6165_v34, %v6169_v39  ;;  %v12804_v32 = vcombine.high %v6166_v55, %v6170_v18  ;;  %v6157_v2 = vld [vmem:[%s13167_s2 + $0x390] sm:$0xff]  ;;  %v12820_v52 = vcombine.low %v6165_v34, %v6169_v39  ;;  %v6150_v34 = vld [vmem:[%s13167_s2 + $0x358] sm:$0xff] }
 0x77c   :  { %v6154_v39 = vld [vmem:[%s13167_s2 + $0x378] sm:$0xff]  ;;  %v12846_v18 = vcombine.low %v6158_v9, %v6162_v26 }
 0x77d   :  { %13968 = vst [vmem:[#allocation56_spill] sm:$0xff] %v12802_v46  ;;  %13969 = vst [vmem:[#allocation57_spill] sm:$0xff] %v12804_v32 }
 0x77e   :  { %6906 = vmatpush1.bf16.msra.mxu0 %v12772_v7  ;;  %6947 = vmatpush1.bf16.msra.mxu1 %v12774_v58  ;;  %v6161_v58 = vld [vmem:[%s13167_s2 + $0x3b0] sm:$0xff]  ;;  %13970 = vst [vmem:[#allocation58_spill] sm:$0xff] %v12820_v52  ;;  %13975 = vst [vmem:[#allocation63_spill] sm:$0xff] %v12846_v18 }
 0x77f   :  { %6907 = vmatprep.subr.bf16.mxu0 %v12778_v61  ;;  %6948 = vmatprep.subr.bf16.mxu1 %v12780_v4  ;;  %v12826_v4 = vcombine.high %v6157_v2, %v6161_v58  ;;  %v12828_v61 = vcombine.high %v6158_v9, %v6162_v26  ;;  %v6149_v7 = vld [vmem:[%s13167_s2 + $0x350] sm:$0xff]  ;;  %v12844_v55 = vcombine.low %v6157_v2, %v6161_v58  ;;  %v6142_v2 = vld [vmem:[%s13167_s2 + $0x318] sm:$0xff] }
 0x780   :  { %v6146_v58 = vld [vmem:[%s13167_s2 + $0x338] sm:$0xff]  ;;  %v12870_v26 = vcombine.low %v6150_v34, %v6154_v39 }
 0x781   :  { %13972 = vst [vmem:[#allocation60_spill] sm:$0xff] %v12826_v4  ;;  %13973 = vst [vmem:[#allocation61_spill] sm:$0xff] %v12828_v61 }
 0x782   :  { %6908 = vmatpush1.bf16.msra.mxu0 %v12796_v51  ;;  %6949 = vmatpush1.bf16.msra.mxu1 %v12798_v49  ;;  %v6153_v49 = vld [vmem:[%s13167_s2 + $0x370] sm:$0xff]  ;;  %13974 = vst [vmem:[#allocation62_spill] sm:$0xff] %v12844_v55  ;;  %13979 = vst [vmem:[#allocation67_spill] sm:$0xff] %v12870_v26 }
 0x783   :  { %6909 = vmatprep.subr.bf16.mxu0 %v12802_v46  ;;  %6950 = vmatprep.subr.bf16.mxu1 %v12804_v32  ;;  %v12850_v32 = vcombine.high %v6149_v7, %v6153_v49  ;;  %v12852_v46 = vcombine.high %v6150_v34, %v6154_v39  ;;  %v6141_v51 = vld [vmem:[%s13167_s2 + $0x310] sm:$0xff]  ;;  %v12868_v9 = vcombine.low %v6149_v7, %v6153_v49  ;;  %v6134_v7 = vld [vmem:[%s13167_s2 + $0x2d8] sm:$0xff] }
 0x784   :  { %v6138_v49 = vld [vmem:[%s13167_s2 + $0x2f8] sm:$0xff]  ;;  %v12894_v39 = vcombine.low %v6142_v2, %v6146_v58 }
 0x785   :  { %13976 = vst [vmem:[#allocation64_spill] sm:$0xff] %v12850_v32  ;;  %13977 = vst [vmem:[#allocation65_spill] sm:$0xff] %v12852_v46 }
 0x786   :  { %6910 = vmatpush2.bf16.msra.mxu0 %v12820_v52  ;;  %6951 = vmatpush2.bf16.msra.mxu1 %v12822_v12  ;;  %v6145_v12 = vld [vmem:[%s13167_s2 + $0x330] sm:$0xff]  ;;  %13978 = vst [vmem:[#allocation66_spill] sm:$0xff] %v12868_v9  ;;  %13983 = vst [vmem:[#allocation71_spill] sm:$0xff] %v12894_v39 }
 0x787   :  { %6911 = vmatprep.subr.bf16.mxu0 %v12826_v4  ;;  %6952 = vmatprep.subr.bf16.mxu1 %v12828_v61  ;;  %v12874_v61 = vcombine.high %v6141_v51, %v6145_v12  ;;  %v12876_v4 = vcombine.high %v6142_v2, %v6146_v58  ;;  %v6133_v52 = vld [vmem:[%s13167_s2 + $0x2d0] sm:$0xff]  ;;  %v12892_v34 = vcombine.low %v6141_v51, %v6145_v12  ;;  %v6126_v51 = vld [vmem:[%s13167_s2 + $0x298] sm:$0xff] }
 0x788   :  { %v6130_v12 = vld [vmem:[%s13167_s2 + $0x2b8] sm:$0xff]  ;;  %v12918_v58 = vcombine.low %v6134_v7, %v6138_v49 }
 0x789   :  { %13980 = vst [vmem:[#allocation68_spill] sm:$0xff] %v12874_v61  ;;  %13981 = vst [vmem:[#allocation69_spill] sm:$0xff] %v12876_v4 }
 0x78a   :  { %6912 = vmatpush2.bf16.msra.mxu0 %v12844_v55  ;;  %6953 = vmatpush2.bf16.msra.mxu1 %v12846_v18  ;;  %v6137_v18 = vld [vmem:[%s13167_s2 + $0x2f0] sm:$0xff]  ;;  %13982 = vst [vmem:[#allocation70_spill] sm:$0xff] %v12892_v34  ;;  %13987 = vst [vmem:[#allocation75_spill] sm:$0xff] %v12918_v58 }
 0x78b   :  { %6913 = vmatprep.subr.bf16.mxu0 %v12850_v32  ;;  %6954 = vmatprep.subr.bf16.mxu1 %v12852_v46  ;;  %v12898_v46 = vcombine.high %v6133_v52, %v6137_v18  ;;  %v12900_v32 = vcombine.high %v6134_v7, %v6138_v49  ;;  %v6125_v55 = vld [vmem:[%s13167_s2 + $0x290] sm:$0xff]  ;;  %v12916_v2 = vcombine.low %v6133_v52, %v6137_v18  ;;  %v6118_v52 = vld [vmem:[%s13167_s2 + $0x258] sm:$0xff] }
 0x78c   :  { %v6122_v18 = vld [vmem:[%s13167_s2 + $0x278] sm:$0xff]  ;;  %v12942_v49 = vcombine.low %v6126_v51, %v6130_v12 }
 0x78d   :  { %13984 = vst [vmem:[#allocation72_spill] sm:$0xff] %v12898_v46  ;;  %13985 = vst [vmem:[#allocation73_spill] sm:$0xff] %v12900_v32 }
 0x78e   :  { %6914 = vmatpush2.bf16.msra.mxu0 %v12868_v9  ;;  %6955 = vmatpush2.bf16.msra.mxu1 %v12870_v26  ;;  %v6129_v26 = vld [vmem:[%s13167_s2 + $0x2b0] sm:$0xff]  ;;  %13986 = vst [vmem:[#allocation74_spill] sm:$0xff] %v12916_v2 }
 0x78f   :  { %6915 = vmatprep.subr.bf16.mxu0 %v12874_v61  ;;  %6956 = vmatprep.subr.bf16.mxu1 %v12876_v4  ;;  %v12922_v4 = vcombine.high %v6125_v55, %v6129_v26  ;;  %v12924_v61 = vcombine.high %v6126_v51, %v6130_v12  ;;  %v6117_v9 = vld [vmem:[%s13167_s2 + $0x250] sm:$0xff]  ;;  %v12940_v7 = vcombine.low %v6125_v55, %v6129_v26  ;;  %v6110_v55 = vld [vmem:[%s13167_s2 + $0x218] sm:$0xff] }
 0x790   :  { %v6114_v26 = vld [vmem:[%s13167_s2 + $0x238] sm:$0xff]  ;;  %v12966_v12 = vcombine.low %v6118_v52, %v6122_v18 }
 0x791   :  { %13988 = vst [vmem:[#allocation76_spill] sm:$0xff] %v12922_v4  ;;  %13989 = vst [vmem:[#allocation77_spill] sm:$0xff] %v12924_v61 }
 0x792   :  { %6916 = vmatpush2.bf16.msra.mxu0 %v12892_v34  ;;  %6957 = vmatpush2.bf16.msra.mxu1 %v12894_v39  ;;  %v6121_v39 = vld [vmem:[%s13167_s2 + $0x270] sm:$0xff]  ;;  %13990 = vst [vmem:[#allocation78_spill] sm:$0xff] %v12940_v7 }
 0x793   :  { %6917 = vmatprep.subr.bf16.mxu0 %v12898_v46  ;;  %6958 = vmatprep.subr.bf16.mxu1 %v12900_v32  ;;  %v12946_v32 = vcombine.high %v6117_v9, %v6121_v39  ;;  %v12948_v46 = vcombine.high %v6118_v52, %v6122_v18  ;;  %v6109_v34 = vld [vmem:[%s13167_s2 + $0x210] sm:$0xff]  ;;  %v12964_v51 = vcombine.low %v6117_v9, %v6121_v39 }
 0x796   :  { %6918 = vmatpush2.bf16.msra.mxu0 %v12916_v2  ;;  %6959 = vmatpush2.bf16.msra.mxu1 %v12918_v58  ;;  %v6113_v58 = vld [vmem:[%s13167_s2 + $0x230] sm:$0xff] }
 0x797   :  { %6919 = vmatprep.subr.bf16.mxu0 %v12922_v4  ;;  %6960 = vmatprep.subr.bf16.mxu1 %v12924_v61  ;;  %v12970_v61 = vcombine.high %v6109_v34, %v6113_v58  ;;  %v12972_v4 = vcombine.high %v6110_v55, %v6114_v26  ;;  %v12976_v2 = vcombine.low %v6109_v34, %v6113_v58 }
 0x79a   :  { %6920 = vmatpush2.bf16.msra.mxu0 %v12940_v7  ;;  %6961 = vmatpush2.bf16.msra.mxu1 %v12942_v49  ;;  %v12978_v7 = vcombine.low %v6110_v55, %v6114_v26 }
 0x79b   :  { %6921 = vmatprep.subr.bf16.mxu0 %v12946_v32  ;;  %6962 = vmatprep.subr.bf16.mxu1 %v12948_v46 }
 0x79e   :  { %6922 = vmatpush2.bf16.msra.mxu0 %v12964_v51  ;;  %6963 = vmatpush2.bf16.msra.mxu1 %v12966_v12 }
 0x79f   :  { %6923 = vmatprep.subr.bf16.mxu0 %v12970_v61  ;;  %6964 = vmatprep.subr.bf16.mxu1 %v12972_v4 }
 0x7a2   :  { %6924 = vmatpush2.bf16.msra.mxu0 %v12976_v2  ;;  %6965 = vmatpush2.bf16.msra.mxu1 %v12978_v7 }
 0x7a3   :  { %7807 = vmatprep.subr.bf16.mxu0 %v12194_v59  ;;  %7848 = vmatprep.subr.bf16.mxu1 %v12203_v14  ;;  %v13991_v59 = vld [vmem:[#allocation4_spill] sm:$0xff]  ;;  %v13994_v14 = vld [vmem:[#allocation7_spill] sm:$0xff] }
 0x7a5   :  { %6926 = vmatmul.mubr.bf16.vlgmr.msra.gmra.mxu0 %v12601_v50  ;;  %6967 = vmatmul.mubr.bf16.vlgmr.msra.gmra.mxu1 %v12601_v50 }
 0x7a6   :  { %7808 = vmatpush1.bf16.msra.mxu0 %v12199_v36  ;;  %7849 = vmatpush1.bf16.msra.mxu1 %v12201_v41  ;;  %v13992_v36 = vld [vmem:[#allocation5_spill] sm:$0xff]  ;;  %v13993_v41 = vld [vmem:[#allocation6_spill] sm:$0xff] }
 0x7a7   :  { %7809 = vmatprep.subr.bf16.mxu0 %v12219_v5  ;;  %7850 = vmatprep.subr.bf16.mxu1 %v12233_v17  ;;  %v13996_v5 = vld [vmem:[#allocation9_spill] sm:$0xff]  ;;  %v13998_v17 = vld [vmem:[#allocation11_spill] sm:$0xff] }
 0x7aa   :  { %7810 = vmatpush1.bf16.msra.mxu0 %v12217_v15  ;;  %7851 = vmatpush1.bf16.msra.mxu1 %v12231_v63  ;;  %v13995_v15 = vld [vmem:[#allocation8_spill] sm:$0xff]  ;;  %v13997_v63 = vld [vmem:[#allocation10_spill] sm:$0xff] }
 0x7ab   :  { %7811 = vmatprep.subr.bf16.mxu0 %v12235_v30  ;;  %7852 = vmatprep.subr.bf16.mxu1 %v12244_v35  ;;  %v13999_v30 = vld [vmem:[#allocation12_spill] sm:$0xff]  ;;  %v14000_v35 = vld [vmem:[#allocation13_spill] sm:$0xff] }
 0x7ae   :  { %7812 = vmatpush1.bf16.msra.mxu0 %v12260_v37  ;;  %7853 = vmatpush1.bf16.msra.mxu1 %v12264_v60  ;;  %v14001_v37 = vld [vmem:[#allocation14_spill] sm:$0xff]  ;;  %v14002_v60 = vld [vmem:[#allocation15_spill] sm:$0xff] }
 0x7af   :  { %7813 = vmatprep.subr.bf16.mxu0 %v12266_v54  ;;  %7854 = vmatprep.subr.bf16.mxu1 %v12269_v62  ;;  %v14003_v54 = vld [vmem:[#allocation16_spill] sm:$0xff]  ;;  %v14004_v62 = vld [vmem:[#allocation17_spill] sm:$0xff] }
 0x7b2   :  { %7814 = vmatpush1.bf16.msra.mxu0 %v12284_v56  ;;  %7855 = vmatpush1.bf16.msra.mxu1 %v12288_v57  ;;  %v14005_v56 = vld [vmem:[#allocation18_spill] sm:$0xff]  ;;  %v14006_v57 = vld [vmem:[#allocation19_spill] sm:$0xff] }
 0x7b3   :  { %7815 = vmatprep.subr.bf16.mxu0 %v12290_v13  ;;  %7856 = vmatprep.subr.bf16.mxu1 %v12293_v25  ;;  %v14007_v13 = vld [vmem:[#allocation20_spill] sm:$0xff]  ;;  %v14008_v25 = vld [vmem:[#allocation21_spill] sm:$0xff] }
 0x7b6   :  { %7816 = vmatpush1.bf16.msra.mxu0 %v12296_v23  ;;  %7857 = vmatpush1.bf16.msra.mxu1 %v12300_v27  ;;  %v14009_v23 = vld [vmem:[#allocation22_spill] sm:$0xff]  ;;  %v14010_v27 = vld [vmem:[#allocation23_spill] sm:$0xff] }
 0x7b7   :  { %7817 = vmatprep.subr.bf16.mxu0 %v12314_v42  ;;  %7858 = vmatprep.subr.bf16.mxu1 %v12323_v11  ;;  %v14011_v42 = vld [vmem:[#allocation24_spill] sm:$0xff]  ;;  %v14014_v11 = vld [vmem:[#allocation27_spill] sm:$0xff] }
 0x7ba   :  { %7818 = vmatpush1.bf16.msra.mxu0 %v12319_v1  ;;  %7859 = vmatpush1.bf16.msra.mxu1 %v12321_v33  ;;  %v14012_v1 = vld [vmem:[#allocation25_spill] sm:$0xff]  ;;  %v14013_v33 = vld [vmem:[#allocation26_spill] sm:$0xff] }
 0x7bb   :  { %7819 = vmatprep.subr.bf16.mxu0 %v12338_v43  ;;  %7860 = vmatprep.subr.bf16.mxu1 %v12347_v38  ;;  %v14015_v43 = vld [vmem:[#allocation28_spill] sm:$0xff]  ;;  %v14018_v38 = vld [vmem:[#allocation31_spill] sm:$0xff] }
 0x7be   :  { %7820 = vmatpush1.bf16.msra.mxu0 %v12343_v47  ;;  %7861 = vmatpush1.bf16.msra.mxu1 %v12345_v28  ;;  %v14016_v47 = vld [vmem:[#allocation29_spill] sm:$0xff]  ;;  %v14017_v28 = vld [vmem:[#allocation30_spill] sm:$0xff] }
 0x7bf   :  { %7821 = vmatprep.subr.bf16.mxu0 %v12362_v21  ;;  %7862 = vmatprep.subr.bf16.mxu1 %v12371_v6  ;;  %v14019_v21 = vld [vmem:[#allocation32_spill] sm:$0xff] }
 0x7c2   :  { %7822 = vmatpush1.bf16.msra.mxu0 %v12367_v45  ;;  %7863 = vmatpush1.bf16.msra.mxu1 %v12369_v31  ;;  %v9002_v45 = vld [vmem:[%s13168_s0 + $0x60] sm:$0xff] }
 0x7c3   :  { %7823 = vmatprep.subr.bf16.mxu0 %v12386_v16  ;;  %7864 = vmatprep.subr.bf16.mxu1 %v12395_v22  ;;  %v6978_v31 = vunpack.c.l.bf16 %v9002_v45  ;;  %v6979_v6 = vunpack.c.h.bf16 %v9002_v45 }
 0x7c6   :  { %7824 = vmatpush2.bf16.msra.mxu0 %v12391_v19  ;;  %7865 = vmatpush2.bf16.msra.mxu1 %v12393_v20  ;;  %v9003_v20 = vld [vmem:[%s13168_s0 + $0x68] sm:$0xff] }
 0x7c7   :  { %7825 = vmatprep.subr.bf16.mxu0 %v12410_v44  ;;  %7866 = vmatprep.subr.bf16.mxu1 %v13991_v59  ;;  %v6980_v34 = vunpack.c.l.bf16 %v9003_v20 }
 0x7ca   :  { %7826 = vmatpush2.bf16.msra.mxu0 %v13992_v36  ;;  %7867 = vmatpush2.bf16.msra.mxu1 %v13993_v41  ;;  %v6981_v36 = vunpack.c.h.bf16 %v9003_v20 }
 0x7cb   :  { %7827 = vmatprep.subr.bf16.mxu0 %v13994_v14  ;;  %7868 = vmatprep.subr.bf16.mxu1 %v13995_v15 }
 0x7ce   :  { %7828 = vmatpush2.bf16.msra.mxu0 %v13996_v5  ;;  %7869 = vmatpush2.bf16.msra.mxu1 %v13997_v63 }
 0x7cf   :  { %7829 = vmatprep.subr.bf16.mxu0 %v13998_v17  ;;  %7870 = vmatprep.subr.bf16.mxu1 %v13999_v30 }
 0x7d2   :  { %7830 = vmatpush2.bf16.msra.mxu0 %v14000_v35  ;;  %7871 = vmatpush2.bf16.msra.mxu1 %v14001_v37 }
 0x7d3   :  { %7831 = vmatprep.subr.bf16.mxu0 %v14002_v60  ;;  %7872 = vmatprep.subr.bf16.mxu1 %v14003_v54  ;;  %v14020_v60 = vld [vmem:[#allocation33_spill] sm:$0xff] }
 0x7d6   :  { %7832 = vmatpush2.bf16.msra.mxu0 %v14004_v62  ;;  %7873 = vmatpush2.bf16.msra.mxu1 %v14005_v56 }
 0x7d7   :  { %7833 = vmatprep.subr.bf16.mxu0 %v14006_v57  ;;  %7874 = vmatprep.subr.bf16.mxu1 %v14007_v13 }
 0x7da   :  { %7834 = vmatpush2.bf16.msra.mxu0 %v14008_v25  ;;  %7875 = vmatpush2.bf16.msra.mxu1 %v14009_v23 }
 0x7db   :  { %7835 = vmatprep.subr.bf16.mxu0 %v14010_v27  ;;  %7876 = vmatprep.subr.bf16.mxu1 %v14011_v42 }
 0x7de   :  { %7836 = vmatpush2.bf16.msra.mxu0 %v14012_v1  ;;  %7877 = vmatpush2.bf16.msra.mxu1 %v14013_v33  ;;  %v9004_v1 = vld [vmem:[%s13170_s1 + $0x10] sm:$0xff] }
 0x7df   :  { %7837 = vmatprep.subr.bf16.mxu0 %v14014_v11  ;;  %7878 = vmatprep.subr.bf16.mxu1 %v14015_v43  ;;  %v6989_v33 = vunpack.c.l.bf16 %v9004_v1  ;;  %v6990_v11 = vunpack.c.h.bf16 %v9004_v1  ;;  %v14037_v1 = vld [vmem:[#allocation50_spill] sm:$0xff] }
 0x7e2   :  { %7838 = vmatpush2.bf16.msra.mxu0 %v14016_v47  ;;  %7879 = vmatpush2.bf16.msra.mxu1 %v14017_v28  ;;  %v9005_v28 = vld [vmem:[%s13170_s1 + $0x18] sm:$0xff] }
 0x7e3   :  { %7889 = vmatprep.subr.bf16.mxu0 %v14018_v38  ;;  %7930 = vmatprep.subr.bf16.mxu1 %v14019_v21 }
 0x825   :  { %v6845_v16 = vpop.f32.mrf.mxu0  ;;  %v6886_v19 = vpop.f32.mrf.mxu1 }
 0x826   :  { %v6982_v22 = vadd.f32 %v6978_v31, %v6845_v16  ;;  %v6984_v59 = vadd.f32 %v6980_v34, %v6886_v19  ;;  %v6992_v34 = vunpack.c.h.bf16 %v9005_v28 }
 0x827   :  { %v6847_v44 = vpop.f32.mrf.mxu0  ;;  %v6888_v50 = vpop.f32.mrf.mxu1 }
 0x828   :  { %v6997_v9 = vmul.f32 0.5, %v6982_v22  ;;  %v6983_v39 = vadd.f32 %v6979_v6, %v6847_v44  ;;  %v6985_v41 = vadd.f32 %v6981_v36, %v6888_v50  ;;  %v6991_v6 = vunpack.c.l.bf16 %v9005_v28  ;;  %v14042_v28 = vld [vmem:[#allocation55_spill] sm:$0xff] }
 0x829   :  { %v6849_v58 = vpop.f32.mrf.mxu0  ;;  %v6890_v52 = vpop.f32.mrf.mxu1 }
 0x82a   :  { %9260 = vtanh.f32 %v6997_v9  ;;  %v7001_v18 = vmul.f32 0.5, %v6983_v39  ;;  %v7006_v14 = vmul.f32 0.5, %v6985_v41 }
 0x82b   :  { %v6850_v55 = vpop.f32.mrf.mxu0  ;;  %v6891_v26 = vpop.f32.mrf.mxu1 }
 0x82c   :  { %9262 = vtanh.f32 %v7001_v18 }
 0x82d   :  { %9264 = vtanh.f32 %v6984_v59 }
 0x82e   :  { %9266 = vtanh.f32 %v7006_v14 }
 0x837   :  { %v9261_v15 = vpop.eup %9260 }
 0x838   :  { %v6999_v5 = vmul.f32 0.5, %v9261_v15 }
 0x839   :  { %v9263_v63 = vpop.eup %9262 }
 0x83a   :  { %v7000_v17 = vadd.f32 0.5, %v6999_v5  ;;  %v7003_v30 = vmul.f32 0.5, %v9263_v63  ;;  %v9265_v37 = vpop.eup %9264 }
 0x83b   :  { %v9267_v57 = vpop.eup %9266 }
 0x83c   :  { %v7004_v35 = vadd.f32 0.5, %v7003_v30  ;;  %v7011_v62 = vmul.f32 %v9265_v37, %v7000_v17  ;;  %v7008_v13 = vmul.f32 0.5, %v9267_v57  ;;  %v14032_v57 = vld [vmem:[#allocation45_spill] sm:$0xff] }
 0x83e   :  { %v7010_v54 = vmul.f32 %v7004_v35, %v14020_v60  ;;  %v7009_v25 = vadd.f32 0.5, %v7008_v13  ;;  %v14033_v13 = vld [vmem:[#allocation46_spill] sm:$0xff] }
 0x840   :  { %v13059_v56 = vadd.f32 %v7011_v62, %v7010_v54  ;;  %v14022_v54 = vld [vmem:[#allocation35_spill] sm:$0xff]  ;;  %v14025_v62 = vld [vmem:[#allocation38_spill] sm:$0xff] }
 0x842   :  { %9268 = vtanh.f32 %v13059_v56 }
 0x84f   :  { %v9269_v23 = vpop.eup %9268 }
 0x850   :  { %v7014_v27 = vmul.f32 %v9269_v23, %v7009_v25  ;;  %v14034_v25 = vld [vmem:[#allocation47_spill] sm:$0xff]  ;;  %v14035_v23 = vld [vmem:[#allocation48_spill] sm:$0xff] }
 0x852   :  { %v13062_v42 = vpack.c.bf16 %v7014_v27, %v7014_v27  ;;  %v14036_v27 = vld [vmem:[#allocation49_spill] sm:$0xff] }
 0x854   :  { %9006 = vst [vmem:[%s13169_s3 + $0x18] sm:$0xf] %v13062_v42 }
 0x865   :  { %v6927_v43 = vpop.f32.mrf.mxu0  ;;  %v6968_v47 = vpop.f32.mrf.mxu1 }
 0x866   :  { %v6993_v38 = vadd.f32 %v6989_v33, %v6927_v43  ;;  %v6995_v9 = vadd.f32 %v6991_v6, %v6968_v47  ;;  %v14038_v33 = vld [vmem:[#allocation51_spill] sm:$0xff]  ;;  %v14040_v43 = vld [vmem:[#allocation53_spill] sm:$0xff]  ;;  %v14041_v47 = vld [vmem:[#allocation54_spill] sm:$0xff] }
 0x867   :  { %v6929_v21 = vpop.f32.mrf.mxu0  ;;  %v6970_v45 = vpop.f32.mrf.mxu1  ;;  %v14047_v6 = vld [vmem:[#allocation60_spill] sm:$0xff] }
 0x868   :  { %v7015_v31 = vmul.f32 0.5, %v6993_v38  ;;  %v6994_v16 = vadd.f32 %v6990_v11, %v6929_v21  ;;  %v6996_v39 = vadd.f32 %v6992_v34, %v6970_v45  ;;  %v14039_v11 = vld [vmem:[#allocation52_spill] sm:$0xff]  ;;  %v14044_v21 = vld [vmem:[#allocation57_spill] sm:$0xff]  ;;  %v14045_v45 = vld [vmem:[#allocation58_spill] sm:$0xff] }
 0x869   :  { %v6931_v19 = vpop.f32.mrf.mxu0  ;;  %v6972_v20 = vpop.f32.mrf.mxu1  ;;  %v14043_v38 = vld [vmem:[#allocation56_spill] sm:$0xff] }
 0x86a   :  { %9270 = vtanh.f32 %v7015_v31  ;;  %v7019_v22 = vmul.f32 0.5, %v6994_v16  ;;  %v7024_v58 = vmul.f32 0.5, %v6996_v39  ;;  %v14046_v31 = vld [vmem:[#allocation59_spill] sm:$0xff]  ;;  %v14048_v16 = vld [vmem:[#allocation61_spill] sm:$0xff]  ;;  %v14049_v19 = vld [vmem:[#allocation62_spill] sm:$0xff] }
 0x86b   :  { %v6932_v44 = vpop.f32.mrf.mxu0  ;;  %v6973_v50 = vpop.f32.mrf.mxu1  ;;  %v14050_v20 = vld [vmem:[#allocation63_spill] sm:$0xff]  ;;  %v14055_v34 = vld [vmem:[#allocation68_spill] sm:$0xff]  ;;  %v14056_v39 = vld [vmem:[#allocation69_spill] sm:$0xff] }
 0x86c   :  { %9272 = vtanh.f32 %v7019_v22  ;;  %v14051_v22 = vld [vmem:[#allocation64_spill] sm:$0xff]  ;;  %v14052_v44 = vld [vmem:[#allocation65_spill] sm:$0xff]  ;;  %v14053_v50 = vld [vmem:[#allocation66_spill] sm:$0xff] }
 0x86d   :  { %9274 = vtanh.f32 %v6995_v9  ;;  %v14054_v9 = vld [vmem:[#allocation67_spill] sm:$0xff] }
 0x86e   :  { %9276 = vtanh.f32 %v7024_v58  ;;  %v14057_v58 = vld [vmem:[#allocation70_spill] sm:$0xff] }
 0x877   :  { %v9271_v52 = vpop.eup %9270 }
 0x878   :  { %v7017_v18 = vmul.f32 0.5, %v9271_v52  ;;  %v14058_v52 = vld [vmem:[#allocation71_spill] sm:$0xff] }
 0x879   :  { %v9273_v55 = vpop.eup %9272 }
 0x87a   :  { %v7018_v26 = vadd.f32 0.5, %v7017_v18  ;;  %v7021_v59 = vmul.f32 0.5, %v9273_v55  ;;  %v9275_v41 = vpop.eup %9274  ;;  %v14059_v18 = vld [vmem:[#allocation72_spill] sm:$0xff]  ;;  %v14060_v55 = vld [vmem:[#allocation73_spill] sm:$0xff] }
 0x87b   :  { %v9277_v63 = vpop.eup %9276 }
 0x87c   :  { %v7022_v36 = vadd.f32 0.5, %v7021_v59  ;;  %v7029_v15 = vmul.f32 %v9275_v41, %v7018_v26  ;;  %v7026_v17 = vmul.f32 0.5, %v9277_v63  ;;  %v14061_v26 = vld [vmem:[#allocation74_spill] sm:$0xff]  ;;  %v14062_v59 = vld [vmem:[#allocation75_spill] sm:$0xff]  ;;  %v14064_v41 = vld [vmem:[#allocation77_spill] sm:$0xff] }
 0x87e   :  { %v7028_v14 = vmul.f32 %v7022_v36, %v12614_v29  ;;  %v7027_v30 = vadd.f32 0.5, %v7026_v17  ;;  %v14021_v29 = vld [vmem:[#allocation34_spill] sm:$0xff]  ;;  %v14063_v36 = vld [vmem:[#allocation76_spill] sm:$0xff] }
 0x880   :  { %v13075_v5 = vadd.f32 %v7029_v15, %v7028_v14  ;;  %v14065_v14 = vld [vmem:[#allocation78_spill] sm:$0xff] }
 0x882   :  { %9278 = vtanh.f32 %v13075_v5 }
 0x88f   :  { %v9279_v35 = vpop.eup %9278 }
 0x890   :  { %v7032_v37 = vmul.f32 %v9279_v35, %v7027_v30 }
 0x892   :  { %v7036_v60 = vpack.c.bf16 %v7032_v37, %v7032_v37 }
 0x894   :  { %9007 = vst [vmem:[%s13171_s4 + $0x4] sm:$0xf] %v7036_v60  ;;  %7839 = vmatprep.mubr.bf16.mxu0 %v7036_v60  ;;  %7880 = vmatprep.mubr.bf16.mxu1 %v7036_v60 }
 0x895   :  { %7840 = vmatmul.mubr.bf16.vlgmr.msra.gmra.mxu0 %v13062_v42  ;;  %7881 = vmatmul.mubr.bf16.vlgmr.msra.gmra.mxu1 %v13062_v42 }
 0x896   :  { %7890 = vmatpush1.bf16.msra.mxu0 %v12583_v0  ;;  %7931 = vmatpush1.bf16.msra.mxu1 %v12585_v3  ;;  %v14023_v0 = vld [vmem:[#allocation36_spill] sm:$0xff]  ;;  %v14024_v3 = vld [vmem:[#allocation37_spill] sm:$0xff] }
 0x897   :  { %7921 = vmatprep.mubr.bf16.mxu0 %v7036_v60  ;;  %7962 = vmatprep.mubr.bf16.mxu1 %v7036_v60 }
 0x898   :  { %7891 = vmatprep.subr.bf16.mxu0 %v12635_v24  ;;  %7932 = vmatprep.subr.bf16.mxu1 %v12637_v40  ;;  %v14026_v24 = vld [vmem:[#allocation39_spill] sm:$0xff]  ;;  %v14027_v40 = vld [vmem:[#allocation40_spill] sm:$0xff] }
 0x89a   :  { %7892 = vmatpush1.bf16.msra.mxu0 %v12652_v53  ;;  %7933 = vmatpush1.bf16.msra.mxu1 %v12654_v10  ;;  %v14028_v53 = vld [vmem:[#allocation41_spill] sm:$0xff]  ;;  %v14029_v10 = vld [vmem:[#allocation42_spill] sm:$0xff] }
 0x89b   :  { %7893 = vmatprep.subr.bf16.mxu0 %v12656_v8  ;;  %7934 = vmatprep.subr.bf16.mxu1 %v12658_v48  ;;  %v14030_v8 = vld [vmem:[#allocation43_spill] sm:$0xff]  ;;  %v14031_v48 = vld [vmem:[#allocation44_spill] sm:$0xff] }
 0x89e   :  { %7894 = vmatpush1.bf16.msra.mxu0 %v14021_v29  ;;  %7935 = vmatpush1.bf16.msra.mxu1 %v14022_v54 }
 0x89f   :  { %7895 = vmatprep.subr.bf16.mxu0 %v14023_v0  ;;  %7936 = vmatprep.subr.bf16.mxu1 %v14024_v3 }
 0x8a2   :  { %7896 = vmatpush1.bf16.msra.mxu0 %v14025_v62  ;;  %7937 = vmatpush1.bf16.msra.mxu1 %v14026_v24 }
 0x8a3   :  { %7897 = vmatprep.subr.bf16.mxu0 %v14027_v40  ;;  %7938 = vmatprep.subr.bf16.mxu1 %v14028_v53 }
 0x8a6   :  { %7898 = vmatpush1.bf16.msra.mxu0 %v14029_v10  ;;  %7939 = vmatpush1.bf16.msra.mxu1 %v14030_v8 }
 0x8a7   :  { %7899 = vmatprep.subr.bf16.mxu0 %v14031_v48  ;;  %7940 = vmatprep.subr.bf16.mxu1 %v14032_v57 }
 0x8aa   :  { %7900 = vmatpush1.bf16.msra.mxu0 %v14033_v13  ;;  %7941 = vmatpush1.bf16.msra.mxu1 %v14034_v25 }
 0x8ab   :  { %7901 = vmatprep.subr.bf16.mxu0 %v14035_v23  ;;  %7942 = vmatprep.subr.bf16.mxu1 %v14036_v27 }
 0x8ae   :  { %7902 = vmatpush1.bf16.msra.mxu0 %v14037_v1  ;;  %7943 = vmatpush1.bf16.msra.mxu1 %v14038_v33 }
 0x8af   :  { %7903 = vmatprep.subr.bf16.mxu0 %v14039_v11  ;;  %7944 = vmatprep.subr.bf16.mxu1 %v14040_v43 }
 0x8b2   :  { %7904 = vmatpush1.bf16.msra.mxu0 %v14041_v47  ;;  %7945 = vmatpush1.bf16.msra.mxu1 %v14042_v28  ;;  %v7982_v47 = vld [vmem:[%s13170_s1] sm:$0xff] }
 0x8b3   :  { %7905 = vmatprep.subr.bf16.mxu0 %v14043_v38  ;;  %7946 = vmatprep.subr.bf16.mxu1 %v14044_v21  ;;  %v7984_v28 = vunpack.c.l.bf16 %v7982_v47  ;;  %v7985_v38 = vunpack.c.h.bf16 %v7982_v47 }
 0x8b6   :  { %7906 = vmatpush2.bf16.msra.mxu0 %v14045_v45  ;;  %7947 = vmatpush2.bf16.msra.mxu1 %v14046_v31  ;;  %v7983_v45 = vld [vmem:[%s13170_s1 + $0x8] sm:$0xff] }
 0x8b7   :  { %7907 = vmatprep.subr.bf16.mxu0 %v14047_v6  ;;  %7948 = vmatprep.subr.bf16.mxu1 %v14048_v16 }
 0x8ba   :  { %7908 = vmatpush2.bf16.msra.mxu0 %v14049_v19  ;;  %7949 = vmatpush2.bf16.msra.mxu1 %v14050_v20  ;;  %v7986_v20 = vunpack.c.l.bf16 %v7983_v45 }
 0x8bb   :  { %7909 = vmatprep.subr.bf16.mxu0 %v14051_v22  ;;  %7950 = vmatprep.subr.bf16.mxu1 %v14052_v44 }
 0x8be   :  { %7910 = vmatpush2.bf16.msra.mxu0 %v14053_v50  ;;  %7951 = vmatpush2.bf16.msra.mxu1 %v14054_v9 }
 0x8bf   :  { %7911 = vmatprep.subr.bf16.mxu0 %v14055_v34  ;;  %7952 = vmatprep.subr.bf16.mxu1 %v14056_v39 }
 0x8c2   :  { %7912 = vmatpush2.bf16.msra.mxu0 %v14057_v58  ;;  %7953 = vmatpush2.bf16.msra.mxu1 %v14058_v52  ;;  %v7987_v52 = vunpack.c.h.bf16 %v7983_v45 }
 0x8c3   :  { %7913 = vmatprep.subr.bf16.mxu0 %v14059_v18  ;;  %7954 = vmatprep.subr.bf16.mxu1 %v14060_v55 }
 0x8c6   :  { %7914 = vmatpush2.bf16.msra.mxu0 %v14061_v26  ;;  %7955 = vmatpush2.bf16.msra.mxu1 %v14062_v59 }
 0x8c7   :  { %7915 = vmatprep.subr.bf16.mxu0 %v14063_v36  ;;  %7956 = vmatprep.subr.bf16.mxu1 %v14064_v41 }
 0x8ca   :  { %7916 = vmatpush2.bf16.msra.mxu0 %v14065_v14  ;;  %7957 = vmatpush2.bf16.msra.mxu1 %v12942_v49 }
 0x8cb   :  { %7917 = vmatprep.subr.bf16.mxu0 %v12946_v32  ;;  %7958 = vmatprep.subr.bf16.mxu1 %v12948_v46  ;;  %v9136_v46 = vld [vmem:[%s13168_s0 + $0x70] sm:$0xff] }
 0x8cc   :  { %v7974_v32 = vunpack.c.l.bf16 %v9136_v46  ;;  %v7975_v49 = vunpack.c.h.bf16 %v9136_v46 }
 0x8ce   :  { %7918 = vmatpush2.bf16.msra.mxu0 %v12964_v51  ;;  %7959 = vmatpush2.bf16.msra.mxu1 %v12966_v12 }
 0x8cf   :  { %7919 = vmatprep.subr.bf16.mxu0 %v12970_v61  ;;  %7960 = vmatprep.subr.bf16.mxu1 %v12972_v4  ;;  %v9137_v61 = vld [vmem:[%s13168_s0 + $0x78] sm:$0xff] }
 0x8d0   :  { %v7976_v63 = vunpack.c.l.bf16 %v9137_v61  ;;  %v7977_v54 = vunpack.c.h.bf16 %v9137_v61 }
 0x8d2   :  { %7920 = vmatpush2.bf16.msra.mxu0 %v12976_v2  ;;  %7961 = vmatpush2.bf16.msra.mxu1 %v12978_v7 }
 0x8d5   :  { %7922 = vmatmul.mubr.bf16.vlgmr.msra.gmra.mxu0 %v13062_v42  ;;  %7963 = vmatmul.mubr.bf16.vlgmr.msra.gmra.mxu1 %v13062_v42 }
 0x955   :  { %v7841_v51 = vpop.f32.mrf.mxu0  ;;  %v7882_v12 = vpop.f32.mrf.mxu1 }
 0x956   :  { %v7978_v4 = vadd.f32 %v7974_v32, %v7841_v51  ;;  %v7980_v29 = vadd.f32 %v7976_v63, %v7882_v12 }
 0x957   :  { %v7843_v2 = vpop.f32.mrf.mxu0  ;;  %v7884_v15 = vpop.f32.mrf.mxu1 }
 0x958   :  { %v7992_v7 = vmul.f32 0.5, %v7978_v4  ;;  %v7979_v17 = vadd.f32 %v7975_v49, %v7843_v2  ;;  %v7981_v0 = vadd.f32 %v7977_v54, %v7884_v15 }
 0x959   :  { %v7845_v30 = vpop.f32.mrf.mxu0  ;;  %v7886_v42 = vpop.f32.mrf.mxu1 }
 0x95a   :  { %9280 = vtanh.f32 %v7992_v7  ;;  %v7996_v35 = vmul.f32 0.5, %v7979_v17  ;;  %v8001_v3 = vmul.f32 0.5, %v7981_v0 }
 0x95b   :  { %v7846_v37 = vpop.f32.mrf.mxu0  ;;  %v7887_v60 = vpop.f32.mrf.mxu1 }
 0x95c   :  { %9282 = vtanh.f32 %v7996_v35 }
 0x95d   :  { %9284 = vtanh.f32 %v7980_v29 }
 0x95e   :  { %9286 = vtanh.f32 %v8001_v3 }
 0x967   :  { %v9281_v62 = vpop.eup %9280 }
 0x968   :  { %v7994_v24 = vmul.f32 0.5, %v9281_v62 }
 0x969   :  { %v9283_v40 = vpop.eup %9282 }
 0x96a   :  { %v7995_v53 = vadd.f32 0.5, %v7994_v24  ;;  %v7998_v10 = vmul.f32 0.5, %v9283_v40  ;;  %v9285_v48 = vpop.eup %9284 }
 0x96b   :  { %v9287_v23 = vpop.eup %9286 }
 0x96c   :  { %v7999_v8 = vadd.f32 0.5, %v7998_v10  ;;  %v8006_v13 = vmul.f32 %v9285_v48, %v7995_v53  ;;  %v8003_v27 = vmul.f32 0.5, %v9287_v23 }
 0x96e   :  { %v8005_v57 = vmul.f32 %v7999_v8, %v13059_v56  ;;  %v8004_v1 = vadd.f32 0.5, %v8003_v27 }
 0x970   :  { %v8007_v25 = vadd.f32 %v8006_v13, %v8005_v57 }
 0x972   :  { %9288 = vtanh.f32 %v8007_v25 }
 0x97f   :  { %v9289_v33 = vpop.eup %9288 }
 0x980   :  { %v8009_v11 = vmul.f32 %v9289_v33, %v8004_v1 }
 0x982   :  { %v8028_v43 = vpack.c.bf16 %v8009_v11, %v8009_v11 }
 0x984   :  { %9138 = vst [vmem:[%s13169_s3 + $0x1c] sm:$0xf] %v8028_v43 }
 0x995   :  { %v7923_v56 = vpop.f32.mrf.mxu0  ;;  %v7964_v21 = vpop.f32.mrf.mxu1 }
 0x996   :  { %v7988_v31 = vadd.f32 %v7984_v28, %v7923_v56  ;;  %v7990_v58 = vadd.f32 %v7986_v20, %v7964_v21 }
 0x997   :  { %v7925_v6 = vpop.f32.mrf.mxu0  ;;  %v7966_v16 = vpop.f32.mrf.mxu1 }
 0x998   :  { %v8010_v19 = vmul.f32 0.5, %v7988_v31  ;;  %v7989_v22 = vadd.f32 %v7985_v38, %v7925_v6  ;;  %v7991_v18 = vadd.f32 %v7987_v52, %v7966_v16 }
 0x999   :  { %v7927_v44 = vpop.f32.mrf.mxu0  ;;  %v7968_v50 = vpop.f32.mrf.mxu1 }
 0x99a   :  { %9290 = vtanh.f32 %v8010_v19  ;;  %v8014_v9 = vmul.f32 0.5, %v7989_v22  ;;  %v8019_v55 = vmul.f32 0.5, %v7991_v18 }
 0x99b   :  { %v7928_v34 = vpop.f32.mrf.mxu0  ;;  %v7969_v39 = vpop.f32.mrf.mxu1 }
 0x99c   :  { %9292 = vtanh.f32 %v8014_v9 }
 0x99d   :  { %9294 = vtanh.f32 %v7990_v58 }
 0x99e   :  { %9296 = vtanh.f32 %v8019_v55 }
 0x9a7   :  { %v9291_v26 = vpop.eup %9290 }
 0x9a8   :  { %v8012_v59 = vmul.f32 0.5, %v9291_v26 }
 0x9a9   :  { %v9293_v36 = vpop.eup %9292 }
 0x9aa   :  { %v8013_v41 = vadd.f32 0.5, %v8012_v59  ;;  %v8016_v14 = vmul.f32 0.5, %v9293_v36  ;;  %v9295_v32 = vpop.eup %9294 }
 0x9ab   :  { %v9297_v61 = vpop.eup %9296 }
 0x9ac   :  { %v8017_v46 = vadd.f32 0.5, %v8016_v14  ;;  %v8024_v51 = vmul.f32 %v9295_v32, %v8013_v41  ;;  %v8021_v4 = vmul.f32 0.5, %v9297_v61 }
 0x9ae   :  { %v8023_v49 = vmul.f32 %v8017_v46, %v13075_v5  ;;  %v8022_v2 = vadd.f32 0.5, %v8021_v4 }
 0x9b0   :  { %v8025_v12 = vadd.f32 %v8024_v51, %v8023_v49 }
 0x9b2   :  { %9298 = vtanh.f32 %v8025_v12 }
 0x9bf   :  { %v9299_v15 = vpop.eup %9298 }
 0x9c0   :  { %v8027_v7 = vmul.f32 %v9299_v15, %v8022_v2 }
 0x9c2   :  { %v8031_v63 = vpack.c.bf16 %v8027_v7, %v8027_v7 }
 0x9c4   :  { %8032 = vst [vmem:[%s13171_s4] sm:$0xf] %v8031_v63 }

</bundles_post_ra>
